<compile_context>
chip_gen: v5e
topology: v5e:2x2
jax: 0.10.0
libtpu: 0.0.40
codegen_flags: <defaults>
</compile_context>

<pallas_src>
import jax
import jax.numpy as jnp
from jax.experimental import pallas as pl
from jax.experimental.pallas import tpu as pltpu

# ----------------------------- configuration ------------------------------
B, C, H, W = 2, 4, 16, 16          # small image batch (NCHW, like PyTorch)
PS = 4                             # patch size
HP, WP = H // PS, W // PS
N = HP * WP                        # 16 tokens
D = 32                             # embed dim
NH = 4                             # attention heads
DH = D // NH                       # head dim (8)
MLP_H = 4 * D                      # MLP hidden (128)
DEPTH = 2                          # encoder depth
P_IN = C * PS * PS                 # flattened patch length (64)
LN_EPS = 1e-5                      # nn.LayerNorm default

# --- packed-slab layout constants ---
# W_A slab  (DEPTH, D, 256)  lanes: [ wqkv(96) | wo(32) | w1(128) ]
WA_QKV_END = 3 * D                 # 96
WA_WO_END = WA_QKV_END + D         # 128
WA_W1_END = WA_WO_END + MLP_H      # 256
# bias slab (DEPTH, 288)     lanes: [ bqkv(96) | bo(32) | b1(128) | b2(32) ]
BV_QKV_END = 3 * D                 # 96
BV_BO_END = BV_QKV_END + D         # 128
BV_B1_END = BV_BO_END + MLP_H      # 256
BV_B2_END = BV_B1_END + D          # 288
# vec slab (42, D) rows: [ pos_tiled(B*N) | per-layer ln1g,ln1b,ln2g,ln2b | lnf_g,lnf_b ]
VEC_POS_ROWS = B * N               # 32
VEC_LN0 = VEC_POS_ROWS
VEC_FINAL = VEC_LN0 + 4 * DEPTH    # 40


# ------------------------------- kernel ------------------------------------
def _layernorm(v, g, b):
    mu = jnp.mean(v, axis=-1, keepdims=True)
    var = jnp.mean((v - mu) * (v - mu), axis=-1, keepdims=True)
    return (v - mu) * jax.lax.rsqrt(var + LN_EPS) * g + b


def teacher_fused_kernel(patches_ref, wpe_ref, wa_ref, w2_ref, bias_ref,
                         vec_ref, o_ref):
    f32 = jnp.float32
    bf16 = jnp.bfloat16

    # ---- patch embedding + pre-tiled positional embedding (conv bias folded) ----
    x = jnp.dot(patches_ref[...], wpe_ref[...], preferred_element_type=f32)
    x = x + vec_ref[0:VEC_POS_ROWS, :]                      # (B*N, D) f32

    def to_heads(t):  # (B*N, D) -> (B*NH, N, DH)
        return t.reshape(B, N, NH, DH).swapaxes(1, 2).reshape(B * NH, N, DH)

    # ---- DEPTH pre-LN transformer blocks (statically unrolled) ----
    for layer in range(DEPTH):
        ln = VEC_LN0 + 4 * layer

        # --- multi-head self attention ---
        h = _layernorm(x, vec_ref[ln + 0, :], vec_ref[ln + 1, :])
        # fused QKV: one (B*N, D) @ (D, 3D) matmul (1/sqrt(DH) folded into wq/bq)
        qkv = jnp.dot(h.astype(bf16), wa_ref[layer, :, 0:WA_QKV_END],
                      preferred_element_type=f32) + bias_ref[layer, 0:BV_QKV_END]
        q = qkv[:, 0:D]
        k = qkv[:, D:2 * D]
        v = qkv[:, 2 * D:3 * D]

        qg = to_heads(q).astype(bf16)                       # (B*NH, N, DH)
        kg = to_heads(k).astype(bf16)
        vg = to_heads(v).astype(bf16)

        s = jnp.einsum("gnd,gmd->gnm", qg, kg,
                       preferred_element_type=f32)          # (B*NH, N, N), pre-scaled
        s = s - jnp.max(s, axis=-1, keepdims=True)
        e = jnp.exp(s)
        p = e * pl.reciprocal(jnp.sum(e, axis=-1, keepdims=True), approx=True)
        ctx = jnp.einsum("gnm,gmd->gnd", p.astype(bf16), vg,
                         preferred_element_type=f32)        # (B*NH, N, DH)

        cat = ctx.reshape(B, NH, N, DH).swapaxes(1, 2).reshape(B * N, D)
        attn = jnp.dot(cat.astype(bf16), wa_ref[layer, :, WA_QKV_END:WA_WO_END],
                       preferred_element_type=f32) + bias_ref[layer, BV_QKV_END:BV_BO_END]
        x = x + attn

        # --- MLP (tanh-GELU; nn.GELU() default is exact erf, diff ~1e-3) ---
        h2 = _layernorm(x, vec_ref[ln + 2, :], vec_ref[ln + 3, :])
        m = jnp.dot(h2.astype(bf16), wa_ref[layer, :, WA_WO_END:WA_W1_END],
                    preferred_element_type=f32) + bias_ref[layer, BV_BO_END:BV_B1_END]
        m = jax.nn.gelu(m, approximate=True)
        m = jnp.dot(m.astype(bf16), w2_ref[layer],
                    preferred_element_type=f32) + bias_ref[layer, BV_B1_END:BV_B2_END]
        x = x + m

    # ---- final LayerNorm ----
    o_ref[...] = _layernorm(x, vec_ref[VEC_FINAL, :], vec_ref[VEC_FINAL + 1, :])


# --------------------------- pallas_call wrapper -----------------------------
def teacher_forward_call(patches, params):
    vmem = pl.BlockSpec(memory_space=pltpu.MemorySpace.VMEM)
    return pl.pallas_call(
        teacher_fused_kernel,
        out_shape=jax.ShapeDtypeStruct((B * N, D), jnp.float32),
        in_specs=[vmem] * 6,            # whole arrays, VMEM-resident, no grid
        out_specs=vmem,
    )(patches, params["wpe"], params["wa"], params["w2"],
      params["bias"], params["vec"])


@jax.jit
def teacher_forward(x_nchw, params):
    # im2col for the stride=kernel conv: pure relayout of an 8 KiB tensor, fused
    # by XLA into one tiny copy inside this same jit program (kept out of the
    # kernel to avoid 6-D Mosaic relayouts). Cast to bf16 in the same fusion.
    xp = x_nchw.reshape(B, C, HP, PS, WP, PS)
    xp = xp.transpose(0, 2, 4, 1, 3, 5).reshape(B * N, P_IN).astype(jnp.bfloat16)
    out = teacher_forward_call(xp, params)                  # (B*N, D) f32
    return out.reshape(B, N, D)


# ------------------------------ parameters ----------------------------------
def init_params(key):
    ks = jax.random.split(key, 4)
    scale = 1.0 / (DH ** 0.5)

    # patch_embed: Conv2d weight [D, C, PS, PS] -> matmul weight (P_IN, D), bf16
    conv_w = 0.02 * jax.random.normal(ks[0], (D, C, PS, PS), jnp.float32)
    conv_b = 0.02 * jax.random.normal(ks[1], (D,), jnp.float32)
    wpe = conv_w.reshape(D, P_IN).T.astype(jnp.bfloat16)

    # pos_emb with conv bias folded in, pre-tiled over the batch
    pos = 0.02 * jax.random.normal(ks[2], (N, D), jnp.float32)
    pos_tiled = jnp.tile(pos + conv_b[None, :], (B, 1))     # (B*N, D)

    wa_layers, w2_layers, b_layers, ln_rows = [], [], [], []
    for layer in range(DEPTH):
        kk = jax.random.split(jax.random.fold_in(ks[3], layer), 10)
        wq = 0.02 * jax.random.normal(kk[0], (D, D), jnp.float32) * scale
        wk = 0.02 * jax.random.normal(kk[1], (D, D), jnp.float32)
        wv = 0.02 * jax.random.normal(kk[2], (D, D), jnp.float32)
        wo = 0.02 * jax.random.normal(kk[3], (D, D), jnp.float32)
        w1 = 0.02 * jax.random.normal(kk[4], (D, MLP_H), jnp.float32)
        w2 = 0.02 * jax.random.normal(kk[5], (MLP_H, D), jnp.float32)
        bq = 0.02 * jax.random.normal(kk[6], (D,), jnp.float32) * scale
        bk = 0.02 * jax.random.normal(kk[7], (D,), jnp.float32)
        bv = 0.02 * jax.random.normal(kk[8], (D,), jnp.float32)
        rest = 0.02 * jax.random.normal(kk[9], (D + MLP_H + D,), jnp.float32)
        bo, b1, b2 = rest[:D], rest[D:D + MLP_H], rest[D + MLP_H:]

        wa_layers.append(jnp.concatenate(
            [jnp.concatenate([wq, wk, wv], axis=1), wo, w1], axis=1))  # (D, 256)
        w2_layers.append(w2)                                           # (MLP_H, D)
        b_layers.append(jnp.concatenate([bq, bk, bv, bo, b1, b2]))     # (288,)
        ln_rows += [jnp.ones((D,), jnp.float32), jnp.zeros((D,), jnp.float32),   # ln1
                    jnp.ones((D,), jnp.float32), jnp.zeros((D,), jnp.float32)]   # ln2

    vec = jnp.concatenate(
        [pos_tiled] + [r[None, :] for r in ln_rows]
        + [jnp.ones((1, D), jnp.float32), jnp.zeros((1, D), jnp.float32)], axis=0)

    return {
        "wpe": wpe,                                          # (P_IN, D) bf16
        "wa": jnp.stack(wa_layers).astype(jnp.bfloat16),     # (DEPTH, D, 256) bf16
        "w2": jnp.stack(w2_layers).astype(jnp.bfloat16),     # (DEPTH, MLP_H, D) bf16
        "bias": jnp.stack(b_layers),                         # (DEPTH, 288) f32
        "vec": vec,                                          # (42, D) f32
    }


# ---------------------------------- main -------------------------------------
if __name__ == "__main__":
    key = jax.random.PRNGKey(0)
    k_param, k_x = jax.random.split(key)
    params = init_params(k_param)
    x = jax.random.normal(k_x, (B, C, H, W), jnp.float32)   # NCHW, like PyTorch

    out = jax.block_until_ready(teacher_forward(x, params))

    assert out.shape == (B, N, D), out.shape
    assert out.dtype == jnp.float32
    assert bool(jnp.all(jnp.isfinite(out)))
    print("KERNEL_OK")
</pallas_src>

<mosaic_0001>
module attributes {stable_mosaic.version = 11 : i64} {
  func.func @teacher_fused_kernel(%arg0: memref<32x64xbf16, #tpu.memory_space<vmem>>, %arg1: memref<64x32xbf16, #tpu.memory_space<vmem>>, %arg2: memref<2x32x256xbf16, #tpu.memory_space<vmem>>, %arg3: memref<2x128x32xbf16, #tpu.memory_space<vmem>>, %arg4: memref<2x288xf32, #tpu.memory_space<vmem>>, %arg5: memref<42x32xf32, #tpu.memory_space<vmem>>, %arg6: memref<32x32xf32, #tpu.memory_space<vmem>>) attributes {dimension_semantics = [], scalar_prefetch = 0 : i64, scratch_operands = 0 : i64, tpu.core_type = #tpu.core_type<tc>} {
    %c0 = arith.constant 0 : index
    %c0_0 = arith.constant 0 : index
    %0 = vector.load %arg0[%c0, %c0_0] : memref<32x64xbf16, #tpu.memory_space<vmem>>, vector<32x64xbf16>
    %c0_1 = arith.constant 0 : index
    %c0_2 = arith.constant 0 : index
    %1 = vector.load %arg1[%c0_1, %c0_2] : memref<64x32xbf16, #tpu.memory_space<vmem>>, vector<64x32xbf16>
    %cst = arith.constant dense<0.000000e+00> : vector<32x32xf32>
    %2 = tpu.matmul %0, %1, %cst {dimension_numbers = #tpu.dot_dimension_numbers<[1], [0], [0], [1], [0, 0, 1, 1], [], []>} : vector<32x64xbf16>, vector<64x32xbf16>, vector<32x32xf32> -> vector<32x32xf32>
    %c0_3 = arith.constant 0 : index
    %c0_4 = arith.constant 0 : index
    %3 = vector.load %arg5[%c0_3, %c0_4] : memref<42x32xf32, #tpu.memory_space<vmem>>, vector<32x32xf32>
    %4 = arith.addf %2, %3 : vector<32x32xf32>
    %c32 = arith.constant 32 : index
    %c0_5 = arith.constant 0 : index
    %5 = vector.load %arg5[%c32, %c0_5] : memref<42x32xf32, #tpu.memory_space<vmem>>, vector<1x32xf32>
    %6 = vector.shape_cast %5 : vector<1x32xf32> to vector<32xf32>
    %c33 = arith.constant 33 : index
    %c0_6 = arith.constant 0 : index
    %7 = vector.load %arg5[%c33, %c0_6] : memref<42x32xf32, #tpu.memory_space<vmem>>, vector<1x32xf32>
    %8 = vector.shape_cast %7 : vector<1x32xf32> to vector<32xf32>
    %cst_7 = arith.constant dense<0.000000e+00> : vector<32xf32>
    %9 = vector.multi_reduction <add>, %4, %cst_7 [1] : vector<32x32xf32> to vector<32xf32>
    %10 = vector.shape_cast %9 : vector<32xf32> to vector<32x1xf32>
    %cst_8 = arith.constant 3.200000e+01 : f32
    %11 = vector.broadcast %cst_8 : f32 to vector<32x1xf32>
    %12 = arith.divf %10, %11 : vector<32x1xf32>
    %13 = vector.broadcast %12 : vector<32x1xf32> to vector<32x32xf32>
    %14 = arith.subf %4, %13 : vector<32x32xf32>
    %15 = vector.broadcast %12 : vector<32x1xf32> to vector<32x32xf32>
    %16 = arith.subf %4, %15 : vector<32x32xf32>
    %17 = arith.mulf %14, %16 : vector<32x32xf32>
    %cst_9 = arith.constant dense<0.000000e+00> : vector<32xf32>
    %18 = vector.multi_reduction <add>, %17, %cst_9 [1] : vector<32x32xf32> to vector<32xf32>
    %19 = vector.shape_cast %18 : vector<32xf32> to vector<32x1xf32>
    %cst_10 = arith.constant 3.200000e+01 : f32
    %20 = vector.broadcast %cst_10 : f32 to vector<32x1xf32>
    %21 = arith.divf %19, %20 : vector<32x1xf32>
    %22 = vector.broadcast %12 : vector<32x1xf32> to vector<32x32xf32>
    %23 = arith.subf %4, %22 : vector<32x32xf32>
    %cst_11 = arith.constant 9.99999974E-6 : f32
    %24 = vector.broadcast %cst_11 : f32 to vector<32x1xf32>
    %25 = arith.addf %21, %24 : vector<32x1xf32>
    %26 = math.rsqrt %25 : vector<32x1xf32>
    %27 = vector.broadcast %26 : vector<32x1xf32> to vector<32x32xf32>
    %28 = arith.mulf %23, %27 : vector<32x32xf32>
    %29 = vector.shape_cast %6 : vector<32xf32> to vector<1x32xf32>
    %30 = vector.broadcast %29 : vector<1x32xf32> to vector<32x32xf32>
    %31 = arith.mulf %28, %30 : vector<32x32xf32>
    %32 = vector.shape_cast %8 : vector<32xf32> to vector<1x32xf32>
    %33 = vector.broadcast %32 : vector<1x32xf32> to vector<32x32xf32>
    %34 = arith.addf %31, %33 : vector<32x32xf32>
    %35 = arith.truncf %34 : vector<32x32xf32> to vector<32x32xbf16>
    %c0_12 = arith.constant 0 : index
    %c0_13 = arith.constant 0 : index
    %c0_14 = arith.constant 0 : index
    %36 = vector.load %arg2[%c0_12, %c0_13, %c0_14] : memref<2x32x256xbf16, #tpu.memory_space<vmem>>, vector<1x32x96xbf16>
    %37 = vector.shape_cast %36 : vector<1x32x96xbf16> to vector<32x96xbf16>
    %cst_15 = arith.constant dense<0.000000e+00> : vector<32x96xf32>
    %38 = tpu.matmul %35, %37, %cst_15 {dimension_numbers = #tpu.dot_dimension_numbers<[1], [0], [0], [1], [0, 0, 1, 1], [], []>} : vector<32x32xbf16>, vector<32x96xbf16>, vector<32x96xf32> -> vector<32x96xf32>
    %c0_16 = arith.constant 0 : index
    %c0_17 = arith.constant 0 : index
    %39 = vector.load %arg4[%c0_16, %c0_17] : memref<2x288xf32, #tpu.memory_space<vmem>>, vector<1x96xf32>
    %40 = vector.shape_cast %39 : vector<1x96xf32> to vector<96xf32>
    %41 = vector.shape_cast %40 : vector<96xf32> to vector<1x96xf32>
    %42 = vector.broadcast %41 : vector<1x96xf32> to vector<32x96xf32>
    %43 = arith.addf %38, %42 : vector<32x96xf32>
    %44 = vector.extract_strided_slice %43 {offsets = [0, 0], sizes = [32, 32], strides = [1, 1]} : vector<32x96xf32> to vector<32x32xf32>
    %45 = vector.extract_strided_slice %43 {offsets = [0, 32], sizes = [32, 32], strides = [1, 1]} : vector<32x96xf32> to vector<32x32xf32>
    %46 = vector.extract_strided_slice %43 {offsets = [0, 64], sizes = [32, 32], strides = [1, 1]} : vector<32x96xf32> to vector<32x32xf32>
    %47 = vector.shape_cast %44 : vector<32x32xf32> to vector<2x16x4x8xf32>
    %48 = tpu.transpose %47, [0, 2, 1, 3] : vector<2x16x4x8xf32> -> vector<2x4x16x8xf32>
    %49 = vector.shape_cast %48 : vector<2x4x16x8xf32> to vector<8x16x8xf32>
    %50 = arith.truncf %49 : vector<8x16x8xf32> to vector<8x16x8xbf16>
    %51 = vector.shape_cast %45 : vector<32x32xf32> to vector<2x16x4x8xf32>
    %52 = tpu.transpose %51, [0, 2, 1, 3] : vector<2x16x4x8xf32> -> vector<2x4x16x8xf32>
    %53 = vector.shape_cast %52 : vector<2x4x16x8xf32> to vector<8x16x8xf32>
    %54 = arith.truncf %53 : vector<8x16x8xf32> to vector<8x16x8xbf16>
    %55 = vector.shape_cast %46 : vector<32x32xf32> to vector<2x16x4x8xf32>
    %56 = tpu.transpose %55, [0, 2, 1, 3] : vector<2x16x4x8xf32> -> vector<2x4x16x8xf32>
    %57 = vector.shape_cast %56 : vector<2x4x16x8xf32> to vector<8x16x8xf32>
    %58 = arith.truncf %57 : vector<8x16x8xf32> to vector<8x16x8xbf16>
    "tpu.trace_start"() <{level = 10 : i32, message = "gnd,gmd->gnm"}> : () -> ()
    %cst_18 = arith.constant dense<0.000000e+00> : vector<8x16x16xf32>
    %59 = tpu.matmul %50, %54, %cst_18 {dimension_numbers = #tpu.dot_dimension_numbers<[2], [2], [1], [1], [0, 0, 0, 1, 1, 1], [0], [0]>} : vector<8x16x8xbf16>, vector<8x16x8xbf16>, vector<8x16x16xf32> -> vector<8x16x16xf32>
    "tpu.trace_stop"() : () -> ()
    %cst_19 = arith.constant dense<0xFF800000> : vector<8x16xf32>
    %60 = vector.multi_reduction <maximumf>, %59, %cst_19 [2] : vector<8x16x16xf32> to vector<8x16xf32>
    %61 = vector.shape_cast %60 : vector<8x16xf32> to vector<8x16x1xf32>
    %62 = vector.broadcast %61 : vector<8x16x1xf32> to vector<8x16x16xf32>
    %63 = arith.subf %59, %62 : vector<8x16x16xf32>
    %64 = math.exp %63 : vector<8x16x16xf32>
    %cst_20 = arith.constant dense<0.000000e+00> : vector<8x16xf32>
    %65 = vector.multi_reduction <add>, %64, %cst_20 [2] : vector<8x16x16xf32> to vector<8x16xf32>
    %66 = vector.shape_cast %65 : vector<8x16xf32> to vector<8x16x1xf32>
    %67 = tpu.reciprocal %66 {approx = true} : vector<8x16x1xf32> -> vector<8x16x1xf32>
    %68 = vector.broadcast %67 : vector<8x16x1xf32> to vector<8x16x16xf32>
    %69 = arith.mulf %64, %68 : vector<8x16x16xf32>
    %70 = arith.truncf %69 : vector<8x16x16xf32> to vector<8x16x16xbf16>
    "tpu.trace_start"() <{level = 10 : i32, message = "gnm,gmd->gnd"}> : () -> ()
    %cst_21 = arith.constant dense<0.000000e+00> : vector<8x16x8xf32>
    %71 = tpu.matmul %70, %58, %cst_21 {dimension_numbers = #tpu.dot_dimension_numbers<[2], [1], [1], [2], [0, 0, 0, 1, 1, 2], [0], [0]>} : vector<8x16x16xbf16>, vector<8x16x8xbf16>, vector<8x16x8xf32> -> vector<8x16x8xf32>
    "tpu.trace_stop"() : () -> ()
    %72 = vector.shape_cast %71 : vector<8x16x8xf32> to vector<2x4x16x8xf32>
    %73 = tpu.transpose %72, [0, 2, 1, 3] : vector<2x4x16x8xf32> -> vector<2x16x4x8xf32>
    %74 = vector.shape_cast %73 : vector<2x16x4x8xf32> to vector<32x32xf32>
    %75 = arith.truncf %74 : vector<32x32xf32> to vector<32x32xbf16>
    %c0_22 = arith.constant 0 : index
    %c0_23 = arith.constant 0 : index
    %c96 = arith.constant 96 : index
    %76 = vector.load %arg2[%c0_22, %c0_23, %c96] : memref<2x32x256xbf16, #tpu.memory_space<vmem>>, vector<1x32x32xbf16>
    %77 = vector.shape_cast %76 : vector<1x32x32xbf16> to vector<32x32xbf16>
    %cst_24 = arith.constant dense<0.000000e+00> : vector<32x32xf32>
    %78 = tpu.matmul %75, %77, %cst_24 {dimension_numbers = #tpu.dot_dimension_numbers<[1], [0], [0], [1], [0, 0, 1, 1], [], []>} : vector<32x32xbf16>, vector<32x32xbf16>, vector<32x32xf32> -> vector<32x32xf32>
    %c0_25 = arith.constant 0 : index
    %c96_26 = arith.constant 96 : index
    %79 = vector.load %arg4[%c0_25, %c96_26] : memref<2x288xf32, #tpu.memory_space<vmem>>, vector<1x32xf32>
    %80 = vector.shape_cast %79 : vector<1x32xf32> to vector<32xf32>
    %81 = vector.shape_cast %80 : vector<32xf32> to vector<1x32xf32>
    %82 = vector.broadcast %81 : vector<1x32xf32> to vector<32x32xf32>
    %83 = arith.addf %78, %82 : vector<32x32xf32>
    %84 = arith.addf %4, %83 : vector<32x32xf32>
    %c34 = arith.constant 34 : index
    %c0_27 = arith.constant 0 : index
    %85 = vector.load %arg5[%c34, %c0_27] : memref<42x32xf32, #tpu.memory_space<vmem>>, vector<1x32xf32>
    %86 = vector.shape_cast %85 : vector<1x32xf32> to vector<32xf32>
    %c35 = arith.constant 35 : index
    %c0_28 = arith.constant 0 : index
    %87 = vector.load %arg5[%c35, %c0_28] : memref<42x32xf32, #tpu.memory_space<vmem>>, vector<1x32xf32>
    %88 = vector.shape_cast %87 : vector<1x32xf32> to vector<32xf32>
    %cst_29 = arith.constant dense<0.000000e+00> : vector<32xf32>
    %89 = vector.multi_reduction <add>, %84, %cst_29 [1] : vector<32x32xf32> to vector<32xf32>
    %90 = vector.shape_cast %89 : vector<32xf32> to vector<32x1xf32>
    %cst_30 = arith.constant 3.200000e+01 : f32
    %91 = vector.broadcast %cst_30 : f32 to vector<32x1xf32>
    %92 = arith.divf %90, %91 : vector<32x1xf32>
    %93 = vector.broadcast %92 : vector<32x1xf32> to vector<32x32xf32>
    %94 = arith.subf %84, %93 : vector<32x32xf32>
    %95 = vector.broadcast %92 : vector<32x1xf32> to vector<32x32xf32>
    %96 = arith.subf %84, %95 : vector<32x32xf32>
    %97 = arith.mulf %94, %96 : vector<32x32xf32>
    %cst_31 = arith.constant dense<0.000000e+00> : vector<32xf32>
    %98 = vector.multi_reduction <add>, %97, %cst_31 [1] : vector<32x32xf32> to vector<32xf32>
    %99 = vector.shape_cast %98 : vector<32xf32> to vector<32x1xf32>
    %cst_32 = arith.constant 3.200000e+01 : f32
    %100 = vector.broadcast %cst_32 : f32 to vector<32x1xf32>
    %101 = arith.divf %99, %100 : vector<32x1xf32>
    %102 = vector.broadcast %92 : vector<32x1xf32> to vector<32x32xf32>
    %103 = arith.subf %84, %102 : vector<32x32xf32>
    %cst_33 = arith.constant 9.99999974E-6 : f32
    %104 = vector.broadcast %cst_33 : f32 to vector<32x1xf32>
    %105 = arith.addf %101, %104 : vector<32x1xf32>
    %106 = math.rsqrt %105 : vector<32x1xf32>
    %107 = vector.broadcast %106 : vector<32x1xf32> to vector<32x32xf32>
    %108 = arith.mulf %103, %107 : vector<32x32xf32>
    %109 = vector.shape_cast %86 : vector<32xf32> to vector<1x32xf32>
    %110 = vector.broadcast %109 : vector<1x32xf32> to vector<32x32xf32>
    %111 = arith.mulf %108, %110 : vector<32x32xf32>
    %112 = vector.shape_cast %88 : vector<32xf32> to vector<1x32xf32>
    %113 = vector.broadcast %112 : vector<1x32xf32> to vector<32x32xf32>
    %114 = arith.addf %111, %113 : vector<32x32xf32>
    %115 = arith.truncf %114 : vector<32x32xf32> to vector<32x32xbf16>
    %c0_34 = arith.constant 0 : index
    %c0_35 = arith.constant 0 : index
    %c128 = arith.constant 128 : index
    %116 = vector.load %arg2[%c0_34, %c0_35, %c128] : memref<2x32x256xbf16, #tpu.memory_space<vmem>>, vector<1x32x128xbf16>
    %117 = vector.shape_cast %116 : vector<1x32x128xbf16> to vector<32x128xbf16>
    %cst_36 = arith.constant dense<0.000000e+00> : vector<32x128xf32>
    %118 = tpu.matmul %115, %117, %cst_36 {dimension_numbers = #tpu.dot_dimension_numbers<[1], [0], [0], [1], [0, 0, 1, 1], [], []>} : vector<32x32xbf16>, vector<32x128xbf16>, vector<32x128xf32> -> vector<32x128xf32>
    %c0_37 = arith.constant 0 : index
    %c128_38 = arith.constant 128 : index
    %119 = vector.load %arg4[%c0_37, %c128_38] : memref<2x288xf32, #tpu.memory_space<vmem>>, vector<1x128xf32>
    %120 = vector.shape_cast %119 : vector<1x128xf32> to vector<128xf32>
    %121 = vector.shape_cast %120 : vector<128xf32> to vector<1x128xf32>
    %122 = vector.broadcast %121 : vector<1x128xf32> to vector<32x128xf32>
    %123 = arith.addf %118, %122 : vector<32x128xf32>
    %124 = arith.mulf %123, %123 : vector<32x128xf32>
    %125 = arith.mulf %123, %124 : vector<32x128xf32>
    %cst_39 = arith.constant 4.471500e-02 : f32
    %126 = vector.broadcast %cst_39 : f32 to vector<32x128xf32>
    %127 = arith.mulf %126, %125 : vector<32x128xf32>
    %128 = arith.addf %123, %127 : vector<32x128xf32>
    %cst_40 = arith.constant 0.797884583 : f32
    %129 = vector.broadcast %cst_40 : f32 to vector<32x128xf32>
    %130 = arith.mulf %129, %128 : vector<32x128xf32>
    %131 = math.tanh %130 : vector<32x128xf32>
    %cst_41 = arith.constant 1.000000e+00 : f32
    %132 = vector.broadcast %cst_41 : f32 to vector<32x128xf32>
    %133 = arith.addf %132, %131 : vector<32x128xf32>
    %cst_42 = arith.constant 5.000000e-01 : f32
    %134 = vector.broadcast %cst_42 : f32 to vector<32x128xf32>
    %135 = arith.mulf %134, %133 : vector<32x128xf32>
    %136 = arith.mulf %123, %135 : vector<32x128xf32>
    %137 = arith.truncf %136 : vector<32x128xf32> to vector<32x128xbf16>
    %c0_43 = arith.constant 0 : index
    %c0_44 = arith.constant 0 : index
    %c0_45 = arith.constant 0 : index
    %138 = vector.load %arg3[%c0_43, %c0_44, %c0_45] : memref<2x128x32xbf16, #tpu.memory_space<vmem>>, vector<1x128x32xbf16>
    %139 = vector.shape_cast %138 : vector<1x128x32xbf16> to vector<128x32xbf16>
    %cst_46 = arith.constant dense<0.000000e+00> : vector<32x32xf32>
    %140 = tpu.matmul %137, %139, %cst_46 {dimension_numbers = #tpu.dot_dimension_numbers<[1], [0], [0], [1], [0, 0, 1, 1], [], []>} : vector<32x128xbf16>, vector<128x32xbf16>, vector<32x32xf32> -> vector<32x32xf32>
    %c0_47 = arith.constant 0 : index
    %c256 = arith.constant 256 : index
    %141 = vector.load %arg4[%c0_47, %c256] : memref<2x288xf32, #tpu.memory_space<vmem>>, vector<1x32xf32>
    %142 = vector.shape_cast %141 : vector<1x32xf32> to vector<32xf32>
    %143 = vector.shape_cast %142 : vector<32xf32> to vector<1x32xf32>
    %144 = vector.broadcast %143 : vector<1x32xf32> to vector<32x32xf32>
    %145 = arith.addf %140, %144 : vector<32x32xf32>
    %146 = arith.addf %84, %145 : vector<32x32xf32>
    %c36 = arith.constant 36 : index
    %c0_48 = arith.constant 0 : index
    %147 = vector.load %arg5[%c36, %c0_48] : memref<42x32xf32, #tpu.memory_space<vmem>>, vector<1x32xf32>
    %148 = vector.shape_cast %147 : vector<1x32xf32> to vector<32xf32>
    %c37 = arith.constant 37 : index
    %c0_49 = arith.constant 0 : index
    %149 = vector.load %arg5[%c37, %c0_49] : memref<42x32xf32, #tpu.memory_space<vmem>>, vector<1x32xf32>
    %150 = vector.shape_cast %149 : vector<1x32xf32> to vector<32xf32>
    %cst_50 = arith.constant dense<0.000000e+00> : vector<32xf32>
    %151 = vector.multi_reduction <add>, %146, %cst_50 [1] : vector<32x32xf32> to vector<32xf32>
    %152 = vector.shape_cast %151 : vector<32xf32> to vector<32x1xf32>
    %cst_51 = arith.constant 3.200000e+01 : f32
    %153 = vector.broadcast %cst_51 : f32 to vector<32x1xf32>
    %154 = arith.divf %152, %153 : vector<32x1xf32>
    %155 = vector.broadcast %154 : vector<32x1xf32> to vector<32x32xf32>
    %156 = arith.subf %146, %155 : vector<32x32xf32>
    %157 = vector.broadcast %154 : vector<32x1xf32> to vector<32x32xf32>
    %158 = arith.subf %146, %157 : vector<32x32xf32>
    %159 = arith.mulf %156, %158 : vector<32x32xf32>
    %cst_52 = arith.constant dense<0.000000e+00> : vector<32xf32>
    %160 = vector.multi_reduction <add>, %159, %cst_52 [1] : vector<32x32xf32> to vector<32xf32>
    %161 = vector.shape_cast %160 : vector<32xf32> to vector<32x1xf32>
    %cst_53 = arith.constant 3.200000e+01 : f32
    %162 = vector.broadcast %cst_53 : f32 to vector<32x1xf32>
    %163 = arith.divf %161, %162 : vector<32x1xf32>
    %164 = vector.broadcast %154 : vector<32x1xf32> to vector<32x32xf32>
    %165 = arith.subf %146, %164 : vector<32x32xf32>
    %cst_54 = arith.constant 9.99999974E-6 : f32
    %166 = vector.broadcast %cst_54 : f32 to vector<32x1xf32>
    %167 = arith.addf %163, %166 : vector<32x1xf32>
    %168 = math.rsqrt %167 : vector<32x1xf32>
    %169 = vector.broadcast %168 : vector<32x1xf32> to vector<32x32xf32>
    %170 = arith.mulf %165, %169 : vector<32x32xf32>
    %171 = vector.shape_cast %148 : vector<32xf32> to vector<1x32xf32>
    %172 = vector.broadcast %171 : vector<1x32xf32> to vector<32x32xf32>
    %173 = arith.mulf %170, %172 : vector<32x32xf32>
    %174 = vector.shape_cast %150 : vector<32xf32> to vector<1x32xf32>
    %175 = vector.broadcast %174 : vector<1x32xf32> to vector<32x32xf32>
    %176 = arith.addf %173, %175 : vector<32x32xf32>
    %177 = arith.truncf %176 : vector<32x32xf32> to vector<32x32xbf16>
    %c1 = arith.constant 1 : index
    %c0_55 = arith.constant 0 : index
    %c0_56 = arith.constant 0 : index
    %178 = vector.load %arg2[%c1, %c0_55, %c0_56] : memref<2x32x256xbf16, #tpu.memory_space<vmem>>, vector<1x32x96xbf16>
    %179 = vector.shape_cast %178 : vector<1x32x96xbf16> to vector<32x96xbf16>
    %cst_57 = arith.constant dense<0.000000e+00> : vector<32x96xf32>
    %180 = tpu.matmul %177, %179, %cst_57 {dimension_numbers = #tpu.dot_dimension_numbers<[1], [0], [0], [1], [0, 0, 1, 1], [], []>} : vector<32x32xbf16>, vector<32x96xbf16>, vector<32x96xf32> -> vector<32x96xf32>
    %c1_58 = arith.constant 1 : index
    %c0_59 = arith.constant 0 : index
    %181 = vector.load %arg4[%c1_58, %c0_59] : memref<2x288xf32, #tpu.memory_space<vmem>>, vector<1x96xf32>
    %182 = vector.shape_cast %181 : vector<1x96xf32> to vector<96xf32>
    %183 = vector.shape_cast %182 : vector<96xf32> to vector<1x96xf32>
    %184 = vector.broadcast %183 : vector<1x96xf32> to vector<32x96xf32>
    %185 = arith.addf %180, %184 : vector<32x96xf32>
    %186 = vector.extract_strided_slice %185 {offsets = [0, 0], sizes = [32, 32], strides = [1, 1]} : vector<32x96xf32> to vector<32x32xf32>
    %187 = vector.extract_strided_slice %185 {offsets = [0, 32], sizes = [32, 32], strides = [1, 1]} : vector<32x96xf32> to vector<32x32xf32>
    %188 = vector.extract_strided_slice %185 {offsets = [0, 64], sizes = [32, 32], strides = [1, 1]} : vector<32x96xf32> to vector<32x32xf32>
    %189 = vector.shape_cast %186 : vector<32x32xf32> to vector<2x16x4x8xf32>
    %190 = tpu.transpose %189, [0, 2, 1, 3] : vector<2x16x4x8xf32> -> vector<2x4x16x8xf32>
    %191 = vector.shape_cast %190 : vector<2x4x16x8xf32> to vector<8x16x8xf32>
    %192 = arith.truncf %191 : vector<8x16x8xf32> to vector<8x16x8xbf16>
    %193 = vector.shape_cast %187 : vector<32x32xf32> to vector<2x16x4x8xf32>
    %194 = tpu.transpose %193, [0, 2, 1, 3] : vector<2x16x4x8xf32> -> vector<2x4x16x8xf32>
    %195 = vector.shape_cast %194 : vector<2x4x16x8xf32> to vector<8x16x8xf32>
    %196 = arith.truncf %195 : vector<8x16x8xf32> to vector<8x16x8xbf16>
    %197 = vector.shape_cast %188 : vector<32x32xf32> to vector<2x16x4x8xf32>
    %198 = tpu.transpose %197, [0, 2, 1, 3] : vector<2x16x4x8xf32> -> vector<2x4x16x8xf32>
    %199 = vector.shape_cast %198 : vector<2x4x16x8xf32> to vector<8x16x8xf32>
    %200 = arith.truncf %199 : vector<8x16x8xf32> to vector<8x16x8xbf16>
    "tpu.trace_start"() <{level = 10 : i32, message = "gnd,gmd->gnm"}> : () -> ()
    %cst_60 = arith.constant dense<0.000000e+00> : vector<8x16x16xf32>
    %201 = tpu.matmul %192, %196, %cst_60 {dimension_numbers = #tpu.dot_dimension_numbers<[2], [2], [1], [1], [0, 0, 0, 1, 1, 1], [0], [0]>} : vector<8x16x8xbf16>, vector<8x16x8xbf16>, vector<8x16x16xf32> -> vector<8x16x16xf32>
    "tpu.trace_stop"() : () -> ()
    %cst_61 = arith.constant dense<0xFF800000> : vector<8x16xf32>
    %202 = vector.multi_reduction <maximumf>, %201, %cst_61 [2] : vector<8x16x16xf32> to vector<8x16xf32>
    %203 = vector.shape_cast %202 : vector<8x16xf32> to vector<8x16x1xf32>
    %204 = vector.broadcast %203 : vector<8x16x1xf32> to vector<8x16x16xf32>
    %205 = arith.subf %201, %204 : vector<8x16x16xf32>
    %206 = math.exp %205 : vector<8x16x16xf32>
    %cst_62 = arith.constant dense<0.000000e+00> : vector<8x16xf32>
    %207 = vector.multi_reduction <add>, %206, %cst_62 [2] : vector<8x16x16xf32> to vector<8x16xf32>
    %208 = vector.shape_cast %207 : vector<8x16xf32> to vector<8x16x1xf32>
    %209 = tpu.reciprocal %208 {approx = true} : vector<8x16x1xf32> -> vector<8x16x1xf32>
    %210 = vector.broadcast %209 : vector<8x16x1xf32> to vector<8x16x16xf32>
    %211 = arith.mulf %206, %210 : vector<8x16x16xf32>
    %212 = arith.truncf %211 : vector<8x16x16xf32> to vector<8x16x16xbf16>
    "tpu.trace_start"() <{level = 10 : i32, message = "gnm,gmd->gnd"}> : () -> ()
    %cst_63 = arith.constant dense<0.000000e+00> : vector<8x16x8xf32>
    %213 = tpu.matmul %212, %200, %cst_63 {dimension_numbers = #tpu.dot_dimension_numbers<[2], [1], [1], [2], [0, 0, 0, 1, 1, 2], [0], [0]>} : vector<8x16x16xbf16>, vector<8x16x8xbf16>, vector<8x16x8xf32> -> vector<8x16x8xf32>
    "tpu.trace_stop"() : () -> ()
    %214 = vector.shape_cast %213 : vector<8x16x8xf32> to vector<2x4x16x8xf32>
    %215 = tpu.transpose %214, [0, 2, 1, 3] : vector<2x4x16x8xf32> -> vector<2x16x4x8xf32>
    %216 = vector.shape_cast %215 : vector<2x16x4x8xf32> to vector<32x32xf32>
    %217 = arith.truncf %216 : vector<32x32xf32> to vector<32x32xbf16>
    %c1_64 = arith.constant 1 : index
    %c0_65 = arith.constant 0 : index
    %c96_66 = arith.constant 96 : index
    %218 = vector.load %arg2[%c1_64, %c0_65, %c96_66] : memref<2x32x256xbf16, #tpu.memory_space<vmem>>, vector<1x32x32xbf16>
    %219 = vector.shape_cast %218 : vector<1x32x32xbf16> to vector<32x32xbf16>
    %cst_67 = arith.constant dense<0.000000e+00> : vector<32x32xf32>
    %220 = tpu.matmul %217, %219, %cst_67 {dimension_numbers = #tpu.dot_dimension_numbers<[1], [0], [0], [1], [0, 0, 1, 1], [], []>} : vector<32x32xbf16>, vector<32x32xbf16>, vector<32x32xf32> -> vector<32x32xf32>
    %c1_68 = arith.constant 1 : index
    %c96_69 = arith.constant 96 : index
    %221 = vector.load %arg4[%c1_68, %c96_69] : memref<2x288xf32, #tpu.memory_space<vmem>>, vector<1x32xf32>
    %222 = vector.shape_cast %221 : vector<1x32xf32> to vector<32xf32>
    %223 = vector.shape_cast %222 : vector<32xf32> to vector<1x32xf32>
    %224 = vector.broadcast %223 : vector<1x32xf32> to vector<32x32xf32>
    %225 = arith.addf %220, %224 : vector<32x32xf32>
    %226 = arith.addf %146, %225 : vector<32x32xf32>
    %c38 = arith.constant 38 : index
    %c0_70 = arith.constant 0 : index
    %227 = vector.load %arg5[%c38, %c0_70] : memref<42x32xf32, #tpu.memory_space<vmem>>, vector<1x32xf32>
    %228 = vector.shape_cast %227 : vector<1x32xf32> to vector<32xf32>
    %c39 = arith.constant 39 : index
    %c0_71 = arith.constant 0 : index
    %229 = vector.load %arg5[%c39, %c0_71] : memref<42x32xf32, #tpu.memory_space<vmem>>, vector<1x32xf32>
    %230 = vector.shape_cast %229 : vector<1x32xf32> to vector<32xf32>
    %cst_72 = arith.constant dense<0.000000e+00> : vector<32xf32>
    %231 = vector.multi_reduction <add>, %226, %cst_72 [1] : vector<32x32xf32> to vector<32xf32>
    %232 = vector.shape_cast %231 : vector<32xf32> to vector<32x1xf32>
    %cst_73 = arith.constant 3.200000e+01 : f32
    %233 = vector.broadcast %cst_73 : f32 to vector<32x1xf32>
    %234 = arith.divf %232, %233 : vector<32x1xf32>
    %235 = vector.broadcast %234 : vector<32x1xf32> to vector<32x32xf32>
    %236 = arith.subf %226, %235 : vector<32x32xf32>
    %237 = vector.broadcast %234 : vector<32x1xf32> to vector<32x32xf32>
    %238 = arith.subf %226, %237 : vector<32x32xf32>
    %239 = arith.mulf %236, %238 : vector<32x32xf32>
    %cst_74 = arith.constant dense<0.000000e+00> : vector<32xf32>
    %240 = vector.multi_reduction <add>, %239, %cst_74 [1] : vector<32x32xf32> to vector<32xf32>
    %241 = vector.shape_cast %240 : vector<32xf32> to vector<32x1xf32>
    %cst_75 = arith.constant 3.200000e+01 : f32
    %242 = vector.broadcast %cst_75 : f32 to vector<32x1xf32>
    %243 = arith.divf %241, %242 : vector<32x1xf32>
    %244 = vector.broadcast %234 : vector<32x1xf32> to vector<32x32xf32>
    %245 = arith.subf %226, %244 : vector<32x32xf32>
    %cst_76 = arith.constant 9.99999974E-6 : f32
    %246 = vector.broadcast %cst_76 : f32 to vector<32x1xf32>
    %247 = arith.addf %243, %246 : vector<32x1xf32>
    %248 = math.rsqrt %247 : vector<32x1xf32>
    %249 = vector.broadcast %248 : vector<32x1xf32> to vector<32x32xf32>
    %250 = arith.mulf %245, %249 : vector<32x32xf32>
    %251 = vector.shape_cast %228 : vector<32xf32> to vector<1x32xf32>
    %252 = vector.broadcast %251 : vector<1x32xf32> to vector<32x32xf32>
    %253 = arith.mulf %250, %252 : vector<32x32xf32>
    %254 = vector.shape_cast %230 : vector<32xf32> to vector<1x32xf32>
    %255 = vector.broadcast %254 : vector<1x32xf32> to vector<32x32xf32>
    %256 = arith.addf %253, %255 : vector<32x32xf32>
    %257 = arith.truncf %256 : vector<32x32xf32> to vector<32x32xbf16>
    %c1_77 = arith.constant 1 : index
    %c0_78 = arith.constant 0 : index
    %c128_79 = arith.constant 128 : index
    %258 = vector.load %arg2[%c1_77, %c0_78, %c128_79] : memref<2x32x256xbf16, #tpu.memory_space<vmem>>, vector<1x32x128xbf16>
    %259 = vector.shape_cast %258 : vector<1x32x128xbf16> to vector<32x128xbf16>
    %cst_80 = arith.constant dense<0.000000e+00> : vector<32x128xf32>
    %260 = tpu.matmul %257, %259, %cst_80 {dimension_numbers = #tpu.dot_dimension_numbers<[1], [0], [0], [1], [0, 0, 1, 1], [], []>} : vector<32x32xbf16>, vector<32x128xbf16>, vector<32x128xf32> -> vector<32x128xf32>
    %c1_81 = arith.constant 1 : index
    %c128_82 = arith.constant 128 : index
    %261 = vector.load %arg4[%c1_81, %c128_82] : memref<2x288xf32, #tpu.memory_space<vmem>>, vector<1x128xf32>
    %262 = vector.shape_cast %261 : vector<1x128xf32> to vector<128xf32>
    %263 = vector.shape_cast %262 : vector<128xf32> to vector<1x128xf32>
    %264 = vector.broadcast %263 : vector<1x128xf32> to vector<32x128xf32>
    %265 = arith.addf %260, %264 : vector<32x128xf32>
    %266 = arith.mulf %265, %265 : vector<32x128xf32>
    %267 = arith.mulf %265, %266 : vector<32x128xf32>
    %cst_83 = arith.constant 4.471500e-02 : f32
    %268 = vector.broadcast %cst_83 : f32 to vector<32x128xf32>
    %269 = arith.mulf %268, %267 : vector<32x128xf32>
    %270 = arith.addf %265, %269 : vector<32x128xf32>
    %cst_84 = arith.constant 0.797884583 : f32
    %271 = vector.broadcast %cst_84 : f32 to vector<32x128xf32>
    %272 = arith.mulf %271, %270 : vector<32x128xf32>
    %273 = math.tanh %272 : vector<32x128xf32>
    %cst_85 = arith.constant 1.000000e+00 : f32
    %274 = vector.broadcast %cst_85 : f32 to vector<32x128xf32>
    %275 = arith.addf %274, %273 : vector<32x128xf32>
    %cst_86 = arith.constant 5.000000e-01 : f32
    %276 = vector.broadcast %cst_86 : f32 to vector<32x128xf32>
    %277 = arith.mulf %276, %275 : vector<32x128xf32>
    %278 = arith.mulf %265, %277 : vector<32x128xf32>
    %279 = arith.truncf %278 : vector<32x128xf32> to vector<32x128xbf16>
    %c1_87 = arith.constant 1 : index
    %c0_88 = arith.constant 0 : index
    %c0_89 = arith.constant 0 : index
    %280 = vector.load %arg3[%c1_87, %c0_88, %c0_89] : memref<2x128x32xbf16, #tpu.memory_space<vmem>>, vector<1x128x32xbf16>
    %281 = vector.shape_cast %280 : vector<1x128x32xbf16> to vector<128x32xbf16>
    %cst_90 = arith.constant dense<0.000000e+00> : vector<32x32xf32>
    %282 = tpu.matmul %279, %281, %cst_90 {dimension_numbers = #tpu.dot_dimension_numbers<[1], [0], [0], [1], [0, 0, 1, 1], [], []>} : vector<32x128xbf16>, vector<128x32xbf16>, vector<32x32xf32> -> vector<32x32xf32>
    %c1_91 = arith.constant 1 : index
    %c256_92 = arith.constant 256 : index
    %283 = vector.load %arg4[%c1_91, %c256_92] : memref<2x288xf32, #tpu.memory_space<vmem>>, vector<1x32xf32>
    %284 = vector.shape_cast %283 : vector<1x32xf32> to vector<32xf32>
    %285 = vector.shape_cast %284 : vector<32xf32> to vector<1x32xf32>
    %286 = vector.broadcast %285 : vector<1x32xf32> to vector<32x32xf32>
    %287 = arith.addf %282, %286 : vector<32x32xf32>
    %288 = arith.addf %226, %287 : vector<32x32xf32>
    %c40 = arith.constant 40 : index
    %c0_93 = arith.constant 0 : index
    %289 = vector.load %arg5[%c40, %c0_93] : memref<42x32xf32, #tpu.memory_space<vmem>>, vector<1x32xf32>
    %290 = vector.shape_cast %289 : vector<1x32xf32> to vector<32xf32>
    %c41 = arith.constant 41 : index
    %c0_94 = arith.constant 0 : index
    %291 = vector.load %arg5[%c41, %c0_94] : memref<42x32xf32, #tpu.memory_space<vmem>>, vector<1x32xf32>
    %292 = vector.shape_cast %291 : vector<1x32xf32> to vector<32xf32>
    %cst_95 = arith.constant dense<0.000000e+00> : vector<32xf32>
    %293 = vector.multi_reduction <add>, %288, %cst_95 [1] : vector<32x32xf32> to vector<32xf32>
    %294 = vector.shape_cast %293 : vector<32xf32> to vector<32x1xf32>
    %cst_96 = arith.constant 3.200000e+01 : f32
    %295 = vector.broadcast %cst_96 : f32 to vector<32x1xf32>
    %296 = arith.divf %294, %295 : vector<32x1xf32>
    %297 = vector.broadcast %296 : vector<32x1xf32> to vector<32x32xf32>
    %298 = arith.subf %288, %297 : vector<32x32xf32>
    %299 = vector.broadcast %296 : vector<32x1xf32> to vector<32x32xf32>
    %300 = arith.subf %288, %299 : vector<32x32xf32>
    %301 = arith.mulf %298, %300 : vector<32x32xf32>
    %cst_97 = arith.constant dense<0.000000e+00> : vector<32xf32>
    %302 = vector.multi_reduction <add>, %301, %cst_97 [1] : vector<32x32xf32> to vector<32xf32>
    %303 = vector.shape_cast %302 : vector<32xf32> to vector<32x1xf32>
    %cst_98 = arith.constant 3.200000e+01 : f32
    %304 = vector.broadcast %cst_98 : f32 to vector<32x1xf32>
    %305 = arith.divf %303, %304 : vector<32x1xf32>
    %306 = vector.broadcast %296 : vector<32x1xf32> to vector<32x32xf32>
    %307 = arith.subf %288, %306 : vector<32x32xf32>
    %cst_99 = arith.constant 9.99999974E-6 : f32
    %308 = vector.broadcast %cst_99 : f32 to vector<32x1xf32>
    %309 = arith.addf %305, %308 : vector<32x1xf32>
    %310 = math.rsqrt %309 : vector<32x1xf32>
    %311 = vector.broadcast %310 : vector<32x1xf32> to vector<32x32xf32>
    %312 = arith.mulf %307, %311 : vector<32x32xf32>
    %313 = vector.shape_cast %290 : vector<32xf32> to vector<1x32xf32>
    %314 = vector.broadcast %313 : vector<1x32xf32> to vector<32x32xf32>
    %315 = arith.mulf %312, %314 : vector<32x32xf32>
    %316 = vector.shape_cast %292 : vector<32xf32> to vector<1x32xf32>
    %317 = vector.broadcast %316 : vector<1x32xf32> to vector<32x32xf32>
    %318 = arith.addf %315, %317 : vector<32x32xf32>
    %c0_100 = arith.constant 0 : index
    %c0_101 = arith.constant 0 : index
    %319 = vector.load %arg6[%c0_100, %c0_101] : memref<32x32xf32, #tpu.memory_space<vmem>>, vector<32x32xf32>
    tpu.vector_store %arg6[%c0_100, %c0_101], %318 {strides = array<i32>} : memref<32x32xf32, #tpu.memory_space<vmem>>, vector<32x32xf32>,
    return
  }
}

</mosaic_0001>

<bundles_post_ra>
// kernel: teacher_forward.1
= control target key start
LH: loop header
LB: loop body
LE: loop exit
PB: predicated region body
PF: predicated region fallthrough
CT: control target
= control target key end

     0   :  { %s10467_s0 = inlined_call_operand.vmem [shape: bf16[32,64], index: 0, kind: input, shape index: {}]   ;;  %s10468_s1 = inlined_call_operand.vmem [shape: bf16[64,32], index: 1, kind: input, shape index: {}]   ;;  %s10469_s2 = inlined_call_operand.vmem [shape: bf16[2,32,256], index: 2, kind: input, shape index: {}]   ;;  %s10470_s3 = inlined_call_operand.vmem [shape: bf16[2,128,32], index: 3, kind: input, shape index: {}]   ;;  %s10471_s4 = inlined_call_operand.vmem [shape: f32[2,288], index: 4, kind: input, shape index: {}]   ;;  %s10472_s5 = inlined_call_operand.vmem [shape: f32[42,32], index: 5, kind: input, shape index: {}]   ;;  %s10473_s6 = inlined_call_operand.hbm [shape: f32[32,32], index: 6, kind: output, shape index: {}]  }
   0x1   :  { %v6720_v0 = vld [vmem:[%s10468_s1 + $0x18] sm:$0xff]  ;;  %v6719_v1 = vld [vmem:[%s10468_s1 + $0x10] sm:$0xff]  ;;  %v6718_v2 = vld [vmem:[%s10468_s1 + $0x8] sm:$0xff] }
   0x2   :  { %86 = vmatpush.bf16.msra.mxu0 %v6720_v0  ;;  %6749 = vmatpush.bf16.msra.mxu1 %v6720_v0 }
   0x6   :  { %87 = vmatpush.bf16.msra.mxu0 %v6719_v1  ;;  %6750 = vmatpush.bf16.msra.mxu1 %v6719_v1 }
   0x7   :  { %11 = vsyncpa [#allocation3], 0  ;;  %v6717_v3 = vld [vmem:[%s10468_s1] sm:$0xff]  ;;  %v6716_v5 = vld [vmem:[%s10467_s0 + $0x8] sm:$0xff]  ;;  %vm75_vm0 = vcmask 523264   ;;  %vm103_vm1 = vcmask 261120  }
   0x8   :  { %v6715_v4 = vld [vmem:[%s10467_s0] sm:$0xff]  ;;  %v39_v7 = vld [vmem:[%s10472_s5 + $0x10] sm:$0xff]  ;;  %v38_v14 = vld [vmem:[%s10472_s5 + $0x8] sm:$0xff]  ;;  %v7277_v22 = vmov 32.0   ;;  %s7278_s29 = smov 104   ;;  %s7279_s30 = smov 112  }
   0x9   :  { %v37_v6 = vld [vmem:[%s10472_s5] sm:$0xff]  ;;  %v40_v15 = vld [vmem:[%s10472_s5 + $0x18] sm:$0xff]  ;;  %7065 = vrcp.f32 %v7277_v22  ;;  %v6537_v49 = vld [vmem:[%s10469_s2 + $0x10] sm:$0xf]  ;;  %s7280_s7 = smov 120   ;;  %s7281_s8 = smov 96  }
   0xa   :  { %88 = vmatpush.bf16.msra.mxu0 %v6718_v2  ;;  %6751 = vmatpush.bf16.msra.mxu1 %v6718_v2  ;;  %v6722_v50 = vld [vmem:[%s10469_s2 + $0x14] sm:$0xf0]  ;;  %v6533_v53 = vld [vmem:[%s10469_s2] sm:$0xf]  ;;  %v6721_v54 = vld [vmem:[%s10469_s2 + $0x4] sm:$0xf0] }
   0xb   :  { %v6538_v51 = vor.u32 %v6722_v50, %v6537_v49  ;;  %v6534_v57 = vor.u32 %v6721_v54, %v6533_v53  ;;  %vm295_vm15 = vcmask 1047556   ;;  %s7284_s9 = smov 64   ;;  %s7285_s1 = smov 32  }
   0xc   :  { %s7286_s17 = smov 24   ;;  %s7287_s18 = smov 16  }
   0xd   :  { %s7288_s19 = smov 8   ;;  %s6493_s28 = sshll.u32 %s10473_s6, 4  ;;  %s6494_s28 = int_to_ptr.hbm [resolvable:$true] %s6493_s28 }
   0xe   :  { %89 = vmatpush.bf16.msra.mxu0 %v6717_v3  ;;  %6752 = vmatpush.bf16.msra.mxu1 %v6717_v3  ;;  %s7289_s10 = smov [#allocation2]  }
   0xf   :  { %v7066_v23 = vpop.eup %7065  ;;  %s6491_s11 = sshll.u32 %s7289_s10, 4  ;;  %s6492_s11 = int_to_ptr.vmem [resolvable:$true] %s6491_s11 }
  0x10   :  { %v117_v24 = vmul.f32 32.0, %v7066_v23  ;;  %vm121_vm2 = vweird.f32 %v7066_v23 }
  0x11   :  { %6529 = vmatmul.msk.bf16.vlgmr.msra.gmra.mxu0 %vm75_vm0, %v6715_v4  ;;  %6530 = vmatmul.msk.bf16.vlgmr.msra.gmra.mxu1 %vm75_vm0, %v6716_v5  ;;  %vm1769_vm0 = vcmask 64512  }
  0x12   :  { %v118_v25 = vsub.f32 1.0, %v117_v24  ;;  %241 = vmatpush.bf16.msrb.mxu1 %v6538_v51 }
  0x14   :  { %v119_v26 = vmul.f32 %v7066_v23, %v118_v25 }
  0x16   :  { %v120_v27 = vadd.f32 %v7066_v23, %v119_v26  ;;  %242 = vmatpush.bf16.msrb.mxu1 %v6534_v57 }
  0x18   :  { %v7372_v28 = vsel %vm121_vm2, %v7066_v23, %v120_v27  ;;  %v7047_v27 = vld [vmem:[%s10472_s5 + $0x20] ss:$0 sm:$0xff]  ;;  %vm2000_vm2 = vcmask 130048  }
  0x19   :  { %10501 = vst [vmem:[#allocation9_spill] sm:$0xff] %v7372_v28 }
  0x8e   :  { %v91_v8 = vpop.f32.mrf.mxu0  ;;  %v96_v9 = vpop.f32.mrf.mxu1 }
  0x8f   :  { %v7350_v10 = vadd.f32 %v91_v8, %v37_v6  ;;  %v7352_v11 = vadd.f32 %v96_v9, %v39_v7 }
  0x91   :  { %10497 = vst [vmem:[#allocation5_spill] sm:$0xff] %v7350_v10  ;;  %v110_v12 = vsel %vm103_vm1, %v7352_v11, 0.0  ;;  %v104_v13 = vsel %vm103_vm1, %v7350_v10, 0.0 }
  0x92   :  { %10498 = vst [vmem:[#allocation6_spill] sm:$0xff] %v7352_v11  ;;  %111 = vadd.xlane.f32.xlu1 %v110_v12  ;;  %105 = vadd.xlane.f32.xlu0 %v104_v13 }
  0x96   :  { %v93_v16 = vpop.f32.mrf.mxu0  ;;  %v98_v17 = vpop.f32.mrf.mxu1 }
  0x97   :  { %v7364_v18 = vadd.f32 %v93_v16, %v38_v14  ;;  %v7366_v19 = vadd.f32 %v98_v17, %v40_v15 }
  0x99   :  { %10499 = vst [vmem:[#allocation7_spill] sm:$0xff] %v7364_v18  ;;  %v113_v20 = vsel %vm103_vm1, %v7366_v19, 0.0  ;;  %v107_v21 = vsel %vm103_vm1, %v7364_v18, 0.0 }
  0x9a   :  { %10500 = vst [vmem:[#allocation8_spill] sm:$0xff] %v7366_v19  ;;  %114 = vadd.xlane.f32.xlu1 %v113_v20  ;;  %108 = vadd.xlane.f32.xlu0 %v107_v21 }
 0x105   :  { %v112_v29 = vpop.xlane.xlu1 %111  ;;  %v106_v30 = vpop.xlane.xlu0 %105 }
 0x106   :  { %v125_v31 = vmul.f32 %v7372_v28, %v112_v29  ;;  %v123_v32 = vmul.f32 %v7372_v28, %v106_v30 }
 0x108   :  { %v7377_v33 = vsub.f32 %v7352_v11, %v125_v31  ;;  %v7380_v34 = vsub.f32 %v7350_v10, %v123_v32 }
 0x10a   :  { %v133_v35 = vmul.f32 %v7377_v33, %v7377_v33  ;;  %v131_v36 = vmul.f32 %v7380_v34, %v7380_v34 }
 0x10c   :  { %v141_v37 = vsel %vm103_vm1, %v133_v35, 0.0  ;;  %v135_v38 = vsel %vm103_vm1, %v131_v36, 0.0 }
 0x10d   :  { %v115_v39 = vpop.xlane.xlu1 %114  ;;  %142 = vadd.xlane.f32.xlu0 %v141_v37  ;;  %136 = vadd.xlane.f32.xlu2 %v135_v38  ;;  %v109_v40 = vpop.xlane.xlu0 %108  ;;  %v7048_v37 = vld [vmem:[%s10472_s5 + $0x21] ss:$0 sm:$0xff] }
 0x10e   :  { %v126_v41 = vmul.f32 %v7372_v28, %v115_v39  ;;  %v124_v42 = vmul.f32 %v7372_v28, %v109_v40 }
 0x110   :  { %v7391_v43 = vsub.f32 %v7366_v19, %v126_v41  ;;  %v7394_v44 = vsub.f32 %v7364_v18, %v124_v42 }
 0x112   :  { %v134_v45 = vmul.f32 %v7391_v43, %v7391_v43  ;;  %v132_v46 = vmul.f32 %v7394_v44, %v7394_v44 }
 0x114   :  { %v144_v47 = vsel %vm103_vm1, %v134_v45, 0.0  ;;  %v138_v48 = vsel %vm103_vm1, %v132_v46, 0.0 }
 0x115   :  { %145 = vadd.xlane.f32.xlu1 %v144_v47  ;;  %139 = vadd.xlane.f32.xlu2 %v138_v48 }
 0x180   :  { %v137_v52 = vpop.xlane.xlu2 %136  ;;  %v143_v56 = vpop.xlane.xlu0 %142 }
 0x181   :  { %v147_v55 = vmul.f32 %v137_v52, %v7372_v28  ;;  %v149_v59 = vmul.f32 %v143_v56, %v7372_v28 }
 0x183   :  { %v151_v58 = vadd.f32 1e-05, %v147_v55  ;;  %v153_v60 = vadd.f32 1e-05, %v149_v59  ;;  %v7049_v55 = vld [vmem:[%s10471_s4] ss:$0 sm:$0xff] }
 0x185   :  { %7067 = vrsqrt.f32 %v151_v58  ;;  %vm161_vm4 = vweird.f32 %v151_v58  ;;  %vm181_vm13 = vweird.f32 %v153_v60 }
 0x186   :  { %7069 = vrsqrt.f32 %v153_v60 }
 0x188   :  { %v146_v61 = vpop.xlane.xlu1 %145  ;;  %v140_v62 = vpop.xlane.xlu2 %139 }
 0x189   :  { %v150_v63 = vmul.f32 %v146_v61, %v7372_v28  ;;  %v148_v0 = vmul.f32 %v140_v62, %v7372_v28 }
 0x18b   :  { %v7068_v1 = vpop.eup %7067  ;;  %v154_v2 = vadd.f32 1e-05, %v150_v63  ;;  %v152_v3 = vadd.f32 1e-05, %v148_v0 }
 0x18c   :  { %v156_v4 = vmul.f32 %v7068_v1, %v151_v58  ;;  %v7070_v7 = vpop.eup %7069  ;;  %vm162_vm3 = vweird.f32 %v7068_v1 }
 0x18d   :  { %7071 = vrsqrt.f32 %v154_v2  ;;  %v176_v15 = vmul.f32 %v7070_v7, %v153_v60  ;;  %vm163_vm5 = vmor %vm161_vm4, %vm162_vm3  ;;  %vm171_vm7 = vweird.f32 %v152_v3  ;;  %vm182_vm10 = vweird.f32 %v7070_v7 }
 0x18e   :  { %v157_v5 = vmul.f32 %v7068_v1, %v156_v4  ;;  %7073 = vrsqrt.f32 %v152_v3  ;;  %vm191_vm11 = vweird.f32 %v154_v2  ;;  %vm183_vm14 = vmor %vm181_vm13, %vm182_vm10  ;;  %v7282_v4 = vmov 1983009808  }
 0x18f   :  { %v177_v22 = vmul.f32 %v7070_v7, %v176_v15  ;;  %vm2913_vm3 = vcmask 195584  }
 0x190   :  { %v158_v6 = vmul.f32 0.5, %v157_v5  ;;  %v300_v5 = vunpack.c.l.s4 %v7282_v4 }
 0x191   :  { %v178_v29 = vmul.f32 0.5, %v177_v22 }
 0x192   :  { %v159_v8 = vsub.f32 1.5, %v158_v6 }
 0x193   :  { %v7072_v9 = vpop.eup %7071  ;;  %v179_v38 = vsub.f32 1.5, %v178_v29 }
 0x194   :  { %v7074_v12 = vpop.eup %7073  ;;  %v186_v13 = vmul.f32 %v7072_v9, %v154_v2  ;;  %v160_v14 = vmul.f32 %v7068_v1, %v159_v8  ;;  %vm192_vm9 = vweird.f32 %v7072_v9 }
 0x195   :  { %v166_v16 = vmul.f32 %v7074_v12, %v152_v3  ;;  %vm172_vm6 = vweird.f32 %v7074_v12  ;;  %v180_v42 = vmul.f32 %v7070_v7, %v179_v38  ;;  %vm193_vm12 = vmor %vm191_vm11, %vm192_vm9 }
 0x196   :  { %v187_v17 = vmul.f32 %v7072_v9, %v186_v13  ;;  %v164_v21 = vsel %vm163_vm5, %v7068_v1, %v160_v14  ;;  %vm173_vm8 = vmor %vm171_vm7, %vm172_vm6 }
 0x197   :  { %v167_v20 = vmul.f32 %v7074_v12, %v166_v16  ;;  %v195_v26 = vmul.f32 %v164_v21, %v7380_v34 }
 0x198   :  { %v188_v24 = vmul.f32 0.5, %v187_v17  ;;  %v7475_v17 = vunpack.c.0.s8 %v300_v5 }
 0x199   :  { %v168_v23 = vmul.f32 0.5, %v167_v20  ;;  %v200_v36 = vmul.f32 %v7047_v27, %v195_v26 }
 0x19a   :  { %v189_v31 = vsub.f32 1.5, %v188_v24 }
 0x19b   :  { %v169_v25 = vsub.f32 1.5, %v168_v23  ;;  %v205_v40 = vadd.f32 %v7048_v37, %v200_v36 }
 0x19c   :  { %v190_v34 = vmul.f32 %v7072_v9, %v189_v31 }
 0x19d   :  { %v170_v30 = vmul.f32 %v7074_v12, %v169_v25 }
 0x19e   :  { %v194_v46 = vsel %vm193_vm12, %v7072_v9, %v190_v34 }
 0x19f   :  { %v174_v32 = vsel %vm173_vm8, %v7074_v12, %v170_v30  ;;  %v198_v47 = vmul.f32 %v194_v46, %v7391_v43 }
 0x1a0   :  { %v196_v35 = vmul.f32 %v174_v32, %v7394_v44  ;;  %v184_v44 = vsel %vm183_vm14, %v7070_v7, %v180_v42  ;;  %v7283_v7 = vmov 1934713408  }
 0x1a1   :  { %v197_v48 = vmul.f32 %v184_v44, %v7377_v33  ;;  %v203_v49 = vmul.f32 %v7047_v27, %v198_v47  ;;  %v324_v8 = vunpack.c.l.s4 %v7283_v7 }
 0x1a2   :  { %v201_v39 = vmul.f32 %v7047_v27, %v196_v35 }
 0x1a3   :  { %v202_v50 = vmul.f32 %v7047_v27, %v197_v48  ;;  %v208_v51 = vadd.f32 %v7048_v37, %v203_v49  ;;  %v7479_v22 = vunpack.c.0.s8 %v324_v8 }
 0x1a4   :  { %v206_v41 = vadd.f32 %v7048_v37, %v201_v39 }
 0x1a5   :  { %v207_v52 = vadd.f32 %v7048_v37, %v202_v50 }
 0x1a6   :  { %v209_v45 = vpack.c.bf16 %v206_v41, %v205_v40 }
 0x1a7   :  { %v210_v53 = vpack.c.bf16 %v208_v51, %v207_v52 }
 0x1a8   :  { %6539 = vmatmul.msk.bf16.vlgmr.msrb.gmra.mxu1 %vm103_vm1, %v209_v45 }
 0x1b8   :  { %6540 = vmatmul.msk.bf16.gmra.mxu1 %vm103_vm1, %v210_v53 }
 0x225   :  { %v244_v54 = vpop.f32.mrf.mxu1 }
 0x226   :  { %v7433_v57 = vadd.f32 %v7049_v55, %v244_v54 }
 0x228   :  { %v297_v14 = vrot.slane %v7433_v57, 4 }
 0x22d   :  { %v246_v56 = vpop.f32.mrf.mxu1 }
 0x22e   :  { %v7435_v58 = vadd.f32 %v7049_v55, %v246_v56 }
 0x230   :  { %v7439_v33 = vpack.i.bf16 %v7435_v58, %v7433_v57  ;;  %v353_v15 = vrot.slane %v7435_v58, 4 }
 0x232   :  { %6778 = vrot.lane.b32.xlu1 %v7439_v33, %s7278_s29  ;;  %6773 = vrot.lane.b32.xlu0 %v7439_v33, %s7279_s30 }
 0x233   :  { %6768 = vrot.lane.b32.xlu2 %v7439_v33, %s7280_s7 }
 0x235   :  { %v249_v43 = vpop.f32.mrf.mxu1 }
 0x236   :  { %v7449_v60 = vadd.f32 %v7049_v55, %v249_v43 }
 0x238   :  { %v409_v13 = vrot.slane %v7449_v60, 4 }
 0x23b   :  { %6783 = vrot.lane.b32.xlu2 %v7439_v33, %s7281_s8 }
 0x23d   :  { %v251_v59 = vpop.f32.mrf.mxu1 }
 0x23e   :  { %v252_v61 = vadd.f32 %v7049_v55, %v251_v59 }
 0x240   :  { %v7452_v62 = vpack.i.bf16 %v252_v61, %v7449_v60  ;;  %v465_v12 = vrot.slane %v252_v61, 4 }
 0x242   :  { %6788 = vrot.lane.b32.xlu0 %v7452_v62, %s7280_s7 }
 0x243   :  { %6793 = vrot.lane.b32.xlu2 %v7452_v62, %s7279_s30 }
 0x24b   :  { %6808 = vrot.lane.b32.xlu2 %v7452_v62, %s7278_s29 }
 0x28d   :  { %v7460_v63 = vpop.permute.xlu2 %6768 }
 0x28e   :  { %v6771_v0 = vunpack.i.h.bf16 %v7460_v63  ;;  %v6770_v1 = vunpack.i.l.bf16 %v7460_v63  ;;  %6798 = vrot.lane.b32.xlu1 %v7460_v63, %s7281_s8 }
 0x290   :  { %v365_v16 = vrot.slane %v6771_v0, 4  ;;  %v309_v24 = vrot.slane %v6770_v1, 4 }
 0x295   :  { %v7466_v2 = vpop.permute.xlu2 %6783 }
 0x29d   :  { %v7468_v3 = vpop.permute.xlu2 %6793 }
 0x29e   :  { %10502 = vst [vmem:[#allocation10_spill] sm:$0xff] %v7468_v3  ;;  %v6796_v6 = vunpack.i.h.bf16 %v7468_v3  ;;  %v6795_v9 = vunpack.i.l.bf16 %v7468_v3 }
 0x2a0   :  { %v463_v20 = vrot.slane %v6796_v6, 4  ;;  %v466_v25 = vsel %vm295_vm15, %v6796_v6, %v465_v12  ;;  %v407_v29 = vrot.slane %v6795_v9, 4  ;;  %v410_v30 = vsel %vm295_vm15, %v6795_v9, %v409_v13 }
 0x2a1   :  { %v7493_v34 = vperm.slane %v466_v25, %v7475_v17  ;;  %v7524_v13 = vperm.slane %v410_v30, %v7475_v17 }
 0x2a2   :  { %v464_v39 = vsel %vm295_vm15, %v463_v20, %v252_v61 }
 0x2a3   :  { %v445_v30 = vrot.slane %v7524_v13, 4 }
 0x2a4   :  { %v7477_v21 = vpop.permute.xlu1 %6778  ;;  %v7481_v23 = vpop.permute.xlu0 %6773 }
 0x2a5   :  { %v6781_v26 = vunpack.i.h.bf16 %v7477_v21  ;;  %v6780_v27 = vunpack.i.l.bf16 %v7477_v21  ;;  %v6776_v31 = vunpack.i.h.bf16 %v7481_v23  ;;  %v6775_v32 = vunpack.i.l.bf16 %v7481_v23  ;;  %v7508_v61 = vpop.permute.xlu2 %6808  ;;  %6813 = vrot.lane.b32.xlu1 %v7477_v21, %s7281_s8  ;;  %6803 = vrot.lane.b32.xlu0 %v7481_v23, %s7281_s8 }
 0x2a6   :  { %10503 = vst [vmem:[#allocation11_spill] sm:$0xff] %v7508_v61 }
 0x2a7   :  { %v363_v35 = vrot.slane %v6781_v26, 4  ;;  %v307_v36 = vrot.slane %v6780_v27, 4  ;;  %v310_v37 = vsel %vm295_vm15, %v6780_v27, %v309_v24  ;;  %v366_v38 = vsel %vm295_vm15, %v6781_v26, %v365_v16 }
 0x2a8   :  { %v318_v40 = vperm.slane %v310_v37, %v7475_v17  ;;  %v374_v41 = vperm.slane %v366_v38, %v7475_v17  ;;  %v351_v46 = vrot.slane %v6776_v31, 4  ;;  %v354_v44 = vsel %vm295_vm15, %v6776_v31, %v353_v15 }
 0x2a9   :  { %v308_v42 = vsel %vm295_vm15, %v307_v36, %v6770_v1  ;;  %v364_v45 = vsel %vm295_vm15, %v363_v35, %v6771_v0  ;;  %v362_v52 = vperm.slane %v354_v44, %v7475_v17  ;;  %v294_v53 = vrot.slane %v6775_v32, 4 }
 0x2aa   :  { %v314_v47 = vperm.slane %v308_v42, %v7475_v17  ;;  %v331_v48 = vrot.slane %v318_v40, 4  ;;  %v370_v49 = vperm.slane %v364_v45, %v7475_v17  ;;  %v387_v50 = vrot.slane %v374_v41, 4 }
 0x2ab   :  { %v352_v51 = vsel %vm295_vm15, %v351_v46, %v7435_v58  ;;  %v298_v54 = vsel %vm295_vm15, %v6775_v32, %v297_v14  ;;  %v389_v1 = vrot.slane %v362_v52, 4  ;;  %v296_v4 = vsel %vm295_vm15, %v294_v53, %v7433_v57 }
 0x2ac   :  { %v319_v55 = vrot.slane %v314_v47, 4  ;;  %v375_v56 = vrot.slane %v370_v49, 4  ;;  %v358_v43 = vperm.slane %v352_v51, %v7475_v17  ;;  %v306_v59 = vperm.slane %v298_v54, %v7475_v17 }
 0x2ad   :  { %v388_v0 = vsel %vm295_vm15, %v387_v50, %v362_v52  ;;  %v408_v58 = vsel %vm295_vm15, %v407_v29, %v7449_v60  ;;  %v302_v7 = vperm.slane %v296_v4, %v7475_v17  ;;  %v390_v8 = vsel %vm295_vm15, %v374_v41, %v389_v1  ;;  %6828 = vrot.lane.b32.xlu1 %v7468_v3, %s7281_s8 }
 0x2ae   :  { %v7516_v5 = vsel %vm295_vm15, %v375_v56, %v358_v43  ;;  %v377_v6 = vrot.slane %v358_v43, 4  ;;  %v332_v9 = vsel %vm295_vm15, %v331_v48, %v306_v59  ;;  %v333_v12 = vrot.slane %v306_v59, 4  ;;  %6818 = vrot.lane.b32.xlu0 %v7452_v62, %s7281_s8 }
 0x2af   :  { %v6811_v57 = vunpack.i.h.bf16 %v7508_v61  ;;  %v7531_v14 = vsel %vm295_vm15, %v319_v55, %v302_v7  ;;  %v6810_v15 = vunpack.i.l.bf16 %v7508_v61  ;;  %v321_v16 = vrot.slane %v302_v7, 4 }
 0x2b0   :  { %v7528_v60 = vsel %vm295_vm15, %v370_v49, %v377_v6  ;;  %v7535_v20 = vsel %vm295_vm15, %v318_v40, %v333_v12  ;;  %v470_v24 = vperm.slane %v464_v39, %v7475_v17  ;;  %v414_v25 = vperm.slane %v408_v58, %v7475_v17 }
 0x2b1   :  { %v7542_v26 = vperm.slane %v388_v0, %v7479_v22  ;;  %v7545_v27 = vsel %vm295_vm15, %v314_v47, %v321_v16  ;;  %v501_v29 = vrot.slane %v7493_v34, 4  ;;  %v475_v31 = vrot.slane %v6811_v57, 4 }
 0x2b2   :  { %v419_v35 = vrot.slane %v6810_v15, 4  ;;  %v398_v36 = vperm.slane %v390_v8, %v7479_v22  ;;  %v489_v39 = vrot.slane %v470_v24, 4  ;;  %v433_v40 = vrot.slane %v414_v25, 4 }
 0x2b3   :  { %v403_v41 = vrot.slane %v7542_v26, 4  ;;  %v7556_v42 = vperm.slane %v332_v9, %v7479_v22  ;;  %v342_v51 = vperm.slane %v7535_v20, %v7479_v22 }
 0x2b4   :  { %v7549_v32 = vpop.permute.xlu0 %6788  ;;  %v7564_v50 = vrot.slane %v398_v36, 4 }
 0x2b5   :  { %10504 = vst [vmem:[#allocation12_spill] sm:$0xff] %v7549_v32  ;;  %v6791_v37 = vunpack.i.h.bf16 %v7549_v32  ;;  %v6790_v38 = vunpack.i.l.bf16 %v7549_v32  ;;  %6823 = vrot.lane.b32.xlu2 %v7549_v32, %s7281_s8  ;;  %6838 = vrot.lane.b32.xlu1 %v7439_v33, %s7284_s9 }
 0x2b6   :  { %6833 = vrot.lane.b32.xlu0 %v7508_v61, %s7281_s8 }
 0x2b7   :  { %v476_v45 = vsel %vm295_vm15, %v475_v31, %v6791_v37  ;;  %v477_v46 = vrot.slane %v6791_v37, 4  ;;  %v420_v44 = vsel %vm295_vm15, %v419_v35, %v6790_v38  ;;  %v421_v48 = vrot.slane %v6790_v38, 4 }
 0x2b8   :  { %v482_v47 = vperm.slane %v476_v45, %v7475_v17  ;;  %v426_v49 = vperm.slane %v420_v44, %v7475_v17 }
 0x2b9   :  { %v478_v52 = vsel %vm295_vm15, %v6811_v57, %v477_v46  ;;  %v422_v56 = vsel %vm295_vm15, %v6810_v15, %v421_v48  ;;  %v404_v48 = vsel %vm295_vm15, 0.0, %v403_v41 }
 0x2ba   :  { %v486_v53 = vperm.slane %v478_v52, %v7475_v17  ;;  %v487_v54 = vrot.slane %v482_v47, 4  ;;  %v490_v55 = vsel %vm295_vm15, %v482_v47, %v489_v39  ;;  %v430_v59 = vperm.slane %v422_v56, %v7475_v17 }
 0x2bb   :  { %v498_v43 = vperm.slane %v490_v55, %v7479_v22  ;;  %v431_v0 = vrot.slane %v426_v49, 4  ;;  %v434_v1 = vsel %vm295_vm15, %v426_v49, %v433_v40  ;;  %v347_v39 = vrot.slane %v7556_v42, 4 }
 0x2bc   :  { %v488_v4 = vsel %vm295_vm15, %v487_v54, %v470_v24  ;;  %v499_v58 = vrot.slane %v486_v53, 4  ;;  %v502_v6 = vsel %vm295_vm15, %v486_v53, %v501_v29  ;;  %v442_v7 = vperm.slane %v434_v1, %v7479_v22 }
 0x2bd   :  { %v494_v8 = vperm.slane %v488_v4, %v7479_v22  ;;  %v510_v9 = vperm.slane %v502_v6, %v7479_v22  ;;  %v513_v12 = vrot.slane %v498_v43, 4  ;;  %v432_v57 = vsel %vm295_vm15, %v431_v0, %v414_v25  ;;  %6848 = vrot.lane.b32.xlu2 %v7481_v23, %s7284_s9 }
 0x2be   :  { %v500_v15 = vsel %vm295_vm15, %v499_v58, %v7493_v34  ;;  %v438_v16 = vperm.slane %v432_v57, %v7479_v22  ;;  %v443_v20 = vrot.slane %v430_v59, 4  ;;  %v446_v24 = vsel %vm295_vm15, %v430_v59, %v445_v30  ;;  %6843 = vrot.lane.b32.xlu0 %v7460_v63, %s7284_s9 }
 0x2bf   :  { %v506_v31 = vperm.slane %v500_v15, %v7479_v22  ;;  %v511_v29 = vrot.slane %v494_v8, 4  ;;  %v514_v35 = vsel %vm295_vm15, 0.0, %v513_v12  ;;  %v517_v36 = vrot.slane %v510_v9, 4 }
 0x2c0   :  { %v681_v25 = vsel %vm295_vm15, %v513_v12, %v494_v8  ;;  %v686_v37 = vrot.slane %v514_v35, 4  ;;  %v444_v34 = vsel %vm295_vm15, %v443_v20, %v7524_v13  ;;  %v454_v38 = vperm.slane %v446_v24, %v7479_v22 }
 0x2c1   :  { %v512_v30 = vsel %vm295_vm15, 0.0, %v511_v29  ;;  %v349_v40 = vrot.slane %v342_v51, 4  ;;  %v7603_v33 = vsel %vm295_vm15, %v517_v36, %v506_v31  ;;  %v406_v13 = vsel %vm295_vm15, 0.0, %v7564_v50 }
 0x2c2   :  { %v687_v45 = vsel %vm295_vm15, %v686_v37, %v512_v30  ;;  %v450_v46 = vperm.slane %v444_v34, %v7479_v22  ;;  %v455_v44 = vrot.slane %v438_v16, 4  ;;  %v457_v47 = vrot.slane %v442_v7, 4 }
 0x2c3   :  { %v461_v49 = vrot.slane %v454_v38, 4  ;;  %v589_v54 = vrot.slane %v406_v13, 4  ;;  %v350_v55 = vsel %vm295_vm15, 0.0, %v349_v40  ;;  %v7616_v23 = vsel %vm295_vm15, 0.0, %v517_v36 }
 0x2c4   :  { %v456_v51 = vsel %vm295_vm15, 0.0, %v455_v44  ;;  %v458_v52 = vsel %vm295_vm15, 0.0, %v457_v47  ;;  %v627_v53 = vsel %vm295_vm15, %v457_v47, %v438_v16  ;;  %v348_v43 = vsel %vm295_vm15, 0.0, %v347_v39 }
 0x2c5   :  { %v632_v56 = vrot.slane %v458_v52, 4  ;;  %v515_v59 = vrot.slane %v506_v31, 4  ;;  %v7620_v0 = vsel %vm295_vm15, %v461_v49, %v450_v46  ;;  %v326_v1 = vperm.slane %v7531_v14, %v7479_v22 }
 0x2c6   :  { %v330_v4 = vperm.slane %v7545_v27, %v7479_v22  ;;  %v382_v58 = vperm.slane %v7516_v5, %v7479_v22  ;;  %v535_v6 = vrot.slane %v350_v55, 4  ;;  %v7632_v7 = vperm.slane %v681_v25, %v7475_v17  ;;  %6853 = vrot.lane.b32.xlu0 %v7477_v21, %s7284_s9 }
 0x2c7   :  { %v7623_v41 = vsel %vm295_vm15, %v632_v56, %v456_v51  ;;  %v697_v8 = vrot.slane %v7616_v23, 4  ;;  %v386_v9 = vperm.slane %v7528_v60, %v7479_v22  ;;  %v343_v12 = vrot.slane %v326_v1, 4 }
 0x2c8   :  { %v345_v14 = vrot.slane %v330_v4, 4  ;;  %v399_v57 = vrot.slane %v382_v58, 4  ;;  %v530_v27 = vsel %vm295_vm15, %v349_v40, %v7556_v42  ;;  %v7642_v5 = vsel %vm295_vm15, 0.0, %v515_v59 }
 0x2c9   :  { %v7645_v15 = vperm.slane %v687_v45, %v7475_v17  ;;  %v401_v16 = vrot.slane %v386_v9, 4  ;;  %v584_v63 = vsel %vm295_vm15, %v7564_v50, %v7542_v26  ;;  %v459_v20 = vrot.slane %v450_v46, 4 }
 0x2ca   :  { %v346_v60 = vsel %vm295_vm15, 0.0, %v345_v14  ;;  %v519_v24 = vsel %vm295_vm15, %v345_v14, %v326_v1  ;;  %v534_v31 = vperm.slane %v530_v27, %v7475_v17  ;;  %v344_v42 = vsel %vm295_vm15, 0.0, %v343_v12 }
 0x2cb   :  { %v402_v29 = vsel %vm295_vm15, 0.0, %v401_v16  ;;  %v524_v35 = vrot.slane %v346_v60, 4  ;;  %v536_v36 = vsel %vm295_vm15, %v535_v6, %v348_v43  ;;  %v400_v25 = vsel %vm295_vm15, 0.0, %v399_v57 }
 0x2cc   :  { %v540_v37 = vperm.slane %v536_v36, %v7475_v17  ;;  %v573_v26 = vsel %vm295_vm15, %v401_v16, %v382_v58  ;;  %v578_v50 = vrot.slane %v402_v29, 4  ;;  %v523_v34 = vperm.slane %v519_v24, %v7475_v17 }
 0x2cd   :  { %v525_v38 = vsel %vm295_vm15, %v524_v35, %v344_v42  ;;  %v577_v30 = vperm.slane %v573_v26, %v7475_v17  ;;  %v588_v39 = vperm.slane %v584_v63, %v7475_v17  ;;  %v590_v46 = vsel %vm295_vm15, %v589_v54, %v404_v48 }
 0x2ce   :  { %v529_v40 = vperm.slane %v525_v38, %v7475_v17  ;;  %v553_v45 = vrot.slane %v540_v37, 4  ;;  %v579_v13 = vsel %vm295_vm15, %v578_v50, %v400_v25  ;;  %v7667_v44 = vsel %vm295_vm15, 0.0, %v459_v20  ;;  %6858 = vrot.lane.b32.xlu0 %v7452_v62, %s7284_s9 }
 0x2cf   :  { %v7670_v47 = vsel %vm295_vm15, 0.0, %v461_v49  ;;  %v583_v51 = vperm.slane %v579_v13, %v7475_v17  ;;  %v594_v52 = vperm.slane %v590_v46, %v7475_v17  ;;  %v555_v43 = vrot.slane %v534_v31, 4 }
 0x2d0   :  { %v541_v55 = vrot.slane %v529_v40, 4  ;;  %v554_v56 = vsel %vm295_vm15, %v553_v45, %v534_v31  ;;  %v609_v59 = vrot.slane %v588_v39, 4  ;;  %v543_v1 = vrot.slane %v523_v34, 4 }
 0x2d1   :  { %v560_v48 = vperm.slane %v554_v56, %v7479_v22  ;;  %v595_v54 = vrot.slane %v583_v51, 4  ;;  %v607_v4 = vrot.slane %v594_v52, 4  ;;  %v7679_v49 = vperm.slane %v627_v53, %v7475_v17 }
 0x2d2   :  { %v643_v58 = vrot.slane %v7670_v47, 4  ;;  %v542_v21 = vsel %vm295_vm15, %v541_v55, %v523_v34  ;;  %v597_v6 = vrot.slane %v577_v30, 4  ;;  %v556_v63 = vsel %vm295_vm15, %v540_v37, %v555_v43 }
 0x2d3   :  { %v548_v9 = vperm.slane %v542_v21, %v7479_v22  ;;  %v565_v12 = vrot.slane %v560_v48, 4  ;;  %v596_v14 = vsel %vm295_vm15, %v595_v54, %v577_v30  ;;  %v608_v57 = vsel %vm295_vm15, %v607_v4, %v588_v39 }
 0x2d4   :  { %v602_v27 = vperm.slane %v596_v14, %v7479_v22  ;;  %v614_v16 = vperm.slane %v608_v57, %v7479_v22  ;;  %v610_v53 = vsel %vm295_vm15, %v594_v52, %v609_v59  ;;  %v544_v24 = vsel %vm295_vm15, %v529_v40, %v543_v1 }
 0x2d5   :  { %v566_v20 = vsel %vm295_vm15, %v565_v12, %v548_v9  ;;  %v567_v60 = vrot.slane %v548_v9, 4  ;;  %v564_v31 = vperm.slane %v556_v63, %v7479_v22  ;;  %v552_v36 = vperm.slane %v544_v24, %v7479_v22 }
 0x2d6   :  { %v619_v42 = vrot.slane %v614_v16, 4  ;;  %v735_v29 = vpack.c.bf16 %v566_v20, %v566_v20  ;;  %v621_v35 = vrot.slane %v602_v27, 4  ;;  %v598_v26 = vsel %vm295_vm15, %v583_v51, %v597_v6 }
 0x2d7   :  { %v568_v25 = vsel %vm295_vm15, %v560_v48, %v567_v60  ;;  %v569_v37 = vrot.slane %v564_v31, 4  ;;  %v618_v50 = vperm.slane %v610_v53, %v7479_v22  ;;  %v606_v62 = vperm.slane %v598_v26, %v7479_v22 }
 0x2d8   :  { %v620_v34 = vsel %vm295_vm15, %v619_v42, %v602_v27  ;;  %v7700_v38 = vunpack.c.l.b16 %v735_v29  ;;  %v622_v30 = vsel %vm295_vm15, %v614_v16, %v621_v35  ;;  %v737_v39 = vpack.c.bf16 %v568_v25, %v568_v25 }
 0x2d9   :  { %v736_v40 = vpack.c.bf16 %v620_v34, %v620_v34  ;;  %v738_v45 = vpack.c.bf16 %v622_v30, %v622_v30  ;;  %v570_v13 = vsel %vm295_vm15, %v569_v37, %v552_v36  ;;  %v623_v47 = vrot.slane %v618_v50, 4 }
 0x2da   :  { %v7705_v46 = vunpack.c.l.b16 %v737_v39  ;;  %v739_v52 = vpack.c.bf16 %v570_v13, %v570_v13  ;;  %v571_v51 = vrot.slane %v552_v36, 4  ;;  %v625_v43 = vrot.slane %v606_v62, 4 }
 0x2db   :  { %v7707_v55 = vunpack.c.l.b16 %v736_v40  ;;  %v7709_v56 = vunpack.c.l.b16 %v738_v45  ;;  %v637_v59 = vperm.slane %v7623_v41, %v7475_v17  ;;  %v624_v1 = vsel %vm295_vm15, %v623_v47, %v606_v62 }
 0x2dc   :  { %v7714_v48 = vunpack.c.l.b16 %v739_v52  ;;  %v572_v54 = vsel %vm295_vm15, %v564_v31, %v571_v51  ;;  %v740_v6 = vpack.c.bf16 %v624_v1, %v624_v1  ;;  %v626_v9 = vsel %vm295_vm15, %v618_v50, %v625_v43 }
 0x2dd   :  { %v642_v12 = vperm.slane %v7620_v0, %v7475_v17  ;;  %v696_v41 = vperm.slane %v7603_v33, %v7475_v17  ;;  %v651_v14 = vrot.slane %v7679_v49, 4  ;;  %v705_v57 = vrot.slane %v7632_v7, 4 }
 0x2de   :  { %v7728_v27 = vunpack.c.l.b16 %v740_v6  ;;  %v741_v16 = vpack.c.bf16 %v572_v54, %v572_v54  ;;  %v742_v63 = vpack.c.bf16 %v626_v9, %v626_v9  ;;  %v644_v53 = vsel %vm295_vm15, %v643_v58, %v7667_v44 }
 0x2df   :  { %v698_v20 = vsel %vm295_vm15, %v697_v8, %v7642_v5  ;;  %v663_v0 = vrot.slane %v642_v12, 4  ;;  %v717_v60 = vrot.slane %v696_v41, 4  ;;  %v648_v33 = vperm.slane %v644_v53, %v7475_v17 }
 0x2e0   :  { %v649_v24 = vrot.slane %v637_v59, 4  ;;  %v702_v31 = vperm.slane %v698_v20, %v7475_v17  ;;  %v703_v42 = vrot.slane %v7645_v15, 4  ;;  %v652_v29 = vsel %vm295_vm15, %v637_v59, %v651_v14 }
 0x2e1   :  { %v706_v35 = vsel %vm295_vm15, %v7645_v15, %v705_v57  ;;  %v7744_v23 = vunpack.c.l.b16 %v741_v16  ;;  %v661_v5 = vrot.slane %v648_v33, 4  ;;  %v660_v26 = vperm.slane %v652_v29, %v7479_v22 }
 0x2e2   :  { %v650_v8 = vsel %vm295_vm15, %v649_v24, %v7679_v49  ;;  %v704_v58 = vsel %vm295_vm15, %v703_v42, %v7632_v7  ;;  %v715_v36 = vrot.slane %v702_v31, 4  ;;  %v664_v15 = vsel %vm295_vm15, %v648_v33, %v663_v0 }
 0x2e3   :  { %v656_v25 = vperm.slane %v650_v8, %v7479_v22  ;;  %v710_v37 = vperm.slane %v704_v58, %v7479_v22  ;;  %v662_v50 = vsel %vm295_vm15, %v661_v5, %v642_v12  ;;  %v672_v30 = vperm.slane %v664_v15, %v7479_v22 }
 0x2e4   :  { %v716_v34 = vsel %vm295_vm15, %v715_v36, %v696_v41  ;;  %v714_v49 = vperm.slane %v706_v35, %v7479_v22  ;;  %v668_v39 = vperm.slane %v662_v50, %v7479_v22  ;;  %v679_v40 = vrot.slane %v660_v26, 4 }
 0x2e5   :  { %v722_v7 = vperm.slane %v716_v34, %v7479_v22  ;;  %v718_v45 = vsel %vm295_vm15, %v702_v31, %v717_v60  ;;  %v677_v13 = vrot.slane %v672_v30, 4  ;;  %v7762_v52 = vunpack.c.l.b16 %v742_v63 }
 0x2e6   :  { %v726_v62 = vperm.slane %v718_v45, %v7479_v22  ;;  %v733_v47 = vrot.slane %v714_v49, 4  ;;  %v673_v51 = vrot.slane %v668_v39, 4  ;;  %v680_v59 = vsel %vm295_vm15, %v672_v30, %v679_v40 }
 0x2e7   :  { %v727_v43 = vrot.slane %v722_v7, 4  ;;  %v675_v1 = vrot.slane %v656_v25, 4  ;;  %v749_v9 = vpack.c.bf16 %v680_v59, %v680_v59  ;;  %v729_v0 = vrot.slane %v710_v37, 4 }
 0x2e8   :  { %v731_v54 = vrot.slane %v726_v62, 4  ;;  %v734_v6 = vsel %vm295_vm15, %v726_v62, %v733_v47  ;;  %v674_v41 = vsel %vm295_vm15, %v673_v51, %v656_v25  ;;  %v678_v24 = vsel %vm295_vm15, %v677_v13, %v660_v26 }
 0x2e9   :  { %v728_v14 = vsel %vm295_vm15, %v727_v43, %v710_v37  ;;  %v750_v57 = vpack.c.bf16 %v734_v6, %v734_v6  ;;  %v676_v16 = vsel %vm295_vm15, %v668_v39, %v675_v1  ;;  %v743_v63 = vpack.c.bf16 %v674_v41, %v674_v41 }
 0x2ea   :  { %v744_v53 = vpack.c.bf16 %v728_v14, %v728_v14  ;;  %v7771_v20 = vunpack.c.l.b16 %v749_v9  ;;  %v745_v33 = vpack.c.bf16 %v676_v16, %v676_v16  ;;  %v732_v31 = vsel %vm295_vm15, %v731_v54, %v714_v49 }
 0x2eb   :  { %v7773_v60 = vunpack.c.l.b16 %v750_v57  ;;  %v7777_v42 = vunpack.c.l.b16 %v743_v63  ;;  %v730_v35 = vsel %vm295_vm15, %v722_v7, %v729_v0  ;;  %v747_v8 = vpack.c.bf16 %v678_v24, %v678_v24 }
 0x2ec   :  { %v7779_v29 = vunpack.c.l.b16 %v744_v53  ;;  %v746_v58 = vpack.c.bf16 %v730_v35, %v730_v35  ;;  %v7784_v36 = vunpack.c.l.b16 %v745_v33  ;;  %v748_v25 = vpack.c.bf16 %v732_v31, %v732_v31 }
 0x2ed   :  { %v7788_v26 = vunpack.c.l.b16 %v747_v8  ;;  %v6786_v45 = vunpack.i.h.bf16 %v7466_v2  ;;  %v6785_v13 = vunpack.i.l.bf16 %v7466_v2 }
 0x2ee   :  { %10505 = vst [vmem:[#allocation13_spill] sm:$0xff] %v7784_v36  ;;  %v7790_v15 = vunpack.c.l.b16 %v746_v58  ;;  %v7792_v50 = vunpack.c.l.b16 %v748_v25 }
 0x2ef   :  { %10506 = vst [vmem:[#allocation14_spill] sm:$0xff] %v7788_v26  ;;  %v857_v54 = vrot.slane %v6786_v45, 4  ;;  %v801_v6 = vrot.slane %v6785_v13, 4 }
 0x2f0   :  { %10507 = vst [vmem:[#allocation15_spill] sm:$0xff] %v7790_v15 }
 0x2f1   :  { %10508 = vst [vmem:[#allocation16_spill] sm:$0xff] %v7792_v50 }
 0x300   :  { %v6799_v49 = vpop.permute.xlu1 %6798 }
 0x301   :  { %v6801_v7 = vunpack.i.h.bf16 %v6799_v49  ;;  %v6800_v40 = vunpack.i.l.bf16 %v6799_v49 }
 0x303   :  { %v869_v62 = vrot.slane %v6801_v7, 4  ;;  %v813_v51 = vrot.slane %v6800_v40, 4 }
 0x30f   :  { %v7798_v39 = vpop.permute.xlu2 %6823 }
 0x310   :  { %v10475_v43 = vunpack.i.h.bf16 %v7798_v39  ;;  %v10474_v9 = vunpack.i.l.bf16 %v7798_v39 }
 0x312   :  { %v7812_v31 = vrot.slane %v10475_v43, 4 }
 0x317   :  { %v6814_v47 = vpop.permute.xlu1 %6813  ;;  %v7804_v41 = vpop.permute.xlu2 %6848 }
 0x318   :  { %v6816_v59 = vunpack.i.h.bf16 %v6814_v47  ;;  %v6815_v1 = vunpack.i.l.bf16 %v6814_v47  ;;  %v6804_v14 = vpop.permute.xlu0 %6803  ;;  %v10477_v58 = vunpack.i.h.bf16 %v7804_v41 }
 0x319   :  { %v6806_v33 = vunpack.i.h.bf16 %v6804_v14  ;;  %v6805_v24 = vunpack.i.l.bf16 %v6804_v14 }
 0x31a   :  { %v867_v57 = vrot.slane %v6816_v59, 4  ;;  %v811_v16 = vrot.slane %v6815_v1, 4  ;;  %v814_v63 = vsel %vm295_vm15, %v6815_v1, %v813_v51  ;;  %v870_v2 = vsel %vm295_vm15, %v6816_v59, %v869_v62 }
 0x31b   :  { %v822_v53 = vperm.slane %v814_v63, %v7475_v17  ;;  %v878_v0 = vperm.slane %v870_v2, %v7475_v17  ;;  %v855_v51 = vrot.slane %v6806_v33, 4  ;;  %v858_v59 = vsel %vm295_vm15, %v6806_v33, %v857_v54 }
 0x31c   :  { %v812_v35 = vsel %vm295_vm15, %v811_v16, %v6800_v40  ;;  %v868_v8 = vsel %vm295_vm15, %v867_v57, %v6801_v7  ;;  %v799_v1 = vrot.slane %v6805_v24, 4  ;;  %v802_v14 = vsel %vm295_vm15, %v6805_v24, %v801_v6 }
 0x31d   :  { %v818_v25 = vperm.slane %v812_v35, %v7475_v17  ;;  %v835_v49 = vrot.slane %v822_v53, 4  ;;  %v874_v62 = vperm.slane %v868_v8, %v7475_v17  ;;  %v891_v47 = vrot.slane %v878_v0, 4 }
 0x31e   :  { %v7823_v63 = vrot.slane %v10474_v9, 4  ;;  %v866_v7 = vperm.slane %v858_v59, %v7475_v17  ;;  %v810_v57 = vperm.slane %v802_v14, %v7475_v17  ;;  %v10476_v35 = vunpack.i.l.bf16 %v7804_v41 }
 0x31f   :  { %v879_v40 = vrot.slane %v874_v62, 4  ;;  %v7827_v16 = vpop.permute.xlu1 %6828  ;;  %v823_v2 = vrot.slane %v818_v25, 4  ;;  %v856_v8 = vsel %vm295_vm15, %v855_v51, %v6786_v45  ;;  %v800_v54 = vsel %vm295_vm15, %v799_v1, %v6785_v13 }
 0x320   :  { %v862_v6 = vperm.slane %v856_v8, %v7475_v17  ;;  %v892_v33 = vsel %vm295_vm15, %v891_v47, %v866_v7  ;;  %v893_v24 = vrot.slane %v866_v7, 4  ;;  %v806_v34 = vperm.slane %v800_v54, %v7475_v17  ;;  %v6819_v30 = vpop.permute.xlu0 %6818 }
 0x321   :  { %v1359_v59 = vrot.slane %v10477_v58, 4  ;;  %v836_v14 = vsel %vm295_vm15, %v835_v49, %v810_v57  ;;  %v837_v37 = vrot.slane %v810_v57, 4  ;;  %v6831_v5 = vunpack.i.h.bf16 %v7827_v16 }
 0x322   :  { %v880_v45 = vsel %vm295_vm15, %v879_v40, %v862_v6  ;;  %v881_v51 = vrot.slane %v862_v6, 4  ;;  %v894_v13 = vsel %vm295_vm15, %v878_v0, %v893_v24  ;;  %v7842_v1 = vperm.slane %v892_v33, %v7479_v22 }
 0x323   :  { %v902_v47 = vperm.slane %v894_v13, %v7479_v22  ;;  %v824_v7 = vsel %vm295_vm15, %v823_v2, %v806_v34  ;;  %v825_v8 = vrot.slane %v806_v34, 4  ;;  %v6830_v54 = vunpack.i.l.bf16 %v7827_v16 }
 0x324   :  { %v882_v49 = vsel %vm295_vm15, %v874_v62, %v881_v51  ;;  %v7849_v57 = vperm.slane %v880_v45, %v7479_v22  ;;  %v838_v40 = vsel %vm295_vm15, %v822_v53, %v837_v37  ;;  %v7853_v6 = vperm.slane %v836_v14, %v7479_v22 }
 0x325   :  { %v1303_v0 = vrot.slane %v10476_v35, 4  ;;  %v890_v33 = vperm.slane %v882_v49, %v7479_v22  ;;  %v7858_v24 = vrot.slane %v902_v47, 4  ;;  %v967_v34 = vrot.slane %v6831_v5, 4 }
 0x326   :  { %v907_v16 = vrot.slane %v7842_v1, 4  ;;  %v826_v62 = vsel %vm295_vm15, %v818_v25, %v825_v8  ;;  %v7863_v2 = vperm.slane %v824_v7, %v7479_v22  ;;  %v846_v37 = vperm.slane %v838_v40, %v7479_v22 }
 0x327   :  { %v6839_v53 = vpop.permute.xlu1 %6838  ;;  %v7866_v14 = vrot.slane %v890_v33, 4  ;;  %v834_v45 = vperm.slane %v826_v62, %v7479_v22  ;;  %v851_v51 = vrot.slane %v7853_v6, 4  ;;  %v911_v13 = vrot.slane %v6830_v54, 4 }
 0x328   :  { %v7873_v49 = vsel %vm295_vm15, 0.0, %v7858_v24  ;;  %v7875_v25 = vrot.slane %v846_v37, 4  ;;  %v6821_v7 = vunpack.i.h.bf16 %v6819_v30  ;;  %v6820_v33 = vunpack.i.l.bf16 %v6819_v30  ;;  %v6834_v4 = vpop.permute.xlu0 %6833 }
 0x329   :  { %v7879_v8 = vsel %vm295_vm15, 0.0, %v7866_v14  ;;  %v7881_v40 = vrot.slane %v834_v45, 4  ;;  %v6841_v62 = vunpack.i.h.bf16 %v6839_v53  ;;  %v7884_v44 = vsel %vm295_vm15, 0.0, %v907_v16 }
 0x32a   :  { %v7888_v12 = vsel %vm295_vm15, 0.0, %v7875_v25  ;;  %v968_v21 = vsel %vm295_vm15, %v967_v34, %v6821_v7  ;;  %v969_v37 = vrot.slane %v6821_v7, 4  ;;  %v7894_v45 = vsel %vm295_vm15, 0.0, %v851_v51 }
 0x32b   :  { %v912_v30 = vsel %vm295_vm15, %v911_v13, %v6820_v33  ;;  %v7900_v43 = vsel %vm295_vm15, 0.0, %v7881_v40  ;;  %v913_v34 = vrot.slane %v6820_v33, 4  ;;  %v974_v47 = vperm.slane %v968_v21, %v7475_v17 }
 0x32c   :  { %v970_v35 = vsel %vm295_vm15, %v6831_v5, %v969_v37  ;;  %v1361_v58 = vrot.slane %v6841_v62, 4  ;;  %v6840_v9 = vunpack.i.l.bf16 %v6839_v53  ;;  %v918_v28 = vperm.slane %v912_v30, %v7475_v17 }
 0x32d   :  { %v914_v51 = vsel %vm295_vm15, %v6830_v54, %v913_v34  ;;  %v1360_v13 = vsel %vm295_vm15, %v1359_v59, %v6841_v62  ;;  %v6836_v16 = vunpack.i.h.bf16 %v6834_v4  ;;  %v978_v19 = vperm.slane %v970_v35, %v7475_v17 }
 0x32e   :  { %v922_v11 = vperm.slane %v914_v51, %v7475_v17  ;;  %v1304_v5 = vsel %vm295_vm15, %v1303_v0, %v6840_v9  ;;  %v1305_v33 = vrot.slane %v6840_v9, 4  ;;  %v10509_v21 = vunpack.i.h.bf16 %v7804_v41 }
 0x32f   :  { %v7912_v37 = vperm.slane %v1304_v5, %v7475_v17  ;;  %v7918_v54 = vperm.slane %v1360_v13, %v7475_v17  ;;  %v979_v30 = vrot.slane %v6836_v16, 4  ;;  %v10510_v35 = vunpack.i.l.bf16 %v7804_v41 }
 0x330   :  { %v1362_v53 = vsel %vm295_vm15, %v10509_v21, %v1361_v58  ;;  %v982_v9 = vsel %vm295_vm15, %v6836_v16, %v7812_v31  ;;  %v993_v34 = vrot.slane %v974_v47, 4  ;;  %v937_v51 = vrot.slane %v918_v28, 4  ;;  %v7940_v59 = vpop.permute.xlu0 %6843 }
 0x331   :  { %v1306_v62 = vsel %vm295_vm15, %v10510_v35, %v1305_v33  ;;  %v7925_v0 = vperm.slane %v1362_v53, %v7475_v17  ;;  %v10511_v13 = vunpack.i.h.bf16 %v7798_v39  ;;  %v1005_v21 = vrot.slane %v978_v19, 4 }
 0x332   :  { %v7930_v58 = vperm.slane %v1306_v62, %v7475_v17  ;;  %v990_v33 = vperm.slane %v982_v9, %v7475_v17  ;;  %v6835_v35 = vunpack.i.l.bf16 %v6834_v4  ;;  %v949_v53 = vrot.slane %v922_v11, 4 }
 0x333   :  { %v980_v5 = vsel %vm295_vm15, %v979_v30, %v10511_v13  ;;  %v10512_v31 = vunpack.i.l.bf16 %v7798_v39 }
 0x334   :  { %v986_v41 = vperm.slane %v980_v5, %v7475_v17  ;;  %v1003_v18 = vrot.slane %v990_v33, 4  ;;  %v923_v10 = vrot.slane %v6835_v35, 4  ;;  %v926_v30 = vsel %vm295_vm15, %v6835_v35, %v7823_v63 }
 0x335   :  { %v934_v9 = vperm.slane %v926_v30, %v7475_v17  ;;  %v1006_v5 = vsel %vm295_vm15, %v990_v33, %v1005_v21  ;;  %v6846_v30 = vunpack.i.h.bf16 %v7940_v59 }
 0x336   :  { %v991_v62 = vrot.slane %v986_v41, 4  ;;  %v994_v4 = vsel %vm295_vm15, %v986_v41, %v993_v34  ;;  %v924_v7 = vsel %vm295_vm15, %v923_v10, %v10512_v31  ;;  %v1004_v3 = vsel %vm295_vm15, %v1003_v18, %v978_v19 }
 0x337   :  { %v1002_v32 = vperm.slane %v994_v4, %v7479_v22  ;;  %v930_v63 = vperm.slane %v924_v7, %v7475_v17  ;;  %v947_v35 = vrot.slane %v934_v9, 4  ;;  %v950_v13 = vsel %vm295_vm15, %v934_v9, %v949_v53 }
 0x338   :  { %v992_v16 = vsel %vm295_vm15, %v991_v62, %v974_v47  ;;  %v958_v34 = vperm.slane %v950_v13, %v7479_v22  ;;  %v1010_v21 = vperm.slane %v1004_v3, %v7479_v22  ;;  %v1014_v39 = vperm.slane %v1006_v5, %v7479_v22  ;;  %v6854_v5 = vpop.permute.xlu0 %6853 }
 0x339   :  { %v7960_v10 = vrot.slane %v1002_v32, 4  ;;  %v935_v47 = vrot.slane %v930_v63, 4  ;;  %v938_v41 = vsel %vm295_vm15, %v930_v63, %v937_v51  ;;  %v948_v18 = vsel %vm295_vm15, %v947_v35, %v922_v11 }
 0x33a   :  { %v7965_v19 = vperm.slane %v992_v16, %v7479_v22  ;;  %v946_v7 = vperm.slane %v938_v41, %v7479_v22  ;;  %v954_v33 = vperm.slane %v948_v18, %v7479_v22  ;;  %v965_v53 = vrot.slane %v958_v34, 4 }
 0x33b   :  { %v6845_v31 = vunpack.i.l.bf16 %v7940_v59  ;;  %v936_v3 = vsel %vm295_vm15, %v935_v47, %v918_v28  ;;  %v7973_v32 = vsel %vm295_vm15, 0.0, %v7960_v10  ;;  %v1019_v62 = vrot.slane %v1010_v21, 4 }
 0x33c   :  { %v1021_v51 = vrot.slane %v1014_v39, 4  ;;  %v7976_v11 = vperm.slane %v936_v3, %v7479_v22  ;;  %v7978_v16 = vrot.slane %v946_v7, 4  ;;  %v963_v13 = vrot.slane %v954_v33, 4 }
 0x33d   :  { %v7981_v9 = vsel %vm295_vm15, 0.0, %v965_v53  ;;  %v1142_v59 = vsel %vm295_vm15, %v965_v53, %v954_v33  ;;  %v1373_v28 = vrot.slane %v6846_v30, 4  ;;  %v10513_v63 = vrot.slane %v7863_v2, 4 }
 0x33e   :  { %v7990_v34 = vsel %vm295_vm15, 0.0, %v7978_v16  ;;  %v7993_v39 = vsel %vm295_vm15, 0.0, %v1019_v62  ;;  %v7996_v47 = vsel %vm295_vm15, 0.0, %v1021_v51  ;;  %v8001_v7 = vsel %vm295_vm15, 0.0, %v963_v13 }
 0x33f   :  { %v848_v35 = vsel %vm295_vm15, 0.0, %v10513_v63  ;;  %v1196_v53 = vsel %vm295_vm15, %v1021_v51, %v1010_v21  ;;  %v8006_v3 = vperm.slane %v1142_v59, %v7475_v17  ;;  %v1317_v63 = vrot.slane %v6845_v31, 4 }
 0x340   :  { %v6856_v62 = vunpack.i.h.bf16 %v6854_v5  ;;  %v6855_v4 = vunpack.i.l.bf16 %v6854_v5  ;;  %v8010_v36 = vperm.slane %v1196_v53, %v7475_v17  ;;  %v10514_v13 = vrot.slane %v7849_v57, 4 }
 0x341   :  { %v1023_v53 = vsel %vm295_vm15, %v7881_v40, %v7863_v2  ;;  %v10515_v41 = vrot.slane %v7900_v43, 4  ;;  %v10517_v43 = vrot.slane %v7930_v58, 4 }
 0x342   :  { %v8016_v18 = vsel %vm295_vm15, 0.0, %v10514_v13  ;;  %v1371_v33 = vrot.slane %v6856_v62, 4  ;;  %v1315_v21 = vrot.slane %v6855_v4, 4  ;;  %v1318_v51 = vsel %vm295_vm15, %v6855_v4, %v1317_v63 }
 0x343   :  { %v1374_v59 = vsel %vm295_vm15, %v6856_v62, %v1373_v28  ;;  %v1326_v5 = vperm.slane %v1318_v51, %v7475_v17  ;;  %v1029_v15 = vsel %vm295_vm15, %v10515_v41, %v848_v35  ;;  %v1034_v4 = vsel %vm295_vm15, %v7875_v25, %v7853_v6 }
 0x344   :  { %v1382_v61 = vperm.slane %v1374_v59, %v7475_v17  ;;  %v1316_v13 = vsel %vm295_vm15, %v1315_v21, %v6845_v31  ;;  %v1372_v26 = vsel %vm295_vm15, %v1371_v33, %v6846_v30  ;;  %v10516_v28 = vrot.slane %v7888_v12, 4 }
 0x345   :  { %v1322_v62 = vperm.slane %v1316_v13, %v7475_v17  ;;  %v1339_v2 = vrot.slane %v1326_v5, 4  ;;  %v1342_v40 = vsel %vm295_vm15, %v1326_v5, %v10517_v43  ;;  %v1378_v31 = vperm.slane %v1372_v26, %v7475_v17 }
 0x346   :  { %v1040_v63 = vsel %vm295_vm15, %v10516_v28, %v7894_v45  ;;  %v1350_v30 = vperm.slane %v1342_v40, %v7479_v22  ;;  %v1395_v35 = vrot.slane %v1382_v61, 4  ;;  %v10518_v41 = vrot.slane %v7925_v0, 4 }
 0x347   :  { %v8047_v12 = vperm.slane %v1023_v53, %v7475_v17  ;;  %v1327_v25 = vrot.slane %v1322_v62, 4  ;;  %v10519_v45 = vrot.slane %v7912_v37, 4  ;;  %v1340_v21 = vsel %vm295_vm15, %v1339_v2, %v7930_v58 }
 0x348   :  { %v1398_v6 = vsel %vm295_vm15, %v1382_v61, %v10518_v41  ;;  %v1383_v51 = vrot.slane %v1378_v31, 4  ;;  %v1346_v59 = vperm.slane %v1340_v21, %v7479_v22  ;;  %v1357_v5 = vrot.slane %v1350_v30, 4 }
 0x349   :  { %v1330_v33 = vsel %vm295_vm15, %v1322_v62, %v10519_v45  ;;  %v10520_v13 = vrot.slane %v7918_v54, 4  ;;  %v1328_v53 = vsel %vm295_vm15, %v1327_v25, %v7912_v37  ;;  %v1396_v58 = vsel %vm295_vm15, %v1395_v35, %v7925_v0 }
 0x34a   :  { %v1338_v26 = vperm.slane %v1330_v33, %v7479_v22  ;;  %v1384_v28 = vsel %vm295_vm15, %v1383_v51, %v7918_v54  ;;  %v1334_v2 = vperm.slane %v1328_v53, %v7479_v22  ;;  %v1355_v40 = vrot.slane %v1346_v59, 4 }
 0x34b   :  { %v1386_v61 = vsel %vm295_vm15, %v1378_v31, %v10520_v13  ;;  %v1033_v30 = vperm.slane %v1029_v15, %v7475_v17  ;;  %v1390_v41 = vperm.slane %v1384_v28, %v7479_v22  ;;  %v1402_v31 = vperm.slane %v1396_v58, %v7479_v22 }
 0x34c   :  { %v1394_v62 = vperm.slane %v1386_v61, %v7479_v22  ;;  %v1353_v43 = vrot.slane %v1338_v26, 4  ;;  %v1406_v37 = vperm.slane %v1398_v6, %v7479_v22  ;;  %v1351_v45 = vrot.slane %v1334_v2, 4 }
 0x34d   :  { %v1038_v33 = vperm.slane %v1034_v4, %v7475_v17  ;;  %v1044_v0 = vperm.slane %v1040_v63, %v7475_v17  ;;  %v1358_v35 = vsel %vm295_vm15, 0.0, %v1357_v5  ;;  %v1407_v21 = vrot.slane %v1390_v41, 4 }
 0x34e   :  { %v1409_v25 = vrot.slane %v1394_v62, 4  ;;  %v1527_v54 = vsel %vm295_vm15, %v1353_v43, %v1334_v2  ;;  %v1411_v51 = vrot.slane %v1402_v31, 4  ;;  %v1413_v26 = vrot.slane %v1406_v37, 4 }
 0x34f   :  { %v8076_v15 = vsel %vm295_vm15, 0.0, %v1353_v43  ;;  %v1538_v6 = vsel %vm295_vm15, %v1357_v5, %v1346_v59  ;;  %v1045_v61 = vrot.slane %v1033_v30, 4  ;;  %v8083_v53 = vsel %vm295_vm15, 0.0, %v1351_v45 }
 0x350   :  { %v8079_v13 = vsel %vm295_vm15, 0.0, %v1409_v25  ;;  %v1356_v4 = vsel %vm295_vm15, 0.0, %v1355_v40  ;;  %v8087_v63 = vperm.slane %v1527_v54, %v7475_v17  ;;  %v8090_v28 = vperm.slane %v1538_v6, %v7475_v17 }
 0x351   :  { %v1414_v62 = vsel %vm295_vm15, 0.0, %v1413_v26  ;;  %v1543_v58 = vrot.slane %v1358_v35, 4  ;;  %v1581_v2 = vsel %vm295_vm15, %v1409_v25, %v1390_v41  ;;  %v1592_v43 = vsel %vm295_vm15, %v1413_v26, %v1402_v31 }
 0x352   :  { %v8096_v59 = vsel %vm295_vm15, 0.0, %v1407_v21  ;;  %v1412_v5 = vsel %vm295_vm15, 0.0, %v1411_v51  ;;  %v1046_v54 = vsel %vm295_vm15, %v1045_v61, %v8047_v12  ;;  %v1057_v6 = vrot.slane %v1044_v0, 4 }
 0x353   :  { %v1077_v41 = vsel %vm295_vm15, %v7866_v14, %v7849_v57  ;;  %v1544_v31 = vsel %vm295_vm15, %v1543_v58, %v1356_v4  ;;  %v8109_v25 = vperm.slane %v1581_v2, %v7475_v17  ;;  %v8112_v35 = vperm.slane %v1592_v43, %v7475_v17 }
 0x354   :  { %v1597_v21 = vrot.slane %v1414_v62, 4  ;;  %v1052_v51 = vperm.slane %v1046_v54, %v7479_v22  ;;  %v1058_v26 = vsel %vm295_vm15, %v1057_v6, %v1038_v33  ;;  %v1081_v61 = vperm.slane %v1077_v41, %v7475_v17 }
 0x355   :  { %v10521_v37 = vrot.slane %v7879_v8, 4  ;;  %v1064_v14 = vperm.slane %v1058_v26, %v7479_v22  ;;  %v1088_v58 = vsel %vm295_vm15, %v7858_v24, %v7842_v1  ;;  %v10522_v62 = vrot.slane %v7873_v49, 4 }
 0x356   :  { %v8131_v43 = vperm.slane %v1544_v31, %v7475_v17  ;;  %v1092_v8 = vperm.slane %v1088_v58, %v7475_v17  ;;  %v1059_v41 = vrot.slane %v1038_v33, 4  ;;  %v1101_v26 = vrot.slane %v1081_v61, 4 }
 0x357   :  { %v1083_v57 = vsel %vm295_vm15, %v10521_v37, %v8016_v18  ;;  %v1094_v2 = vsel %vm295_vm15, %v10522_v62, %v7884_v44  ;;  %v1047_v37 = vrot.slane %v8047_v12, 4  ;;  %v1069_v54 = vrot.slane %v1064_v14, 4 }
 0x358   :  { %v1087_v4 = vperm.slane %v1083_v57, %v7475_v17  ;;  %v1098_v18 = vperm.slane %v1094_v2, %v7475_v17  ;;  %v1113_v24 = vrot.slane %v1092_v8, 4  ;;  %v1071_v49 = vrot.slane %v1052_v51, 4 }
 0x359   :  { %v1048_v1 = vsel %vm295_vm15, %v1033_v30, %v1047_v37  ;;  %v1070_v44 = vsel %vm295_vm15, %v1069_v54, %v1052_v51  ;;  %v1060_v58 = vsel %vm295_vm15, %v1044_v0, %v1059_v41 }
 0x35a   :  { %v1099_v6 = vrot.slane %v1087_v4, 4  ;;  %v1111_v57 = vrot.slane %v1098_v18, 4  ;;  %v1056_v62 = vperm.slane %v1048_v1, %v7479_v22  ;;  %v1239_v45 = vpack.c.bf16 %v1070_v44, %v1070_v44 }
 0x35b   :  { %v1068_v33 = vperm.slane %v1060_v58, %v7479_v22  ;;  %v1102_v30 = vsel %vm295_vm15, %v1087_v4, %v1101_v26  ;;  %v1114_v37 = vsel %vm295_vm15, %v1098_v18, %v1113_v24  ;;  %v1072_v51 = vsel %vm295_vm15, %v1064_v14, %v1071_v49 }
 0x35c   :  { %v1100_v31 = vsel %vm295_vm15, %v1099_v6, %v1081_v61  ;;  %v1112_v12 = vsel %vm295_vm15, %v1111_v57, %v1092_v8  ;;  %v1598_v61 = vsel %vm295_vm15, %v1597_v21, %v1412_v5  ;;  %v1110_v0 = vperm.slane %v1102_v30, %v7479_v22 }
 0x35d   :  { %v1106_v2 = vperm.slane %v1100_v31, %v7479_v22  ;;  %v1118_v40 = vperm.slane %v1112_v12, %v7479_v22  ;;  %v1073_v54 = vrot.slane %v1068_v33, 4  ;;  %v1122_v6 = vperm.slane %v1114_v37, %v7479_v22 }
 0x35e   :  { %v1241_v57 = vpack.c.bf16 %v1072_v51, %v1072_v51  ;;  %v1075_v1 = vrot.slane %v1056_v62, 4  ;;  %v1766_v44 = vunpack.c.l.b16 %v1239_v45  ;;  %v1129_v4 = vrot.slane %v1110_v0, 4 }
 0x35f   :  { %v1123_v41 = vrot.slane %v1118_v40, 4  ;;  %v1125_v8 = vrot.slane %v1106_v2, 4  ;;  %v1074_v31 = vsel %vm295_vm15, %v1073_v54, %v1056_v62  ;;  %v1127_v58 = vrot.slane %v1122_v6, 4 }
 0x360   :  { %v1243_v26 = vpack.c.bf16 %v1074_v31, %v1074_v31  ;;  %v1797_v5 = vunpack.c.l.b16 %v1241_v57  ;;  %v1076_v12 = vsel %vm295_vm15, %v1068_v33, %v1075_v1  ;;  %v1130_v45 = vsel %vm295_vm15, %v1122_v6, %v1129_v4 }
 0x361   :  { %v1124_v18 = vsel %vm295_vm15, %v1123_v41, %v1106_v2  ;;  %v1126_v14 = vsel %vm295_vm15, %v1118_v40, %v1125_v8  ;;  %v1128_v24 = vsel %vm295_vm15, %v1127_v58, %v1110_v0  ;;  %v1245_v51 = vpack.c.bf16 %v1076_v12, %v1076_v12 }
 0x362   :  { %v1240_v21 = vpack.c.bf16 %v1124_v18, %v1124_v18  ;;  %v1242_v49 = vpack.c.bf16 %v1126_v14, %v1126_v14  ;;  %v1244_v30 = vpack.c.bf16 %v1128_v24, %v1128_v24  ;;  %v1827_v37 = vunpack.c.l.b16 %v1243_v26 }
 0x363   :  { %v1617_v62 = vrot.slane %v8112_v35, 4  ;;  %v1246_v2 = vpack.c.bf16 %v1130_v45, %v1130_v45  ;;  %v8159_v41 = vperm.slane %v1598_v61, %v7475_v17  ;;  %v1857_v8 = vunpack.c.l.b16 %v1245_v51 }
 0x364   :  { %v1767_v54 = vunpack.c.l.b16 %v1240_v21  ;;  %v1798_v50 = vunpack.c.l.b16 %v1242_v49  ;;  %v1828_v40 = vunpack.c.l.b16 %v1244_v30  ;;  %v10523_v0 = vrot.slane %v7976_v11, 4 }
 0x365   :  { %v1858_v31 = vunpack.c.l.b16 %v1246_v2  ;;  %v10524_v58 = vrot.slane %v7965_v19, 4  ;;  %v1131_v61 = vsel %vm295_vm15, %v7978_v16, %v7976_v11  ;;  %v10525_v18 = vrot.slane %v7990_v34, 4 }
 0x366   :  { %v960_v57 = vsel %vm295_vm15, 0.0, %v10523_v0  ;;  %v1768_v33 = vpack.c.b16 %v1767_v54, %v1766_v44  ;;  %v1799_v1 = vpack.c.b16 %v1798_v50, %v1797_v5  ;;  %v1829_v6 = vpack.c.b16 %v1828_v40, %v1827_v37 }
 0x367   :  { %v1016_v4 = vsel %vm295_vm15, 0.0, %v10524_v58  ;;  %v1137_v26 = vsel %vm295_vm15, %v10525_v18, %v960_v57  ;;  %v1859_v21 = vpack.c.b16 %v1858_v31, %v1857_v8  ;;  %v1135_v50 = vperm.slane %v1131_v61, %v7475_v17 }
 0x368   :  { %v1774_v14 = vsel %vm1769_vm0, %v1768_v33, 0  ;;  %v1804_v44 = vsel %vm1769_vm0, %v1799_v1, 0  ;;  %v1834_v5 = vsel %vm1769_vm0, %v1829_v6, 0  ;;  %v1141_v24 = vperm.slane %v1137_v26, %v7475_v17 }
 0x369   :  { %1783 = vmatpush.bf16.xpose.msra.mxu2 %v1774_v14  ;;  %1813 = vmatpush.bf16.xpose.msra.mxu3 %v1804_v44  ;;  %v10526_v11 = vrot.slane %v7981_v9, 4  ;;  %v1167_v34 = vrot.slane %v8006_v3, 4  ;;  %v1864_v49 = vsel %vm1769_vm0, %v1859_v21, 0  ;;  %v1155_v30 = vrot.slane %v1135_v50, 4 }
 0x36a   :  { %v1185_v37 = vsel %vm295_vm15, %v7960_v10, %v7965_v19  ;;  %v10527_v51 = vrot.slane %v7973_v32, 4  ;;  %v1221_v2 = vrot.slane %v8010_v36, 4  ;;  %v1153_v33 = vrot.slane %v1141_v24, 4 }
 0x36b   :  { %v1148_v16 = vsel %vm295_vm15, %v10526_v11, %v8001_v7  ;;  %v1189_v45 = vperm.slane %v1185_v37, %v7475_v17  ;;  %v10528_v7 = vrot.slane %v7996_v47, 4  ;;  %v1156_v40 = vsel %vm295_vm15, %v1141_v24, %v1155_v30 }
 0x36c   :  { %v1152_v12 = vperm.slane %v1148_v16, %v7475_v17  ;;  %v1191_v9 = vsel %vm295_vm15, %v10527_v51, %v1016_v4  ;;  %v1164_v0 = vperm.slane %v1156_v40, %v7479_v22  ;;  %v1154_v61 = vsel %vm295_vm15, %v1153_v33, %v1135_v50 }
 0x36d   :  { %v1202_v54 = vsel %vm295_vm15, %v10528_v7, %v7993_v39  ;;  %v1195_v10 = vperm.slane %v1191_v9, %v7475_v17  ;;  %v1209_v57 = vrot.slane %v1189_v45, 4  ;;  %v10529_v18 = vpack.c.b16 %v7707_v55, %v7700_v38 }
 0x36e   :  { %v1168_v8 = vsel %vm295_vm15, %v1152_v12, %v1167_v34  ;;  %v1206_v19 = vperm.slane %v1202_v54, %v7475_v17  ;;  %v1165_v1 = vrot.slane %v1152_v12, 4  ;;  %v10530_v26 = vpack.c.b16 %v7709_v56, %v7705_v46 }
 0x36f   :  { %v1176_v32 = vperm.slane %v1168_v8, %v7479_v22  ;;  %v1207_v39 = vrot.slane %v1195_v10, 4  ;;  %v1210_v58 = vsel %vm295_vm15, %v1195_v10, %v1209_v57  ;;  %v1160_v44 = vperm.slane %v1154_v61, %v7479_v22 }
 0x370   :  { %v1222_v47 = vsel %vm295_vm15, %v1206_v19, %v1221_v2  ;;  %v1219_v31 = vrot.slane %v1206_v19, 4  ;;  %6541 = vmatmul.msk.bf16.vlgmr.msra.gmra.mxu2 %vm1769_vm0, %v10529_v18  ;;  %6542 = vmatmul.msk.bf16.vlgmr.msra.gmra.mxu3 %vm1769_vm0, %v10530_v26  ;;  %v1218_v14 = vperm.slane %v1210_v58, %v7479_v22  ;;  %v1166_v21 = vsel %vm295_vm15, %v1165_v1, %v8006_v3 }
 0x371   :  { %1843 = vmatpush.bf16.xpose.msrb.mxu2 %v1834_v5  ;;  %1873 = vmatpush.bf16.xpose.msrb.mxu3 %v1864_v49  ;;  %v1181_v6 = vrot.slane %v1176_v32, 4  ;;  %v1230_v4 = vperm.slane %v1222_v47, %v7479_v22  ;;  %v1183_v5 = vrot.slane %v1164_v0, 4  ;;  %v1172_v38 = vperm.slane %v1166_v21, %v7479_v22 }
 0x372   :  { %v1208_v55 = vsel %vm295_vm15, %v1207_v39, %v1189_v45  ;;  %v1220_v56 = vsel %vm295_vm15, %v1219_v31, %v8010_v36  ;;  %v1237_v12 = vrot.slane %v1218_v14, 4  ;;  %v1179_v9 = vrot.slane %v1160_v44, 4 }
 0x373   :  { %v1182_v50 = vsel %vm295_vm15, %v1181_v6, %v1164_v0  ;;  %v1235_v24 = vrot.slane %v1230_v4, 4  ;;  %v1214_v46 = vperm.slane %v1208_v55, %v7479_v22  ;;  %v1184_v16 = vsel %vm295_vm15, %v1176_v32, %v1183_v5 }
 0x374   :  { %v1251_v11 = vpack.c.bf16 %v1182_v50, %v1182_v50  ;;  %v1177_v49 = vrot.slane %v1172_v38, 4  ;;  %v1226_v3 = vperm.slane %v1220_v56, %v7479_v22  ;;  %v1253_v51 = vpack.c.bf16 %v1184_v16, %v1184_v16 }
 0x375   :  { %v1236_v34 = vsel %vm295_vm15, %v1235_v24, %v1218_v14  ;;  %v1238_v54 = vsel %vm295_vm15, %v1230_v4, %v1237_v12  ;;  %v1233_v2 = vrot.slane %v1214_v46, 4  ;;  %v1180_v0 = vsel %vm295_vm15, %v1172_v38, %v1179_v9 }
 0x376   :  { %v1252_v30 = vpack.c.bf16 %v1236_v34, %v1236_v34  ;;  %v1947_v37 = vunpack.c.l.b16 %v1251_v11  ;;  %v1178_v45 = vsel %vm295_vm15, %v1177_v49, %v1160_v44  ;;  %v1231_v7 = vrot.slane %v1226_v3, 4 }
 0x377   :  { %v1247_v36 = vpack.c.bf16 %v1178_v45, %v1178_v45  ;;  %v1254_v8 = vpack.c.bf16 %v1238_v54, %v1238_v54  ;;  %v1977_v10 = vunpack.c.l.b16 %v1253_v51  ;;  %v1234_v32 = vsel %vm295_vm15, %v1226_v3, %v1233_v2 }
 0x378   :  { %v1948_v40 = vunpack.c.l.b16 %v1252_v30  ;;  %v1232_v19 = vsel %vm295_vm15, %v1231_v7, %v1214_v46  ;;  %v10531_v57 = vrot.slane %v8076_v15, 4  ;;  %v1249_v6 = vpack.c.bf16 %v1180_v0, %v1180_v0 }
 0x379   :  { %v1248_v1 = vpack.c.bf16 %v1232_v19, %v1232_v19  ;;  %v1887_v39 = vunpack.c.l.b16 %v1247_v36  ;;  %v1978_v31 = vunpack.c.l.b16 %v1254_v8  ;;  %v1250_v58 = vpack.c.bf16 %v1234_v32, %v1234_v32 }
 0x37a   :  { %v1533_v33 = vsel %vm295_vm15, %v10531_v57, %v8083_v53  ;;  %v1949_v47 = vpack.c.b16 %v1948_v40, %v1947_v37  ;;  %v1551_v61 = vrot.slane %v8087_v63, 4  ;;  %v10532_v44 = vrot.slane %v8090_v28, 4 }
 0x37b   :  { %v1537_v4 = vperm.slane %v1533_v33, %v7475_v17  ;;  %v1888_v26 = vunpack.c.l.b16 %v1248_v1  ;;  %v1979_v14 = vpack.c.b16 %v1978_v31, %v1977_v10  ;;  %v1917_v53 = vunpack.c.l.b16 %v1249_v6 }
 0x37c   :  { %v1954_v18 = vsel %vm1769_vm0, %v1949_v47, 0  ;;  %v1564_v15 = vsel %vm295_vm15, %v8131_v43, %v10532_v44  ;;  %v1918_v21 = vunpack.c.l.b16 %v1250_v58  ;;  %v10533_v11 = vrot.slane %v8079_v13, 4 }
 0x37d   :  { %1963 = vmatpush.bf16.xpose.msra.mxu3 %v1954_v18  ;;  %v1552_v5 = vsel %vm295_vm15, %v1537_v4, %v1551_v61  ;;  %v1572_v50 = vperm.slane %v1564_v15, %v7479_v22  ;;  %v1889_v24 = vpack.c.b16 %v1888_v26, %v1887_v39  ;;  %v1984_v38 = vsel %vm1769_vm0, %v1979_v14, 0 }
 0x37e   :  { %v1560_v55 = vperm.slane %v1552_v5, %v7479_v22  ;;  %v1587_v46 = vsel %vm295_vm15, %v10533_v11, %v8096_v59  ;;  %1993 = vmatpush.bf16.xpose.msrb.mxu0 %v1984_v38  ;;  %v1919_v56 = vpack.c.b16 %v1918_v21, %v1917_v53  ;;  %v1605_v49 = vrot.slane %v8109_v25, 4 }
 0x37f   :  { %v1577_v16 = vrot.slane %v1572_v50, 4  ;;  %v1591_v34 = vperm.slane %v1587_v46, %v7475_v17  ;;  %v1894_v3 = vsel %vm1769_vm0, %v1889_v24, 0  ;;  %v1618_v12 = vsel %vm295_vm15, %v8159_v41, %v1617_v62  ;;  %v10538_v46 = vld [vmem:[#allocation16_spill] sm:$0xff] }
 0x380   :  { %v1549_v30 = vrot.slane %v1537_v4, 4  ;;  %v1561_v37 = vrot.slane %v8131_v43, 4  ;;  %1903 = vmatpush.bf16.xpose.msra.mxu1 %v1894_v3  ;;  %v1924_v13 = vsel %vm1769_vm0, %v1919_v56, 0  ;;  %v1626_v9 = vperm.slane %v1618_v12, %v7479_v22  ;;  %v10539_v56 = vld [vmem:[#allocation14_spill] sm:$0xff] }
 0x381   :  { %v1578_v59 = vsel %vm295_vm15, %v1577_v16, %v1560_v55  ;;  %v1606_v51 = vsel %vm295_vm15, %v1591_v34, %v1605_v49  ;;  %1933 = vmatpush.bf16.xpose.msra.mxu2 %v1924_v13  ;;  %v10534_v45 = vpack.c.b16 %v7762_v52, %v7744_v23  ;;  %v1603_v54 = vrot.slane %v1591_v34, 4  ;;  %v10541_v34 = vld [vmem:[#allocation15_spill] sm:$0xff]  ;;  %v10542_v49 = vld [vmem:[#allocation13_spill] sm:$0xff] }
 0x382   :  { %v1614_v62 = vperm.slane %v1606_v51, %v7479_v22  ;;  %v1747_v7 = vpack.c.bf16 %v1578_v59, %v1578_v59  ;;  %v1550_v43 = vsel %vm295_vm15, %v1549_v30, %v8087_v63  ;;  %v10535_v2 = vpack.c.b16 %v7728_v27, %v7714_v48 }
 0x383   :  { %6544 = vmatmul.msk.bf16.vlgmr.msrb.gmra.mxu3 %vm1769_vm0, %v10534_v45  ;;  %v1631_v40 = vrot.slane %v1626_v9, 4  ;;  %v1556_v36 = vperm.slane %v1550_v43, %v7479_v22  ;;  %v1562_v23 = vsel %vm295_vm15, %v1561_v37, %v8090_v28  ;;  %v1615_v52 = vrot.slane %v8159_v41, 4 }
 0x384   :  { %6543 = vmatmul.msk.bf16.vlgmr.msrb.gmra.mxu2 %vm1769_vm0, %v10535_v2  ;;  %v2256_v8 = vunpack.c.l.b16 %v1747_v7  ;;  %v1568_v10 = vperm.slane %v1562_v23, %v7479_v22  ;;  %v1604_v63 = vsel %vm295_vm15, %v1603_v54, %v8109_v25  ;;  %v1579_v19 = vrot.slane %v1560_v55, 4 }
 0x385   :  { %v1632_v0 = vsel %vm295_vm15, %v1631_v40, %v1614_v62  ;;  %v1610_v48 = vperm.slane %v1604_v63, %v7479_v22  ;;  %v1616_v27 = vsel %vm295_vm15, %v1615_v52, %v8112_v35  ;;  %v1633_v32 = vrot.slane %v1614_v62, 4 }
 0x386   :  { %v10536_v28 = vpack.c.b16 %v7773_v60, %v7771_v20  ;;  %v1748_v41 = vpack.c.bf16 %v1632_v0, %v1632_v0  ;;  %v1573_v57 = vrot.slane %v1568_v10, 4  ;;  %v1622_v33 = vperm.slane %v1616_v27, %v7479_v22 }
 0x387   :  { %v1580_v25 = vsel %vm295_vm15, %v1572_v50, %v1579_v19  ;;  %v1634_v47 = vsel %vm295_vm15, %v1626_v9, %v1633_v32  ;;  %v1575_v39 = vrot.slane %v1556_v36, 4  ;;  %v1629_v31 = vrot.slane %v1610_v48, 4 }
 0x388   :  { %6548 = vmatmul.msk.bf16.vlgmr.msrb.gmra.mxu0 %vm1769_vm0, %v10536_v28  ;;  %v1749_v1 = vpack.c.bf16 %v1580_v25, %v1580_v25  ;;  %v10537_v35 = vpack.c.b16 %v7779_v29, %v7777_v42  ;;  %v2257_v6 = vunpack.c.l.b16 %v1748_v41  ;;  %v1574_v20 = vsel %vm295_vm15, %v1573_v57, %v1556_v36 }
 0x389   :  { %v1627_v60 = vrot.slane %v1622_v33, 4  ;;  %v1750_v58 = vpack.c.bf16 %v1634_v47, %v1634_v47  ;;  %v1743_v4 = vpack.c.bf16 %v1574_v20, %v1574_v20  ;;  %v1576_v18 = vsel %vm295_vm15, %v1568_v10, %v1575_v39  ;;  %v10544_v39 = vld [vmem:[#allocation11_spill] sm:$0xff] }
 0x38a   :  { %6545 = vmatmul.msk.bf16.vlgmr.msra.gmra.mxu1 %vm1769_vm0, %v10537_v35  ;;  %v2284_v61 = vunpack.c.l.b16 %v1749_v1  ;;  %v1630_v26 = vsel %vm295_vm15, %v1622_v33, %v1629_v31  ;;  %v2258_v14 = vpack.c.b16 %v2257_v6, %v2256_v8  ;;  %v1745_v53 = vpack.c.bf16 %v1576_v18, %v1576_v18  ;;  %v10545_v31 = vld [vmem:[#allocation10_spill] sm:$0xff]  ;;  %v10546_v35 = vld [vmem:[#allocation12_spill] sm:$0xff]  ;;  %v8370_v6 = vpop.permute.xlu0 %6858 }
 0x38b   :  { %v1628_v44 = vsel %vm295_vm15, %v1627_v60, %v1610_v48  ;;  %v2285_v15 = vunpack.c.l.b16 %v1750_v58  ;;  %v2200_v42 = vunpack.c.l.b16 %v1743_v4  ;;  %v1746_v29 = vpack.c.bf16 %v1630_v26, %v1630_v26 }
 0x38c   :  { %v1744_v21 = vpack.c.bf16 %v1628_v44, %v1628_v44  ;;  %2270 = vmatpush.bf16.msrb.mxu3 %v2258_v14  ;;  %v2228_v50 = vunpack.c.l.b16 %v1745_v53  ;;  %v10540_v16 = vpack.c.b16 %v10538_v46, %v10539_v56  ;;  %v10543_v3 = vpack.c.b16 %v10541_v34, %v10542_v49 }
 0x38d   :  { %v2286_v5 = vpack.c.b16 %v2285_v15, %v2284_v61  ;;  %v2229_v38 = vunpack.c.l.b16 %v1746_v29 }
 0x38e   :  { %v2201_v24 = vunpack.c.l.b16 %v1744_v21 }
 0x38f   :  { %2298 = vmatpush.bf16.msra.mxu0 %v2286_v5  ;;  %v2230_v11 = vpack.c.b16 %v2229_v38, %v2228_v50 }
 0x390   :  { %v2202_v55 = vpack.c.b16 %v2201_v24, %v2200_v42 }
 0x391   :  { %2242 = vmatpush.bf16.msrb.mxu2 %v2230_v11 }
 0x392   :  { %2214 = vmatpush.bf16.msrb.mxu1 %v2202_v55 }
 0x393   :  { %6547 = vmatmul.msk.bf16.vlgmr.msra.gmra.mxu3 %vm1769_vm0, %v10540_v16 }
 0x394   :  { %6546 = vmatmul.msk.bf16.vlgmr.msra.gmra.mxu2 %vm1769_vm0, %v10543_v3 }
 0x3f3   :  { %v1785_v12 = vpop.f32.mrf.mxu2  ;;  %v1815_v30 = vpop.f32.mrf.mxu3 }
 0x3f4   :  { %v2001_v37 = vsel %vm2000_vm2, %v1785_v12, -inf  ;;  %v2007_v13 = vsel %vm2000_vm2, %v1815_v30, -inf }
 0x3f5   :  { %2002 = vmax.xlane.f32.xlu1 %v2001_v37  ;;  %2008 = vmax.xlane.f32.xlu0 %v2007_v13 }
 0x3fb   :  { %v8311_v59 = vpop.f32.mrf.mxu2  ;;  %v1817_v51 = vpop.f32.mrf.mxu3 }
 0x3fc   :  { %v2010_v9 = vsel %vm2000_vm2, %v1817_v51, -inf  ;;  %v2004_v45 = vsel %vm2000_vm2, %v8311_v59, -inf }
 0x3fd   :  { %2011 = vmax.xlane.f32.xlu2 %v2010_v9  ;;  %2005 = vmax.xlane.f32.xlu0 %v2004_v45 }
 0x405   :  { %v8316_v62 = vpop.f32.mrf.mxu0 }
 0x406   :  { %v8320_v43 = vpop.f32.mrf.mxu3  ;;  %v2043_v40 = vsel %vm2000_vm2, %v8316_v62, -inf }
 0x407   :  { %v8318_v7 = vpop.f32.mrf.mxu1  ;;  %v8322_v54 = vpop.f32.mrf.mxu2  ;;  %2044 = vmax.xlane.f32.xlu0 %v2043_v40  ;;  %v2019_v27 = vsel %vm2000_vm2, %v8320_v43, -inf }
 0x408   :  { %v2025_v2 = vsel %vm2000_vm2, %v8318_v7, -inf  ;;  %v2013_v10 = vsel %vm2000_vm2, %v8322_v54, -inf }
 0x409   :  { %2026 = vmax.xlane.f32.xlu2 %v2025_v2 }
 0x40d   :  { %v8348_v32 = vpop.f32.mrf.mxu0 }
 0x40e   :  { %v8330_v23 = vpop.f32.mrf.mxu3  ;;  %v2046_v57 = vsel %vm2000_vm2, %v8348_v32, -inf }
 0x40f   :  { %v8328_v36 = vpop.f32.mrf.mxu1  ;;  %v8334_v8 = vpop.f32.mrf.mxu2  ;;  %v2022_v28 = vsel %vm2000_vm2, %v8330_v23, -inf }
 0x410   :  { %v2028_v52 = vsel %vm2000_vm2, %v8328_v36, -inf  ;;  %v2016_v63 = vsel %vm2000_vm2, %v8334_v8, -inf }
 0x411   :  { %2029 = vmax.xlane.f32.xlu1 %v2028_v52  ;;  %2014 = vmax.xlane.f32.xlu2 %v2013_v10 }
 0x416   :  { %v8340_v19 = vpop.f32.mrf.mxu3 }
 0x417   :  { %v8342_v0 = vpop.f32.mrf.mxu2  ;;  %v2037_v48 = vsel %vm2000_vm2, %v8340_v19, -inf }
 0x418   :  { %2038 = vmax.xlane.f32.xlu0 %v2037_v48  ;;  %v2031_v47 = vsel %vm2000_vm2, %v8342_v0, -inf }
 0x419   :  { %2017 = vmax.xlane.f32.xlu1 %v2016_v63  ;;  %2020 = vmax.xlane.f32.xlu2 %v2019_v27 }
 0x41e   :  { %v8358_v25 = vpop.f32.mrf.mxu3 }
 0x41f   :  { %v8352_v41 = vpop.f32.mrf.mxu2  ;;  %v2040_v1 = vsel %vm2000_vm2, %v8358_v25, -inf }
 0x420   :  { %v2034_v33 = vsel %vm2000_vm2, %v8352_v41, -inf }
 0x421   :  { %2023 = vmax.xlane.f32.xlu1 %v2022_v28  ;;  %2047 = vmax.xlane.f32.xlu2 %v2046_v57 }
 0x422   :  { %2035 = vmax.xlane.f32.xlu0 %v2034_v33 }
 0x429   :  { %2032 = vmax.xlane.f32.xlu1 %v2031_v47  ;;  %2041 = vmax.xlane.f32.xlu2 %v2040_v1 }
 0x436   :  { %6873 = vrot.lane.b32.xlu0 %v10544_v39, %s7284_s9 }
 0x441   :  { %6863 = vrot.lane.b32.xlu2 %v10546_v35, %s7284_s9 }
 0x442   :  { %6868 = vrot.lane.b32.xlu1 %v10545_v31, %s7284_s9 }
 0x468   :  { %v2003_v20 = vpop.xlane.xlu1 %2002  ;;  %v2009_v60 = vpop.xlane.xlu0 %2008 }
 0x469   :  { %v2049_v58 = vsub.f32 %v1785_v12, %v2003_v20  ;;  %v2051_v4 = vsub.f32 %v1815_v30, %v2009_v60 }
 0x46b   :  { %v2065_v61 = vmul.f32 1.442695, %v2049_v58  ;;  %v2069_v18 = vmul.f32 1.442695, %v2051_v4 }
 0x46d   :  { %7075 = vpow2.f32 %v2065_v61 }
 0x46e   :  { %7077 = vpow2.f32 %v2069_v18 }
 0x470   :  { %v2012_v26 = vpop.xlane.xlu2 %2011  ;;  %v2006_v42 = vpop.xlane.xlu0 %2005 }
 0x471   :  { %v2052_v14 = vsub.f32 %v1817_v51, %v2012_v26  ;;  %v2050_v16 = vsub.f32 %v8311_v59, %v2006_v42 }
 0x473   :  { %v8372_v44 = vpop.eup %7075  ;;  %v2071_v15 = vmul.f32 1.442695, %v2052_v14  ;;  %v2067_v34 = vmul.f32 1.442695, %v2050_v16 }
 0x474   :  { %v8374_v53 = vpop.eup %7077  ;;  %v2097_v21 = vsel %vm2000_vm2, %v8372_v44, 0.0 }
 0x475   :  { %7079 = vpow2.f32 %v2071_v15  ;;  %2098 = vadd.xlane.f32.xlu2 %v2097_v21  ;;  %v2103_v29 = vsel %vm2000_vm2, %v8374_v53, 0.0 }
 0x476   :  { %2104 = vadd.xlane.f32.xlu0 %v2103_v29 }
 0x47a   :  { %v2045_v38 = vpop.xlane.xlu0 %2044 }
 0x47b   :  { %v8380_v50 = vpop.eup %7079  ;;  %v2063_v35 = vsub.f32 %v8316_v62, %v2045_v38 }
 0x47c   :  { %v2027_v5 = vpop.xlane.xlu2 %2026  ;;  %v2106_v24 = vsel %vm2000_vm2, %v8380_v50, 0.0 }
 0x47d   :  { %2107 = vadd.xlane.f32.xlu1 %v2106_v24  ;;  %v2057_v13 = vsub.f32 %v8318_v7, %v2027_v5  ;;  %v2093_v26 = vmul.f32 1.442695, %v2063_v35 }
 0x47f   :  { %v2081_v2 = vmul.f32 1.442695, %v2057_v13 }
 0x484   :  { %v8384_v55 = vpop.xlane.xlu1 %2029  ;;  %v2015_v11 = vpop.xlane.xlu2 %2014 }
 0x485   :  { %v2053_v46 = vsub.f32 %v8322_v54, %v2015_v11  ;;  %v2058_v58 = vsub.f32 %v8328_v36, %v8384_v55 }
 0x487   :  { %v2073_v56 = vmul.f32 1.442695, %v2053_v46  ;;  %v2083_v36 = vmul.f32 1.442695, %v2058_v58 }
 0x489   :  { %7081 = vpow2.f32 %v2073_v56 }
 0x48a   :  { %7083 = vpow2.f32 %v2067_v34 }
 0x48b   :  { %v2039_v3 = vpop.xlane.xlu0 %2038 }
 0x48c   :  { %v2018_v49 = vpop.xlane.xlu1 %2017  ;;  %v2021_v30 = vpop.xlane.xlu2 %2020  ;;  %v2061_v45 = vsub.f32 %v8340_v19, %v2039_v3 }
 0x48d   :  { %v2054_v12 = vsub.f32 %v8334_v8, %v2018_v49  ;;  %v2055_v37 = vsub.f32 %v8320_v43, %v2021_v30 }
 0x48e   :  { %v2089_v52 = vmul.f32 1.442695, %v2061_v45  ;;  %v6861_v45 = vunpack.i.h.bf16 %v8370_v6 }
 0x48f   :  { %v2075_v51 = vmul.f32 1.442695, %v2054_v12  ;;  %v8391_v9 = vpop.eup %7081  ;;  %v2077_v54 = vmul.f32 1.442695, %v2055_v37 }
 0x490   :  { %v2109_v59 = vsel %vm2000_vm2, %v8391_v9, 0.0  ;;  %v8397_v10 = vpop.eup %7083 }
 0x491   :  { %7085 = vpow2.f32 %v2075_v51  ;;  %2110 = vadd.xlane.f32.xlu1 %v2109_v59  ;;  %v6860_v59 = vunpack.i.l.bf16 %v8370_v6 }
 0x492   :  { %7087 = vpow2.f32 %v2077_v54 }
 0x493   :  { %7089 = vpow2.f32 %v2081_v2 }
 0x494   :  { %v2024_v40 = vpop.xlane.xlu1 %2023  ;;  %v2048_v8 = vpop.xlane.xlu2 %2047  ;;  %7091 = vpow2.f32 %v2089_v52 }
 0x495   :  { %v2056_v43 = vsub.f32 %v8330_v23, %v2024_v40  ;;  %v2036_v7 = vpop.xlane.xlu0 %2035  ;;  %v2100_v23 = vsel %vm2000_vm2, %v8397_v10, 0.0  ;;  %v2064_v61 = vsub.f32 %v8348_v32, %v2048_v8 }
 0x496   :  { %v2060_v27 = vsub.f32 %v8352_v41, %v2036_v7 }
 0x497   :  { %v8399_v63 = vpop.eup %7085  ;;  %v2079_v19 = vmul.f32 1.442695, %v2056_v43  ;;  %v2095_v14 = vmul.f32 1.442695, %v2064_v61 }
 0x498   :  { %v2112_v48 = vsel %vm2000_vm2, %v8399_v63, 0.0  ;;  %v8404_v28 = vpop.eup %7087  ;;  %v2087_v47 = vmul.f32 1.442695, %v2060_v27  ;;  %v1473_v27 = vrot.slane %v6861_v45, 4 }
 0x499   :  { %7093 = vpow2.f32 %v2079_v19  ;;  %2113 = vadd.xlane.f32.xlu2 %v2112_v48  ;;  %2101 = vadd.xlane.f32.xlu1 %v2100_v23  ;;  %v2115_v57 = vsel %vm2000_vm2, %v8404_v28, 0.0  ;;  %v8410_v1 = vpop.eup %7089  ;;  %v1417_v23 = vrot.slane %v6860_v59, 4 }
 0x49a   :  { %2116 = vadd.xlane.f32.xlu0 %v2115_v57  ;;  %v8413_v41 = vpop.eup %7091  ;;  %7095 = vpow2.f32 %v2087_v47 }
 0x49b   :  { %v2133_v62 = vsel %vm2000_vm2, %v8413_v41, 0.0 }
 0x49c   :  { %v2033_v33 = vpop.xlane.xlu1 %2032  ;;  %v2042_v31 = vpop.xlane.xlu2 %2041 }
 0x49d   :  { %v2059_v39 = vsub.f32 %v8342_v0, %v2033_v33  ;;  %v2062_v20 = vsub.f32 %v8358_v25, %v2042_v31  ;;  %v2121_v25 = vsel %vm2000_vm2, %v8410_v1, 0.0 }
 0x49f   :  { %v8417_v60 = vpop.eup %7093  ;;  %v2085_v4 = vmul.f32 1.442695, %v2059_v39  ;;  %v2091_v0 = vmul.f32 1.442695, %v2062_v20 }
 0x4a0   :  { %v2118_v18 = vsel %vm2000_vm2, %v8417_v60, 0.0  ;;  %v8428_v15 = vpop.eup %7095 }
 0x4a1   :  { %7097 = vpow2.f32 %v2085_v4  ;;  %2119 = vadd.xlane.f32.xlu2 %v2118_v18  ;;  %2134 = vadd.xlane.f32.xlu1 %v2133_v62  ;;  %v2130_v56 = vsel %vm2000_vm2, %v8428_v15, 0.0 }
 0x4a2   :  { %7099 = vpow2.f32 %v2091_v0  ;;  %2122 = vadd.xlane.f32.xlu0 %v2121_v25 }
 0x4a3   :  { %7101 = vpow2.f32 %v2093_v26 }
 0x4a4   :  { %v6864_v32 = vpop.permute.xlu2 %6863  ;;  %7103 = vpow2.f32 %v2083_v36 }
 0x4a5   :  { %v6866_v42 = vunpack.i.h.bf16 %v6864_v32  ;;  %v6865_v29 = vunpack.i.l.bf16 %v6864_v32  ;;  %7105 = vpow2.f32 %v2095_v14 }
 0x4a7   :  { %v8430_v21 = vpop.eup %7097  ;;  %v1485_v16 = vrot.slane %v6866_v42, 4  ;;  %v1429_v34 = vrot.slane %v6865_v29, 4 }
 0x4a8   :  { %v8432_v5 = vpop.eup %7099  ;;  %v2127_v24 = vsel %vm2000_vm2, %v8430_v21, 0.0  ;;  %v6874_v38 = vpop.permute.xlu0 %6873 }
 0x4a9   :  { %2128 = vadd.xlane.f32.xlu2 %v2127_v24  ;;  %v6876_v55 = vunpack.i.h.bf16 %v6874_v38  ;;  %v6875_v11 = vunpack.i.l.bf16 %v6874_v38  ;;  %v2136_v46 = vsel %vm2000_vm2, %v8432_v5, 0.0  ;;  %2131 = vadd.xlane.f32.xlu1 %v2130_v56  ;;  %v8440_v49 = vpop.eup %7101 }
 0x4aa   :  { %2137 = vadd.xlane.f32.xlu0 %v2136_v46  ;;  %v8442_v3 = vpop.eup %7103  ;;  %v2139_v52 = vsel %vm2000_vm2, %v8440_v49, 0.0 }
 0x4ab   :  { %v1483_v12 = vrot.slane %v6876_v55, 4  ;;  %v1427_v30 = vrot.slane %v6875_v11, 4  ;;  %v8444_v37 = vpop.eup %7105  ;;  %v1486_v13 = vsel %vm295_vm15, %v6876_v55, %v1485_v16  ;;  %v1430_v51 = vsel %vm295_vm15, %v6875_v11, %v1429_v34 }
 0x4ac   :  { %v2124_v54 = vsel %vm2000_vm2, %v8442_v3, 0.0  ;;  %v1494_v43 = vperm.slane %v1486_v13, %v7475_v17  ;;  %v1438_v8 = vperm.slane %v1430_v51, %v7475_v17  ;;  %v2142_v7 = vsel %vm2000_vm2, %v8444_v37, 0.0 }
 0x4ad   :  { %v1484_v2 = vsel %vm295_vm15, %v1483_v12, %v6866_v42  ;;  %v1428_v40 = vsel %vm295_vm15, %v1427_v30, %v6865_v29 }
 0x4ae   :  { %v1490_v19 = vperm.slane %v1484_v2, %v7475_v17  ;;  %v1434_v6 = vperm.slane %v1428_v40, %v7475_v17  ;;  %v1507_v47 = vrot.slane %v1494_v43, 4  ;;  %v1451_v39 = vrot.slane %v1438_v8, 4 }
 0x4b0   :  { %v1495_v4 = vrot.slane %v1490_v19, 4  ;;  %v1439_v61 = vrot.slane %v1434_v6, 4 }
 0x4b1   :  { %2125 = vadd.xlane.f32.xlu2 %v2124_v54  ;;  %2140 = vadd.xlane.f32.xlu1 %v2139_v52 }
 0x4b2   :  { %2143 = vadd.xlane.f32.xlu0 %v2142_v7 }
 0x4b4   :  { %v6869_v48 = vpop.permute.xlu1 %6868 }
 0x4b5   :  { %v6871_v57 = vunpack.i.h.bf16 %v6869_v48  ;;  %v6870_v33 = vunpack.i.l.bf16 %v6869_v48 }
 0x4b7   :  { %v1471_v31 = vrot.slane %v6871_v57, 4  ;;  %v1474_v35 = vsel %vm295_vm15, %v6871_v57, %v1473_v27  ;;  %v1415_v20 = vrot.slane %v6870_v33, 4  ;;  %v1418_v58 = vsel %vm295_vm15, %v6870_v33, %v1417_v23 }
 0x4b8   :  { %v1482_v18 = vperm.slane %v1474_v35, %v7475_v17  ;;  %v1426_v0 = vperm.slane %v1418_v58, %v7475_v17 }
 0x4b9   :  { %v1472_v62 = vsel %vm295_vm15, %v1471_v31, %v6861_v45  ;;  %v1416_v26 = vsel %vm295_vm15, %v1415_v20, %v6860_v59 }
 0x4ba   :  { %v1478_v25 = vperm.slane %v1472_v62, %v7475_v17  ;;  %v1509_v36 = vrot.slane %v1482_v18, 4  ;;  %v1422_v14 = vperm.slane %v1416_v26, %v7475_v17  ;;  %v1452_v32 = vsel %vm295_vm15, %v1451_v39, %v1426_v0 }
 0x4bb   :  { %v1453_v42 = vrot.slane %v1426_v0, 4  ;;  %v1458_v29 = vperm.slane %v1452_v32, %v7479_v22  ;;  %v1508_v24 = vsel %vm295_vm15, %v1507_v47, %v1482_v18 }
 0x4bc   :  { %v1497_v38 = vrot.slane %v1478_v25, 4  ;;  %v1440_v55 = vsel %vm295_vm15, %v1439_v61, %v1422_v14  ;;  %v1441_v11 = vrot.slane %v1422_v14, 4  ;;  %v1496_v46 = vsel %vm295_vm15, %v1495_v4, %v1478_v25 }
 0x4bd   :  { %v1446_v56 = vperm.slane %v1440_v55, %v7479_v22  ;;  %v1454_v16 = vsel %vm295_vm15, %v1438_v8, %v1453_v42  ;;  %v1467_v34 = vrot.slane %v1458_v29, 4  ;;  %v1502_v12 = vperm.slane %v1496_v46, %v7479_v22 }
 0x4be   :  { %v1442_v30 = vsel %vm295_vm15, %v1434_v6, %v1441_v11  ;;  %v1462_v13 = vperm.slane %v1454_v16, %v7479_v22  ;;  %v1498_v51 = vsel %vm295_vm15, %v1490_v19, %v1497_v38  ;;  %v1510_v45 = vsel %vm295_vm15, %v1494_v43, %v1509_v36 }
 0x4bf   :  { %v1450_v54 = vperm.slane %v1442_v30, %v7479_v22  ;;  %v1463_v59 = vrot.slane %v1446_v56, 4  ;;  %v1506_v2 = vperm.slane %v1498_v51, %v7479_v22  ;;  %v1514_v52 = vperm.slane %v1508_v24, %v7479_v22 }
 0x4c0   :  { %v1469_v40 = vrot.slane %v1462_v13, 4  ;;  %v1518_v8 = vperm.slane %v1510_v45, %v7479_v22  ;;  %v1519_v7 = vrot.slane %v1502_v12, 4  ;;  %v1468_v27 = vsel %vm295_vm15, 0.0, %v1467_v34 }
 0x4c1   :  { %v1464_v48 = vsel %vm295_vm15, 0.0, %v1463_v59  ;;  %v1465_v6 = vrot.slane %v1450_v54, 4  ;;  %v1521_v23 = vrot.slane %v1506_v2, 4  ;;  %v1523_v57 = vrot.slane %v1514_v52, 4 }
 0x4c2   :  { %v1470_v19 = vsel %vm295_vm15, 0.0, %v1469_v40  ;;  %v1520_v43 = vsel %vm295_vm15, 0.0, %v1519_v7  ;;  %v1525_v33 = vrot.slane %v1518_v8, 4  ;;  %v1646_v35 = vsel %vm295_vm15, %v1469_v40, %v1458_v29 }
 0x4c3   :  { %v1466_v47 = vsel %vm295_vm15, 0.0, %v1465_v6  ;;  %v1522_v39 = vsel %vm295_vm15, 0.0, %v1521_v23  ;;  %v1635_v31 = vsel %vm295_vm15, %v1465_v6, %v1446_v56  ;;  %v1524_v20 = vsel %vm295_vm15, 0.0, %v1523_v57 }
 0x4c4   :  { %v1526_v58 = vsel %vm295_vm15, 0.0, %v1525_v33  ;;  %v1639_v4 = vperm.slane %v1635_v31, %v7475_v17  ;;  %v1640_v61 = vrot.slane %v1466_v47, 4  ;;  %v1650_v18 = vperm.slane %v1646_v35, %v7475_v17 }
 0x4c5   :  { %v1651_v0 = vrot.slane %v1470_v19, 4  ;;  %v1689_v62 = vsel %vm295_vm15, %v1521_v23, %v1502_v12  ;;  %v1694_v26 = vrot.slane %v1522_v39, 4  ;;  %v1700_v14 = vsel %vm295_vm15, %v1525_v33, %v1514_v52 }
 0x4c6   :  { %v1641_v25 = vsel %vm295_vm15, %v1640_v61, %v1464_v48  ;;  %v1693_v36 = vperm.slane %v1689_v62, %v7475_v17  ;;  %v1705_v32 = vrot.slane %v1526_v58, 4  ;;  %v1671_v29 = vrot.slane %v1650_v18, 4 }
 0x4c7   :  { %v1652_v42 = vsel %vm295_vm15, %v1651_v0, %v1468_v27  ;;  %v1695_v24 = vsel %vm295_vm15, %v1694_v26, %v1520_v43  ;;  %v1704_v38 = vperm.slane %v1700_v14, %v7475_v17  ;;  %v1645_v46 = vperm.slane %v1641_v25, %v7475_v17 }
 0x4c8   :  { %v1656_v55 = vperm.slane %v1652_v42, %v7475_v17  ;;  %v1706_v11 = vsel %vm295_vm15, %v1705_v32, %v1524_v20  ;;  %v1659_v56 = vrot.slane %v1639_v4, 4  ;;  %v1699_v12 = vperm.slane %v1695_v24, %v7475_v17 }
 0x4c9   :  { %v1710_v16 = vperm.slane %v1706_v11, %v7475_v17  ;;  %v1725_v34 = vrot.slane %v1704_v38, 4  ;;  %v1713_v30 = vrot.slane %v1693_v36, 4  ;;  %v1657_v54 = vrot.slane %v1645_v46, 4 }
 0x4ca   :  { %v1669_v13 = vrot.slane %v1656_v55, 4  ;;  %v1660_v51 = vsel %vm295_vm15, %v1645_v46, %v1659_v56  ;;  %v1672_v45 = vsel %vm295_vm15, %v1656_v55, %v1671_v29  ;;  %v1711_v57 = vrot.slane %v1699_v12, 4 }
 0x4cb   :  { %v1723_v59 = vrot.slane %v1710_v16, 4  ;;  %v1668_v2 = vperm.slane %v1660_v51, %v7479_v22  ;;  %v1680_v40 = vperm.slane %v1672_v45, %v7479_v22  ;;  %v1714_v52 = vsel %vm295_vm15, %v1699_v12, %v1713_v30 }
 0x4cc   :  { %v1722_v8 = vperm.slane %v1714_v52, %v7479_v22  ;;  %v1726_v7 = vsel %vm295_vm15, %v1710_v16, %v1725_v34  ;;  %v1658_v48 = vsel %vm295_vm15, %v1657_v54, %v1639_v4  ;;  %v1670_v6 = vsel %vm295_vm15, %v1669_v13, %v1650_v18 }
 0x4cd   :  { %v1685_v27 = vrot.slane %v1680_v40, 4  ;;  %v1734_v23 = vperm.slane %v1726_v7, %v7479_v22  ;;  %v1664_v19 = vperm.slane %v1658_v48, %v7479_v22  ;;  %v1676_v43 = vperm.slane %v1670_v6, %v7479_v22 }
 0x4ce   :  { %v1724_v33 = vsel %vm295_vm15, %v1723_v59, %v1704_v38  ;;  %v1687_v47 = vrot.slane %v1668_v2, 4  ;;  %v1741_v39 = vrot.slane %v1722_v8, 4  ;;  %v1712_v61 = vsel %vm295_vm15, %v1711_v57, %v1693_v36 }
 0x4cf   :  { %v1686_v31 = vsel %vm295_vm15, %v1685_v27, %v1668_v2  ;;  %v1739_v35 = vrot.slane %v1734_v23, 4  ;;  %v1681_v20 = vrot.slane %v1676_v43, 4  ;;  %v1730_v58 = vperm.slane %v1724_v33, %v7479_v22 }
 0x4d0   :  { %v1755_v4 = vpack.c.bf16 %v1686_v31, %v1686_v31  ;;  %v1688_v18 = vsel %vm295_vm15, %v1680_v40, %v1687_v47  ;;  %v1742_v0 = vsel %vm295_vm15, %v1734_v23, %v1741_v39  ;;  %v1718_v25 = vperm.slane %v1712_v61, %v7479_v22 }
 0x4d1   :  { %v1740_v62 = vsel %vm295_vm15, %v1739_v35, %v1722_v8  ;;  %v1682_v26 = vsel %vm295_vm15, %v1681_v20, %v1664_v19  ;;  %v1735_v14 = vrot.slane %v1730_v58, 4  ;;  %v1757_v24 = vpack.c.bf16 %v1688_v18, %v1688_v18 }
 0x4d2   :  { %v1756_v32 = vpack.c.bf16 %v1740_v62, %v1740_v62  ;;  %v2368_v42 = vunpack.c.l.b16 %v1755_v4  ;;  %v1751_v29 = vpack.c.bf16 %v1682_v26, %v1682_v26  ;;  %v1758_v55 = vpack.c.bf16 %v1742_v0, %v1742_v0 }
 0x4d3   :  { %v1736_v38 = vsel %vm295_vm15, %v1735_v14, %v1718_v25  ;;  %v1683_v11 = vrot.slane %v1664_v19, 4  ;;  %v1737_v36 = vrot.slane %v1718_v25, 4  ;;  %v2396_v34 = vunpack.c.l.b16 %v1757_v24 }
 0x4d4   :  { %v2369_v46 = vunpack.c.l.b16 %v1756_v32  ;;  %v1752_v56 = vpack.c.bf16 %v1736_v38, %v1736_v38  ;;  %v2312_v16 = vunpack.c.l.b16 %v1751_v29  ;;  %v2397_v12 = vunpack.c.l.b16 %v1758_v55 }
 0x4d5   :  { %v1684_v30 = vsel %vm295_vm15, %v1676_v43, %v1683_v11  ;;  %v1738_v13 = vsel %vm295_vm15, %v1730_v58, %v1737_v36 }
 0x4d6   :  { %v2370_v51 = vpack.c.b16 %v2369_v46, %v2368_v42  ;;  %v2313_v45 = vunpack.c.l.b16 %v1752_v56  ;;  %v1753_v54 = vpack.c.bf16 %v1684_v30, %v1684_v30  ;;  %v1754_v59 = vpack.c.bf16 %v1738_v13, %v1738_v13 }
 0x4d7   :  { %v2398_v2 = vpack.c.b16 %v2397_v12, %v2396_v34 }
 0x4d8   :  { %2382 = vmatpush.bf16.msra.mxu3 %v2370_v51  ;;  %v2314_v40 = vpack.c.b16 %v2313_v45, %v2312_v16  ;;  %v2340_v52 = vunpack.c.l.b16 %v1753_v54  ;;  %v2341_v8 = vunpack.c.l.b16 %v1754_v59 }
 0x4d9   :  { %2410 = vmatpush.bf16.msrb.mxu0 %v2398_v2 }
 0x4da   :  { %2326 = vmatpush.bf16.msra.mxu1 %v2314_v40  ;;  %v2342_v7 = vpack.c.b16 %v2341_v8, %v2340_v52 }
 0x4dc   :  { %2354 = vmatpush.bf16.msra.mxu2 %v2342_v7 }
 0x4e8   :  { %v2099_v35 = vpop.xlane.xlu2 %2098 }
 0x4e9   :  { %v2105_v48 = vpop.xlane.xlu0 %2104 }
 0x4ea   :  { %7107 = vrcp.f32 %v2105_v48 }
 0x4f0   :  { %v2108_v6 = vpop.xlane.xlu1 %2107  ;;  %v7108_v27 = vpop.eup %7107 }
 0x4f1   :  { %7109 = vrcp.f32 %v2108_v6  ;;  %v2163_v23 = vmul.f32 %v7108_v27, %v8374_v53 }
 0x4f3   :  { %v2179_v43 = vpack.c.bf16 %v2163_v23, %v2163_v23 }
 0x4f5   :  { %v2223_v47 = vunpack.c.l.b16 %v2179_v43 }
 0x4f7   :  { %v7110_v19 = vpop.eup %7109 }
 0x4f8   :  { %v2164_v57 = vmul.f32 %v7110_v19, %v8380_v50 }
 0x4fa   :  { %v2180_v33 = vpack.c.bf16 %v2164_v57, %v2164_v57 }
 0x4fc   :  { %v2224_v39 = vunpack.c.l.b16 %v2180_v33 }
 0x4fe   :  { %v2225_v31 = vpack.c.b16 %v2224_v39, %v2223_v47 }
 0x500   :  { %6550 = vmatmul.msk.bf16.vlgmr.msrb.gmra.mxu2 %vm2000_vm2, %v2225_v31 }
 0x504   :  { %v2111_v20 = vpop.xlane.xlu1 %2110 }
 0x505   :  { %7111 = vrcp.f32 %v2111_v20 }
 0x506   :  { %7113 = vrcp.f32 %v2099_v35 }
 0x50b   :  { %v7112_v58 = vpop.eup %7111 }
 0x50c   :  { %v2114_v4 = vpop.xlane.xlu2 %2113  ;;  %v2102_v61 = vpop.xlane.xlu1 %2101  ;;  %v2165_v53 = vmul.f32 %v7112_v58, %v8391_v9 }
 0x50d   :  { %7115 = vrcp.f32 %v2114_v4  ;;  %v7114_v18 = vpop.eup %7113  ;;  %v2117_v0 = vpop.xlane.xlu0 %2116 }
 0x50e   :  { %7117 = vrcp.f32 %v2102_v61  ;;  %v2161_v50 = vmul.f32 %v7114_v18, %v8372_v44  ;;  %v2181_v62 = vpack.c.bf16 %v2165_v53, %v2165_v53 }
 0x50f   :  { %7119 = vrcp.f32 %v2117_v0 }
 0x510   :  { %v2177_v29 = vpack.c.bf16 %v2161_v50, %v2161_v50  ;;  %v2251_v11 = vunpack.c.l.b16 %v2181_v62 }
 0x512   :  { %v2195_v44 = vunpack.c.l.b16 %v2177_v29 }
 0x513   :  { %v7116_v26 = vpop.eup %7115 }
 0x514   :  { %v7118_v25 = vpop.eup %7117  ;;  %v2166_v14 = vmul.f32 %v7116_v26, %v8399_v63  ;;  %v2120_v32 = vpop.xlane.xlu2 %2119 }
 0x515   :  { %v7120_v42 = vpop.eup %7119  ;;  %7121 = vrcp.f32 %v2120_v32  ;;  %v2162_v24 = vmul.f32 %v7118_v25, %v8397_v10  ;;  %v2135_v38 = vpop.xlane.xlu1 %2134 }
 0x516   :  { %v2182_v55 = vpack.c.bf16 %v2166_v14, %v2166_v14  ;;  %v2167_v9 = vmul.f32 %v7120_v42, %v8404_v28  ;;  %v2123_v36 = vpop.xlane.xlu0 %2122  ;;  %7123 = vrcp.f32 %v2135_v38 }
 0x517   :  { %v2178_v46 = vpack.c.bf16 %v2162_v24, %v2162_v24  ;;  %7125 = vrcp.f32 %v2123_v36 }
 0x518   :  { %v2252_v56 = vunpack.c.l.b16 %v2182_v55  ;;  %v2183_v12 = vpack.c.bf16 %v2167_v9, %v2167_v9 }
 0x519   :  { %v2196_v16 = vunpack.c.l.b16 %v2178_v46 }
 0x51a   :  { %v2253_v34 = vpack.c.b16 %v2252_v56, %v2251_v11  ;;  %v2279_v45 = vunpack.c.l.b16 %v2183_v12  ;;  %v6724_v11 = vld [vmem:[%s10469_s2 + $0x14] sm:$0xf0] }
 0x51b   :  { %v7122_v63 = vpop.eup %7121  ;;  %v2197_v30 = vpack.c.b16 %v2196_v16, %v2195_v44 }
 0x51c   :  { %v2168_v13 = vmul.f32 %v7122_v63, %v8417_v60  ;;  %v2129_v51 = vpop.xlane.xlu2 %2128  ;;  %6551 = vmatmul.msk.bf16.vlgmr.msrb.gmra.mxu3 %vm2000_vm2, %v2253_v34  ;;  %v7124_v59 = vpop.eup %7123 }
 0x51d   :  { %7127 = vrcp.f32 %v2129_v51  ;;  %6549 = vmatmul.msk.bf16.vlgmr.msrb.gmra.mxu1 %vm2000_vm2, %v2197_v30  ;;  %v2132_v10 = vpop.xlane.xlu1 %2131  ;;  %v7126_v40 = vpop.eup %7125  ;;  %v2173_v8 = vmul.f32 %v7124_v59, %v8413_v41 }
 0x51e   :  { %v2184_v28 = vpack.c.bf16 %v2168_v13, %v2168_v13  ;;  %7129 = vrcp.f32 %v2132_v10  ;;  %v2138_v54 = vpop.xlane.xlu0 %2137  ;;  %v2169_v41 = vmul.f32 %v7126_v40, %v8410_v1 }
 0x51f   :  { %7131 = vrcp.f32 %v2138_v54  ;;  %v2189_v57 = vpack.c.bf16 %v2173_v8, %v2173_v8 }
 0x520   :  { %v2280_v2 = vunpack.c.l.b16 %v2184_v28 }
 0x521   :  { %v2363_v20 = vunpack.c.l.b16 %v2189_v57 }
 0x522   :  { %v2281_v52 = vpack.c.b16 %v2280_v2, %v2279_v45 }
 0x523   :  { %v7128_v60 = vpop.eup %7127 }
 0x524   :  { %v7130_v7 = vpop.eup %7129  ;;  %v2171_v48 = vmul.f32 %v7128_v60, %v8430_v21  ;;  %v2126_v6 = vpop.xlane.xlu2 %2125  ;;  %6552 = vmatmul.msk.bf16.vlgmr.msra.gmra.mxu0 %vm2000_vm2, %v2281_v52 }
 0x525   :  { %v7132_v27 = vpop.eup %7131  ;;  %7133 = vrcp.f32 %v2126_v6  ;;  %v2172_v23 = vmul.f32 %v7130_v7, %v8428_v15  ;;  %v2141_v19 = vpop.xlane.xlu1 %2140  ;;  %v2185_v15 = vpack.c.bf16 %v2169_v41, %v2169_v41 }
 0x526   :  { %v2187_v43 = vpack.c.bf16 %v2171_v48, %v2171_v48  ;;  %v2174_v33 = vmul.f32 %v7132_v27, %v8432_v5  ;;  %7135 = vrcp.f32 %v2141_v19  ;;  %v2144_v47 = vpop.xlane.xlu0 %2143 }
 0x527   :  { %v2188_v39 = vpack.c.bf16 %v2172_v23, %v2172_v23  ;;  %7137 = vrcp.f32 %v2144_v47  ;;  %v2307_v25 = vunpack.c.l.b16 %v2185_v15 }
 0x528   :  { %v2190_v31 = vpack.c.bf16 %v2174_v33, %v2174_v33  ;;  %v2335_v21 = vunpack.c.l.b16 %v2187_v43 }
 0x529   :  { %v2336_v35 = vunpack.c.l.b16 %v2188_v39 }
 0x52a   :  { %v2364_v58 = vunpack.c.l.b16 %v2190_v31 }
 0x52b   :  { %v7134_v4 = vpop.eup %7133  ;;  %v2337_v61 = vpack.c.b16 %v2336_v35, %v2335_v21 }
 0x52c   :  { %v7136_v18 = vpop.eup %7135  ;;  %v2170_v53 = vmul.f32 %v7134_v4, %v8442_v3  ;;  %v2365_v0 = vpack.c.b16 %v2364_v58, %v2363_v20 }
 0x52d   :  { %v7138_v50 = vpop.eup %7137  ;;  %v2175_v5 = vmul.f32 %v7136_v18, %v8440_v49  ;;  %6554 = vmatmul.msk.bf16.vlgmr.msra.gmra.mxu2 %vm2000_vm2, %v2337_v61 }
 0x52e   :  { %v2186_v62 = vpack.c.bf16 %v2170_v53, %v2170_v53  ;;  %v2176_v1 = vmul.f32 %v7138_v50, %v8444_v37  ;;  %6555 = vmatmul.msk.bf16.vlgmr.msra.gmra.mxu3 %vm2000_vm2, %v2365_v0  ;;  %v6563_v37 = vld [vmem:[%s10469_s2 + $0x10] sm:$0xf] }
 0x52f   :  { %v2191_v26 = vpack.c.bf16 %v2175_v5, %v2175_v5  ;;  %v6564_v36 = vor.u32 %v6724_v11, %v6563_v37 }
 0x530   :  { %v2308_v14 = vunpack.c.l.b16 %v2186_v62  ;;  %v2192_v32 = vpack.c.bf16 %v2176_v1, %v2176_v1 }
 0x531   :  { %v2391_v42 = vunpack.c.l.b16 %v2191_v26  ;;  %2938 = vrot.lane.b32.xlu2 %v6564_v36, %s7285_s1 }
 0x532   :  { %v2309_v29 = vpack.c.b16 %v2308_v14, %v2307_v25  ;;  %v2392_v24 = vunpack.c.l.b16 %v2192_v32 }
 0x534   :  { %v2393_v38 = vpack.c.b16 %v2392_v24, %v2391_v42  ;;  %6553 = vmatmul.msk.bf16.vlgmr.msra.gmra.mxu1 %vm2000_vm2, %v2309_v29 }
 0x536   :  { %6556 = vmatmul.msk.bf16.vlgmr.msrb.gmra.mxu0 %vm2000_vm2, %v2393_v38 }
 0x583   :  { %v2244_v3 = vpop.f32.mrf.mxu2 }
 0x584   :  { %v2431_v46 = vrot.slane %v2244_v3, 4 }
 0x58b   :  { %v2246_v8 = vpop.f32.mrf.mxu2 }
 0x58c   :  { %v2487_v33 = vrot.slane %v2246_v8, 4 }
 0x59a   :  { %v2216_v49 = vpop.f32.mrf.mxu1 }
 0x59b   :  { %v2419_v55 = vrot.slane %v2216_v49, 4 }
 0x59f   :  { %v2272_v9 = vpop.f32.mrf.mxu3 }
 0x5a0   :  { %v2417_v56 = vrot.slane %v2272_v9, 4  ;;  %v2420_v44 = vsel %vm295_vm15, %v2272_v9, %v2419_v55 }
 0x5a1   :  { %v2428_v16 = vperm.slane %v2420_v44, %v7475_v17  ;;  %v2300_v34 = vpop.f32.mrf.mxu0 }
 0x5a2   :  { %v2418_v12 = vsel %vm295_vm15, %v2417_v56, %v2216_v49  ;;  %v2429_v63 = vrot.slane %v2300_v34, 4  ;;  %v2432_v30 = vsel %vm295_vm15, %v2300_v34, %v2431_v46  ;;  %v2218_v13 = vpop.f32.mrf.mxu1 }
 0x5a3   :  { %v2424_v51 = vperm.slane %v2418_v12, %v7475_v17  ;;  %v2455_v10 = vrot.slane %v2428_v16, 4  ;;  %v2440_v28 = vperm.slane %v2432_v30, %v7475_v17  ;;  %v2475_v54 = vrot.slane %v2218_v13, 4 }
 0x5a4   :  { %v2430_v45 = vsel %vm295_vm15, %v2429_v63, %v2244_v3 }
 0x5a5   :  { %v2443_v59 = vrot.slane %v2424_v51, 4  ;;  %v2436_v2 = vperm.slane %v2430_v45, %v7475_v17  ;;  %v2453_v40 = vrot.slane %v2440_v28, 4  ;;  %v2456_v52 = vsel %vm295_vm15, %v2440_v28, %v2455_v10 }
 0x5a6   :  { %v2464_v60 = vperm.slane %v2456_v52, %v7479_v22 }
 0x5a7   :  { %v2441_v7 = vrot.slane %v2436_v2, 4  ;;  %v2444_v48 = vsel %vm295_vm15, %v2436_v2, %v2443_v59  ;;  %v2454_v6 = vsel %vm295_vm15, %v2453_v40, %v2428_v16  ;;  %v2274_v27 = vpop.f32.mrf.mxu3 }
 0x5a8   :  { %v2452_v23 = vperm.slane %v2444_v48, %v7479_v22  ;;  %v2460_v19 = vperm.slane %v2454_v6, %v7479_v22  ;;  %v2471_v43 = vrot.slane %v2464_v60, 4  ;;  %v2473_v57 = vrot.slane %v2274_v27, 4 }
 0x5a9   :  { %v2442_v47 = vsel %vm295_vm15, %v2441_v7, %v2424_v51  ;;  %v2476_v39 = vsel %vm295_vm15, %v2274_v27, %v2475_v54  ;;  %v2302_v18 = vpop.f32.mrf.mxu0 }
 0x5aa   :  { %v2448_v41 = vperm.slane %v2442_v47, %v7479_v22  ;;  %v2467_v31 = vrot.slane %v2452_v23, 4  ;;  %v2469_v21 = vrot.slane %v2460_v19, 4  ;;  %v2472_v35 = vsel %vm295_vm15, 0.0, %v2471_v43 }
 0x5ab   :  { %v2652_v20 = vsel %vm295_vm15, %v2471_v43, %v2460_v19  ;;  %v2657_v58 = vrot.slane %v2472_v35, 4  ;;  %v2474_v4 = vsel %vm295_vm15, %v2473_v57, %v2218_v13  ;;  %v2484_v61 = vperm.slane %v2476_v39, %v7475_v17 }
 0x5ac   :  { %v2465_v15 = vrot.slane %v2448_v41, 4  ;;  %v2468_v53 = vsel %vm295_vm15, 0.0, %v2467_v31  ;;  %v2470_v0 = vsel %vm295_vm15, 0.0, %v2469_v21  ;;  %v2641_v50 = vsel %vm295_vm15, %v2467_v31, %v2448_v41 }
 0x5ad   :  { %v8590_v5 = vperm.slane %v2641_v50, %v7475_v17  ;;  %v2646_v62 = vrot.slane %v2468_v53, 4  ;;  %v8593_v1 = vperm.slane %v2652_v20, %v7475_v17  ;;  %v2658_v26 = vsel %vm295_vm15, %v2657_v58, %v2470_v0 }
 0x5ae   :  { %v2466_v25 = vsel %vm295_vm15, 0.0, %v2465_v15  ;;  %v2480_v14 = vperm.slane %v2474_v4, %v7475_v17  ;;  %v2511_v32 = vrot.slane %v2484_v61, 4  ;;  %v2485_v42 = vrot.slane %v2302_v18, 4 }
 0x5af   :  { %v2488_v29 = vsel %vm295_vm15, %v2302_v18, %v2487_v33  ;;  %v2647_v24 = vsel %vm295_vm15, %v2646_v62, %v2466_v25  ;;  %v8601_v38 = vperm.slane %v2658_v26, %v7475_v17  ;;  %v2665_v11 = vrot.slane %v8590_v5, 4 }
 0x5b0   :  { %v2499_v49 = vrot.slane %v2480_v14, 4  ;;  %v2486_v3 = vsel %vm295_vm15, %v2485_v42, %v2246_v8  ;;  %v2496_v55 = vperm.slane %v2488_v29, %v7475_v17  ;;  %v2356_v37 = vpop.f32.mrf.mxu2  ;;  %v8608_v44 = vperm.slane %v2647_v24, %v7475_v17 }
 0x5b1   :  { %v2492_v9 = vperm.slane %v2486_v3, %v7475_v17  ;;  %v2328_v36 = vpop.f32.mrf.mxu1  ;;  %v2543_v46 = vrot.slane %v2356_v37, 4  ;;  %v2384_v56 = vpop.f32.mrf.mxu3  ;;  %v2677_v16 = vrot.slane %v8593_v1, 4  ;;  %v2675_v45 = vrot.slane %v8601_v38, 4 }
 0x5b2   :  { %v2509_v34 = vrot.slane %v2496_v55, 4  ;;  %v2512_v12 = vsel %vm295_vm15, %v2496_v55, %v2511_v32  ;;  %v2531_v63 = vrot.slane %v2328_v36, 4  ;;  %v2529_v30 = vrot.slane %v2384_v56, 4 }
 0x5b3   :  { %v2497_v13 = vrot.slane %v2492_v9, 4  ;;  %v2500_v51 = vsel %vm295_vm15, %v2492_v9, %v2499_v49  ;;  %v2520_v10 = vperm.slane %v2512_v12, %v7479_v22  ;;  %v2412_v28 = vpop.f32.mrf.mxu0  ;;  %v8628_v33 = vsel %vm295_vm15, %v8608_v44, %v2665_v11 }
 0x5b4   :  { %v2508_v54 = vperm.slane %v2500_v51, %v7479_v22  ;;  %v2510_v59 = vsel %vm295_vm15, %v2509_v34, %v2484_v61  ;;  %v2530_v2 = vsel %vm295_vm15, %v2529_v30, %v2328_v36  ;;  %v2532_v40 = vsel %vm295_vm15, %v2384_v56, %v2531_v63 }
 0x5b5   :  { %v2498_v52 = vsel %vm295_vm15, %v2497_v13, %v2480_v14  ;;  %v2516_v8 = vperm.slane %v2510_v59, %v7479_v22  ;;  %v2527_v60 = vrot.slane %v2520_v10, 4  ;;  %v2536_v7 = vperm.slane %v2530_v2, %v7475_v17 }
 0x5b6   :  { %v2504_v48 = vperm.slane %v2498_v52, %v7479_v22  ;;  %v2523_v6 = vrot.slane %v2508_v54, 4  ;;  %v2540_v27 = vperm.slane %v2532_v40, %v7475_v17  ;;  %v2541_v23 = vrot.slane %v2412_v28, 4 }
 0x5b7   :  { %v2525_v19 = vrot.slane %v2516_v8, 4  ;;  %v2528_v43 = vsel %vm295_vm15, 0.0, %v2527_v60  ;;  %v2706_v57 = vsel %vm295_vm15, %v2527_v60, %v2516_v8  ;;  %v2555_v31 = vrot.slane %v2536_v7, 4 }
 0x5b8   :  { %v2521_v47 = vrot.slane %v2504_v48, 4  ;;  %v8631_v39 = vsel %vm295_vm15, 0.0, %v2523_v6  ;;  %v2695_v41 = vsel %vm295_vm15, %v2523_v6, %v2504_v48  ;;  %v2358_v21 = vpop.f32.mrf.mxu2  ;;  %v8640_v4 = vperm.slane %v2706_v57, %v7475_v17 }
 0x5b9   :  { %v2526_v35 = vsel %vm295_vm15, 0.0, %v2525_v19  ;;  %v8636_v20 = vperm.slane %v2695_v41, %v7475_v17  ;;  %v2700_v58 = vrot.slane %v8631_v39, 4  ;;  %v2330_v61 = vpop.f32.mrf.mxu1  ;;  %v2386_v18 = vpop.f32.mrf.mxu3  ;;  %v2711_v15 = vrot.slane %v2528_v43, 4 }
 0x5ba   :  { %v2567_v53 = vrot.slane %v2540_v27, 4  ;;  %v2587_v0 = vrot.slane %v2330_v61, 4  ;;  %v2542_v50 = vsel %vm295_vm15, %v2541_v23, %v2356_v37  ;;  %v8644_v62 = vsel %vm295_vm15, 0.0, %v2521_v47 }
 0x5bb   :  { %v2544_v26 = vsel %vm295_vm15, %v2412_v28, %v2543_v46  ;;  %v2548_v25 = vperm.slane %v2542_v50, %v7475_v17  ;;  %v2599_v14 = vrot.slane %v2358_v21, 4  ;;  %v2414_v32 = vpop.f32.mrf.mxu0  ;;  %v2585_v29 = vrot.slane %v2386_v18, 4 }
 0x5bc   :  { %v2552_v42 = vperm.slane %v2544_v26, %v7475_v17  ;;  %v2588_v24 = vsel %vm295_vm15, %v2386_v18, %v2587_v0  ;;  %v2597_v49 = vrot.slane %v2414_v32, 4  ;;  %v2712_v52 = vsel %vm295_vm15, %v2711_v15, %v2526_v35 }
 0x5bd   :  { %v2553_v3 = vrot.slane %v2548_v25, 4  ;;  %v2556_v55 = vsel %vm295_vm15, %v2548_v25, %v2555_v31  ;;  %v2596_v37 = vperm.slane %v2588_v24, %v7475_v17  ;;  %v2600_v11 = vsel %vm295_vm15, %v2414_v32, %v2599_v14 }
 0x5be   :  { %v2564_v9 = vperm.slane %v2556_v55, %v7479_v22  ;;  %v2565_v36 = vrot.slane %v2552_v42, 4  ;;  %v2568_v46 = vsel %vm295_vm15, %v2552_v42, %v2567_v53  ;;  %v2586_v56 = vsel %vm295_vm15, %v2585_v29, %v2330_v61 }
 0x5bf   :  { %v2554_v34 = vsel %vm295_vm15, %v2553_v3, %v2536_v7  ;;  %v2576_v12 = vperm.slane %v2568_v46, %v7479_v22  ;;  %v2592_v63 = vperm.slane %v2586_v56, %v7475_v17  ;;  %v2623_v30 = vrot.slane %v2596_v37, 4 }
 0x5c0   :  { %v8660_v13 = vperm.slane %v2554_v34, %v7479_v22  ;;  %v2566_v51 = vsel %vm295_vm15, %v2565_v36, %v2540_v27  ;;  %v2579_v10 = vrot.slane %v2564_v9, 4  ;;  %v2598_v28 = vsel %vm295_vm15, %v2597_v49, %v2358_v21 }
 0x5c1   :  { %v2572_v54 = vperm.slane %v2566_v51, %v7479_v22  ;;  %v2583_v59 = vrot.slane %v2576_v12, 4  ;;  %v2611_v2 = vrot.slane %v2592_v63, 4  ;;  %v2604_v40 = vperm.slane %v2598_v28, %v7475_v17 }
 0x5c2   :  { %v2577_v8 = vrot.slane %v8660_v13, 4  ;;  %v8669_v60 = vsel %vm295_vm15, 0.0, %v2579_v10  ;;  %v2608_v7 = vperm.slane %v2600_v11, %v7475_v17  ;;  %v8675_v27 = vsel %vm295_vm15, %v2579_v10, %v8660_v13 }
 0x5c3   :  { %v2581_v48 = vrot.slane %v2572_v54, 4  ;;  %v2584_v6 = vsel %vm295_vm15, 0.0, %v2583_v59  ;;  %v2760_v23 = vsel %vm295_vm15, %v2583_v59, %v2572_v54  ;;  %v2609_v57 = vrot.slane %v2604_v40, 4 }
 0x5c4   :  { %v8679_v19 = vperm.slane %v2760_v23, %v7475_v17  ;;  %v2765_v43 = vrot.slane %v2584_v6, 4  ;;  %v2612_v47 = vsel %vm295_vm15, %v2604_v40, %v2611_v2  ;;  %v2621_v21 = vrot.slane %v2608_v7, 4 }
 0x5c5   :  { %v2582_v41 = vsel %vm295_vm15, 0.0, %v2581_v48  ;;  %v2620_v31 = vperm.slane %v2612_v47, %v7479_v22  ;;  %v2624_v35 = vsel %vm295_vm15, %v2608_v7, %v2623_v30  ;;  %v2754_v61 = vrot.slane %v8669_v60, 4 }
 0x5c6   :  { %v2766_v18 = vsel %vm295_vm15, %v2765_v43, %v2582_v41  ;;  %v2610_v15 = vsel %vm295_vm15, %v2609_v57, %v2592_v63  ;;  %v2632_v53 = vperm.slane %v2624_v35, %v7479_v22  ;;  %v2785_v0 = vrot.slane %v8679_v19, 4 }
 0x5c7   :  { %v2616_v50 = vperm.slane %v2610_v15, %v7479_v22  ;;  %v2622_v26 = vsel %vm295_vm15, %v2621_v21, %v2596_v37  ;;  %v2635_v25 = vrot.slane %v2620_v31, 4  ;;  %v2674_v42 = vperm.slane %v8628_v33, %v7479_v22  ;;  %v6723_v21 = vld [vmem:[%s10469_s2 + $0x4] sm:$0xf0] }
 0x5c8   :  { %v2628_v14 = vperm.slane %v2622_v26, %v7479_v22  ;;  %v2639_v32 = vrot.slane %v2632_v53, 4  ;;  %v2678_v29 = vsel %vm295_vm15, %v8601_v38, %v2677_v16  ;;  %v8700_v24 = vperm.slane %v2766_v18, %v7475_v17 }
 0x5c9   :  { %v2633_v49 = vrot.slane %v2616_v50, 4  ;;  %v8703_v3 = vsel %vm295_vm15, 0.0, %v2635_v25  ;;  %v8706_v55 = vsel %vm295_vm15, %v2635_v25, %v2616_v50  ;;  %v2686_v9 = vperm.slane %v2678_v29, %v7479_v22 }
 0x5ca   :  { %v2637_v37 = vrot.slane %v2628_v14, 4  ;;  %v2640_v11 = vsel %vm295_vm15, 0.0, %v2639_v32  ;;  %v2814_v33 = vsel %vm295_vm15, %v2639_v32, %v2628_v14  ;;  %v2693_v46 = vrot.slane %v2674_v42, 4 }
 0x5cb   :  { %v8712_v36 = vperm.slane %v2814_v33, %v7475_v17  ;;  %v2819_v16 = vrot.slane %v2640_v11, 4  ;;  %v2701_v56 = vsel %vm295_vm15, %v2700_v58, %v8644_v62  ;;  %v2716_v63 = vperm.slane %v2712_v52, %v7475_v17 }
 0x5cc   :  { %v2638_v34 = vsel %vm295_vm15, 0.0, %v2637_v37  ;;  %v2705_v12 = vperm.slane %v2701_v56, %v7475_v17  ;;  %v2719_v30 = vrot.slane %v8636_v20, 4  ;;  %v2808_v51 = vrot.slane %v8703_v3, 4 }
 0x5cd   :  { %v2820_v10 = vsel %vm295_vm15, %v2819_v16, %v2638_v34  ;;  %v2839_v28 = vrot.slane %v8712_v36, 4  ;;  %v2731_v54 = vrot.slane %v8640_v4, 4  ;;  %v2694_v39 = vsel %vm295_vm15, %v2686_v9, %v2693_v46 }
 0x5ce   :  { %v2720_v58 = vsel %vm295_vm15, %v2705_v12, %v2719_v30  ;;  %v2691_v62 = vrot.slane %v2686_v9, 4  ;;  %v2663_v59 = vrot.slane %v8608_v44, 4  ;;  %v2676_v52 = vsel %vm295_vm15, %v2675_v45, %v8593_v1 }
 0x5cf   :  { %v2728_v2 = vperm.slane %v2720_v58, %v7479_v22  ;;  %v2732_v40 = vsel %vm295_vm15, %v2716_v63, %v2731_v54  ;;  %v2717_v7 = vrot.slane %v2705_v12, 4  ;;  %v8736_v48 = vperm.slane %v2820_v10, %v7475_v17 }
 0x5d0   :  { %v2740_v6 = vperm.slane %v2732_v40, %v7479_v22  ;;  %v2664_v23 = vsel %vm295_vm15, %v2663_v59, %v8590_v5  ;;  %v8742_v44 = vperm.slane %v2676_v52, %v7479_v22  ;;  %v2729_v1 = vrot.slane %v2716_v63, 4  ;;  %v6559_v5 = vld [vmem:[%s10469_s2] sm:$0xf] }
 0x5d1   :  { %v2747_v43 = vrot.slane %v2728_v2, 4  ;;  %v8745_v57 = vperm.slane %v2664_v23, %v7479_v22  ;;  %v2718_v38 = vsel %vm295_vm15, %v2717_v7, %v8636_v20  ;;  %v2692_v45 = vsel %vm295_vm15, %v2691_v62, %v2674_v42 }
 0x5d2   :  { %v2745_v47 = vrot.slane %v2740_v6, 4  ;;  %v2687_v41 = vrot.slane %v8742_v44, 4  ;;  %v8752_v31 = vperm.slane %v2718_v38, %v7479_v22  ;;  %v2730_v18 = vsel %vm295_vm15, %v2729_v1, %v8640_v4 }
 0x5d3   :  { %v2748_v35 = vsel %vm295_vm15, %v2740_v6, %v2747_v43  ;;  %v2689_v20 = vrot.slane %v8745_v57, 4  ;;  %v2578_v15 = vsel %vm295_vm15, 0.0, %v2577_v8  ;;  %v2736_v26 = vperm.slane %v2730_v18, %v7479_v22 }
 0x5d4   :  { %v6887_v53 = vpack.i.bf16 %v2748_v35, %v2694_v39  ;;  %v2746_v50 = vsel %vm295_vm15, %v2745_v47, %v2728_v2  ;;  %v2743_v25 = vrot.slane %v8752_v31, 4  ;;  %v6560_v32 = vor.u32 %v6723_v21, %v6559_v5 }
 0x5d5   :  { %v6882_v14 = vpack.i.bf16 %v2746_v50, %v2692_v45  ;;  %v2634_v42 = vsel %vm295_vm15, 0.0, %v2633_v49  ;;  %v2753_v29 = vperm.slane %v8675_v27, %v7475_v17  ;;  %v2690_v4 = vsel %vm295_vm15, %v8742_v44, %v2689_v20 }
 0x5d6   :  { %6888 = vrot.lane.b32.xlu2 %v6887_v53, %s7286_s17  ;;  %v2744_v13 = vsel %vm295_vm15, %v2736_v26, %v2743_v25  ;;  %v2755_v8 = vsel %vm295_vm15, %v2754_v61, %v2578_v15  ;;  %v2786_v49 = vsel %vm295_vm15, %v8700_v24, %v2785_v0  ;;  %v2807_v33 = vperm.slane %v8706_v55, %v7475_v17  ;;  %v7050_v15 = vld [vmem:[%s10471_s4] ss:$0 sm:$0xff] }
 0x5d7   :  { %6883 = vrot.lane.b32.xlu0 %v6882_v14, %s7287_s18  ;;  %v6877_v27 = vpack.i.bf16 %v2744_v13, %v2690_v4  ;;  %v2759_v3 = vperm.slane %v2755_v8, %v7475_v17  ;;  %v2773_v37 = vrot.slane %v2753_v29, 4  ;;  %v2794_v11 = vperm.slane %v2786_v49, %v7479_v22 }
 0x5d8   :  { %v2809_v60 = vsel %vm295_vm15, %v2808_v51, %v2634_v42  ;;  %v2840_v61 = vsel %vm295_vm15, %v8736_v48, %v2839_v28  ;;  %v2783_v9 = vrot.slane %v8700_v24, 4  ;;  %v2827_v55 = vrot.slane %v2807_v33, 4 }
 0x5d9   :  { %6878 = vrot.lane.b32.xlu1 %v6877_v27, %s7288_s19  ;;  %v2774_v0 = vsel %vm295_vm15, %v2759_v3, %v2773_v37  ;;  %v2799_v16 = vrot.slane %v2794_v11, 4  ;;  %v2813_v46 = vperm.slane %v2809_v60, %v7475_v17  ;;  %v2848_v56 = vperm.slane %v2840_v61, %v7479_v22 }
 0x5da   :  { %v2782_v34 = vperm.slane %v2774_v0, %v7479_v22  ;;  %v2771_v12 = vrot.slane %v2759_v3, 4  ;;  %v2784_v63 = vsel %vm295_vm15, %v2783_v9, %v8679_v19  ;;  %v2837_v10 = vrot.slane %v8736_v48, 4 }
 0x5db   :  { %v2853_v30 = vrot.slane %v2848_v56, 4  ;;  %v2790_v24 = vperm.slane %v2784_v63, %v7479_v22  ;;  %v2825_v51 = vrot.slane %v2813_v46, 4  ;;  %v2741_v28 = vrot.slane %v2736_v26, 4 }
 0x5dc   :  { %v2800_v54 = vsel %vm295_vm15, %v2799_v16, %v2782_v34  ;;  %v2828_v39 = vsel %vm295_vm15, %v2813_v46, %v2827_v55  ;;  %v2772_v58 = vsel %vm295_vm15, %v2771_v12, %v2753_v29  ;;  %v2801_v40 = vrot.slane %v2782_v34, 4 }
 0x5dd   :  { %v2836_v62 = vperm.slane %v2828_v39, %v7479_v22  ;;  %v2778_v59 = vperm.slane %v2772_v58, %v7479_v22  ;;  %v2795_v2 = vrot.slane %v2790_v24, 4  ;;  %v2826_v19 = vsel %vm295_vm15, %v2825_v51, %v2807_v33 }
 0x5de   :  { %v2832_v52 = vperm.slane %v2826_v19, %v7479_v22  ;;  %v2838_v7 = vsel %vm295_vm15, %v2837_v10, %v8712_v36  ;;  %v2688_v48 = vsel %vm295_vm15, %v2687_v41, %v8745_v57  ;;  %v2742_v45 = vsel %vm295_vm15, %v2741_v28, %v8752_v31  ;;  %v2939_v31 = vpop.permute.xlu2 %2938 }
 0x5df   :  { %2936 = vrot.lane.b32.xlu0 %v6560_v32, %s7285_s1  ;;  %v2854_v6 = vsel %vm295_vm15, %v2853_v30, %v2836_v62  ;;  %v2855_v23 = vrot.slane %v2836_v62, 4  ;;  %v2797_v44 = vrot.slane %v2778_v59, 4  ;;  %v2844_v43 = vperm.slane %v2838_v7, %v7479_v22  ;;  %2958 = vmatpush.bf16.msrb.mxu1 %v2939_v31  ;;  %v10547_v62 = vld [vmem:[#allocation5_spill] sm:$0xff] }
 0x5e0   :  { %v6897_v38 = vpack.i.bf16 %v2854_v6, %v2800_v54  ;;  %v2851_v1 = vrot.slane %v2832_v52, 4  ;;  %v2796_v47 = vsel %vm295_vm15, %v2795_v2, %v2778_v59  ;;  %v2802_v57 = vsel %vm295_vm15, %v2794_v11, %v2801_v40 }
 0x5e1   :  { %v2856_v36 = vsel %vm295_vm15, %v2848_v56, %v2855_v23  ;;  %v2849_v5 = vrot.slane %v2844_v43, 4  ;;  %v2798_v41 = vsel %vm295_vm15, %v2790_v24, %v2797_v44  ;;  %v10549_v44 = vld [vmem:[#allocation6_spill] sm:$0xff] }
 0x5e2   :  { %6898 = vrot.lane.b32.xlu2 %v6897_v38, %s7287_s18  ;;  %v2852_v21 = vsel %vm295_vm15, %v2844_v43, %v2851_v1  ;;  %v6902_v35 = vpack.i.bf16 %v2856_v36, %v2802_v57 }
 0x5e3   :  { %v6892_v20 = vpack.i.bf16 %v2852_v21, %v2798_v41  ;;  %v2850_v18 = vsel %vm295_vm15, %v2849_v5, %v2832_v52  ;;  %v10548_v52 = vld [vmem:[#allocation7_spill] sm:$0xff]  ;;  %v10551_v41 = vld [vmem:[#allocation9_spill] sm:$0xff] }
 0x5e5   :  { %6893 = vrot.lane.b32.xlu1 %v6892_v20, %s7288_s19 }
 0x5e7   :  { %6903 = vrot.lane.b32.xlu0 %v6902_v35, %s7286_s17 }
 0x5ed   :  { %2943 = vrot.lane.b32.xlu1 %v7050_v15, %s7285_s1 }
 0x630   :  { %v6889_v50 = vpop.permute.xlu2 %6888 }
 0x631   :  { %v6891_v29 = vunpack.i.h.bf16 %v6889_v50  ;;  %v6890_v4 = vunpack.i.l.bf16 %v6889_v50 }
 0x63c   :  { %v6899_v60 = vpop.permute.xlu2 %6898 }
 0x63d   :  { %v6901_v16 = vunpack.i.h.bf16 %v6899_v60  ;;  %v6900_v46 = vunpack.i.l.bf16 %v6899_v60 }
 0x649   :  { %v6884_v53 = vpop.permute.xlu0 %6883 }
 0x64a   :  { %v6886_v25 = vunpack.i.h.bf16 %v6884_v53  ;;  %v6885_v14 = vunpack.i.l.bf16 %v6884_v53 }
 0x64b   :  { %v6879_v26 = vpop.permute.xlu1 %6878 }
 0x64c   :  { %v6881_v32 = vunpack.i.h.bf16 %v6879_v26  ;;  %v6880_v42 = vunpack.i.l.bf16 %v6879_v26 }
 0x64e   :  { %v2905_v13 = vsel %vm1769_vm0, %v2688_v48, %v6880_v42  ;;  %v2906_v8 = vsel %vm1769_vm0, %v2742_v45, %v6881_v32 }
 0x64f   :  { %v2910_v49 = vsel %vm2000_vm2, %v2906_v8, %v6886_v25  ;;  %v2909_v27 = vsel %vm2000_vm2, %v2905_v13, %v6885_v14 }
 0x650   :  { %v2915_v3 = vsel %vm2913_vm3, %v2910_v49, %v6891_v29  ;;  %v2914_v37 = vsel %vm2913_vm3, %v2909_v27, %v6890_v4 }
 0x651   :  { %v2918_v11 = vpack.c.bf16 %v2915_v3, %v2914_v37  ;;  %v2937_v33 = vpop.permute.xlu0 %2936 }
 0x652   :  { %2959 = vmatpush.bf16.msrb.mxu1 %v2937_v33 }
 0x655   :  { %6565 = vmatmul.msk.bf16.vlgmr.msrb.gmra.mxu1 %vm103_vm1, %v2918_v11 }
 0x657   :  { %v6894_v61 = vpop.permute.xlu1 %6893 }
 0x658   :  { %v6896_v9 = vunpack.i.h.bf16 %v6894_v61  ;;  %v6895_v0 = vunpack.i.l.bf16 %v6894_v61 }
 0x659   :  { %v6904_v56 = vpop.permute.xlu0 %6903 }
 0x65a   :  { %v6906_v34 = vunpack.i.h.bf16 %v6904_v56  ;;  %v6905_v55 = vunpack.i.l.bf16 %v6904_v56  ;;  %v2907_v12 = vsel %vm1769_vm0, %v2796_v47, %v6895_v0  ;;  %v2908_v63 = vsel %vm1769_vm0, %v2850_v18, %v6896_v9  ;;  %v10550_v47 = vld [vmem:[#allocation8_spill] sm:$0xff] }
 0x65b   :  { %v2911_v30 = vsel %vm2000_vm2, %v2907_v12, %v6900_v46  ;;  %v2912_v24 = vsel %vm2000_vm2, %v2908_v63, %v6901_v16  ;;  %v6573_v16 = vld [vmem:[%s10469_s2 + $0x14] sm:$0xf]  ;;  %v6726_v46 = vld [vmem:[%s10469_s2 + $0x18] sm:$0xf0]  ;;  %v6725_v12 = vld [vmem:[%s10469_s2 + $0x8] sm:$0xf0] }
 0x65c   :  { %v2916_v51 = vsel %vm2913_vm3, %v2911_v30, %v6905_v55  ;;  %v2917_v10 = vsel %vm2913_vm3, %v2912_v24, %v6906_v34  ;;  %v6574_v34 = vor.u32 %v6726_v46, %v6573_v16  ;;  %v6569_v55 = vld [vmem:[%s10469_s2 + $0x4] sm:$0xf]  ;;  %v7053_v16 = vld [vmem:[%s10471_s4 + $0x2] ss:$0 sm:$0xff] }
 0x65d   :  { %v2919_v28 = vpack.c.bf16 %v2917_v10, %v2916_v51  ;;  %v6570_v24 = vor.u32 %v6725_v12, %v6569_v55  ;;  %v6731_v46 = vld [vmem:[%s10470_s3 + $0x20] sm:$0xff]  ;;  %v6730_v55 = vld [vmem:[%s10470_s3 + $0x18] sm:$0xff] }
 0x65e   :  { %3107 = vmatpush.bf16.msrb.mxu2 %v6574_v34 }
 0x65f   :  { %v2944_v54 = vpop.permute.xlu1 %2943 }
 0x662   :  { %3108 = vmatpush.bf16.msrb.mxu2 %v6570_v24 }
 0x665   :  { %6566 = vmatmul.msk.bf16.gmra.mxu1 %vm103_vm1, %v2919_v28 }
 0x6d2   :  { %v2961_v39 = vpop.f32.mrf.mxu1 }
 0x6d3   :  { %v2962_v58 = vadd.f32 %v2961_v39, %v2944_v54 }
 0x6d5   :  { %v8846_v59 = vadd.f32 %v2962_v58, %v10547_v62 }
 0x6d7   :  { %v2977_v2 = vsel %vm103_vm1, %v8846_v59, 0.0 }
 0x6d8   :  { %2978 = vadd.xlane.f32.xlu2 %v2977_v2 }
 0x6da   :  { %v2963_v19 = vpop.f32.mrf.mxu1 }
 0x6db   :  { %v2964_v40 = vadd.f32 %v2963_v19, %v2944_v54 }
 0x6dd   :  { %v8851_v7 = vadd.f32 %v2964_v40, %v10548_v52 }
 0x6df   :  { %v2980_v48 = vsel %vm103_vm1, %v8851_v7, 0.0 }
 0x6e0   :  { %2981 = vadd.xlane.f32.xlu0 %v2980_v48 }
 0x6e2   :  { %v2966_v6 = vpop.f32.mrf.mxu1 }
 0x6e3   :  { %v2967_v23 = vadd.f32 %v2966_v6, %v2944_v54 }
 0x6e5   :  { %v8856_v43 = vadd.f32 %v2967_v23, %v10549_v44  ;;  %v7051_v23 = vld [vmem:[%s10472_s5 + $0x22] ss:$0 sm:$0xff] }
 0x6e7   :  { %v2983_v38 = vsel %vm103_vm1, %v8856_v43, 0.0 }
 0x6e8   :  { %2984 = vadd.xlane.f32.xlu1 %v2983_v38 }
 0x6ea   :  { %v2968_v1 = vpop.f32.mrf.mxu1 }
 0x6eb   :  { %v2969_v45 = vadd.f32 %v2968_v1, %v2944_v54 }
 0x6ed   :  { %v8861_v36 = vadd.f32 %v2969_v45, %v10550_v47 }
 0x6ef   :  { %v2986_v5 = vsel %vm103_vm1, %v8861_v36, 0.0 }
 0x6f0   :  { %2987 = vadd.xlane.f32.xlu2 %v2986_v5 }
 0x74b   :  { %v2979_v57 = vpop.xlane.xlu2 %2978 }
 0x74c   :  { %v2989_v21 = vmul.f32 %v2979_v57, %v10551_v41  ;;  %v7052_v57 = vld [vmem:[%s10472_s5 + $0x23] ss:$0 sm:$0xff] }
 0x74e   :  { %v2993_v35 = vsub.f32 %v8846_v59, %v2989_v21 }
 0x750   :  { %v2997_v20 = vmul.f32 %v2993_v35, %v2993_v35 }
 0x752   :  { %v3001_v18 = vsel %vm103_vm1, %v2997_v20, 0.0 }
 0x753   :  { %v2982_v31 = vpop.xlane.xlu0 %2981  ;;  %3002 = vadd.xlane.f32.xlu0 %v3001_v18 }
 0x754   :  { %v2990_v15 = vmul.f32 %v2982_v31, %v10551_v41 }
 0x756   :  { %v8870_v53 = vsub.f32 %v8851_v7, %v2990_v15 }
 0x758   :  { %v2998_v50 = vmul.f32 %v8870_v53, %v8870_v53 }
 0x75a   :  { %v3004_v26 = vsel %vm103_vm1, %v2998_v50, 0.0 }
 0x75b   :  { %3005 = vadd.xlane.f32.xlu1 %v3004_v26  ;;  %v2985_v25 = vpop.xlane.xlu1 %2984 }
 0x75c   :  { %v2991_v14 = vmul.f32 %v2985_v25, %v10551_v41 }
 0x75e   :  { %v8877_v32 = vsub.f32 %v8856_v43, %v2991_v14 }
 0x760   :  { %v2999_v42 = vmul.f32 %v8877_v32, %v8877_v32 }
 0x762   :  { %v3007_v29 = vsel %vm103_vm1, %v2999_v42, 0.0 }
 0x763   :  { %v2988_v4 = vpop.xlane.xlu2 %2987  ;;  %3008 = vadd.xlane.f32.xlu2 %v3007_v29 }
 0x764   :  { %v2992_v13 = vmul.f32 %v2988_v4, %v10551_v41 }
 0x766   :  { %v8884_v8 = vsub.f32 %v8861_v36, %v2992_v13 }
 0x768   :  { %v3000_v49 = vmul.f32 %v8884_v8, %v8884_v8 }
 0x76a   :  { %v3010_v27 = vsel %vm103_vm1, %v3000_v49, 0.0 }
 0x76b   :  { %3011 = vadd.xlane.f32.xlu0 %v3010_v27 }
 0x7c6   :  { %v3003_v3 = vpop.xlane.xlu0 %3002 }
 0x7c7   :  { %v3013_v37 = vmul.f32 %v3003_v3, %v10551_v41 }
 0x7c9   :  { %v3017_v11 = vadd.f32 1e-05, %v3013_v37 }
 0x7cb   :  { %7139 = vrsqrt.f32 %v3017_v11  ;;  %vm3027_vm5 = vweird.f32 %v3017_v11 }
 0x7ce   :  { %v3006_v33 = vpop.xlane.xlu1 %3005 }
 0x7cf   :  { %v3014_v60 = vmul.f32 %v3006_v33, %v10551_v41 }
 0x7d1   :  { %v7140_v61 = vpop.eup %7139  ;;  %v3018_v9 = vadd.f32 1e-05, %v3014_v60 }
 0x7d2   :  { %v3022_v0 = vmul.f32 %v7140_v61, %v3017_v11  ;;  %vm3028_vm4 = vweird.f32 %v7140_v61 }
 0x7d3   :  { %7141 = vrsqrt.f32 %v3018_v9  ;;  %vm3029_vm6 = vmor %vm3027_vm5, %vm3028_vm4  ;;  %vm3037_vm8 = vweird.f32 %v3018_v9 }
 0x7d4   :  { %v3023_v56 = vmul.f32 %v7140_v61, %v3022_v0  ;;  %v6734_v0 = vld [vmem:[%s10470_s3 + $0x38] sm:$0xff] }
 0x7d5   :  { %3224 = vmatpush.bf16.msrb.mxu3 %v6734_v0 }
 0x7d6   :  { %v3024_v63 = vmul.f32 0.5, %v3023_v56  ;;  %v3009_v30 = vpop.xlane.xlu2 %3008 }
 0x7d7   :  { %v3015_v51 = vmul.f32 %v3009_v30, %v10551_v41  ;;  %v6729_v30 = vld [vmem:[%s10470_s3 + $0x10] sm:$0xff] }
 0x7d8   :  { %v3025_v10 = vsub.f32 1.5, %v3024_v63 }
 0x7d9   :  { %v7142_v28 = vpop.eup %7141  ;;  %v3019_v54 = vadd.f32 1e-05, %v3015_v51 }
 0x7da   :  { %v3026_v39 = vmul.f32 %v7140_v61, %v3025_v10  ;;  %v3032_v58 = vmul.f32 %v7142_v28, %v3018_v9  ;;  %vm3038_vm7 = vweird.f32 %v7142_v28 }
 0x7db   :  { %7143 = vrsqrt.f32 %v3019_v54  ;;  %vm3039_vm9 = vmor %vm3037_vm8, %vm3038_vm7  ;;  %vm3047_vm11 = vweird.f32 %v3019_v54 }
 0x7dc   :  { %v3033_v62 = vmul.f32 %v7142_v28, %v3032_v58  ;;  %v3030_v2 = vsel %vm3029_vm6, %v7140_v61, %v3026_v39 }
 0x7dd   :  { %v3061_v44 = vmul.f32 %v3030_v2, %v2993_v35  ;;  %v6727_v2 = vld [vmem:[%s10470_s3] sm:$0xff] }
 0x7de   :  { %v3034_v19 = vmul.f32 0.5, %v3033_v62  ;;  %v3012_v40 = vpop.xlane.xlu0 %3011 }
 0x7df   :  { %v3016_v52 = vmul.f32 %v3012_v40, %v10551_v41  ;;  %v3066_v21 = vmul.f32 %v7051_v23, %v3061_v44 }
 0x7e0   :  { %v3035_v48 = vsub.f32 1.5, %v3034_v19 }
 0x7e1   :  { %v7144_v6 = vpop.eup %7143  ;;  %v3020_v38 = vadd.f32 1e-05, %v3016_v52  ;;  %v3071_v35 = vadd.f32 %v7052_v57, %v3066_v21 }
 0x7e2   :  { %v3036_v1 = vmul.f32 %v7142_v28, %v3035_v48  ;;  %v3042_v45 = vmul.f32 %v7144_v6, %v3019_v54  ;;  %vm3048_vm10 = vweird.f32 %v7144_v6  ;;  %v6728_v54 = vld [vmem:[%s10470_s3 + $0x8] sm:$0xff] }
 0x7e3   :  { %7145 = vrsqrt.f32 %v3020_v38  ;;  %vm3049_vm12 = vmor %vm3047_vm11, %vm3048_vm10  ;;  %vm3057_vm14 = vweird.f32 %v3020_v38 }
 0x7e4   :  { %v3040_v47 = vsel %vm3039_vm9, %v7142_v28, %v3036_v1  ;;  %v3043_v5 = vmul.f32 %v7144_v6, %v3042_v45 }
 0x7e5   :  { %v3062_v20 = vmul.f32 %v3040_v47, %v8870_v53 }
 0x7e6   :  { %v3044_v18 = vmul.f32 0.5, %v3043_v5 }
 0x7e7   :  { %v3067_v31 = vmul.f32 %v7051_v23, %v3062_v20 }
 0x7e8   :  { %v3045_v15 = vsub.f32 1.5, %v3044_v18 }
 0x7e9   :  { %v7146_v50 = vpop.eup %7145  ;;  %v3072_v26 = vadd.f32 %v7052_v57, %v3067_v31 }
 0x7ea   :  { %v3046_v25 = vmul.f32 %v7144_v6, %v3045_v15  ;;  %v3052_v14 = vmul.f32 %v7146_v50, %v3020_v38  ;;  %vm3058_vm13 = vweird.f32 %v7146_v50 }
 0x7eb   :  { %v3075_v42 = vpack.c.bf16 %v3072_v26, %v3071_v35  ;;  %vm3059_vm4 = vmor %vm3057_vm14, %vm3058_vm13 }
 0x7ec   :  { %v3053_v29 = vmul.f32 %v7146_v50, %v3052_v14  ;;  %v3050_v4 = vsel %vm3049_vm12, %v7144_v6, %v3046_v25 }
 0x7ed   :  { %6575 = vmatmul.msk.bf16.vlgmr.msrb.gmra.mxu2 %vm103_vm1, %v3075_v42  ;;  %v3063_v53 = vmul.f32 %v3050_v4, %v8877_v32  ;;  %v6733_v32 = vld [vmem:[%s10470_s3 + $0x30] sm:$0xff] }
 0x7ee   :  { %v3054_v13 = vmul.f32 0.5, %v3053_v29  ;;  %3225 = vmatpush.bf16.msrb.mxu3 %v6733_v32 }
 0x7ef   :  { %v3068_v11 = vmul.f32 %v7051_v23, %v3063_v53 }
 0x7f0   :  { %v3055_v49 = vsub.f32 1.5, %v3054_v13 }
 0x7f1   :  { %v3073_v60 = vadd.f32 %v7052_v57, %v3068_v11 }
 0x7f2   :  { %v3056_v27 = vmul.f32 %v7146_v50, %v3055_v49 }
 0x7f4   :  { %v3060_v3 = vsel %vm3059_vm4, %v7146_v50, %v3056_v27 }
 0x7f5   :  { %v3064_v37 = vmul.f32 %v3060_v3, %v8884_v8  ;;  %v6732_v8 = vld [vmem:[%s10470_s3 + $0x28] sm:$0xff] }
 0x7f6   :  { %3226 = vmatpush.bf16.msrb.mxu3 %v6732_v8 }
 0x7f7   :  { %v3069_v33 = vmul.f32 %v7051_v23, %v3064_v37 }
 0x7f9   :  { %v3074_v61 = vadd.f32 %v7052_v57, %v3069_v33 }
 0x7fa   :  { %3227 = vmatpush.bf16.msrb.mxu3 %v6731_v46 }
 0x7fb   :  { %v3076_v9 = vpack.c.bf16 %v3074_v61, %v3073_v60  ;;  %v7054_v61 = vld [vmem:[%s10471_s4 + $0x4] ss:$0 sm:$0xff] }
 0x7fd   :  { %6576 = vmatmul.msk.bf16.gmra.mxu2 %vm103_vm1, %v3076_v9 }
 0x7fe   :  { %3228 = vmatpush.bf16.msrb.mxu3 %v6730_v55 }
 0x802   :  { %3229 = vmatpush.bf16.msrb.mxu3 %v6729_v30 }
 0x806   :  { %3230 = vmatpush.bf16.msrb.mxu3 %v6728_v54 }
 0x80a   :  { %3231 = vmatpush.bf16.msrb.mxu3 %v6727_v2 }
 0x870   :  { %v3110_v56 = vpop.f32.mrf.mxu2 }
 0x871   :  { %v3111_v34 = vadd.f32 %v7053_v16, %v3110_v56 }
 0x873   :  { %v3120_v12 = vmul.f32 %v3111_v34, %v3111_v34 }
 0x875   :  { %v3124_v63 = vmul.f32 %v3120_v12, %v3111_v34 }
 0x877   :  { %v3128_v24 = vmul.f32 0.044715, %v3124_v63 }
 0x878   :  { %v3112_v51 = vpop.f32.mrf.mxu2 }
 0x879   :  { %v3132_v10 = vadd.f32 %v3128_v24, %v3111_v34  ;;  %v3113_v28 = vadd.f32 %v7053_v16, %v3112_v51 }
 0x87b   :  { %v3136_v39 = vmul.f32 0.7978846, %v3132_v10  ;;  %v3121_v58 = vmul.f32 %v3113_v28, %v3113_v28 }
 0x87d   :  { %v3125_v62 = vmul.f32 %v3121_v58, %v3113_v28  ;;  %7147 = vtanh.f32 %v3136_v39 }
 0x87f   :  { %v3129_v19 = vmul.f32 0.044715, %v3125_v62 }
 0x880   :  { %v3115_v40 = vpop.f32.mrf.mxu2 }
 0x881   :  { %v3133_v52 = vadd.f32 %v3129_v19, %v3113_v28  ;;  %v3116_v48 = vadd.f32 %v7053_v16, %v3115_v40 }
 0x883   :  { %v3137_v6 = vmul.f32 0.7978846, %v3133_v52  ;;  %v3122_v23 = vmul.f32 %v3116_v48, %v3116_v48  ;;  %v7148_v44 = vpop.eup %7147 }
 0x884   :  { %v3144_v45 = vadd.f32 1.0, %v7148_v44 }
 0x885   :  { %7149 = vtanh.f32 %v3137_v6  ;;  %v3126_v38 = vmul.f32 %v3122_v23, %v3116_v48 }
 0x886   :  { %v3148_v31 = vmul.f32 0.5, %v3144_v45 }
 0x887   :  { %v3130_v1 = vmul.f32 0.044715, %v3126_v38 }
 0x888   :  { %v3117_v47 = vpop.f32.mrf.mxu2  ;;  %v3152_v25 = vmul.f32 %v3148_v31, %v3111_v34 }
 0x889   :  { %v3134_v5 = vadd.f32 %v3130_v1, %v3116_v48  ;;  %v3118_v57 = vadd.f32 %v7053_v16, %v3117_v47 }
 0x88b   :  { %v7150_v21 = vpop.eup %7149  ;;  %v3123_v20 = vmul.f32 %v3118_v57, %v3118_v57  ;;  %v3138_v18 = vmul.f32 0.7978846, %v3134_v5 }
 0x88c   :  { %v3145_v15 = vadd.f32 1.0, %v7150_v21 }
 0x88d   :  { %v3127_v50 = vmul.f32 %v3123_v20, %v3118_v57  ;;  %7151 = vtanh.f32 %v3138_v18 }
 0x88e   :  { %v3149_v35 = vmul.f32 0.5, %v3145_v15 }
 0x88f   :  { %v3131_v26 = vmul.f32 0.044715, %v3127_v50 }
 0x890   :  { %v3153_v14 = vmul.f32 %v3149_v35, %v3113_v28  ;;  %v6619_v35 = vld [vmem:[%s10469_s2 + $0x30] sm:$0xf] }
 0x891   :  { %v3135_v42 = vadd.f32 %v3131_v26, %v3118_v57  ;;  %v6736_v26 = vld [vmem:[%s10469_s2 + $0x34] sm:$0xf0] }
 0x892   :  { %v3156_v29 = vpack.c.bf16 %v3153_v14, %v3152_v25  ;;  %v6620_v14 = vor.u32 %v6736_v26, %v6619_v35  ;;  %v7057_v35 = vld [vmem:[%s10471_s4 + $0x1] ss:$0 sm:$0xff] }
 0x893   :  { %v3139_v4 = vmul.f32 0.7978846, %v3135_v42  ;;  %v7152_v13 = vpop.eup %7151  ;;  %v6615_v42 = vld [vmem:[%s10469_s2 + $0x20] sm:$0xf] }
 0x894   :  { %3232 = vmatmul.bf16.vlgmr.msrb.gmra.mxu3 %v3156_v29  ;;  %v3146_v49 = vadd.f32 1.0, %v7152_v13  ;;  %v6735_v29 = vld [vmem:[%s10469_s2 + $0x24] sm:$0xf0]  ;;  %3380 = vmatpush.bf16.msra.mxu0 %v6620_v14 }
 0x895   :  { %7153 = vtanh.f32 %v3139_v4 }
 0x896   :  { %v3150_v3 = vmul.f32 0.5, %v3146_v49  ;;  %v6616_v49 = vor.u32 %v6735_v29, %v6615_v42 }
 0x898   :  { %v3154_v11 = vmul.f32 %v3150_v3, %v3116_v48  ;;  %3381 = vmatpush.bf16.msra.mxu0 %v6616_v49 }
 0x89b   :  { %v7154_v53 = vpop.eup %7153 }
 0x89c   :  { %v3147_v27 = vadd.f32 1.0, %v7154_v53 }
 0x89e   :  { %v3151_v37 = vmul.f32 0.5, %v3147_v27 }
 0x8a0   :  { %v3155_v33 = vmul.f32 %v3151_v37, %v3118_v57 }
 0x8a2   :  { %v3157_v60 = vpack.c.bf16 %v3155_v33, %v3154_v11 }
 0x8a4   :  { %3237 = vmatmul.bf16.gmra.mxu3 %v3157_v60 }
 0x917   :  { %v3233_v9 = vpop.f32.mrf.mxu3 }
 0x918   :  { %v3234_v0 = vadd.f32 %v7054_v61, %v3233_v9 }
 0x91a   :  { %v8947_v32 = vadd.f32 %v3234_v0, %v8846_v59 }
 0x91c   :  { %v3249_v8 = vsel %vm103_vm1, %v8947_v32, 0.0 }
 0x91d   :  { %3250 = vadd.xlane.f32.xlu1 %v3249_v8 }
 0x91f   :  { %v3235_v16 = vpop.f32.mrf.mxu3 }
 0x920   :  { %v3236_v46 = vadd.f32 %v7054_v61, %v3235_v16 }
 0x922   :  { %v8952_v56 = vadd.f32 %v3236_v46, %v8851_v7 }
 0x924   :  { %v3252_v34 = vsel %vm103_vm1, %v8952_v56, 0.0 }
 0x925   :  { %3253 = vadd.xlane.f32.xlu2 %v3252_v34  ;;  %v7055_v34 = vld [vmem:[%s10472_s5 + $0x24] ss:$0 sm:$0xff] }
 0x927   :  { %v3238_v55 = vpop.f32.mrf.mxu3 }
 0x928   :  { %v3239_v12 = vadd.f32 %v7054_v61, %v3238_v55 }
 0x92a   :  { %v8957_v63 = vadd.f32 %v3239_v12, %v8856_v43 }
 0x92c   :  { %v3255_v59 = vsel %vm103_vm1, %v8957_v63, 0.0 }
 0x92d   :  { %3256 = vadd.xlane.f32.xlu0 %v3255_v59 }
 0x92f   :  { %v3240_v30 = vpop.f32.mrf.mxu3 }
 0x930   :  { %v3241_v24 = vadd.f32 %v7054_v61, %v3240_v30 }
 0x932   :  { %v8962_v51 = vadd.f32 %v3241_v24, %v8861_v36 }
 0x934   :  { %10552 = vst [vmem:[#allocation16_spill] sm:$0xff] %v8962_v51  ;;  %v3258_v7 = vsel %vm103_vm1, %v8962_v51, 0.0 }
 0x935   :  { %3259 = vadd.xlane.f32.xlu1 %v3258_v7 }
 0x990   :  { %v3251_v10 = vpop.xlane.xlu1 %3250 }
 0x991   :  { %v3261_v28 = vmul.f32 %v3251_v10, %v10551_v41  ;;  %v7056_v10 = vld [vmem:[%s10472_s5 + $0x25] ss:$0 sm:$0xff] }
 0x993   :  { %v3265_v54 = vsub.f32 %v8947_v32, %v3261_v28 }
 0x995   :  { %v3269_v43 = vmul.f32 %v3265_v54, %v3265_v54 }
 0x997   :  { %v3273_v39 = vsel %vm103_vm1, %v3269_v43, 0.0 }
 0x998   :  { %v3254_v58 = vpop.xlane.xlu2 %3253  ;;  %3274 = vadd.xlane.f32.xlu2 %v3273_v39 }
 0x999   :  { %v3262_v62 = vmul.f32 %v3254_v58, %v10551_v41 }
 0x99b   :  { %v8971_v2 = vsub.f32 %v8952_v56, %v3262_v62 }
 0x99d   :  { %v3270_v36 = vmul.f32 %v8971_v2, %v8971_v2 }
 0x99f   :  { %v3276_v19 = vsel %vm103_vm1, %v3270_v36, 0.0 }
 0x9a0   :  { %3277 = vadd.xlane.f32.xlu0 %v3276_v19  ;;  %v3257_v40 = vpop.xlane.xlu0 %3256 }
 0x9a1   :  { %v3263_v52 = vmul.f32 %v3257_v40, %v10551_v41 }
 0x9a3   :  { %v8978_v48 = vsub.f32 %v8957_v63, %v3263_v52 }
 0x9a5   :  { %v3271_v6 = vmul.f32 %v8978_v48, %v8978_v48 }
 0x9a7   :  { %v3279_v23 = vsel %vm103_vm1, %v3271_v6, 0.0 }
 0x9a8   :  { %3280 = vadd.xlane.f32.xlu1 %v3279_v23  ;;  %v3260_v44 = vpop.xlane.xlu1 %3259 }
 0x9a9   :  { %v3264_v38 = vmul.f32 %v3260_v44, %v10551_v41 }
 0x9ab   :  { %v8985_v1 = vsub.f32 %v8962_v51, %v3264_v38 }
 0x9ad   :  { %v3272_v45 = vmul.f32 %v8985_v1, %v8985_v1 }
 0x9af   :  { %v3282_v47 = vsel %vm103_vm1, %v3272_v45, 0.0 }
 0x9b0   :  { %3283 = vadd.xlane.f32.xlu2 %v3282_v47 }
 0xa0b   :  { %v3275_v5 = vpop.xlane.xlu2 %3274 }
 0xa0c   :  { %v3285_v57 = vmul.f32 %v3275_v5, %v10551_v41 }
 0xa0e   :  { %v3289_v21 = vadd.f32 1e-05, %v3285_v57 }
 0xa10   :  { %7155 = vrsqrt.f32 %v3289_v21  ;;  %vm3299_vm6 = vweird.f32 %v3289_v21 }
 0xa13   :  { %v3278_v20 = vpop.xlane.xlu0 %3277 }
 0xa14   :  { %v3286_v18 = vmul.f32 %v3278_v20, %v10551_v41 }
 0xa16   :  { %v7156_v31 = vpop.eup %7155  ;;  %v3290_v15 = vadd.f32 1e-05, %v3286_v18 }
 0xa17   :  { %v3294_v50 = vmul.f32 %v7156_v31, %v3289_v21  ;;  %vm3300_vm5 = vweird.f32 %v7156_v31 }
 0xa18   :  { %7157 = vrsqrt.f32 %v3290_v15  ;;  %vm3301_vm7 = vmor %vm3299_vm6, %vm3300_vm5  ;;  %vm3309_vm9 = vweird.f32 %v3290_v15 }
 0xa19   :  { %v3295_v25 = vmul.f32 %v7156_v31, %v3294_v50 }
 0xa1b   :  { %v3296_v4 = vmul.f32 0.5, %v3295_v25  ;;  %v3281_v13 = vpop.xlane.xlu1 %3280 }
 0xa1c   :  { %v3287_v53 = vmul.f32 %v3281_v13, %v10551_v41 }
 0xa1d   :  { %v3297_v27 = vsub.f32 1.5, %v3296_v4 }
 0xa1e   :  { %v7158_v3 = vpop.eup %7157  ;;  %v3291_v37 = vadd.f32 1e-05, %v3287_v53 }
 0xa1f   :  { %v3298_v11 = vmul.f32 %v7156_v31, %v3297_v27  ;;  %v3304_v33 = vmul.f32 %v7158_v3, %v3290_v15  ;;  %vm3310_vm8 = vweird.f32 %v7158_v3 }
 0xa20   :  { %7159 = vrsqrt.f32 %v3291_v37  ;;  %vm3311_vm10 = vmor %vm3309_vm9, %vm3310_vm8  ;;  %vm3319_vm12 = vweird.f32 %v3291_v37 }
 0xa21   :  { %v3305_v60 = vmul.f32 %v7158_v3, %v3304_v33  ;;  %v3302_v61 = vsel %vm3301_vm7, %v7156_v31, %v3298_v11 }
 0xa22   :  { %v3333_v55 = vmul.f32 %v3302_v61, %v3265_v54 }
 0xa23   :  { %v3306_v9 = vmul.f32 0.5, %v3305_v60  ;;  %v3284_v0 = vpop.xlane.xlu2 %3283 }
 0xa24   :  { %v3288_v8 = vmul.f32 %v3284_v0, %v10551_v41  ;;  %v3338_v28 = vmul.f32 %v7055_v34, %v3333_v55 }
 0xa25   :  { %v3307_v16 = vsub.f32 1.5, %v3306_v9 }
 0xa26   :  { %v7160_v46 = vpop.eup %7159  ;;  %v3292_v12 = vadd.f32 1e-05, %v3288_v8  ;;  %v3343_v54 = vadd.f32 %v7056_v10, %v3338_v28 }
 0xa27   :  { %v3308_v59 = vmul.f32 %v7158_v3, %v3307_v16  ;;  %v3314_v30 = vmul.f32 %v7160_v46, %v3291_v37  ;;  %vm3320_vm11 = vweird.f32 %v7160_v46 }
 0xa28   :  { %7161 = vrsqrt.f32 %v3292_v12  ;;  %vm3321_vm13 = vmor %vm3319_vm12, %vm3320_vm11  ;;  %vm3329_vm4 = vweird.f32 %v3292_v12 }
 0xa29   :  { %v3312_v24 = vsel %vm3311_vm10, %v7158_v3, %v3308_v59  ;;  %v3315_v7 = vmul.f32 %v7160_v46, %v3314_v30 }
 0xa2a   :  { %v3334_v43 = vmul.f32 %v3312_v24, %v8971_v2 }
 0xa2b   :  { %v3316_v39 = vmul.f32 0.5, %v3315_v7 }
 0xa2c   :  { %v3339_v58 = vmul.f32 %v7055_v34, %v3334_v43 }
 0xa2d   :  { %v3317_v62 = vsub.f32 1.5, %v3316_v39 }
 0xa2e   :  { %v7162_v36 = vpop.eup %7161  ;;  %v3344_v19 = vadd.f32 %v7056_v10, %v3339_v58 }
 0xa2f   :  { %v3318_v40 = vmul.f32 %v7160_v46, %v3317_v62  ;;  %v3324_v52 = vmul.f32 %v7162_v36, %v3292_v12  ;;  %vm3330_vm14 = vweird.f32 %v7162_v36 }
 0xa30   :  { %v3347_v6 = vpack.c.bf16 %v3344_v19, %v3343_v54  ;;  %vm3331_vm5 = vmor %vm3329_vm4, %vm3330_vm14 }
 0xa31   :  { %v3325_v23 = vmul.f32 %v7162_v36, %v3324_v52  ;;  %v3322_v44 = vsel %vm3321_vm13, %v7160_v46, %v3318_v40 }
 0xa32   :  { %6621 = vmatmul.msk.bf16.vlgmr.msra.gmra.mxu0 %vm103_vm1, %v3347_v6  ;;  %v3335_v2 = vmul.f32 %v3322_v44, %v8978_v48 }
 0xa33   :  { %v3326_v38 = vmul.f32 0.5, %v3325_v23 }
 0xa34   :  { %v3340_v21 = vmul.f32 %v7055_v34, %v3335_v2 }
 0xa35   :  { %v3327_v45 = vsub.f32 1.5, %v3326_v38 }
 0xa36   :  { %v3345_v18 = vadd.f32 %v7056_v10, %v3340_v21 }
 0xa37   :  { %v3328_v47 = vmul.f32 %v7162_v36, %v3327_v45 }
 0xa39   :  { %v3332_v5 = vsel %vm3331_vm5, %v7162_v36, %v3328_v47 }
 0xa3a   :  { %v3336_v57 = vmul.f32 %v3332_v5, %v8985_v1 }
 0xa3c   :  { %v3341_v20 = vmul.f32 %v7055_v34, %v3336_v57 }
 0xa3e   :  { %v3346_v31 = vadd.f32 %v7056_v10, %v3341_v20 }
 0xa40   :  { %v3348_v15 = vpack.c.bf16 %v3346_v31, %v3345_v18 }
 0xa42   :  { %6622 = vmatmul.msk.bf16.gmra.mxu0 %vm103_vm1, %v3348_v15 }
 0xaaf   :  { %v3383_v50 = vpop.f32.mrf.mxu0 }
 0xab0   :  { %v3384_v48 = vadd.f32 %v7057_v35, %v3383_v50 }
 0xab2   :  { %v3435_v37 = vrot.slane %v3384_v48, 4 }
 0xab7   :  { %v3385_v26 = vpop.f32.mrf.mxu0 }
 0xab8   :  { %v3386_v25 = vadd.f32 %v7057_v35, %v3385_v26 }
 0xaba   :  { %v9020_v14 = vpack.i.bf16 %v3386_v25, %v3384_v48  ;;  %v3491_v61 = vrot.slane %v3386_v25, 4 }
 0xabc   :  { %6913 = vrot.lane.b32.xlu1 %v9020_v14, %s7279_s30  ;;  %6908 = vrot.lane.b32.xlu0 %v9020_v14, %s7280_s7 }
 0xabd   :  { %6918 = vrot.lane.b32.xlu2 %v9020_v14, %s7278_s29 }
 0xabf   :  { %v3388_v1 = vpop.f32.mrf.mxu0 }
 0xac0   :  { %v9030_v29 = vadd.f32 %v7057_v35, %v3388_v1 }
 0xac2   :  { %v3547_v12 = vrot.slane %v9030_v29, 4 }
 0xac4   :  { %6938 = vrot.lane.b32.xlu1 %v9020_v14, %s7281_s8 }
 0xac7   :  { %v3390_v42 = vpop.f32.mrf.mxu0 }
 0xac8   :  { %v9032_v4 = vadd.f32 %v7057_v35, %v3390_v42 }
 0xaca   :  { %v9036_v13 = vpack.i.bf16 %v9032_v4, %v9030_v29  ;;  %v3603_v55 = vrot.slane %v9032_v4, 4 }
 0xacc   :  { %6933 = vrot.lane.b32.xlu2 %v9036_v13, %s7278_s29  ;;  %6923 = vrot.lane.b32.xlu0 %v9036_v13, %s7280_s7 }
 0xad4   :  { %6928 = vrot.lane.b32.xlu0 %v9036_v13, %s7279_s30 }
 0xb17   :  { %v9044_v49 = vpop.permute.xlu2 %6918 }
 0xb18   :  { %v6921_v53 = vunpack.i.h.bf16 %v9044_v49  ;;  %v6920_v27 = vunpack.i.l.bf16 %v9044_v49  ;;  %6953 = vrot.lane.b32.xlu1 %v9044_v49, %s7281_s8 }
 0xb1a   :  { %v3501_v11 = vrot.slane %v6921_v53, 4  ;;  %v3445_v33 = vrot.slane %v6920_v27, 4 }
 0xb26   :  { %v9050_v3 = vpop.permute.xlu2 %6933 }
 0xb27   :  { %v6936_v34 = vunpack.i.h.bf16 %v9050_v3  ;;  %v6935_v1 = vunpack.i.l.bf16 %v9050_v3 }
 0xb2e   :  { %v9052_v60 = vpop.permute.xlu0 %6908  ;;  %v9054_v9 = vpop.permute.xlu1 %6913 }
 0xb2f   :  { %v6911_v0 = vunpack.i.h.bf16 %v9052_v60  ;;  %v6910_v8 = vunpack.i.l.bf16 %v9052_v60  ;;  %v6916_v16 = vunpack.i.h.bf16 %v9054_v9  ;;  %v6915_v46 = vunpack.i.l.bf16 %v9054_v9  ;;  %6943 = vrot.lane.b32.xlu0 %v9052_v60, %s7281_s8  ;;  %6948 = vrot.lane.b32.xlu2 %v9054_v9, %s7281_s8 }
 0xb31   :  { %v3503_v59 = vrot.slane %v6911_v0, 4  ;;  %v3446_v30 = vsel %vm295_vm15, %v3445_v33, %v6910_v8  ;;  %v3447_v24 = vrot.slane %v6910_v8, 4  ;;  %v3502_v7 = vsel %vm295_vm15, %v3501_v11, %v6911_v0 }
 0xb32   :  { %v3452_v10 = vperm.slane %v3446_v30, %v7475_v17  ;;  %v3508_v28 = vperm.slane %v3502_v7, %v7475_v17  ;;  %v3489_v43 = vrot.slane %v6916_v16, 4  ;;  %v3492_v39 = vsel %vm295_vm15, %v6916_v16, %v3491_v61 }
 0xb33   :  { %v3448_v58 = vsel %vm295_vm15, %v6920_v27, %v3447_v24  ;;  %v3504_v62 = vsel %vm295_vm15, %v6921_v53, %v3503_v59  ;;  %v3500_v36 = vperm.slane %v3492_v39, %v7475_v17  ;;  %v3433_v54 = vrot.slane %v6915_v46, 4 }
 0xb34   :  { %v3456_v19 = vperm.slane %v3448_v58, %v7475_v17  ;;  %v3457_v40 = vrot.slane %v3452_v10, 4  ;;  %v3512_v52 = vperm.slane %v3504_v62, %v7475_v17  ;;  %v3513_v6 = vrot.slane %v3508_v28, 4 }
 0xb35   :  { %v3490_v23 = vsel %vm295_vm15, %v3489_v43, %v3386_v25  ;;  %v3527_v44 = vrot.slane %v3500_v36, 4  ;;  %v3434_v38 = vsel %vm295_vm15, %v3433_v54, %v3384_v48  ;;  %v3436_v45 = vsel %vm295_vm15, %v6915_v46, %v3435_v37 }
 0xb36   :  { %v3469_v2 = vrot.slane %v3456_v19, 4  ;;  %v3525_v47 = vrot.slane %v3512_v52, 4  ;;  %v3496_v5 = vperm.slane %v3490_v23, %v7475_v17  ;;  %v3440_v57 = vperm.slane %v3434_v38, %v7475_v17 }
 0xb37   :  { %v3528_v21 = vsel %vm295_vm15, %v3512_v52, %v3527_v44  ;;  %v3444_v20 = vperm.slane %v3436_v45, %v7475_v17  ;;  %v3613_v0 = vrot.slane %v6936_v34, 4  ;;  %v3557_v52 = vrot.slane %v6935_v1, 4  ;;  %6958 = vrot.lane.b32.xlu0 %v9036_v13, %s7281_s8 }
 0xb38   :  { %v3514_v18 = vsel %vm295_vm15, %v3513_v6, %v3496_v5  ;;  %v3515_v31 = vrot.slane %v3496_v5, 4  ;;  %v3526_v15 = vsel %vm295_vm15, %v3525_v47, %v3500_v36  ;;  %v3536_v50 = vperm.slane %v3528_v21, %v7479_v22 }
 0xb39   :  { %v3520_v35 = vperm.slane %v3514_v18, %v7479_v22  ;;  %v3532_v26 = vperm.slane %v3526_v15, %v7479_v22  ;;  %v3458_v48 = vsel %vm295_vm15, %v3457_v40, %v3440_v57  ;;  %v3459_v25 = vrot.slane %v3440_v57, 4 }
 0xb3a   :  { %v3516_v42 = vsel %vm295_vm15, %v3508_v28, %v3515_v31  ;;  %v3543_v53 = vrot.slane %v3536_v50, 4  ;;  %v3470_v27 = vsel %vm295_vm15, %v3469_v2, %v3444_v20  ;;  %v3464_v61 = vperm.slane %v3458_v48, %v7479_v22 }
 0xb3b   :  { %v3524_v37 = vperm.slane %v3516_v42, %v7479_v22  ;;  %v3541_v11 = vrot.slane %v3532_v26, 4  ;;  %v3460_v33 = vsel %vm295_vm15, %v3452_v10, %v3459_v25  ;;  %v3471_v46 = vrot.slane %v3444_v20, 4 }
 0xb3c   :  { %v3544_v8 = vsel %vm295_vm15, 0.0, %v3543_v53  ;;  %v3722_v16 = vsel %vm295_vm15, %v3543_v53, %v3532_v26  ;;  %v3537_v59 = vrot.slane %v3520_v35, 4  ;;  %v3468_v7 = vperm.slane %v3460_v33, %v7479_v22 }
 0xb3d   :  { %v3539_v30 = vrot.slane %v3524_v37, 4  ;;  %v3542_v24 = vsel %vm295_vm15, 0.0, %v3541_v11  ;;  %v9103_v28 = vperm.slane %v3722_v16, %v7475_v17  ;;  %v3727_v10 = vrot.slane %v3544_v8, 4 }
 0xb3e   :  { %v3472_v43 = vsel %vm295_vm15, %v3456_v19, %v3471_v46  ;;  %v3476_v39 = vperm.slane %v3470_v27, %v7479_v22  ;;  %v9107_v58 = vpop.permute.xlu0 %6923  ;;  %v3481_v40 = vrot.slane %v3464_v61, 4  ;;  %v3538_v44 = vsel %vm295_vm15, 0.0, %v3537_v59 }
 0xb3f   :  { %v3540_v62 = vsel %vm295_vm15, 0.0, %v3539_v30  ;;  %v3711_v36 = vsel %vm295_vm15, %v3539_v30, %v3520_v35  ;;  %v3480_v54 = vperm.slane %v3472_v43, %v7479_v22  ;;  %v3728_v23 = vsel %vm295_vm15, %v3727_v10, %v3542_v24  ;;  %6973 = vrot.lane.b32.xlu0 %v9050_v3, %s7281_s8  ;;  %6963 = vrot.lane.b32.xlu2 %v9107_v58, %s7281_s8 }
 0xb40   :  { %v3716_v6 = vrot.slane %v3540_v62, 4  ;;  %v3483_v19 = vrot.slane %v3468_v7, 4  ;;  %v3485_v38 = vrot.slane %v3476_v39, 4  ;;  %v9119_v2 = vperm.slane %v3711_v36, %v7475_v17 }
 0xb41   :  { %v3487_v45 = vrot.slane %v3480_v54, 4  ;;  %v3747_v5 = vrot.slane %v9103_v28, 4  ;;  %v6926_v57 = vunpack.i.h.bf16 %v9107_v58  ;;  %v3482_v21 = vsel %vm295_vm15, 0.0, %v3481_v40 }
 0xb42   :  { %v3717_v47 = vsel %vm295_vm15, %v3716_v6, %v3538_v44  ;;  %v3484_v20 = vsel %vm295_vm15, 0.0, %v3483_v19  ;;  %v3486_v18 = vsel %vm295_vm15, 0.0, %v3485_v38  ;;  %v3657_v15 = vsel %vm295_vm15, %v3483_v19, %v3464_v61 }
 0xb43   :  { %v3488_v31 = vsel %vm295_vm15, 0.0, %v3487_v45  ;;  %v3662_v50 = vrot.slane %v3484_v20, 4  ;;  %v3668_v35 = vsel %vm295_vm15, %v3487_v45, %v3476_v39  ;;  %v9131_v48 = vperm.slane %v3717_v47, %v7475_v17 }
 0xb44   :  { %v3673_v26 = vrot.slane %v3488_v31, 4  ;;  %v9134_v25 = vperm.slane %v3728_v23, %v7475_v17  ;;  %v9137_v42 = vperm.slane %v3657_v15, %v7475_v17  ;;  %v9140_v53 = vperm.slane %v3668_v35, %v7475_v17 }
 0xb45   :  { %v3663_v27 = vsel %vm295_vm15, %v3662_v50, %v3482_v21  ;;  %v3614_v11 = vsel %vm295_vm15, %v3613_v0, %v6926_v57  ;;  %v3615_v33 = vrot.slane %v6926_v57, 4  ;;  %v6925_v24 = vunpack.i.l.bf16 %v9107_v58 }
 0xb46   :  { %v3674_v37 = vsel %vm295_vm15, %v3673_v26, %v3486_v18  ;;  %v9145_v61 = vpop.permute.xlu0 %6928  ;;  %v9148_v8 = vperm.slane %v3663_v27, %v7475_v17  ;;  %v3693_v46 = vrot.slane %v9140_v53, 4  ;;  %v3620_v59 = vperm.slane %v3614_v11, %v7475_v17 }
 0xb47   :  { %v9151_v16 = vperm.slane %v3674_v37, %v7475_v17  ;;  %v3616_v30 = vsel %vm295_vm15, %v6936_v34, %v3615_v33  ;;  %v6931_v0 = vunpack.i.h.bf16 %v9145_v61  ;;  %v6930_v7 = vunpack.i.l.bf16 %v9145_v61  ;;  %6988 = vrot.lane.b32.xlu0 %v9054_v9, %s7284_s9  ;;  %6983 = vrot.lane.b32.xlu2 %v9052_v60, %s7284_s9 }
 0xb48   :  { %v3624_v10 = vperm.slane %v3616_v30, %v7475_v17  ;;  %v3625_v43 = vrot.slane %v3620_v59, 4  ;;  %v3558_v39 = vsel %vm295_vm15, %v3557_v52, %v6925_v24  ;;  %v3559_v62 = vrot.slane %v6925_v24, 4  ;;  %6968 = vrot.lane.b32.xlu1 %v9145_v61, %s7281_s8 }
 0xb49   :  { %v3601_v36 = vrot.slane %v6931_v0, 4  ;;  %v3564_v40 = vperm.slane %v3558_v39, %v7475_v17  ;;  %v3604_v34 = vsel %vm295_vm15, %v6931_v0, %v3603_v55  ;;  %v3545_v6 = vrot.slane %v6930_v7, 4 }
 0xb4a   :  { %v3637_v54 = vrot.slane %v3624_v10, 4  ;;  %v3560_v23 = vsel %vm295_vm15, %v6935_v1, %v3559_v62  ;;  %v3612_v44 = vperm.slane %v3604_v34, %v7475_v17  ;;  %v3548_v19 = vsel %vm295_vm15, %v6930_v7, %v3547_v12 }
 0xb4b   :  { %v3602_v52 = vsel %vm295_vm15, %v3601_v36, %v9032_v4  ;;  %v3568_v38 = vperm.slane %v3560_v23, %v7475_v17  ;;  %v3569_v55 = vrot.slane %v3564_v40, 4  ;;  %v3546_v1 = vsel %vm295_vm15, %v3545_v6, %v9030_v29 }
 0xb4c   :  { %v3608_v45 = vperm.slane %v3602_v52, %v7475_v17  ;;  %v3639_v47 = vrot.slane %v3612_v44, 4  ;;  %v3552_v57 = vperm.slane %v3546_v1, %v7475_v17  ;;  %v3556_v21 = vperm.slane %v3548_v19, %v7475_v17 }
 0xb4d   :  { %v3638_v4 = vsel %vm295_vm15, %v3637_v54, %v3612_v44  ;;  %v3581_v20 = vrot.slane %v3568_v38, 4 }
 0xb4e   :  { %v3627_v18 = vrot.slane %v3608_v45, 4  ;;  %v3626_v31 = vsel %vm295_vm15, %v3625_v43, %v3608_v45  ;;  %v3644_v12 = vperm.slane %v3638_v4, %v7479_v22  ;;  %v3570_v15 = vsel %vm295_vm15, %v3569_v55, %v3552_v57 }
 0xb4f   :  { %v3571_v50 = vrot.slane %v3552_v57, 4  ;;  %v3583_v35 = vrot.slane %v3556_v21, 4  ;;  %v3632_v26 = vperm.slane %v3626_v31, %v7479_v22  ;;  %v3576_v29 = vperm.slane %v3570_v15, %v7479_v22 }
 0xb50   :  { %v3582_v27 = vsel %vm295_vm15, %v3581_v20, %v3556_v21  ;;  %v3628_v37 = vsel %vm295_vm15, %v3620_v59, %v3627_v18  ;;  %v3640_v11 = vsel %vm295_vm15, %v3624_v10, %v3639_v47  ;;  %v3653_v54 = vrot.slane %v3644_v12, 4  ;;  %6978 = vrot.lane.b32.xlu1 %v9020_v14, %s7284_s9 }
 0xb51   :  { %v3572_v33 = vsel %vm295_vm15, %v3564_v40, %v3571_v50  ;;  %v3584_v30 = vsel %vm295_vm15, %v3568_v38, %v3583_v35  ;;  %v3588_v24 = vperm.slane %v3582_v27, %v7479_v22  ;;  %v3636_v0 = vperm.slane %v3628_v37, %v7479_v22 }
 0xb52   :  { %v3580_v7 = vperm.slane %v3572_v33, %v7479_v22  ;;  %v3592_v43 = vperm.slane %v3584_v30, %v7479_v22  ;;  %v3593_v39 = vrot.slane %v3576_v29, 4  ;;  %v3648_v59 = vperm.slane %v3640_v11, %v7479_v22 }
 0xb53   :  { %v3597_v62 = vrot.slane %v3588_v24, 4  ;;  %v3649_v10 = vrot.slane %v3632_v26, 4  ;;  %v3651_v36 = vrot.slane %v3636_v0, 4  ;;  %v3654_v19 = vsel %vm295_vm15, 0.0, %v3653_v54 }
 0xb54   :  { %v9207_v9 = vsel %vm295_vm15, 0.0, %v3593_v39  ;;  %v3595_v40 = vrot.slane %v3580_v7, 4  ;;  %v3599_v34 = vrot.slane %v3592_v43, 4  ;;  %v3655_v6 = vrot.slane %v3648_v59, 4 }
 0xb55   :  { %v3598_v23 = vsel %vm295_vm15, 0.0, %v3597_v62  ;;  %v9211_v52 = vsel %vm295_vm15, 0.0, %v3649_v10  ;;  %v9214_v44 = vsel %vm295_vm15, 0.0, %v3651_v36  ;;  %v3819_v20 = vsel %vm295_vm15, %v3651_v36, %v3632_v26 }
 0xb56   :  { %v9218_v38 = vsel %vm295_vm15, 0.0, %v3595_v40  ;;  %v3600_v60 = vsel %vm295_vm15, 0.0, %v3599_v34  ;;  %v3656_v55 = vsel %vm295_vm15, 0.0, %v3655_v6  ;;  %v3765_v45 = vsel %vm295_vm15, %v3595_v40, %v3576_v29 }
 0xb57   :  { %v9224_v1 = vperm.slane %v3765_v45, %v7475_v17  ;;  %v3770_v47 = vrot.slane %v9218_v38, 4  ;;  %v3776_v57 = vsel %vm295_vm15, %v3599_v34, %v3588_v24  ;;  %v3781_v21 = vrot.slane %v3600_v60, 4 }
 0xb58   :  { %v9229_v4 = vperm.slane %v3776_v57, %v7475_v17  ;;  %v3824_v18 = vrot.slane %v9214_v44, 4  ;;  %v3830_v31 = vsel %vm295_vm15, %v3655_v6, %v3644_v12  ;;  %v9236_v50 = vperm.slane %v3819_v20, %v7475_v17  ;;  %6993 = vrot.lane.b32.xlu1 %v9044_v49, %s7284_s9 }
 0xb59   :  { %v3782_v15 = vsel %vm295_vm15, %v3781_v21, %v3598_v23  ;;  %v9239_v35 = vperm.slane %v3830_v31, %v7475_v17  ;;  %v3835_v29 = vrot.slane %v3656_v55, 4  ;;  %v3679_v26 = vrot.slane %v9148_v8, 4 }
 0xb5a   :  { %v9242_v27 = vperm.slane %v3782_v15, %v7475_v17  ;;  %v3801_v37 = vrot.slane %v9229_v4, 4  ;;  %v3691_v33 = vrot.slane %v9151_v16, 4  ;;  %v3733_v30 = vrot.slane %v9131_v48, 4 }
 0xb5b   :  { %v3836_v11 = vsel %vm295_vm15, %v3835_v29, %v3654_v19  ;;  %v3855_v12 = vrot.slane %v9239_v35, 4  ;;  %v3680_v7 = vsel %vm295_vm15, %v3679_v26, %v9137_v42  ;;  %v3745_v43 = vrot.slane %v9134_v25, 4 }
 0xb5c   :  { %v3799_v24 = vrot.slane %v9242_v27, 4  ;;  %v9252_v0 = vperm.slane %v3836_v11, %v7475_v17  ;;  %v3686_v39 = vperm.slane %v3680_v7, %v7479_v22  ;;  %v3692_v59 = vsel %vm295_vm15, %v3691_v33, %v9140_v53 }
 0xb5d   :  { %v3734_v62 = vsel %vm295_vm15, %v3733_v30, %v9119_v2  ;;  %v3681_v10 = vrot.slane %v9137_v42, 4  ;;  %v3698_v54 = vperm.slane %v3692_v59, %v7479_v22  ;;  %v3746_v34 = vsel %vm295_vm15, %v3745_v43, %v9103_v28 }
 0xb5e   :  { %v3853_v36 = vrot.slane %v9252_v0, 4  ;;  %v3740_v40 = vperm.slane %v3734_v62, %v7479_v22  ;;  %v3705_v6 = vrot.slane %v3686_v39, 4  ;;  %v3752_v23 = vperm.slane %v3746_v34, %v7479_v22 }
 0xb5f   :  { %v3682_v19 = vsel %vm295_vm15, %v9148_v8, %v3681_v10  ;;  %v3694_v42 = vsel %vm295_vm15, %v9151_v16, %v3693_v46  ;;  %v3735_v57 = vrot.slane %v9119_v2, 4  ;;  %v3748_v20 = vsel %vm295_vm15, %v9134_v25, %v3747_v5 }
 0xb60   :  { %v3759_v60 = vrot.slane %v3740_v40, 4  ;;  %v3690_v55 = vperm.slane %v3682_v19, %v7479_v22  ;;  %v3702_v45 = vperm.slane %v3694_v42, %v7479_v22  ;;  %v3706_v21 = vsel %vm295_vm15, %v3698_v54, %v3705_v6 }
 0xb61   :  { %v3703_v8 = vrot.slane %v3698_v54, 4  ;;  %v3757_v31 = vrot.slane %v3752_v23, 4  ;;  %v3875_v15 = vpack.c.bf16 %v3706_v21, %v3706_v21  ;;  %v3736_v46 = vsel %vm295_vm15, %v9131_v48, %v3735_v57 }
 0xb62   :  { %v3760_v53 = vsel %vm295_vm15, %v3752_v23, %v3759_v60  ;;  %v3707_v16 = vrot.slane %v3702_v45, 4  ;;  %v3744_v26 = vperm.slane %v3736_v46, %v7479_v22  ;;  %v3756_v2 = vperm.slane %v3748_v20, %v7479_v22 }
 0xb63   :  { %v3876_v29 = vpack.c.bf16 %v3760_v53, %v3760_v53  ;;  %v3704_v11 = vsel %vm295_vm15, %v3703_v8, %v3686_v39  ;;  %v9293_v28 = vunpack.c.l.b16 %v3875_v15  ;;  %v3758_v25 = vsel %vm295_vm15, %v3757_v31, %v3740_v40 }
 0xb64   :  { %v3708_v5 = vsel %vm295_vm15, %v3707_v16, %v3690_v55  ;;  %v3873_v33 = vpack.c.bf16 %v3704_v11, %v3704_v11  ;;  %v3761_v48 = vrot.slane %v3756_v2, 4  ;;  %v3874_v43 = vpack.c.bf16 %v3758_v25, %v3758_v25 }
 0xb65   :  { %v9297_v30 = vunpack.c.l.b16 %v3876_v29  ;;  %v3877_v7 = vpack.c.bf16 %v3708_v5, %v3708_v5  ;;  %v3709_v62 = vrot.slane %v3690_v55, 4  ;;  %v3763_v10 = vrot.slane %v3744_v26, 4 }
 0xb66   :  { %v9299_v59 = vunpack.c.l.b16 %v3873_v33  ;;  %v3762_v14 = vsel %vm295_vm15, %v3761_v48, %v3744_v26  ;;  %v9306_v34 = vunpack.c.l.b16 %v3874_v43  ;;  %v3771_v19 = vsel %vm295_vm15, %v3770_v47, %v9207_v9 }
 0xb67   :  { %v9304_v54 = vunpack.c.l.b16 %v3877_v7  ;;  %v3878_v40 = vpack.c.bf16 %v3762_v14, %v3762_v14  ;;  %v3710_v6 = vsel %vm295_vm15, %v3702_v45, %v3709_v62  ;;  %v3764_v23 = vsel %vm295_vm15, %v3756_v2, %v3763_v10 }
 0xb68   :  { %v3879_v60 = vpack.c.bf16 %v3710_v6, %v3710_v6  ;;  %v3880_v55 = vpack.c.bf16 %v3764_v23, %v3764_v23  ;;  %v3775_v57 = vperm.slane %v3771_v19, %v7475_v17  ;;  %v3789_v20 = vrot.slane %v9224_v1, 4 }
 0xb69   :  { %v9317_v21 = vunpack.c.l.b16 %v3878_v40  ;;  %v3802_v45 = vsel %vm295_vm15, %v9242_v27, %v3801_v37  ;;  %v3825_v9 = vsel %vm295_vm15, %v3824_v18, %v9211_v52  ;;  %v3843_v44 = vrot.slane %v9236_v50, 4 }
 0xb6a   :  { %v9328_v38 = vunpack.c.l.b16 %v3879_v60  ;;  %v9330_v47 = vunpack.c.l.b16 %v3880_v55  ;;  %v3810_v8 = vperm.slane %v3802_v45, %v7479_v22  ;;  %v3829_v31 = vperm.slane %v3825_v9, %v7475_v17 }
 0xb6b   :  { %v3790_v37 = vsel %vm295_vm15, %v3775_v57, %v3789_v20  ;;  %v3856_v52 = vsel %vm295_vm15, %v9252_v0, %v3855_v12  ;;  %v3787_v29 = vrot.slane %v3775_v57, 4  ;;  %v3800_v26 = vsel %vm295_vm15, %v3799_v24, %v9229_v4 }
 0xb6c   :  { %v3798_v15 = vperm.slane %v3790_v37, %v7479_v22  ;;  %v3815_v16 = vrot.slane %v3810_v8, 4  ;;  %v3864_v49 = vperm.slane %v3856_v52, %v7479_v22  ;;  %v3844_v46 = vsel %vm295_vm15, %v3829_v31, %v3843_v44 }
 0xb6d   :  { %v3841_v2 = vrot.slane %v3829_v31, 4  ;;  %v3852_v12 = vperm.slane %v3844_v46, %v7479_v22  ;;  %v3806_v25 = vperm.slane %v3800_v26, %v7479_v22  ;;  %v3788_v48 = vsel %vm295_vm15, %v3787_v29, %v9224_v1 }
 0xb6e   :  { %v3816_v11 = vsel %vm295_vm15, %v3815_v16, %v3798_v15  ;;  %v3869_v5 = vrot.slane %v3864_v49, 4  ;;  %v3854_v4 = vsel %vm295_vm15, %v3853_v36, %v9239_v35  ;;  %v3794_v24 = vperm.slane %v3788_v48, %v7479_v22 }
 0xb6f   :  { %v3885_v33 = vpack.c.bf16 %v3816_v11, %v3816_v11  ;;  %v3842_v7 = vsel %vm295_vm15, %v3841_v2, %v9236_v50  ;;  %v3811_v43 = vrot.slane %v3806_v25, 4  ;;  %v3860_v1 = vperm.slane %v3854_v4, %v7479_v22 }
 0xb70   :  { %v3870_v27 = vsel %vm295_vm15, %v3869_v5, %v3852_v12  ;;  %v3848_v62 = vperm.slane %v3842_v7, %v7479_v22  ;;  %v3817_v40 = vrot.slane %v3798_v15, 4  ;;  %v3813_v6 = vrot.slane %v3794_v24, 4  ;;  %v6939_v5 = vpop.permute.xlu1 %6938 }
 0xb71   :  { %v3886_v10 = vpack.c.bf16 %v3870_v27, %v3870_v27  ;;  %v9367_v14 = vunpack.c.l.b16 %v3885_v33  ;;  %v3812_v50 = vsel %vm295_vm15, %v3811_v43, %v3794_v24  ;;  %v3871_v0 = vrot.slane %v3852_v12, 4 }
 0xb72   :  { %v3867_v23 = vrot.slane %v3848_v62, 4  ;;  %v3865_v35 = vrot.slane %v3860_v1, 4  ;;  %v3881_v36 = vpack.c.bf16 %v3812_v50, %v3812_v50  ;;  %v3818_v60 = vsel %vm295_vm15, %v3810_v8, %v3817_v40 }
 0xb73   :  { %v9371_v19 = vunpack.c.l.b16 %v3886_v10  ;;  %v3814_v55 = vsel %vm295_vm15, %v3806_v25, %v3813_v6  ;;  %v3872_v20 = vsel %vm295_vm15, %v3864_v49, %v3871_v0  ;;  %v3887_v45 = vpack.c.bf16 %v3818_v60, %v3818_v60 }
 0xb74   :  { %v3868_v57 = vsel %vm295_vm15, %v3860_v1, %v3867_v23  ;;  %v3866_v31 = vsel %vm295_vm15, %v3865_v35, %v3848_v62  ;;  %v9380_v37 = vunpack.c.l.b16 %v3881_v36  ;;  %v3883_v44 = vpack.c.bf16 %v3814_v55, %v3814_v55 }
 0xb75   :  { %v3882_v52 = vpack.c.bf16 %v3866_v31, %v3866_v31  ;;  %v3884_v15 = vpack.c.bf16 %v3868_v57, %v3868_v57  ;;  %v3888_v16 = vpack.c.bf16 %v3872_v20, %v3872_v20  ;;  %v9382_v46 = vunpack.c.l.b16 %v3887_v45 }
 0xb76   :  { %v9384_v8 = vunpack.c.l.b16 %v3883_v44  ;;  %v6941_v33 = vunpack.i.h.bf16 %v6939_v5  ;;  %v6940_v48 = vunpack.i.l.bf16 %v6939_v5 }
 0xb77   :  { %v9386_v29 = vunpack.c.l.b16 %v3882_v52  ;;  %v9388_v26 = vunpack.c.l.b16 %v3884_v15  ;;  %v9390_v49 = vunpack.c.l.b16 %v3888_v16 }
 0xb78   :  { %v3995_v27 = vrot.slane %v6941_v33, 4  ;;  %v3939_v24 = vrot.slane %v6940_v48, 4 }
 0xb89   :  { %v6949_v25 = vpop.permute.xlu2 %6948 }
 0xb8a   :  { %v6951_v7 = vunpack.i.h.bf16 %v6949_v25  ;;  %v6950_v4 = vunpack.i.l.bf16 %v6949_v25  ;;  %v6954_v43 = vpop.permute.xlu1 %6953 }
 0xb8b   :  { %v6956_v6 = vunpack.i.h.bf16 %v6954_v43  ;;  %v6955_v23 = vunpack.i.l.bf16 %v6954_v43 }
 0xb8c   :  { %v3993_v62 = vrot.slane %v6951_v7, 4  ;;  %v3937_v10 = vrot.slane %v6950_v4, 4  ;;  %v3996_v1 = vsel %vm295_vm15, %v6951_v7, %v3995_v27  ;;  %v3940_v40 = vsel %vm295_vm15, %v6950_v4, %v3939_v24 }
 0xb8d   :  { %v4004_v36 = vperm.slane %v3996_v1, %v7475_v17  ;;  %v3948_v60 = vperm.slane %v3940_v40, %v7475_v17  ;;  %v4005_v55 = vrot.slane %v6956_v6, 4  ;;  %v3949_v57 = vrot.slane %v6955_v23, 4 }
 0xb8e   :  { %v3994_v0 = vsel %vm295_vm15, %v3993_v62, %v6941_v33  ;;  %v3938_v35 = vsel %vm295_vm15, %v3937_v10, %v6940_v48 }
 0xb8f   :  { %v4000_v20 = vperm.slane %v3994_v0, %v7475_v17  ;;  %v3944_v45 = vperm.slane %v3938_v35, %v7475_v17  ;;  %v4031_v5 = vrot.slane %v4004_v36, 4  ;;  %v3975_v25 = vrot.slane %v3948_v60, 4 }
 0xb91   :  { %v4019_v27 = vrot.slane %v4000_v20, 4  ;;  %v3963_v24 = vrot.slane %v3944_v45, 4 }
 0xb99   :  { %v9400_v50 = vpop.permute.xlu2 %6963 }
 0xb9a   :  { %v6966_v44 = vunpack.i.h.bf16 %v9400_v50  ;;  %v6965_v52 = vunpack.i.l.bf16 %v9400_v50 }
 0xb9c   :  { %v9418_v1 = vrot.slane %v6966_v44, 4  ;;  %v9422_v40 = vrot.slane %v6965_v52, 4 }
 0xba1   :  { %v6944_v31 = vpop.permute.xlu0 %6943  ;;  %v9414_v10 = vpop.permute.xlu2 %6983 }
 0xba2   :  { %v6946_v15 = vunpack.i.h.bf16 %v6944_v31  ;;  %v6945_v16 = vunpack.i.l.bf16 %v6944_v31  ;;  %v10491_v11 = vunpack.i.h.bf16 %v9414_v10 }
 0xba4   :  { %v4007_v33 = vrot.slane %v6946_v15, 4  ;;  %v3950_v48 = vsel %vm295_vm15, %v3949_v57, %v6945_v16  ;;  %v3951_v7 = vrot.slane %v6945_v16, 4  ;;  %v4006_v4 = vsel %vm295_vm15, %v4005_v55, %v6946_v15 }
 0xba5   :  { %v3956_v43 = vperm.slane %v3950_v48, %v7475_v17  ;;  %v4012_v62 = vperm.slane %v4006_v4, %v7475_v17 }
 0xba6   :  { %v3952_v0 = vsel %vm295_vm15, %v6955_v23, %v3951_v7  ;;  %v4008_v35 = vsel %vm295_vm15, %v6956_v6, %v4007_v33 }
 0xba7   :  { %v3960_v55 = vperm.slane %v3952_v0, %v7475_v17  ;;  %v3961_v57 = vrot.slane %v3956_v43, 4  ;;  %v3964_v31 = vsel %vm295_vm15, %v3956_v43, %v3963_v24  ;;  %v4016_v15 = vperm.slane %v4008_v35, %v7475_v17 }
 0xba8   :  { %v3972_v16 = vperm.slane %v3964_v31, %v7479_v22  ;;  %v4017_v48 = vrot.slane %v4012_v62, 4  ;;  %v4020_v4 = vsel %vm295_vm15, %v4012_v62, %v4019_v27 }
 0xba9   :  { %v3962_v2 = vsel %vm295_vm15, %v3961_v57, %v3944_v45  ;;  %v3973_v12 = vrot.slane %v3960_v55, 4  ;;  %v3976_v23 = vsel %vm295_vm15, %v3960_v55, %v3975_v25  ;;  %v4028_v6 = vperm.slane %v4020_v4, %v7479_v22  ;;  %v9435_v33 = vpop.permute.xlu0 %6958 }
 0xbaa   :  { %v3968_v7 = vperm.slane %v3962_v2, %v7479_v22  ;;  %v3984_v24 = vperm.slane %v3976_v23, %v7479_v22  ;;  %v3987_v43 = vrot.slane %v3972_v16, 4  ;;  %v4018_v0 = vsel %vm295_vm15, %v4017_v48, %v4000_v20 }
 0xbab   :  { %v3974_v27 = vsel %vm295_vm15, %v3973_v12, %v3948_v60  ;;  %v4024_v62 = vperm.slane %v4018_v0, %v7479_v22  ;;  %v4029_v35 = vrot.slane %v4016_v15, 4  ;;  %v4032_v45 = vsel %vm295_vm15, %v4016_v15, %v4031_v5 }
 0xbac   :  { %v3980_v25 = vperm.slane %v3974_v27, %v7479_v22  ;;  %v3985_v55 = vrot.slane %v3968_v7, 4  ;;  %v3988_v57 = vsel %vm295_vm15, 0.0, %v3987_v43  ;;  %v3991_v31 = vrot.slane %v3984_v24, 4 }
 0xbad   :  { %v4030_v2 = vsel %vm295_vm15, %v4029_v35, %v4004_v36  ;;  %v4040_v4 = vperm.slane %v4032_v45, %v7479_v22  ;;  %v4041_v16 = vrot.slane %v4024_v62, 4  ;;  %v4043_v23 = vrot.slane %v4028_v6, 4 }
 0xbae   :  { %v3989_v20 = vrot.slane %v3980_v25, 4  ;;  %v3992_v12 = vsel %vm295_vm15, 0.0, %v3991_v31  ;;  %v4036_v60 = vperm.slane %v4030_v2, %v7479_v22  ;;  %v10492_v48 = vunpack.i.l.bf16 %v9414_v10 }
 0xbaf   :  { %v3986_v5 = vsel %vm295_vm15, 0.0, %v3985_v55  ;;  %v4044_v15 = vsel %vm295_vm15, 0.0, %v4043_v23  ;;  %v4047_v0 = vrot.slane %v4040_v4, 4  ;;  %v4161_v24 = vsel %vm295_vm15, %v3987_v43, %v3968_v7 }
 0xbb0   :  { %v4042_v36 = vsel %vm295_vm15, 0.0, %v4041_v16  ;;  %v4045_v27 = vrot.slane %v4036_v60, 4  ;;  %v4166_v35 = vrot.slane %v3988_v57, 4  ;;  %v9456_v6 = vrot.slane %v10491_v11, 4 }
 0xbb1   :  { %v4048_v45 = vsel %vm295_vm15, 0.0, %v4047_v0  ;;  %v4177_v2 = vrot.slane %v3992_v12, 4  ;;  %v4215_v9 = vsel %vm295_vm15, %v4043_v23, %v4024_v62  ;;  %v4220_v18 = vrot.slane %v4044_v15, 4  ;;  %v6974_v55 = vpop.permute.xlu0 %6973 }
 0xbb2   :  { %v3990_v42 = vsel %vm295_vm15, 0.0, %v3989_v20  ;;  %v4046_v4 = vsel %vm295_vm15, 0.0, %v4045_v27  ;;  %v4165_v7 = vperm.slane %v4161_v24, %v7475_v17  ;;  %v4167_v43 = vsel %vm295_vm15, %v4166_v35, %v3986_v5 }
 0xbb3   :  { %v4171_v57 = vperm.slane %v4167_v43, %v7475_v17  ;;  %v4219_v16 = vperm.slane %v4215_v9, %v7475_v17  ;;  %v4221_v53 = vsel %vm295_vm15, %v4220_v18, %v4042_v36  ;;  %v10494_v12 = vunpack.i.h.bf16 %v9435_v33 }
 0xbb4   :  { %v4231_v11 = vrot.slane %v4048_v45, 4  ;;  %v9470_v62 = vrot.slane %v10492_v48, 4  ;;  %v6976_v23 = vunpack.i.h.bf16 %v6974_v55  ;;  %v6975_v20 = vunpack.i.l.bf16 %v6974_v55 }
 0xbb5   :  { %v4225_v15 = vperm.slane %v4221_v53, %v7475_v17  ;;  %v10493_v24 = vunpack.i.l.bf16 %v9435_v33  ;;  %v4178_v5 = vsel %vm295_vm15, %v4177_v2, %v3990_v42  ;;  %v4183_v27 = vrot.slane %v4171_v57, 4 }
 0xbb6   :  { %v9477_v9 = vrot.slane %v10494_v12, 4  ;;  %v4117_v18 = vrot.slane %v6976_v23, 4  ;;  %v4061_v36 = vrot.slane %v6975_v20, 4  ;;  %v4064_v35 = vsel %vm295_vm15, %v6975_v20, %v9422_v40 }
 0xbb7   :  { %v9482_v45 = vperm.slane %v4064_v35, %v7475_v17  ;;  %v4120_v53 = vsel %vm295_vm15, %v6976_v23, %v9418_v1  ;;  %v4172_v55 = vsel %vm295_vm15, %v3991_v31, %v3980_v25  ;;  %v4182_v42 = vperm.slane %v4178_v5, %v7475_v17 }
 0xbb8   :  { %v4062_v2 = vsel %vm295_vm15, %v4061_v36, %v6965_v52  ;;  %v4118_v43 = vsel %vm295_vm15, %v4117_v18, %v6966_v44  ;;  %v9495_v40 = vperm.slane %v4120_v53, %v7475_v17  ;;  %v4184_v20 = vsel %vm295_vm15, %v4183_v27, %v4165_v7 }
 0xbb9   :  { %v9500_v1 = vrot.slane %v10493_v24, 4  ;;  %v9503_v25 = vperm.slane %v4062_v2, %v7475_v17  ;;  %v9506_v31 = vperm.slane %v4118_v43, %v7475_v17  ;;  %v9508_v52 = vpop.permute.xlu0 %6988  ;;  %v4190_v50 = vperm.slane %v4184_v20, %v7479_v22 }
 0xbba   :  { %v4176_v5 = vperm.slane %v4172_v55, %v7475_v17  ;;  %v4195_v27 = vrot.slane %v4182_v42, 4  ;;  %v4226_v53 = vsel %vm295_vm15, %v4047_v0, %v4036_v60  ;;  %v4232_v55 = vsel %vm295_vm15, %v4231_v11, %v4046_v4 }
 0xbbb   :  { %v4209_v35 = vrot.slane %v4190_v50, 4  ;;  %v4230_v48 = vperm.slane %v4226_v53, %v7475_v17  ;;  %v4237_v23 = vrot.slane %v4225_v15, 4  ;;  %v4185_v44 = vrot.slane %v4165_v7, 4 }
 0xbbc   :  { %v4196_v20 = vsel %vm295_vm15, %v4195_v27, %v4176_v5  ;;  %v4236_v24 = vperm.slane %v4232_v55, %v7475_v17  ;;  %v4197_v12 = vrot.slane %v4176_v5, 4  ;;  %v4239_v36 = vrot.slane %v4219_v16, 4 }
 0xbbd   :  { %v4202_v39 = vperm.slane %v4196_v20, %v7479_v22  ;;  %v4251_v18 = vrot.slane %v4230_v48, 4  ;;  %v4238_v0 = vsel %vm295_vm15, %v4237_v23, %v4219_v16  ;;  %v4186_v43 = vsel %vm295_vm15, %v4171_v57, %v4185_v44 }
 0xbbe   :  { %v4244_v53 = vperm.slane %v4238_v0, %v7479_v22  ;;  %v4249_v2 = vrot.slane %v4236_v24, 4  ;;  %v4194_v11 = vperm.slane %v4186_v43, %v7479_v22  ;;  %v4198_v4 = vsel %vm295_vm15, %v4182_v42, %v4197_v12 }
 0xbbf   :  { %v4210_v60 = vsel %vm295_vm15, %v4202_v39, %v4209_v35  ;;  %v4207_v27 = vrot.slane %v4202_v39, 4  ;;  %v4240_v7 = vsel %vm295_vm15, %v4225_v15, %v4239_v36  ;;  %v4252_v5 = vsel %vm295_vm15, %v4236_v24, %v4251_v18 }
 0xbc0   :  { %v4379_v20 = vpack.c.bf16 %v4210_v60, %v4210_v60  ;;  %v10553_v35 = vunpack.i.h.bf16 %v9508_v52  ;;  %v4250_v39 = vsel %vm295_vm15, %v4249_v2, %v4230_v48  ;;  %v4263_v57 = vrot.slane %v4244_v53, 4  ;;  %v6969_v48 = vpop.permute.xlu1 %6968 }
 0xbc1   :  { %v4208_v55 = vsel %vm295_vm15, %v4207_v27, %v4190_v50  ;;  %v4206_v44 = vperm.slane %v4198_v4, %v7479_v22  ;;  %v10554_v23 = vunpack.i.l.bf16 %v9508_v52  ;;  %v4256_v12 = vperm.slane %v4250_v39, %v7479_v22 }
 0xbc2   :  { %v9535_v16 = vrot.slane %v10553_v35, 4  ;;  %v9545_v15 = vperm.slane %v4252_v5, %v7479_v22  ;;  %v4377_v24 = vpack.c.bf16 %v4208_v55, %v4208_v55  ;;  %v4934_v42 = vunpack.c.l.b16 %v4379_v20 }
 0xbc3   :  { %v9541_v43 = vrot.slane %v10554_v23, 4  ;;  %v4211_v50 = vrot.slane %v4206_v44, 4  ;;  %v9548_v18 = vperm.slane %v4240_v7, %v7479_v22  ;;  %v4213_v36 = vrot.slane %v4194_v11, 4 }
 0xbc4   :  { %v4264_v2 = vsel %vm295_vm15, %v4256_v12, %v4263_v57  ;;  %v4265_v60 = vrot.slane %v9545_v15, 4  ;;  %v4261_v0 = vrot.slane %v4256_v12, 4  ;;  %v9552_v27 = vunpack.c.l.b16 %v4377_v24 }
 0xbc5   :  { %v6971_v4 = vunpack.i.h.bf16 %v6969_v48  ;;  %v6970_v35 = vunpack.i.l.bf16 %v6969_v48  ;;  %v4380_v39 = vpack.c.bf16 %v4264_v2, %v4264_v2  ;;  %v4212_v5 = vsel %vm295_vm15, %v4211_v50, %v4194_v11 }
 0xbc6   :  { %v9557_v20 = vsel %vm295_vm15, %v4265_v60, %v9548_v18  ;;  %v4381_v7 = vpack.c.bf16 %v4212_v5, %v4212_v5  ;;  %v9560_v55 = vsel %vm295_vm15, %v4261_v0, %v4244_v53  ;;  %v9563_v57 = vsel %vm295_vm15, %v4206_v44, %v4213_v36 }
 0xbc7   :  { %v4105_v23 = vrot.slane %v6971_v4, 4  ;;  %v4108_v12 = vsel %vm295_vm15, %v6971_v4, %v9477_v9  ;;  %v4049_v24 = vrot.slane %v6970_v35, 4  ;;  %v4052_v48 = vsel %vm295_vm15, %v6970_v35, %v9500_v1 }
 0xbc8   :  { %v4116_v11 = vperm.slane %v4108_v12, %v7475_v17  ;;  %v4060_v50 = vperm.slane %v4052_v48, %v7475_v17  ;;  %v4935_v2 = vunpack.c.l.b16 %v4380_v39  ;;  %v4382_v53 = vpack.c.bf16 %v9557_v20, %v9557_v20 }
 0xbc9   :  { %v10555_v60 = vunpack.i.h.bf16 %v9435_v33  ;;  %v10556_v36 = vunpack.i.l.bf16 %v9435_v33  ;;  %v9579_v0 = vunpack.c.l.b16 %v4381_v7  ;;  %v4378_v1 = vpack.c.bf16 %v9560_v55, %v9560_v55 }
 0xbca   :  { %v4143_v35 = vrot.slane %v4116_v11, 4  ;;  %v10557_v5 = vrot.slane %v9482_v45, 4  ;;  %v4087_v12 = vrot.slane %v4060_v50, 4  ;;  %v10558_v33 = vrot.slane %v9495_v40, 4 }
 0xbcb   :  { %v4106_v44 = vsel %vm295_vm15, %v4105_v23, %v10555_v60  ;;  %v4050_v9 = vsel %vm295_vm15, %v4049_v24, %v10556_v36  ;;  %v4936_v24 = vpack.c.b16 %v4935_v2, %v4934_v42  ;;  %v10559_v55 = vrot.slane %v9503_v25, 4 }
 0xbcc   :  { %v4112_v4 = vperm.slane %v4106_v44, %v7475_v17  ;;  %v4056_v39 = vperm.slane %v4050_v9, %v7475_v17  ;;  %v4086_v20 = vsel %vm295_vm15, %v10557_v5, %v4060_v50  ;;  %v4142_v7 = vsel %vm295_vm15, %v10558_v33, %v4116_v11 }
 0xbcd   :  { %v4092_v23 = vperm.slane %v4086_v20, %v7479_v22  ;;  %v10560_v36 = vrot.slane %v9506_v31, 4  ;;  %v4088_v50 = vsel %vm295_vm15, %v9482_v45, %v4087_v12 }
 0xbce   :  { %v4131_v48 = vrot.slane %v4112_v4, 4  ;;  %v4074_v60 = vsel %vm295_vm15, %v10559_v55, %v4056_v39  ;;  %v4075_v44 = vrot.slane %v4056_v39, 4  ;;  %v4096_v11 = vperm.slane %v4088_v50, %v7479_v22 }
 0xbcf   :  { %v4130_v9 = vsel %vm295_vm15, %v10560_v36, %v4112_v4  ;;  %v4080_v5 = vperm.slane %v4074_v60, %v7479_v22  ;;  %v4101_v20 = vrot.slane %v4092_v23, 4  ;;  %v4144_v39 = vsel %vm295_vm15, %v9495_v40, %v4143_v35  ;;  %v6979_v4 = vpop.permute.xlu1 %6978 }
 0xbd0   :  { %v4136_v41 = vperm.slane %v4130_v9, %v7479_v22  ;;  %v4076_v42 = vsel %vm295_vm15, %v9503_v25, %v4075_v44  ;;  %v4132_v2 = vsel %vm295_vm15, %v9506_v31, %v4131_v48  ;;  %v4103_v60 = vrot.slane %v4096_v11, 4 }
 0xbd1   :  { %v4084_v33 = vperm.slane %v4076_v42, %v7479_v22  ;;  %v4097_v55 = vrot.slane %v4080_v5, 4  ;;  %v4102_v45 = vsel %vm295_vm15, 0.0, %v4101_v20  ;;  %v4140_v12 = vperm.slane %v4132_v2, %v7479_v22 }
 0xbd2   :  { %v4148_v36 = vperm.slane %v4142_v7, %v7479_v22  ;;  %v4152_v25 = vperm.slane %v4144_v39, %v7479_v22  ;;  %v4153_v44 = vrot.slane %v4136_v41, 4  ;;  %v4941_v40 = vsel %vm1769_vm0, %v4936_v24, 0 }
 0xbd3   :  { %v9615_v9 = vsel %vm295_vm15, 0.0, %v4097_v55  ;;  %v4099_v31 = vrot.slane %v4084_v33, 4  ;;  %v4155_v48 = vrot.slane %v4140_v12, 4  ;;  %v4104_v35 = vsel %vm295_vm15, 0.0, %v4103_v60  ;;  %4950 = vmatpush.bf16.xpose.msra.mxu2 %v4941_v40 }
 0xbd4   :  { %v9620_v50 = vsel %vm295_vm15, 0.0, %v4153_v44  ;;  %v4157_v20 = vrot.slane %v4148_v36, 4  ;;  %v4159_v42 = vrot.slane %v4152_v25, 4  ;;  %v4280_v39 = vsel %vm295_vm15, %v4103_v60, %v4092_v23 }
 0xbd5   :  { %v9623_v7 = vsel %vm295_vm15, 0.0, %v4099_v31  ;;  %v9626_v11 = vsel %vm295_vm15, 0.0, %v4155_v48  ;;  %v4269_v2 = vsel %vm295_vm15, %v4099_v31, %v4080_v5  ;;  %v9634_v12 = vperm.slane %v4280_v39, %v7475_v17 }
 0xbd6   :  { %v4158_v24 = vsel %vm295_vm15, 0.0, %v4157_v20  ;;  %v4160_v33 = vsel %vm295_vm15, 0.0, %v4159_v42  ;;  %v4285_v25 = vrot.slane %v4104_v35, 4  ;;  %v9637_v44 = vsel %vm295_vm15, %v4155_v48, %v4136_v41 }
 0xbd7   :  { %v4328_v40 = vrot.slane %v9626_v11, 4  ;;  %v4334_v51 = vsel %vm295_vm15, %v4159_v42, %v4148_v36  ;;  %v4339_v23 = vrot.slane %v4160_v33, 4  ;;  %v4965_v60 = vunpack.c.l.b16 %v4382_v53  ;;  %v6994_v42 = vpop.permute.xlu1 %6993 }
 0xbd8   :  { %v9642_v5 = vperm.slane %v4334_v51, %v7475_v17  ;;  %v4905_v31 = vunpack.c.l.b16 %v4378_v1  ;;  %v4286_v20 = vsel %vm295_vm15, %v4285_v25, %v4102_v45  ;;  %v4267_v55 = vrot.slane %v9548_v18, 4 }
 0xbd9   :  { %v4383_v35 = vpack.c.bf16 %v9563_v57, %v9563_v57  ;;  %v6981_v39 = vunpack.i.h.bf16 %v6979_v4  ;;  %v9649_v41 = vperm.slane %v4286_v20, %v7475_v17  ;;  %v4340_v48 = vsel %vm295_vm15, %v4339_v23, %v4158_v24 }
 0xbda   :  { %v4966_v36 = vpack.c.b16 %v4965_v60, %v9579_v0  ;;  %v4906_v51 = vpack.c.b16 %v4905_v31, %v9552_v27  ;;  %v9655_v53 = vperm.slane %v4340_v48, %v7475_v17  ;;  %v4268_v18 = vsel %vm295_vm15, %v9545_v15, %v4267_v55 }
 0xbdb   :  { %v4994_v1 = vunpack.c.l.b16 %v4383_v35  ;;  %v4499_v45 = vrot.slane %v6981_v39, 4  ;;  %v10561_v57 = vpack.c.b16 %v9297_v30, %v9293_v28  ;;  %v4384_v33 = vpack.c.bf16 %v4268_v18, %v4268_v18 }
 0xbdc   :  { %v4971_v24 = vsel %vm1769_vm0, %v4966_v36, 0  ;;  %v4911_v0 = vsel %vm1769_vm0, %v4906_v51, 0  ;;  %v6980_v27 = vunpack.i.l.bf16 %v6979_v4  ;;  %v4498_v25 = vsel %vm295_vm15, %v9535_v16, %v6981_v39 }
 0xbdd   :  { %6624 = vmatmul.msk.bf16.vlgmr.msra.gmra.mxu2 %vm1769_vm0, %v10561_v57  ;;  %4980 = vmatpush.bf16.xpose.msrb.mxu0 %v4971_v24  ;;  %v10562_v15 = vunpack.i.h.bf16 %v9508_v52  ;;  %v6996_v23 = vunpack.i.h.bf16 %v6994_v42  ;;  %v6995_v60 = vunpack.i.l.bf16 %v6994_v42  ;;  %v4995_v28 = vunpack.c.l.b16 %v4384_v33 }
 0xbde   :  { %4920 = vmatpush.bf16.xpose.msra.mxu1 %v4911_v0  ;;  %v4442_v30 = vsel %vm295_vm15, %v9541_v43, %v6980_v27  ;;  %v4443_v31 = vrot.slane %v6980_v27, 4  ;;  %v4504_v20 = vperm.slane %v4498_v25, %v7475_v17  ;;  %v10563_v39 = vunpack.i.l.bf16 %v9508_v52 }
 0xbdf   :  { %v4500_v55 = vsel %vm295_vm15, %v10562_v15, %v4499_v45  ;;  %v4448_v4 = vperm.slane %v4442_v30, %v7475_v17  ;;  %v4509_v48 = vrot.slane %v6996_v23, 4  ;;  %v4453_v36 = vrot.slane %v6995_v60, 4 }
 0xbe0   :  { %v4508_v35 = vperm.slane %v4500_v55, %v7475_v17  ;;  %v4996_v16 = vpack.c.b16 %v4995_v28, %v4994_v1  ;;  %v4444_v51 = vsel %vm295_vm15, %v10563_v39, %v4443_v31  ;;  %v4523_v18 = vrot.slane %v4504_v20, 4 }
 0xbe1   :  { %v4456_v42 = vsel %vm295_vm15, %v6995_v60, %v9470_v62  ;;  %v4452_v43 = vperm.slane %v4444_v51, %v7475_v17  ;;  %v4467_v45 = vrot.slane %v4448_v4, 4  ;;  %v10564_v24 = vunpack.i.l.bf16 %v9414_v10 }
 0xbe2   :  { %v4535_v57 = vrot.slane %v4508_v35, 4  ;;  %v5001_v33 = vsel %vm1769_vm0, %v4996_v16, 0  ;;  %v4464_v52 = vperm.slane %v4456_v42, %v7475_v17  ;;  %v10565_v27 = vunpack.i.h.bf16 %v9414_v10 }
 0xbe3   :  { %v4454_v0 = vsel %vm295_vm15, %v4453_v36, %v10564_v24  ;;  %v4479_v62 = vrot.slane %v4452_v43, 4  ;;  %v4512_v15 = vsel %vm295_vm15, %v6996_v23, %v9456_v6  ;;  %v9694_v60 = vperm.slane %v4269_v2, %v7475_v17 }
 0xbe4   :  { %v4460_v1 = vperm.slane %v4454_v0, %v7475_v17  ;;  %v4510_v25 = vsel %vm295_vm15, %v4509_v48, %v10565_v27  ;;  %v10566_v28 = vpack.c.b16 %v9317_v21, %v9304_v54  ;;  %v10567_v10 = vpack.c.b16 %v9306_v34, %v9299_v59 }
 0xbe5   :  { %v4516_v55 = vperm.slane %v4510_v25, %v7475_v17  ;;  %v4477_v48 = vrot.slane %v4464_v52, 4  ;;  %v4520_v6 = vperm.slane %v4512_v15, %v7475_v17  ;;  %v4480_v2 = vsel %vm295_vm15, %v4464_v52, %v4479_v62 }
 0xbe6   :  { %5010 = vmatpush.bf16.xpose.msrb.mxu1 %v5001_v33  ;;  %6625 = vmatmul.msk.bf16.vlgmr.msrb.gmra.mxu0 %vm1769_vm0, %v10566_v28  ;;  %v4465_v30 = vrot.slane %v4460_v1, 4  ;;  %v4468_v31 = vsel %vm295_vm15, %v4460_v1, %v4467_v45  ;;  %v4488_v59 = vperm.slane %v4480_v2, %v7479_v22 }
 0xbe7   :  { %6623 = vmatmul.msk.bf16.vlgmr.msra.gmra.mxu1 %vm1769_vm0, %v10567_v10  ;;  %v4476_v23 = vperm.slane %v4468_v31, %v7479_v22  ;;  %v4521_v36 = vrot.slane %v4516_v55, 4  ;;  %v4524_v54 = vsel %vm295_vm15, %v4516_v55, %v4523_v18  ;;  %v4478_v16 = vsel %vm295_vm15, %v4477_v48, %v4452_v43 }
 0xbe8   :  { %v4466_v21 = vsel %vm295_vm15, %v4465_v30, %v4448_v4  ;;  %v4532_v34 = vperm.slane %v4524_v54, %v7479_v22  ;;  %v4484_v51 = vperm.slane %v4478_v16, %v7479_v22  ;;  %v4495_v24 = vrot.slane %v4488_v59, 4 }
 0xbe9   :  { %v4472_v39 = vperm.slane %v4466_v21, %v7479_v22  ;;  %v4491_v42 = vrot.slane %v4476_v23, 4  ;;  %v4522_v45 = vsel %vm295_vm15, %v4521_v36, %v4504_v20  ;;  %v4533_v33 = vrot.slane %v4520_v6, 4 }
 0xbea   :  { %v4528_v0 = vperm.slane %v4522_v45, %v7479_v22  ;;  %v4536_v18 = vsel %vm295_vm15, %v4520_v6, %v4535_v57  ;;  %v4493_v1 = vrot.slane %v4484_v51, 4  ;;  %v4496_v27 = vsel %vm295_vm15, 0.0, %v4495_v24 }
 0xbeb   :  { %v4489_v4 = vrot.slane %v4472_v39, 4  ;;  %v9719_v43 = vsel %vm295_vm15, 0.0, %v4491_v42  ;;  %v4544_v52 = vperm.slane %v4536_v18, %v7479_v22  ;;  %v4534_v25 = vsel %vm295_vm15, %v4533_v33, %v4508_v35 }
 0xbec   :  { %v4545_v62 = vrot.slane %v4528_v0, 4  ;;  %v4547_v15 = vrot.slane %v4532_v34, 4  ;;  %v4494_v55 = vsel %vm295_vm15, 0.0, %v4493_v1  ;;  %v4540_v57 = vperm.slane %v4534_v25, %v7479_v22 }
 0xbed   :  { %v9725_v20 = vsel %vm295_vm15, 0.0, %v4489_v4  ;;  %v4551_v28 = vrot.slane %v4544_v52, 4  ;;  %v4665_v31 = vsel %vm295_vm15, %v4491_v42, %v4472_v39  ;;  %v4670_v35 = vrot.slane %v9719_v43, 4 }
 0xbee   :  { %v9730_v10 = vsel %vm295_vm15, 0.0, %v4545_v62  ;;  %v9733_v30 = vsel %vm295_vm15, 0.0, %v4547_v15  ;;  %v4549_v48 = vrot.slane %v4540_v57, 4  ;;  %v9739_v23 = vperm.slane %v4665_v31, %v7475_v17 }
 0xbef   :  { %v4552_v6 = vsel %vm295_vm15, 0.0, %v4551_v28  ;;  %v4676_v2 = vsel %vm295_vm15, %v4495_v24, %v4484_v51  ;;  %v4681_v54 = vrot.slane %v4496_v27, 4  ;;  %v4719_v21 = vsel %vm295_vm15, %v4547_v15, %v4528_v0 }
 0xbf0   :  { %v9743_v36 = vperm.slane %v4676_v2, %v7475_v17  ;;  %v4724_v16 = vrot.slane %v9733_v30, 4  ;;  %v4550_v59 = vsel %vm295_vm15, 0.0, %v4549_v48  ;;  %v9749_v34 = vperm.slane %v4719_v21, %v7475_v17 }
 0xbf1   :  { %v4730_v39 = vsel %vm295_vm15, %v4551_v28, %v4540_v57  ;;  %v4735_v42 = vrot.slane %v4552_v6, 4  ;;  %v4682_v45 = vsel %vm295_vm15, %v4681_v54, %v4494_v55  ;;  %v10568_v0 = vrot.slane %v9623_v7, 4 }
 0xbf2   :  { %v4701_v51 = vrot.slane %v9743_v36, 4  ;;  %v9755_v24 = vperm.slane %v4730_v39, %v7475_v17  ;;  %v9762_v18 = vperm.slane %v4682_v45, %v7475_v17  ;;  %v4293_v52 = vrot.slane %v9694_v60, 4 }
 0xbf3   :  { %v4275_v33 = vsel %vm295_vm15, %v10568_v0, %v9615_v9  ;;  %v4736_v4 = vsel %vm295_vm15, %v4735_v42, %v4550_v59  ;;  %v4305_v62 = vrot.slane %v9634_v12, 4  ;;  %v4327_v7 = vperm.slane %v9637_v44, %v7475_v17 }
 0xbf4   :  { %v4279_v1 = vperm.slane %v4275_v33, %v7475_v17  ;;  %v9768_v27 = vperm.slane %v4736_v4, %v7475_v17  ;;  %v4755_v25 = vrot.slane %v9755_v24, 4  ;;  %v4329_v15 = vsel %vm295_vm15, %v4328_v40, %v9620_v50 }
 0xbf5   :  { %v4359_v55 = vrot.slane %v9642_v5, 4  ;;  %v10569_v28 = vpack.c.b16 %v9330_v47, %v9328_v38  ;;  %v4306_v44 = vsel %vm295_vm15, %v9649_v41, %v4305_v62  ;;  %v4333_v48 = vperm.slane %v4329_v15, %v7475_v17 }
 0xbf6   :  { %v4294_v9 = vsel %vm295_vm15, %v4279_v1, %v4293_v52  ;;  %v4291_v57 = vrot.slane %v4279_v1, 4  ;;  %v4347_v6 = vrot.slane %v4327_v7, 4  ;;  %v4314_v11 = vperm.slane %v4306_v44, %v7479_v22 }
 0xbf7   :  { %6626 = vmatmul.msk.bf16.vlgmr.msrb.gmra.mxu1 %vm1769_vm0, %v10569_v28  ;;  %v4302_v31 = vperm.slane %v4294_v9, %v7479_v22  ;;  %v4360_v50 = vsel %vm295_vm15, %v9655_v53, %v4359_v55  ;;  %v4303_v38 = vrot.slane %v9649_v41, 4  ;;  %v4345_v21 = vrot.slane %v4333_v48, 4 }
 0xbf8   :  { %v4292_v40 = vsel %vm295_vm15, %v4291_v57, %v9694_v60  ;;  %v4348_v47 = vsel %vm295_vm15, %v4333_v48, %v4347_v6  ;;  %v4368_v2 = vperm.slane %v4360_v50, %v7479_v22  ;;  %v4319_v59 = vrot.slane %v4314_v11, 4 }
 0xbf9   :  { %v4298_v54 = vperm.slane %v4292_v40, %v7479_v22  ;;  %v4356_v39 = vperm.slane %v4348_v47, %v7479_v22  ;;  %v4304_v42 = vsel %vm295_vm15, %v4303_v38, %v9634_v12  ;;  %v4357_v45 = vrot.slane %v9655_v53, 4 }
 0xbfa   :  { %v4373_v0 = vrot.slane %v4368_v2, 4  ;;  %v4310_v60 = vperm.slane %v4304_v42, %v7479_v22  ;;  %v4346_v41 = vsel %vm295_vm15, %v4345_v21, %v4327_v7  ;;  %v4321_v33 = vrot.slane %v4302_v31, 4 }
 0xbfb   :  { %v4320_v4 = vsel %vm295_vm15, %v4319_v59, %v4302_v31  ;;  %v4352_v1 = vperm.slane %v4346_v41, %v7479_v22  ;;  %v4358_v52 = vsel %vm295_vm15, %v4357_v45, %v9642_v5  ;;  %v4375_v62 = vrot.slane %v4356_v39, 4 }
 0xbfc   :  { %v4374_v9 = vsel %vm295_vm15, %v4373_v0, %v4356_v39  ;;  %v4389_v15 = vpack.c.bf16 %v4320_v4, %v4320_v4  ;;  %v4315_v12 = vrot.slane %v4310_v60, 4  ;;  %v4364_v53 = vperm.slane %v4358_v52, %v7479_v22 }
 0xbfd   :  { %v4390_v55 = vpack.c.bf16 %v4374_v9, %v4374_v9  ;;  %v4322_v57 = vsel %vm295_vm15, %v4314_v11, %v4321_v33  ;;  %v4376_v7 = vsel %vm295_vm15, %v4368_v2, %v4375_v62  ;;  %v4317_v28 = vrot.slane %v4298_v54, 4 }
 0xbfe   :  { %v5084_v44 = vunpack.c.l.b16 %v4389_v15  ;;  %v4316_v31 = vsel %vm295_vm15, %v4315_v12, %v4298_v54  ;;  %v4369_v48 = vrot.slane %v4364_v53, 4  ;;  %v4391_v6 = vpack.c.bf16 %v4322_v57, %v4322_v57 }
 0xbff   :  { %v5085_v50 = vunpack.c.l.b16 %v4390_v55  ;;  %v4385_v5 = vpack.c.bf16 %v4316_v31, %v4316_v31  ;;  %v4392_v40 = vpack.c.bf16 %v4376_v7, %v4376_v7  ;;  %v4318_v38 = vsel %vm295_vm15, %v4310_v60, %v4317_v28 }
 0xc00   :  { %v4370_v47 = vsel %vm295_vm15, %v4369_v48, %v4352_v1  ;;  %v5114_v21 = vunpack.c.l.b16 %v4391_v6  ;;  %v4371_v59 = vrot.slane %v4352_v1, 4  ;;  %v4387_v39 = vpack.c.bf16 %v4318_v38, %v4318_v38 }
 0xc01   :  { %v5086_v42 = vpack.c.b16 %v5085_v50, %v5084_v44  ;;  %v4386_v11 = vpack.c.bf16 %v4370_v47, %v4370_v47  ;;  %v5024_v45 = vunpack.c.l.b16 %v4385_v5  ;;  %v5115_v2 = vunpack.c.l.b16 %v4392_v40 }
 0xc02   :  { %v4372_v0 = vsel %vm295_vm15, %v4364_v53, %v4371_v59  ;;  %v5054_v41 = vunpack.c.l.b16 %v4387_v39  ;;  %v4671_v54 = vsel %vm295_vm15, %v4670_v35, %v9725_v20  ;;  %v4689_v33 = vrot.slane %v9739_v23, 4 }
 0xc03   :  { %v5091_v60 = vsel %vm1769_vm0, %v5086_v42, 0  ;;  %v5025_v4 = vunpack.c.l.b16 %v4386_v11  ;;  %v5116_v52 = vpack.c.b16 %v5115_v2, %v5114_v21  ;;  %v4388_v1 = vpack.c.bf16 %v4372_v0, %v4372_v0 }
 0xc04   :  { %5100 = vmatpush.bf16.xpose.msra.mxu0 %v5091_v60  ;;  %v4675_v62 = vperm.slane %v4671_v54, %v7475_v17  ;;  %v4702_v9 = vsel %vm295_vm15, %v9762_v18, %v4701_v51  ;;  %v4725_v43 = vsel %vm295_vm15, %v4724_v16, %v9730_v10  ;;  %v4743_v20 = vrot.slane %v9749_v34, 4 }
 0xc05   :  { %v5026_v35 = vpack.c.b16 %v5025_v4, %v5024_v45  ;;  %v5121_v15 = vsel %vm1769_vm0, %v5116_v52, 0  ;;  %v5055_v12 = vunpack.c.l.b16 %v4388_v1  ;;  %v4710_v53 = vperm.slane %v4702_v9, %v7479_v22 }
 0xc06   :  { %5130 = vmatpush.bf16.xpose.msra.mxu1 %v5121_v15  ;;  %v4690_v55 = vsel %vm295_vm15, %v4675_v62, %v4689_v33  ;;  %v4729_v57 = vperm.slane %v4725_v43, %v7475_v17  ;;  %v4756_v30 = vsel %vm295_vm15, %v9768_v27, %v4755_v25  ;;  %v4687_v51 = vrot.slane %v4675_v62, 4 }
 0xc07   :  { %v5031_v10 = vsel %vm1769_vm0, %v5026_v35, 0  ;;  %v5056_v16 = vpack.c.b16 %v5055_v12, %v5054_v41  ;;  %v4698_v7 = vperm.slane %v4690_v55, %v7479_v22  ;;  %v4715_v28 = vrot.slane %v4710_v53, 4 }
 0xc08   :  { %5040 = vmatpush.bf16.xpose.msrb.mxu2 %v5031_v10  ;;  %v4744_v44 = vsel %vm295_vm15, %v4729_v57, %v4743_v20  ;;  %v4764_v31 = vperm.slane %v4756_v30, %v7479_v22  ;;  %v4688_v48 = vsel %vm295_vm15, %v4687_v51, %v9739_v23  ;;  %v4699_v6 = vrot.slane %v9762_v18, 4 }
 0xc09   :  { %v5061_v50 = vsel %vm1769_vm0, %v5056_v16, 0  ;;  %v4716_v25 = vsel %vm295_vm15, %v4715_v28, %v4698_v7  ;;  %v4752_v5 = vperm.slane %v4744_v44, %v7479_v22  ;;  %v4694_v40 = vperm.slane %v4688_v48, %v7479_v22 }
 0xc0a   :  { %5070 = vmatpush.bf16.xpose.msra.mxu3 %v5061_v50  ;;  %v4769_v38 = vrot.slane %v4764_v31, 4  ;;  %v4885_v47 = vpack.c.bf16 %v4716_v25, %v4716_v25  ;;  %v4700_v21 = vsel %vm295_vm15, %v4699_v6, %v9743_v36  ;;  %v4741_v59 = vrot.slane %v4729_v57, 4 }
 0xc0b   :  { %v10570_v23 = vpack.c.b16 %v9371_v19, %v9367_v14  ;;  %v4706_v18 = vperm.slane %v4700_v21, %v7479_v22  ;;  %v4753_v39 = vrot.slane %v9768_v27, 4  ;;  %v4717_v42 = vrot.slane %v4698_v7, 4 }
 0xc0c   :  { %v4771_v11 = vrot.slane %v4752_v5, 4  ;;  %v4770_v45 = vsel %vm295_vm15, %v4769_v38, %v4752_v5  ;;  %v5392_v2 = vunpack.c.l.b16 %v4885_v47  ;;  %v4742_v0 = vsel %vm295_vm15, %v4741_v59, %v9749_v34 }
 0xc0d   :  { %6629 = vmatmul.msk.bf16.vlgmr.msra.gmra.mxu0 %vm1769_vm0, %v10570_v23  ;;  %v4713_v41 = vrot.slane %v4694_v40, 4  ;;  %v10571_v36 = vpack.c.b16 %v9390_v49, %v9382_v46  ;;  %v4886_v14 = vpack.c.bf16 %v4770_v45, %v4770_v45  ;;  %v4711_v19 = vrot.slane %v4706_v18, 4 }
 0xc0e   :  { %v4748_v54 = vperm.slane %v4742_v0, %v7479_v22  ;;  %v4754_v27 = vsel %vm295_vm15, %v4753_v39, %v9755_v24  ;;  %v4718_v60 = vsel %vm295_vm15, %v4710_v53, %v4717_v42  ;;  %v4772_v4 = vsel %vm295_vm15, %v4764_v31, %v4771_v11 }
 0xc0f   :  { %6630 = vmatmul.msk.bf16.vlgmr.msra.gmra.mxu1 %vm1769_vm0, %v10571_v36  ;;  %v4760_v33 = vperm.slane %v4754_v27, %v7479_v22  ;;  %v4714_v34 = vsel %vm295_vm15, %v4706_v18, %v4713_v41  ;;  %v10572_v46 = vpack.c.b16 %v9386_v29, %v9380_v37  ;;  %v5393_v49 = vunpack.c.l.b16 %v4886_v14 }
 0xc10   :  { %v4712_v52 = vsel %vm295_vm15, %v4711_v19, %v4694_v40  ;;  %v4887_v1 = vpack.c.bf16 %v4718_v60, %v4718_v60  ;;  %v4888_v62 = vpack.c.bf16 %v4772_v4, %v4772_v4  ;;  %v4767_v43 = vrot.slane %v4748_v54, 4 }
 0xc11   :  { %6627 = vmatmul.msk.bf16.vlgmr.msrb.gmra.mxu2 %vm1769_vm0, %v10572_v46  ;;  %v4765_v9 = vrot.slane %v4760_v33, 4  ;;  %v4881_v24 = vpack.c.bf16 %v4712_v52, %v4712_v52  ;;  %v4883_v20 = vpack.c.bf16 %v4714_v34, %v4714_v34  ;;  %v10573_v35 = vpack.c.b16 %v9388_v26, %v9384_v8 }
 0xc12   :  { %v5394_v15 = vpack.c.b16 %v5393_v49, %v5392_v2  ;;  %v5420_v12 = vunpack.c.l.b16 %v4887_v1  ;;  %v5421_v53 = vunpack.c.l.b16 %v4888_v62  ;;  %v4768_v55 = vsel %vm295_vm15, %v4760_v33, %v4767_v43 }
 0xc13   :  { %6628 = vmatmul.msk.bf16.vlgmr.msra.gmra.mxu3 %vm1769_vm0, %v10573_v35  ;;  %v4766_v37 = vsel %vm295_vm15, %v4765_v9, %v4748_v54  ;;  %v5336_v29 = vunpack.c.l.b16 %v4881_v24  ;;  %v4884_v51 = vpack.c.bf16 %v4768_v55, %v4768_v55  ;;  %v5364_v10 = vunpack.c.l.b16 %v4883_v20 }
 0xc14   :  { %5406 = vmatpush.bf16.msrb.mxu0 %v5394_v15  ;;  %v4882_v57 = vpack.c.bf16 %v4766_v37, %v4766_v37  ;;  %v5422_v30 = vpack.c.b16 %v5421_v53, %v5420_v12 }
 0xc15   :  { %v5365_v7 = vunpack.c.l.b16 %v4884_v51 }
 0xc16   :  { %v5337_v16 = vunpack.c.l.b16 %v4882_v57  ;;  %5434 = vmatpush.bf16.msrb.mxu1 %v5422_v30 }
 0xc17   :  { %v5366_v8 = vpack.c.b16 %v5365_v7, %v5364_v10 }
 0xc18   :  { %v5338_v28 = vpack.c.b16 %v5337_v16, %v5336_v29 }
 0xc19   :  { %5378 = vmatpush.bf16.msrb.mxu3 %v5366_v8 }
 0xc1a   :  { %5350 = vmatpush.bf16.msra.mxu2 %v5338_v28 }
 0xc60   :  { %v4952_v26 = vpop.f32.mrf.mxu2 }
 0xc61   :  { %v5143_v44 = vsel %vm2000_vm2, %v4952_v26, -inf }
 0xc62   :  { %5144 = vmax.xlane.f32.xlu0 %v5143_v44 }
 0xc63   :  { %v4982_v31 = vpop.f32.mrf.mxu0 }
 0xc64   :  { %v4922_v48 = vpop.f32.mrf.mxu1  ;;  %v5149_v6 = vsel %vm2000_vm2, %v4982_v31, -inf }
 0xc65   :  { %v5137_v50 = vsel %vm2000_vm2, %v4922_v48, -inf  ;;  %5150 = vmax.xlane.f32.xlu1 %v5149_v6 }
 0xc66   :  { %5138 = vmax.xlane.f32.xlu2 %v5137_v50 }
 0xc68   :  { %v9888_v47 = vpop.f32.mrf.mxu2 }
 0xc69   :  { %v5146_v59 = vsel %vm2000_vm2, %v9888_v47, -inf }
 0xc6b   :  { %v4984_v25 = vpop.f32.mrf.mxu0 }
 0xc6c   :  { %v4924_v5 = vpop.f32.mrf.mxu1  ;;  %v5152_v40 = vsel %vm2000_vm2, %v4984_v25, -inf }
 0xc6d   :  { %v5140_v38 = vsel %vm2000_vm2, %v4924_v5, -inf }
 0xc6e   :  { %5153 = vmax.xlane.f32.xlu2 %v5152_v40  ;;  %5141 = vmax.xlane.f32.xlu1 %v5140_v38 }
 0xc74   :  { %v9890_v21 = vpop.f32.mrf.mxu1 }
 0xc75   :  { %v5155_v23 = vsel %vm2000_vm2, %v9890_v21, -inf }
 0xc76   :  { %5147 = vmax.xlane.f32.xlu2 %v5146_v59  ;;  %5156 = vmax.xlane.f32.xlu0 %v5155_v23 }
 0xc7c   :  { %v9896_v18 = vpop.f32.mrf.mxu1 }
 0xc7d   :  { %v5158_v39 = vsel %vm2000_vm2, %v9896_v18, -inf }
 0xc7e   :  { %5159 = vmax.xlane.f32.xlu1 %v5158_v39 }
 0xc8a   :  { %v9900_v42 = vpop.f32.mrf.mxu0 }
 0xc8b   :  { %v5173_v11 = vsel %vm2000_vm2, %v9900_v42, -inf }
 0xc8c   :  { %5174 = vmax.xlane.f32.xlu0 %v5173_v11  ;;  %v9912_v36 = vpop.f32.mrf.mxu1 }
 0xc8d   :  { %v5179_v33 = vsel %vm2000_vm2, %v9912_v36, -inf }
 0xc92   :  { %v9904_v45 = vpop.f32.mrf.mxu0 }
 0xc93   :  { %v5176_v2 = vsel %vm2000_vm2, %v9904_v45, -inf }
 0xc94   :  { %v9908_v0 = vpop.f32.mrf.mxu2  ;;  %5177 = vmax.xlane.f32.xlu1 %v5176_v2  ;;  %v9924_v60 = vpop.f32.mrf.mxu1 }
 0xc95   :  { %v5161_v41 = vsel %vm2000_vm2, %v9908_v0, -inf  ;;  %v5182_v46 = vsel %vm2000_vm2, %v9924_v60, -inf }
 0xc96   :  { %5162 = vmax.xlane.f32.xlu2 %v5161_v41  ;;  %v9914_v14 = vpop.f32.mrf.mxu3 }
 0xc97   :  { %v5167_v19 = vsel %vm2000_vm2, %v9914_v14, -inf }
 0xc9c   :  { %v9918_v54 = vpop.f32.mrf.mxu2  ;;  %5168 = vmax.xlane.f32.xlu1 %v5167_v19 }
 0xc9d   :  { %v5164_v27 = vsel %vm2000_vm2, %v9918_v54, -inf }
 0xc9e   :  { %5165 = vmax.xlane.f32.xlu0 %v5164_v27  ;;  %5180 = vmax.xlane.f32.xlu2 %v5179_v33  ;;  %v9926_v4 = vpop.f32.mrf.mxu3 }
 0xc9f   :  { %v5170_v34 = vsel %vm2000_vm2, %v9926_v4, -inf }
 0xca6   :  { %5171 = vmax.xlane.f32.xlu2 %v5170_v34  ;;  %5183 = vmax.xlane.f32.xlu0 %v5182_v46 }
 0xcb5   :  { %7008 = vrot.lane.b32.xlu1 %v9145_v61, %s7284_s9 }
 0xcba   :  { %6998 = vrot.lane.b32.xlu0 %v9036_v13, %s7284_s9 }
 0xcbd   :  { %7013 = vrot.lane.b32.xlu1 %v9050_v3, %s7284_s9 }
 0xcbe   :  { %7003 = vrot.lane.b32.xlu2 %v9107_v58, %s7284_s9 }
 0xcd5   :  { %v5145_v49 = vpop.xlane.xlu0 %5144 }
 0xcd6   :  { %v5187_v52 = vsub.f32 %v4952_v26, %v5145_v49 }
 0xcd8   :  { %v5151_v1 = vpop.xlane.xlu1 %5150  ;;  %v5205_v9 = vmul.f32 1.442695, %v5187_v52 }
 0xcd9   :  { %v5139_v62 = vpop.xlane.xlu2 %5138  ;;  %v5189_v24 = vsub.f32 %v4982_v31, %v5151_v1 }
 0xcda   :  { %v5185_v43 = vsub.f32 %v4922_v48, %v5139_v62  ;;  %7163 = vpow2.f32 %v5205_v9 }
 0xcdb   :  { %v5209_v20 = vmul.f32 1.442695, %v5189_v24 }
 0xcdc   :  { %v5201_v35 = vmul.f32 1.442695, %v5185_v43 }
 0xcdd   :  { %7165 = vpow2.f32 %v5209_v20 }
 0xcde   :  { %7167 = vpow2.f32 %v5201_v35 }
 0xce0   :  { %v9940_v61 = vpop.eup %7163 }
 0xce1   :  { %v5154_v13 = vpop.xlane.xlu2 %5153  ;;  %v5142_v15 = vpop.xlane.xlu1 %5141  ;;  %v5239_v58 = vsel %vm2000_vm2, %v9940_v61, 0.0 }
 0xce2   :  { %v5190_v3 = vsub.f32 %v4984_v25, %v5154_v13  ;;  %v5186_v12 = vsub.f32 %v4924_v5, %v5142_v15 }
 0xce3   :  { %v9944_v53 = vpop.eup %7165 }
 0xce4   :  { %v5211_v37 = vmul.f32 1.442695, %v5190_v3  ;;  %v5203_v29 = vmul.f32 1.442695, %v5186_v12  ;;  %v9946_v55 = vpop.eup %7167  ;;  %v5245_v57 = vsel %vm2000_vm2, %v9944_v53, 0.0 }
 0xce5   :  { %v5233_v30 = vsel %vm2000_vm2, %v9946_v55, 0.0 }
 0xce6   :  { %7169 = vpow2.f32 %v5211_v37  ;;  %5234 = vadd.xlane.f32.xlu0 %v5233_v30 }
 0xce7   :  { %5246 = vadd.xlane.f32.xlu2 %v5245_v57  ;;  %5240 = vadd.xlane.f32.xlu1 %v5239_v58  ;;  %7171 = vpow2.f32 %v5203_v29 }
 0xce9   :  { %v5148_v51 = vpop.xlane.xlu2 %5147  ;;  %v5157_v10 = vpop.xlane.xlu0 %5156 }
 0xcea   :  { %v5188_v16 = vsub.f32 %v9888_v47, %v5148_v51  ;;  %v5191_v7 = vsub.f32 %v9890_v21, %v5157_v10 }
 0xcec   :  { %v9954_v28 = vpop.eup %7169  ;;  %v5207_v8 = vmul.f32 1.442695, %v5188_v16  ;;  %v5213_v26 = vmul.f32 1.442695, %v5191_v7 }
 0xced   :  { %v9956_v44 = vpop.eup %7171  ;;  %v5248_v31 = vsel %vm2000_vm2, %v9954_v28, 0.0 }
 0xcee   :  { %7173 = vpow2.f32 %v5207_v8  ;;  %v5236_v48 = vsel %vm2000_vm2, %v9956_v44, 0.0  ;;  %5249 = vadd.xlane.f32.xlu0 %v5248_v31 }
 0xcef   :  { %7175 = vpow2.f32 %v5213_v26  ;;  %5237 = vadd.xlane.f32.xlu2 %v5236_v48 }
 0xcf1   :  { %v5160_v6 = vpop.xlane.xlu1 %5159 }
 0xcf2   :  { %v5192_v50 = vsub.f32 %v9896_v18, %v5160_v6 }
 0xcf4   :  { %v9963_v25 = vpop.eup %7173  ;;  %v5215_v5 = vmul.f32 1.442695, %v5192_v50 }
 0xcf5   :  { %v9965_v40 = vpop.eup %7175  ;;  %v5242_v38 = vsel %vm2000_vm2, %v9963_v25, 0.0 }
 0xcf6   :  { %7177 = vpow2.f32 %v5215_v5  ;;  %v5251_v47 = vsel %vm2000_vm2, %v9965_v40, 0.0  ;;  %5243 = vadd.xlane.f32.xlu0 %v5242_v38 }
 0xcf7   :  { %5252 = vadd.xlane.f32.xlu2 %v5251_v47 }
 0xcfc   :  { %v9971_v21 = vpop.eup %7177 }
 0xcfd   :  { %v5254_v59 = vsel %vm2000_vm2, %v9971_v21, 0.0 }
 0xcfe   :  { %5255 = vadd.xlane.f32.xlu1 %v5254_v59 }
 0xcff   :  { %v5175_v23 = vpop.xlane.xlu0 %5174 }
 0xd00   :  { %v5197_v18 = vsub.f32 %v9900_v42, %v5175_v23 }
 0xd02   :  { %v5225_v39 = vmul.f32 1.442695, %v5197_v18 }
 0xd04   :  { %7179 = vpow2.f32 %v5225_v39 }
 0xd07   :  { %v5178_v11 = vpop.xlane.xlu1 %5177 }
 0xd08   :  { %v5198_v42 = vsub.f32 %v9904_v45, %v5178_v11 }
 0xd09   :  { %v5163_v2 = vpop.xlane.xlu2 %5162 }
 0xd0a   :  { %v9976_v41 = vpop.eup %7179  ;;  %v5193_v19 = vsub.f32 %v9908_v0, %v5163_v2  ;;  %v5227_v43 = vmul.f32 1.442695, %v5198_v42 }
 0xd0b   :  { %v5269_v27 = vsel %vm2000_vm2, %v9976_v41, 0.0 }
 0xd0c   :  { %v5217_v33 = vmul.f32 1.442695, %v5193_v19  ;;  %5270 = vadd.xlane.f32.xlu2 %v5269_v27 }
 0xd0e   :  { %7181 = vpow2.f32 %v5217_v33 }
 0xd0f   :  { %v5169_v34 = vpop.xlane.xlu1 %5168 }
 0xd10   :  { %v5195_v46 = vsub.f32 %v9914_v14, %v5169_v34 }
 0xd11   :  { %v5166_v49 = vpop.xlane.xlu0 %5165  ;;  %v5181_v52 = vpop.xlane.xlu2 %5180 }
 0xd12   :  { %v5194_v1 = vsub.f32 %v9918_v54, %v5166_v49  ;;  %v5221_v62 = vmul.f32 1.442695, %v5195_v46  ;;  %v5199_v3 = vsub.f32 %v9912_v36, %v5181_v52 }
 0xd14   :  { %v9984_v9 = vpop.eup %7181  ;;  %v5219_v24 = vmul.f32 1.442695, %v5194_v1  ;;  %7183 = vpow2.f32 %v5221_v62 }
 0xd15   :  { %v5257_v0 = vsel %vm2000_vm2, %v9984_v9, 0.0 }
 0xd16   :  { %7185 = vpow2.f32 %v5219_v24  ;;  %5258 = vadd.xlane.f32.xlu0 %v5257_v0 }
 0xd17   :  { %7187 = vpow2.f32 %v5227_v43 }
 0xd19   :  { %v5172_v20 = vpop.xlane.xlu2 %5171  ;;  %v5184_v35 = vpop.xlane.xlu0 %5183 }
 0xd1a   :  { %v9988_v14 = vpop.eup %7183  ;;  %v5196_v45 = vsub.f32 %v9926_v4, %v5172_v20  ;;  %v5200_v54 = vsub.f32 %v9924_v60, %v5184_v35  ;;  %v5229_v4 = vmul.f32 1.442695, %v5199_v3 }
 0xd1b   :  { %v5263_v13 = vsel %vm2000_vm2, %v9988_v14, 0.0 }
 0xd1c   :  { %v9994_v15 = vpop.eup %7185  ;;  %v5223_v12 = vmul.f32 1.442695, %v5196_v45  ;;  %v5231_v58 = vmul.f32 1.442695, %v5200_v54  ;;  %5264 = vadd.xlane.f32.xlu1 %v5263_v13 }
 0xd1d   :  { %v5260_v37 = vsel %vm2000_vm2, %v9994_v15, 0.0  ;;  %v9999_v29 = vpop.eup %7187 }
 0xd1e   :  { %7189 = vpow2.f32 %v5223_v12  ;;  %5261 = vadd.xlane.f32.xlu2 %v5260_v37  ;;  %v5272_v60 = vsel %vm2000_vm2, %v9999_v29, 0.0 }
 0xd1f   :  { %7191 = vpow2.f32 %v5231_v58 }
 0xd20   :  { %7193 = vpow2.f32 %v5229_v4 }
 0xd21   :  { %v7004_v8 = vpop.permute.xlu2 %7003 }
 0xd22   :  { %v7006_v6 = vunpack.i.h.bf16 %v7004_v8  ;;  %v7005_v5 = vunpack.i.l.bf16 %v7004_v8 }
 0xd24   :  { %v10003_v57 = vpop.eup %7189  ;;  %5273 = vadd.xlane.f32.xlu1 %v5272_v60  ;;  %v4623_v19 = vrot.slane %v7006_v6, 4  ;;  %v4567_v34 = vrot.slane %v7005_v5, 4 }
 0xd25   :  { %v10005_v36 = vpop.eup %7191  ;;  %v5266_v30 = vsel %vm2000_vm2, %v10003_v57, 0.0 }
 0xd26   :  { %5267 = vadd.xlane.f32.xlu0 %v5266_v30  ;;  %v5278_v51 = vsel %vm2000_vm2, %v10005_v36, 0.0  ;;  %v10011_v26 = vpop.eup %7193 }
 0xd27   :  { %5279 = vadd.xlane.f32.xlu2 %v5278_v51  ;;  %v7009_v10 = vpop.permute.xlu1 %7008  ;;  %v5275_v59 = vsel %vm2000_vm2, %v10011_v26, 0.0 }
 0xd28   :  { %v7011_v16 = vunpack.i.h.bf16 %v7009_v10  ;;  %v7010_v7 = vunpack.i.l.bf16 %v7009_v10 }
 0xd2a   :  { %v4609_v31 = vrot.slane %v7011_v16, 4  ;;  %v4553_v48 = vrot.slane %v7010_v7, 4 }
 0xd2c   :  { %v6999_v50 = vpop.permute.xlu0 %6998 }
 0xd2d   :  { %v7001_v38 = vunpack.i.h.bf16 %v6999_v50  ;;  %v7000_v47 = vunpack.i.l.bf16 %v6999_v50 }
 0xd2e   :  { %5276 = vadd.xlane.f32.xlu0 %v5275_v59 }
 0xd2f   :  { %v4610_v23 = vsel %vm295_vm15, %v4609_v31, %v7001_v38  ;;  %v4611_v18 = vrot.slane %v7001_v38, 4  ;;  %v4554_v39 = vsel %vm295_vm15, %v4553_v48, %v7000_v47  ;;  %v4555_v11 = vrot.slane %v7000_v47, 4  ;;  %v7014_v2 = vpop.permute.xlu1 %7013 }
 0xd30   :  { %v7016_v27 = vunpack.i.h.bf16 %v7014_v2  ;;  %v7015_v33 = vunpack.i.l.bf16 %v7014_v2  ;;  %v4560_v52 = vperm.slane %v4554_v39, %v7475_v17  ;;  %v4616_v42 = vperm.slane %v4610_v23, %v7475_v17 }
 0xd31   :  { %v4612_v46 = vsel %vm295_vm15, %v7011_v16, %v4611_v18  ;;  %v4556_v49 = vsel %vm295_vm15, %v7010_v7, %v4555_v11 }
 0xd32   :  { %v4620_v1 = vperm.slane %v4612_v46, %v7475_v17  ;;  %v4564_v62 = vperm.slane %v4556_v49, %v7475_v17  ;;  %v4621_v24 = vrot.slane %v7016_v27, 4  ;;  %v4565_v0 = vrot.slane %v7015_v33, 4 }
 0xd33   :  { %v4568_v43 = vsel %vm295_vm15, %v7015_v33, %v4567_v34  ;;  %v4624_v20 = vsel %vm295_vm15, %v7016_v27, %v4623_v19  ;;  %v4579_v3 = vrot.slane %v4560_v52, 4  ;;  %v4635_v51 = vrot.slane %v4616_v42, 4 }
 0xd34   :  { %v4647_v35 = vrot.slane %v4620_v1, 4  ;;  %v4591_v45 = vrot.slane %v4564_v62, 4  ;;  %v4576_v54 = vperm.slane %v4568_v43, %v7475_v17  ;;  %v4632_v13 = vperm.slane %v4624_v20, %v7475_v17 }
 0xd35   :  { %v4566_v12 = vsel %vm295_vm15, %v4565_v0, %v7005_v5  ;;  %v4622_v58 = vsel %vm295_vm15, %v4621_v24, %v7006_v6 }
 0xd36   :  { %v4572_v37 = vperm.slane %v4566_v12, %v7475_v17  ;;  %v4589_v4 = vrot.slane %v4576_v54, 4  ;;  %v4592_v60 = vsel %vm295_vm15, %v4576_v54, %v4591_v45  ;;  %v4628_v30 = vperm.slane %v4622_v58, %v7475_v17 }
 0xd37   :  { %v4600_v10 = vperm.slane %v4592_v60, %v7479_v22  ;;  %v4645_v16 = vrot.slane %v4632_v13, 4  ;;  %v4648_v7 = vsel %vm295_vm15, %v4632_v13, %v4647_v35 }
 0xd38   :  { %v4577_v8 = vrot.slane %v4572_v37, 4  ;;  %v4580_v31 = vsel %vm295_vm15, %v4572_v37, %v4579_v3  ;;  %v4590_v48 = vsel %vm295_vm15, %v4589_v4, %v4564_v62  ;;  %v4633_v50 = vrot.slane %v4628_v30, 4 }
 0xd39   :  { %v4588_v6 = vperm.slane %v4580_v31, %v7479_v22  ;;  %v4596_v5 = vperm.slane %v4590_v48, %v7479_v22  ;;  %v4607_v38 = vrot.slane %v4600_v10, 4  ;;  %v4636_v47 = vsel %vm295_vm15, %v4628_v30, %v4635_v51 }
 0xd3a   :  { %v4578_v59 = vsel %vm295_vm15, %v4577_v8, %v4560_v52  ;;  %v4634_v23 = vsel %vm295_vm15, %v4633_v50, %v4616_v42  ;;  %v4644_v18 = vperm.slane %v4636_v47, %v7479_v22  ;;  %v4646_v39 = vsel %vm295_vm15, %v4645_v16, %v4620_v1 }
 0xd3b   :  { %v4584_v11 = vperm.slane %v4578_v59, %v7479_v22  ;;  %v4603_v2 = vrot.slane %v4588_v6, 4  ;;  %v4605_v19 = vrot.slane %v4596_v5, 4  ;;  %v4608_v27 = vsel %vm295_vm15, 0.0, %v4607_v38 }
 0xd3c   :  { %v4640_v33 = vperm.slane %v4634_v23, %v7479_v22  ;;  %v4652_v34 = vperm.slane %v4646_v39, %v7479_v22  ;;  %v4656_v46 = vperm.slane %v4648_v7, %v7479_v22  ;;  %v4659_v49 = vrot.slane %v4644_v18, 4 }
 0xd3d   :  { %v4601_v52 = vrot.slane %v4584_v11, 4  ;;  %v4604_v42 = vsel %vm295_vm15, 0.0, %v4603_v2  ;;  %v4606_v62 = vsel %vm295_vm15, 0.0, %v4605_v19  ;;  %v4773_v1 = vsel %vm295_vm15, %v4603_v2, %v4584_v11 }
 0xd3e   :  { %v4657_v24 = vrot.slane %v4640_v33, 4  ;;  %v4660_v0 = vsel %vm295_vm15, 0.0, %v4659_v49  ;;  %v4661_v43 = vrot.slane %v4652_v34, 4  ;;  %v4663_v20 = vrot.slane %v4656_v46, 4 }
 0xd3f   :  { %v4602_v35 = vsel %vm295_vm15, 0.0, %v4601_v52  ;;  %v4777_v45 = vperm.slane %v4773_v1, %v7475_v17  ;;  %v4778_v54 = vrot.slane %v4604_v42, 4  ;;  %v4784_v13 = vsel %vm295_vm15, %v4607_v38, %v4596_v5 }
 0xd40   :  { %v4658_v3 = vsel %vm295_vm15, 0.0, %v4657_v24  ;;  %v4662_v12 = vsel %vm295_vm15, 0.0, %v4661_v43  ;;  %v4664_v58 = vsel %vm295_vm15, 0.0, %v4663_v20  ;;  %v4788_v37 = vperm.slane %v4784_v13, %v7475_v17 }
 0xd41   :  { %v4789_v4 = vrot.slane %v4608_v27, 4  ;;  %v4827_v60 = vsel %vm295_vm15, %v4659_v49, %v4640_v33  ;;  %v4832_v30 = vrot.slane %v4660_v0, 4  ;;  %v4838_v51 = vsel %vm295_vm15, %v4663_v20, %v4652_v34 }
 0xd42   :  { %v4809_v10 = vrot.slane %v4788_v37, 4  ;;  %v4831_v16 = vperm.slane %v4827_v60, %v7475_v17  ;;  %v4842_v7 = vperm.slane %v4838_v51, %v7475_v17  ;;  %v4843_v8 = vrot.slane %v4664_v58, 4 }
 0xd43   :  { %v4790_v31 = vsel %vm295_vm15, %v4789_v4, %v4606_v62  ;;  %v4779_v48 = vsel %vm295_vm15, %v4778_v54, %v4602_v35  ;;  %v4797_v50 = vrot.slane %v4777_v45, 4  ;;  %v4833_v6 = vsel %vm295_vm15, %v4832_v30, %v4658_v3 }
 0xd44   :  { %v4794_v5 = vperm.slane %v4790_v31, %v7475_v17  ;;  %v4844_v38 = vsel %vm295_vm15, %v4843_v8, %v4662_v12  ;;  %v4863_v47 = vrot.slane %v4842_v7, 4  ;;  %v4783_v59 = vperm.slane %v4779_v48, %v7475_v17 }
 0xd45   :  { %v4848_v23 = vperm.slane %v4844_v38, %v7475_v17  ;;  %v4837_v18 = vperm.slane %v4833_v6, %v7475_v17  ;;  %v4851_v39 = vrot.slane %v4831_v16, 4 }
 0xd46   :  { %v4798_v11 = vsel %vm295_vm15, %v4783_v59, %v4797_v50  ;;  %v4810_v2 = vsel %vm295_vm15, %v4794_v5, %v4809_v10  ;;  %v4795_v19 = vrot.slane %v4783_v59, 4  ;;  %v4807_v27 = vrot.slane %v4794_v5, 4 }
 0xd47   :  { %v4806_v33 = vperm.slane %v4798_v11, %v7479_v22  ;;  %v4818_v34 = vperm.slane %v4810_v2, %v7479_v22  ;;  %v4852_v46 = vsel %vm295_vm15, %v4837_v18, %v4851_v39  ;;  %v4864_v49 = vsel %vm295_vm15, %v4848_v23, %v4863_v47 }
 0xd48   :  { %v4860_v52 = vperm.slane %v4852_v46, %v7479_v22  ;;  %v4872_v42 = vperm.slane %v4864_v49, %v7479_v22  ;;  %v4796_v62 = vsel %vm295_vm15, %v4795_v19, %v4777_v45  ;;  %v4808_v1 = vsel %vm295_vm15, %v4807_v27, %v4788_v37 }
 0xd49   :  { %v4823_v24 = vrot.slane %v4818_v34, 4  ;;  %v4802_v0 = vperm.slane %v4796_v62, %v7479_v22  ;;  %v4814_v43 = vperm.slane %v4808_v1, %v7479_v22  ;;  %v4849_v20 = vrot.slane %v4837_v18, 4 }
 0xd4a   :  { %v4877_v35 = vrot.slane %v4872_v42, 4  ;;  %v4861_v54 = vrot.slane %v4848_v23, 4  ;;  %v4825_v13 = vrot.slane %v4806_v33, 4  ;;  %v4879_v3 = vrot.slane %v4860_v52, 4 }
 0xd4b   :  { %v4824_v12 = vsel %vm295_vm15, %v4823_v24, %v4806_v33  ;;  %v4819_v58 = vrot.slane %v4814_v43, 4  ;;  %v4850_v4 = vsel %vm295_vm15, %v4849_v20, %v4831_v16  ;;  %v4821_v60 = vrot.slane %v4802_v0, 4 }
 0xd4c   :  { %v4878_v45 = vsel %vm295_vm15, %v4877_v35, %v4860_v52  ;;  %v4893_v30 = vpack.c.bf16 %v4824_v12, %v4824_v12  ;;  %v4856_v37 = vperm.slane %v4850_v4, %v7479_v22  ;;  %v4862_v51 = vsel %vm295_vm15, %v4861_v54, %v4842_v7 }
 0xd4d   :  { %v4894_v10 = vpack.c.bf16 %v4878_v45, %v4878_v45  ;;  %v4820_v8 = vsel %vm295_vm15, %v4819_v58, %v4802_v0  ;;  %v4868_v31 = vperm.slane %v4862_v51, %v7479_v22  ;;  %v4826_v48 = vsel %vm295_vm15, %v4818_v34, %v4825_v13 }
 0xd4e   :  { %v5504_v50 = vunpack.c.l.b16 %v4893_v30  ;;  %v4889_v6 = vpack.c.bf16 %v4820_v8, %v4820_v8  ;;  %v4880_v5 = vsel %vm295_vm15, %v4872_v42, %v4879_v3  ;;  %v4895_v16 = vpack.c.bf16 %v4826_v48, %v4826_v48 }
 0xd4f   :  { %v5505_v38 = vunpack.c.l.b16 %v4894_v10  ;;  %v4873_v47 = vrot.slane %v4868_v31, 4  ;;  %v4896_v59 = vpack.c.bf16 %v4880_v5, %v4880_v5  ;;  %v4822_v23 = vsel %vm295_vm15, %v4814_v43, %v4821_v60 }
 0xd50   :  { %v5532_v18 = vunpack.c.l.b16 %v4895_v16  ;;  %v4875_v39 = vrot.slane %v4856_v37, 4  ;;  %v4891_v7 = vpack.c.bf16 %v4822_v23, %v4822_v23  ;;  %v5448_v33 = vunpack.c.l.b16 %v4889_v6 }
 0xd51   :  { %v5506_v11 = vpack.c.b16 %v5505_v38, %v5504_v50  ;;  %v4874_v2 = vsel %vm295_vm15, %v4873_v47, %v4856_v37  ;;  %v5533_v19 = vunpack.c.l.b16 %v4896_v59 }
 0xd52   :  { %v4890_v27 = vpack.c.bf16 %v4874_v2, %v4874_v2  ;;  %v4876_v34 = vsel %vm295_vm15, %v4868_v31, %v4875_v39  ;;  %v5476_v52 = vunpack.c.l.b16 %v4891_v7 }
 0xd53   :  { %5518 = vmatpush.bf16.msra.mxu0 %v5506_v11  ;;  %v5534_v46 = vpack.c.b16 %v5533_v19, %v5532_v18  ;;  %v4892_v49 = vpack.c.bf16 %v4876_v34, %v4876_v34 }
 0xd54   :  { %v5449_v42 = vunpack.c.l.b16 %v4890_v27 }
 0xd55   :  { %5546 = vmatpush.bf16.msra.mxu1 %v5534_v46  ;;  %v5477_v62 = vunpack.c.l.b16 %v4892_v49 }
 0xd56   :  { %v5450_v1 = vpack.c.b16 %v5449_v42, %v5448_v33 }
 0xd57   :  { %v5478_v24 = vpack.c.b16 %v5477_v62, %v5476_v52 }
 0xd58   :  { %5462 = vmatpush.bf16.msrb.mxu2 %v5450_v1 }
 0xd59   :  { %5490 = vmatpush.bf16.msra.mxu3 %v5478_v24  ;;  %v5235_v43 = vpop.xlane.xlu0 %5234 }
 0xd5a   :  { %v5247_v0 = vpop.xlane.xlu2 %5246  ;;  %7195 = vrcp.f32 %v5235_v43  ;;  %v5241_v13 = vpop.xlane.xlu1 %5240 }
 0xd5b   :  { %7197 = vrcp.f32 %v5247_v0 }
 0xd60   :  { %v7196_v54 = vpop.eup %7195 }
 0xd61   :  { %v5250_v35 = vpop.xlane.xlu0 %5249  ;;  %v7198_v3 = vpop.eup %7197  ;;  %v5297_v12 = vmul.f32 %v7196_v54, %v9946_v55 }
 0xd62   :  { %v5238_v20 = vpop.xlane.xlu2 %5237  ;;  %v5301_v58 = vmul.f32 %v7198_v3, %v9944_v53 }
 0xd63   :  { %7199 = vrcp.f32 %v5238_v20  ;;  %v5313_v45 = vpack.c.bf16 %v5297_v12, %v5297_v12 }
 0xd64   :  { %7201 = vrcp.f32 %v5250_v35  ;;  %v5317_v10 = vpack.c.bf16 %v5301_v58, %v5301_v58 }
 0xd65   :  { %7203 = vrcp.f32 %v5241_v13  ;;  %v5331_v6 = vunpack.c.l.b16 %v5313_v45 }
 0xd66   :  { %v5387_v5 = vunpack.c.l.b16 %v5317_v10 }
 0xd69   :  { %v7200_v4 = vpop.eup %7199  ;;  %v5244_v51 = vpop.xlane.xlu0 %5243 }
 0xd6a   :  { %v7202_v60 = vpop.eup %7201  ;;  %v5298_v30 = vmul.f32 %v7200_v4, %v9956_v44  ;;  %v5253_v37 = vpop.xlane.xlu2 %5252 }
 0xd6b   :  { %v5302_v8 = vmul.f32 %v7202_v60, %v9954_v28  ;;  %7205 = vrcp.f32 %v5253_v37  ;;  %v7204_v31 = vpop.eup %7203 }
 0xd6c   :  { %v5314_v48 = vpack.c.bf16 %v5298_v30, %v5298_v30  ;;  %7207 = vrcp.f32 %v5244_v51  ;;  %v5299_v53 = vmul.f32 %v7204_v31, %v9940_v61 }
 0xd6d   :  { %v5318_v50 = vpack.c.bf16 %v5302_v8, %v5302_v8 }
 0xd6e   :  { %v5332_v55 = vunpack.c.l.b16 %v5314_v48  ;;  %v5315_v28 = vpack.c.bf16 %v5299_v53, %v5299_v53 }
 0xd6f   :  { %v5388_v16 = vunpack.c.l.b16 %v5318_v50 }
 0xd70   :  { %v5333_v38 = vpack.c.b16 %v5332_v55, %v5331_v6  ;;  %v5359_v11 = vunpack.c.l.b16 %v5315_v28 }
 0xd71   :  { %v7206_v47 = vpop.eup %7205  ;;  %v5389_v59 = vpack.c.b16 %v5388_v16, %v5387_v5  ;;  %v5256_v44 = vpop.xlane.xlu1 %5255 }
 0xd72   :  { %v7208_v23 = vpop.eup %7207  ;;  %7209 = vrcp.f32 %v5256_v44  ;;  %6631 = vmatmul.msk.bf16.vlgmr.msra.gmra.mxu2 %vm2000_vm2, %v5333_v38  ;;  %v5303_v39 = vmul.f32 %v7206_v47, %v9965_v40 }
 0xd73   :  { %v5300_v18 = vmul.f32 %v7208_v23, %v9963_v25  ;;  %6633 = vmatmul.msk.bf16.vlgmr.msrb.gmra.mxu0 %vm2000_vm2, %v5389_v59 }
 0xd74   :  { %v5319_v19 = vpack.c.bf16 %v5303_v39, %v5303_v39 }
 0xd75   :  { %v5316_v7 = vpack.c.bf16 %v5300_v18, %v5300_v18 }
 0xd76   :  { %v5415_v46 = vunpack.c.l.b16 %v5319_v19 }
 0xd77   :  { %v5360_v2 = vunpack.c.l.b16 %v5316_v7 }
 0xd78   :  { %v7210_v61 = vpop.eup %7209 }
 0xd79   :  { %v5361_v27 = vpack.c.b16 %v5360_v2, %v5359_v11  ;;  %v5304_v33 = vmul.f32 %v7210_v61, %v9971_v21 }
 0xd7b   :  { %v5320_v34 = vpack.c.bf16 %v5304_v33, %v5304_v33  ;;  %6632 = vmatmul.msk.bf16.vlgmr.msrb.gmra.mxu3 %vm2000_vm2, %v5361_v27 }
 0xd7d   :  { %v5416_v49 = vunpack.c.l.b16 %v5320_v34 }
 0xd7f   :  { %v5417_v52 = vpack.c.b16 %v5416_v49, %v5415_v46  ;;  %v5271_v25 = vpop.xlane.xlu2 %5270 }
 0xd81   :  { %6634 = vmatmul.msk.bf16.vlgmr.msrb.gmra.mxu1 %vm2000_vm2, %v5417_v52 }
 0xd89   :  { %v5259_v42 = vpop.xlane.xlu0 %5258 }
 0xd8a   :  { %7211 = vrcp.f32 %v5259_v42 }
 0xd8b   :  { %7213 = vrcp.f32 %v5271_v25 }
 0xd8f   :  { %v5265_v40 = vpop.xlane.xlu1 %5264 }
 0xd90   :  { %v7212_v1 = vpop.eup %7211 }
 0xd91   :  { %v5262_v62 = vpop.xlane.xlu2 %5261  ;;  %v5305_v24 = vmul.f32 %v7212_v1, %v9984_v9  ;;  %v7214_v21 = vpop.eup %7213 }
 0xd92   :  { %7215 = vrcp.f32 %v5262_v62  ;;  %v5309_v12 = vmul.f32 %v7214_v21, %v9976_v41 }
 0xd93   :  { %7217 = vrcp.f32 %v5265_v40  ;;  %v5321_v20 = vpack.c.bf16 %v5305_v24, %v5305_v24 }
 0xd94   :  { %v5325_v30 = vpack.c.bf16 %v5309_v12, %v5309_v12 }
 0xd95   :  { %v5443_v4 = vunpack.c.l.b16 %v5321_v20 }
 0xd96   :  { %v5499_v50 = vunpack.c.l.b16 %v5325_v30 }
 0xd97   :  { %v5274_v0 = vpop.xlane.xlu1 %5273 }
 0xd98   :  { %v7216_v43 = vpop.eup %7215  ;;  %7219 = vrcp.f32 %v5274_v0 }
 0xd99   :  { %v5306_v35 = vmul.f32 %v7216_v43, %v9994_v15  ;;  %v5268_v54 = vpop.xlane.xlu0 %5267  ;;  %v7218_v13 = vpop.eup %7217 }
 0xd9a   :  { %v5280_v3 = vpop.xlane.xlu2 %5279  ;;  %7221 = vrcp.f32 %v5268_v54  ;;  %v5307_v60 = vmul.f32 %v7218_v13, %v9988_v14 }
 0xd9b   :  { %v5322_v58 = vpack.c.bf16 %v5306_v35, %v5306_v35  ;;  %7223 = vrcp.f32 %v5280_v3 }
 0xd9c   :  { %v5323_v8 = vpack.c.bf16 %v5307_v60, %v5307_v60 }
 0xd9d   :  { %v5444_v45 = vunpack.c.l.b16 %v5322_v58 }
 0xd9e   :  { %v7220_v9 = vpop.eup %7219  ;;  %v5471_v14 = vunpack.c.l.b16 %v5323_v8 }
 0xd9f   :  { %v5445_v37 = vpack.c.b16 %v5444_v45, %v5443_v4  ;;  %v5310_v51 = vmul.f32 %v7220_v9, %v9999_v29 }
 0xda0   :  { %v7222_v10 = vpop.eup %7221 }
 0xda1   :  { %v5326_v15 = vpack.c.bf16 %v5310_v51, %v5310_v51  ;;  %v5308_v31 = vmul.f32 %v7222_v10, %v10003_v57  ;;  %v5277_v48 = vpop.xlane.xlu0 %5276  ;;  %6635 = vmatmul.msk.bf16.vlgmr.msrb.gmra.mxu2 %vm2000_vm2, %v5445_v37  ;;  %v7224_v41 = vpop.eup %7223 }
 0xda2   :  { %7225 = vrcp.f32 %v5277_v48  ;;  %v5312_v53 = vmul.f32 %v7224_v41, %v10005_v36 }
 0xda3   :  { %v5500_v6 = vunpack.c.l.b16 %v5326_v15  ;;  %v5324_v55 = vpack.c.bf16 %v5308_v31, %v5308_v31 }
 0xda4   :  { %v5328_v47 = vpack.c.bf16 %v5312_v53, %v5312_v53 }
 0xda5   :  { %v5501_v5 = vpack.c.b16 %v5500_v6, %v5499_v50  ;;  %v5472_v16 = vunpack.c.l.b16 %v5324_v55 }
 0xda6   :  { %v5528_v44 = vunpack.c.l.b16 %v5328_v47 }
 0xda7   :  { %v5473_v38 = vpack.c.b16 %v5472_v16, %v5471_v14  ;;  %6637 = vmatmul.msk.bf16.vlgmr.msra.gmra.mxu0 %vm2000_vm2, %v5501_v5 }
 0xda8   :  { %v7226_v29 = vpop.eup %7225 }
 0xda9   :  { %v5311_v57 = vmul.f32 %v7226_v29, %v10011_v26  ;;  %6636 = vmatmul.msk.bf16.vlgmr.msra.gmra.mxu3 %vm2000_vm2, %v5473_v38 }
 0xdab   :  { %v5327_v59 = vpack.c.bf16 %v5311_v57, %v5311_v57 }
 0xdad   :  { %v5527_v23 = vunpack.c.l.b16 %v5327_v59 }
 0xdaf   :  { %v5529_v28 = vpack.c.b16 %v5528_v44, %v5527_v23 }
 0xdb1   :  { %6638 = vmatmul.msk.bf16.vlgmr.msra.gmra.mxu1 %vm2000_vm2, %v5529_v28 }
 0xdf0   :  { %v5408_v18 = vpop.f32.mrf.mxu0 }
 0xdf1   :  { %v5553_v36 = vrot.slane %v5408_v18, 4 }
 0xdf5   :  { %v5352_v39 = vpop.f32.mrf.mxu2 }
 0xdf6   :  { %v5555_v7 = vrot.slane %v5352_v39, 4  ;;  %v5554_v11 = vsel %vm295_vm15, %v5553_v36, %v5352_v39 }
 0xdf7   :  { %v5560_v26 = vperm.slane %v5554_v11, %v7475_v17 }
 0xdf8   :  { %v5556_v2 = vsel %vm295_vm15, %v5408_v18, %v5555_v7  ;;  %v5410_v61 = vpop.f32.mrf.mxu0 }
 0xdf9   :  { %v5564_v27 = vperm.slane %v5556_v2, %v7475_v17  ;;  %v5609_v33 = vrot.slane %v5410_v61, 4  ;;  %v5579_v24 = vrot.slane %v5560_v26, 4 }
 0xdfb   :  { %v5591_v21 = vrot.slane %v5564_v27, 4 }
 0xdfd   :  { %v5354_v19 = vpop.f32.mrf.mxu2 }
 0xdfe   :  { %v5611_v34 = vrot.slane %v5354_v19, 4  ;;  %v5380_v46 = vpop.f32.mrf.mxu3  ;;  %v5436_v49 = vpop.f32.mrf.mxu1  ;;  %v5610_v42 = vsel %vm295_vm15, %v5609_v33, %v5354_v19 }
 0xdff   :  { %v5567_v52 = vrot.slane %v5380_v46, 4  ;;  %v5565_v25 = vrot.slane %v5436_v49, 4  ;;  %v5616_v20 = vperm.slane %v5610_v42, %v7475_v17 }
 0xe00   :  { %v5612_v40 = vsel %vm295_vm15, %v5410_v61, %v5611_v34 }
 0xe01   :  { %v5566_v62 = vsel %vm295_vm15, %v5565_v25, %v5380_v46  ;;  %v5568_v1 = vsel %vm295_vm15, %v5436_v49, %v5567_v52  ;;  %v5620_v35 = vperm.slane %v5612_v40, %v7475_v17  ;;  %v5635_v15 = vrot.slane %v5616_v20, 4 }
 0xe02   :  { %v5572_v0 = vperm.slane %v5566_v62, %v7475_v17  ;;  %v5576_v43 = vperm.slane %v5568_v1, %v7475_v17 }
 0xe03   :  { %v5647_v31 = vrot.slane %v5620_v35, 4 }
 0xe04   :  { %v5577_v54 = vrot.slane %v5572_v0, 4  ;;  %v5580_v13 = vsel %vm295_vm15, %v5572_v0, %v5579_v24  ;;  %v5589_v3 = vrot.slane %v5576_v43, 4  ;;  %v5592_v12 = vsel %vm295_vm15, %v5576_v43, %v5591_v21 }
 0xe05   :  { %v5588_v58 = vperm.slane %v5580_v13, %v7479_v22  ;;  %v5600_v4 = vperm.slane %v5592_v12, %v7479_v22 }
 0xe06   :  { %v5578_v60 = vsel %vm295_vm15, %v5577_v54, %v5560_v26  ;;  %v5590_v45 = vsel %vm295_vm15, %v5589_v3, %v5564_v27  ;;  %v5382_v9 = vpop.f32.mrf.mxu3  ;;  %v5438_v30 = vpop.f32.mrf.mxu1 }
 0xe07   :  { %v5584_v37 = vperm.slane %v5578_v60, %v7479_v22  ;;  %v5596_v51 = vperm.slane %v5590_v45, %v7479_v22  ;;  %v5603_v10 = vrot.slane %v5588_v58, 4  ;;  %v5607_v8 = vrot.slane %v5600_v4, 4 }
 0xe08   :  { %v5623_v48 = vrot.slane %v5382_v9, 4  ;;  %v5621_v41 = vrot.slane %v5438_v30, 4 }
 0xe09   :  { %v5601_v50 = vrot.slane %v5584_v37, 4  ;;  %v5604_v6 = vsel %vm295_vm15, 0.0, %v5603_v10  ;;  %v5605_v55 = vrot.slane %v5596_v51, 4  ;;  %v5608_v14 = vsel %vm295_vm15, 0.0, %v5607_v8 }
 0xe0a   :  { %v5777_v5 = vsel %vm295_vm15, %v5603_v10, %v5584_v37  ;;  %v5782_v53 = vrot.slane %v5604_v6, 4  ;;  %v5788_v16 = vsel %vm295_vm15, %v5607_v8, %v5596_v51  ;;  %v5793_v38 = vrot.slane %v5608_v14, 4 }
 0xe0b   :  { %v5606_v29 = vsel %vm295_vm15, 0.0, %v5605_v55  ;;  %v10145_v47 = vperm.slane %v5788_v16, %v7475_v17  ;;  %v5622_v57 = vsel %vm295_vm15, %v5621_v41, %v5382_v9  ;;  %v5624_v59 = vsel %vm295_vm15, %v5438_v30, %v5623_v48 }
 0xe0c   :  { %v5794_v44 = vsel %vm295_vm15, %v5793_v38, %v5606_v29  ;;  %v5628_v23 = vperm.slane %v5622_v57, %v7475_v17  ;;  %v5632_v28 = vperm.slane %v5624_v59, %v7475_v17  ;;  %v5602_v18 = vsel %vm295_vm15, 0.0, %v5601_v50  ;;  %v6649_v29 = vld [vmem:[%s10469_s2 + $0x30] sm:$0xf]  ;;  %v6738_v57 = vld [vmem:[%s10469_s2 + $0x34] sm:$0xf0] }
 0xe0d   :  { %v5798_v39 = vperm.slane %v5794_v44, %v7475_v17  ;;  %v5813_v7 = vrot.slane %v10145_v47, 4  ;;  %v5781_v36 = vperm.slane %v5777_v5, %v7475_v17  ;;  %v5783_v33 = vsel %vm295_vm15, %v5782_v53, %v5602_v18 }
 0xe0e   :  { %v5633_v11 = vrot.slane %v5628_v23, 4  ;;  %v5636_v2 = vsel %vm295_vm15, %v5628_v23, %v5635_v15  ;;  %v5645_v61 = vrot.slane %v5632_v28, 4  ;;  %v5648_v19 = vsel %vm295_vm15, %v5632_v28, %v5647_v31 }
 0xe0f   :  { %v5644_v26 = vperm.slane %v5636_v2, %v7479_v22  ;;  %v5656_v27 = vperm.slane %v5648_v19, %v7479_v22  ;;  %v5787_v40 = vperm.slane %v5783_v33, %v7475_v17  ;;  %v5801_v62 = vrot.slane %v5781_v36, 4 }
 0xe10   :  { %v5634_v34 = vsel %vm295_vm15, %v5633_v11, %v5616_v20  ;;  %v5646_v46 = vsel %vm295_vm15, %v5645_v61, %v5620_v35  ;;  %v5814_v1 = vsel %vm295_vm15, %v5798_v39, %v5813_v7  ;;  %v5811_v14 = vrot.slane %v5798_v39, 4 }
 0xe11   :  { %v5640_v49 = vperm.slane %v5634_v34, %v7479_v22  ;;  %v5652_v52 = vperm.slane %v5646_v46, %v7479_v22  ;;  %v5659_v25 = vrot.slane %v5644_v26, 4  ;;  %v5663_v42 = vrot.slane %v5656_v27, 4 }
 0xe12   :  { %v5822_v4 = vperm.slane %v5814_v1, %v7479_v22  ;;  %v5802_v45 = vsel %vm295_vm15, %v5787_v40, %v5801_v62  ;;  %v5799_v10 = vrot.slane %v5787_v40, 4  ;;  %v5812_v23 = vsel %vm295_vm15, %v5811_v14, %v10145_v47 }
 0xe13   :  { %v5657_v24 = vrot.slane %v5640_v49, 4  ;;  %v5660_v21 = vsel %vm295_vm15, 0.0, %v5659_v25  ;;  %v5661_v0 = vrot.slane %v5652_v52, 4  ;;  %v5664_v43 = vsel %vm295_vm15, 0.0, %v5663_v42 }
 0xe14   :  { %v5831_v20 = vsel %vm295_vm15, %v5659_v25, %v5640_v49  ;;  %v5836_v35 = vrot.slane %v5660_v21, 4  ;;  %v5842_v54 = vsel %vm295_vm15, %v5663_v42, %v5652_v52  ;;  %v5847_v13 = vrot.slane %v5664_v43, 4  ;;  %v6737_v21 = vld [vmem:[%s10469_s2 + $0x24] sm:$0xf0] }
 0xe15   :  { %v5662_v3 = vsel %vm295_vm15, 0.0, %v5661_v0  ;;  %v5846_v12 = vperm.slane %v5842_v54, %v7475_v17  ;;  %v5658_v58 = vsel %vm295_vm15, 0.0, %v5657_v24  ;;  %v5835_v9 = vperm.slane %v5831_v20, %v7475_v17  ;;  %v6645_v24 = vld [vmem:[%s10469_s2 + $0x20] sm:$0xf] }
 0xe16   :  { %v5848_v60 = vsel %vm295_vm15, %v5847_v13, %v5662_v3  ;;  %v5837_v30 = vsel %vm295_vm15, %v5836_v35, %v5658_v58  ;;  %v5810_v31 = vperm.slane %v5802_v45, %v7479_v22  ;;  %v5827_v48 = vrot.slane %v5822_v4, 4 }
 0xe17   :  { %v5852_v37 = vperm.slane %v5848_v60, %v7475_v17  ;;  %v5867_v51 = vrot.slane %v5846_v12, 4  ;;  %v5841_v8 = vperm.slane %v5837_v30, %v7475_v17  ;;  %v5855_v15 = vrot.slane %v5835_v9, 4 }
 0xe18   :  { %v5800_v53 = vsel %vm295_vm15, %v5799_v10, %v5781_v36  ;;  %v5828_v18 = vsel %vm295_vm15, %v5827_v48, %v5810_v31  ;;  %v5818_v39 = vperm.slane %v5812_v23, %v7479_v22  ;;  %v6650_v36 = vor.u32 %v6738_v57, %v6649_v29 }
 0xe19   :  { %v5868_v41 = vsel %vm295_vm15, %v5852_v37, %v5867_v51  ;;  %v5853_v50 = vrot.slane %v5841_v8, 4  ;;  %v5856_v6 = vsel %vm295_vm15, %v5841_v8, %v5855_v15  ;;  %v5865_v38 = vrot.slane %v5852_v37, 4 }
 0xe1a   :  { %v5876_v55 = vperm.slane %v5868_v41, %v7479_v22  ;;  %v5864_v5 = vperm.slane %v5856_v6, %v7479_v22  ;;  %v5806_v44 = vperm.slane %v5800_v53, %v7479_v22  ;;  %6073 = vrot.lane.b32.xlu1 %v6650_v36, %s7285_s1  ;;  %v5823_v27 = vrot.slane %v5818_v39, 4 }
 0xe1b   :  { %v5854_v16 = vsel %vm295_vm15, %v5853_v50, %v5835_v9  ;;  %v5866_v7 = vsel %vm295_vm15, %v5865_v38, %v5846_v12  ;;  %v5829_v40 = vrot.slane %v5810_v31, 4  ;;  %v6646_v0 = vor.u32 %v6737_v21, %v6645_v24 }
 0xe1c   :  { %v5881_v59 = vrot.slane %v5876_v55, 4  ;;  %v5860_v28 = vperm.slane %v5854_v16, %v7479_v22  ;;  %v5825_v2 = vrot.slane %v5806_v44, 4  ;;  %v5872_v61 = vperm.slane %v5866_v7, %v7479_v22 }
 0xe1d   :  { %v10208_v46 = vsel %vm295_vm15, %v5823_v27, %v5806_v44  ;;  %v5883_v49 = vrot.slane %v5864_v5, 4  ;;  %v5830_v20 = vsel %vm295_vm15, %v5822_v4, %v5829_v40 }
 0xe1e   :  { %v5882_v11 = vsel %vm295_vm15, %v5881_v59, %v5864_v5  ;;  %v5879_v19 = vrot.slane %v5860_v28, 4  ;;  %v5826_v47 = vsel %vm295_vm15, %v5818_v39, %v5825_v2  ;;  %v5877_v35 = vrot.slane %v5872_v61, 4 }
 0xe1f   :  { %v7017_v26 = vpack.i.bf16 %v5882_v11, %v5828_v18  ;;  %v5884_v1 = vsel %vm295_vm15, %v5876_v55, %v5883_v49 }
 0xe20   :  { %v5880_v33 = vsel %vm295_vm15, %v5872_v61, %v5879_v19  ;;  %v7027_v13 = vpack.i.bf16 %v5884_v1, %v5830_v20  ;;  %v10223_v3 = vsel %vm295_vm15, %v5877_v35, %v5860_v28 }
 0xe21   :  { %7018 = vrot.lane.b32.xlu2 %v7017_v26, %s7287_s18  ;;  %v7022_v34 = vpack.i.bf16 %v5880_v33, %v5826_v47 }
 0xe22   :  { %6071 = vrot.lane.b32.xlu1 %v6646_v0, %s7285_s1 }
 0xe23   :  { %7023 = vrot.lane.b32.xlu0 %v7022_v34, %s7288_s19 }
 0xe24   :  { %v5464_v52 = vpop.f32.mrf.mxu2  ;;  %v5520_v25 = vpop.f32.mrf.mxu0 }
 0xe25   :  { %v5667_v42 = vrot.slane %v5464_v52, 4  ;;  %v5665_v62 = vrot.slane %v5520_v25, 4 }
 0xe27   :  { %v5668_v43 = vsel %vm295_vm15, %v5520_v25, %v5667_v42  ;;  %v5666_v54 = vsel %vm295_vm15, %v5665_v62, %v5464_v52 }
 0xe28   :  { %v5676_v12 = vperm.slane %v5668_v43, %v7475_v17  ;;  %v5672_v45 = vperm.slane %v5666_v54, %v7475_v17 }
 0xe2a   :  { %v5703_v31 = vrot.slane %v5676_v12, 4  ;;  %v5691_v41 = vrot.slane %v5672_v45, 4 }
 0xe2b   :  { %7028 = vrot.lane.b32.xlu0 %v7027_v13, %s7286_s17 }
 0xe2c   :  { %v5466_v58 = vpop.f32.mrf.mxu2  ;;  %v5492_v60 = vpop.f32.mrf.mxu3 }
 0xe2d   :  { %v5723_v9 = vrot.slane %v5466_v58, 4  ;;  %v5679_v30 = vrot.slane %v5492_v60, 4  ;;  %v5522_v4 = vpop.f32.mrf.mxu0 }
 0xe2e   :  { %v5548_v37 = vpop.f32.mrf.mxu1  ;;  %v5721_v51 = vrot.slane %v5522_v4, 4 }
 0xe2f   :  { %v5724_v10 = vsel %vm295_vm15, %v5522_v4, %v5723_v9  ;;  %v5677_v8 = vrot.slane %v5548_v37, 4  ;;  %v5680_v15 = vsel %vm295_vm15, %v5548_v37, %v5679_v30 }
 0xe30   :  { %v5688_v48 = vperm.slane %v5680_v15, %v7475_v17  ;;  %v5732_v6 = vperm.slane %v5724_v10, %v7475_v17  ;;  %v5722_v53 = vsel %vm295_vm15, %v5721_v51, %v5466_v58 }
 0xe31   :  { %v5678_v50 = vsel %vm295_vm15, %v5677_v8, %v5492_v60  ;;  %v5728_v39 = vperm.slane %v5722_v53, %v7475_v17 }
 0xe32   :  { %v5684_v55 = vperm.slane %v5678_v50, %v7475_v17  ;;  %v5701_v14 = vrot.slane %v5688_v48, 4  ;;  %v5704_v5 = vsel %vm295_vm15, %v5688_v48, %v5703_v31  ;;  %v5759_v7 = vrot.slane %v5732_v6, 4 }
 0xe33   :  { %v5712_v16 = vperm.slane %v5704_v5, %v7479_v22  ;;  %v5747_v35 = vrot.slane %v5728_v39, 4 }
 0xe34   :  { %v5689_v38 = vrot.slane %v5684_v55, 4  ;;  %v5692_v29 = vsel %vm295_vm15, %v5684_v55, %v5691_v41  ;;  %v5702_v57 = vsel %vm295_vm15, %v5701_v14, %v5676_v12  ;;  %v5494_v59 = vpop.f32.mrf.mxu3 }
 0xe35   :  { %v5700_v44 = vperm.slane %v5692_v29, %v7479_v22  ;;  %v5708_v23 = vperm.slane %v5702_v57, %v7479_v22  ;;  %v5719_v28 = vrot.slane %v5712_v16, 4  ;;  %v5735_v18 = vrot.slane %v5494_v59, 4 }
 0xe36   :  { %v5690_v36 = vsel %vm295_vm15, %v5689_v38, %v5672_v45  ;;  %v5550_v11 = vpop.f32.mrf.mxu1 }
 0xe37   :  { %v5696_v2 = vperm.slane %v5690_v36, %v7479_v22  ;;  %v5715_v61 = vrot.slane %v5700_v44, 4  ;;  %v5717_v19 = vrot.slane %v5708_v23, 4  ;;  %v5720_v26 = vsel %vm295_vm15, 0.0, %v5719_v28 }
 0xe38   :  { %v5896_v27 = vsel %vm295_vm15, %v5719_v28, %v5708_v23  ;;  %v5901_v47 = vrot.slane %v5720_v26, 4  ;;  %v5733_v33 = vrot.slane %v5550_v11, 4  ;;  %v5736_v34 = vsel %vm295_vm15, %v5550_v11, %v5735_v18 }
 0xe39   :  { %v5713_v49 = vrot.slane %v5696_v2, 4  ;;  %v5716_v52 = vsel %vm295_vm15, 0.0, %v5715_v61  ;;  %v5718_v25 = vsel %vm295_vm15, 0.0, %v5717_v19  ;;  %v5885_v42 = vsel %vm295_vm15, %v5715_v61, %v5696_v2 }
 0xe3a   :  { %v5889_v40 = vperm.slane %v5885_v42, %v7475_v17  ;;  %v5890_v62 = vrot.slane %v5716_v52, 4  ;;  %v5900_v1 = vperm.slane %v5896_v27, %v7475_v17  ;;  %v5902_v24 = vsel %vm295_vm15, %v5901_v47, %v5718_v25 }
 0xe3b   :  { %v5714_v21 = vsel %vm295_vm15, 0.0, %v5713_v49  ;;  %v5906_v0 = vperm.slane %v5902_v24, %v7475_v17  ;;  %v5734_v43 = vsel %vm295_vm15, %v5733_v33, %v5494_v59  ;;  %v5744_v20 = vperm.slane %v5736_v34, %v7475_v17 }
 0xe3c   :  { %v5921_v54 = vrot.slane %v5900_v1, 4  ;;  %v5740_v13 = vperm.slane %v5734_v43, %v7475_v17  ;;  %v5891_v12 = vsel %vm295_vm15, %v5890_v62, %v5714_v21  ;;  %v5909_v9 = vrot.slane %v5889_v40, 4 }
 0xe3d   :  { %v5757_v58 = vrot.slane %v5744_v20, 4  ;;  %v5760_v60 = vsel %vm295_vm15, %v5744_v20, %v5759_v7  ;;  %v5895_v45 = vperm.slane %v5891_v12, %v7475_v17  ;;  %v5919_v41 = vrot.slane %v5906_v0, 4 }
 0xe3e   :  { %v5745_v30 = vrot.slane %v5740_v13, 4  ;;  %v5748_v4 = vsel %vm295_vm15, %v5740_v13, %v5747_v35  ;;  %v5768_v37 = vperm.slane %v5760_v60, %v7479_v22  ;;  %v5922_v51 = vsel %vm295_vm15, %v5906_v0, %v5921_v54 }
 0xe3f   :  { %v5756_v10 = vperm.slane %v5748_v4, %v7479_v22  ;;  %v5758_v8 = vsel %vm295_vm15, %v5757_v58, %v5732_v6  ;;  %v5910_v14 = vsel %vm295_vm15, %v5895_v45, %v5909_v9  ;;  %v5930_v5 = vperm.slane %v5922_v51, %v7479_v22 }
 0xe40   :  { %v5746_v15 = vsel %vm295_vm15, %v5745_v30, %v5728_v39  ;;  %v5764_v31 = vperm.slane %v5758_v8, %v7479_v22  ;;  %v5775_v48 = vrot.slane %v5768_v37, 4  ;;  %v5907_v29 = vrot.slane %v5895_v45, 4 }
 0xe41   :  { %v5752_v50 = vperm.slane %v5746_v15, %v7479_v22  ;;  %v5771_v55 = vrot.slane %v5756_v10, 4  ;;  %v5918_v11 = vperm.slane %v5910_v14, %v7479_v22  ;;  %v5920_v34 = vsel %vm295_vm15, %v5919_v41, %v5900_v1 }
 0xe42   :  { %v5773_v53 = vrot.slane %v5764_v31, 4  ;;  %v5776_v16 = vsel %vm295_vm15, 0.0, %v5775_v48  ;;  %v5950_v38 = vsel %vm295_vm15, %v5775_v48, %v5764_v31  ;;  %v5908_v26 = vsel %vm295_vm15, %v5907_v29, %v5889_v40 }
 0xe43   :  { %v5769_v6 = vrot.slane %v5752_v50, 4  ;;  %v5772_v57 = vsel %vm295_vm15, 0.0, %v5771_v55  ;;  %v5939_v59 = vsel %vm295_vm15, %v5771_v55, %v5752_v50  ;;  %v5954_v44 = vperm.slane %v5950_v38, %v7475_v17 }
 0xe44   :  { %v5774_v23 = vsel %vm295_vm15, 0.0, %v5773_v53  ;;  %v5943_v28 = vperm.slane %v5939_v59, %v7475_v17  ;;  %v5944_v18 = vrot.slane %v5772_v57, 4  ;;  %v5955_v39 = vrot.slane %v5776_v16, 4 }
 0xe45   :  { %v5770_v7 = vsel %vm295_vm15, 0.0, %v5769_v6  ;;  %v5975_v36 = vrot.slane %v5954_v44, 4  ;;  %v5914_v33 = vperm.slane %v5908_v26, %v7479_v22  ;;  %v5935_v49 = vrot.slane %v5930_v5, 4 }
 0xe46   :  { %v5945_v2 = vsel %vm295_vm15, %v5944_v18, %v5770_v7  ;;  %v5956_v61 = vsel %vm295_vm15, %v5955_v39, %v5774_v23  ;;  %v5963_v19 = vrot.slane %v5943_v28, 4  ;;  %v5926_v52 = vperm.slane %v5920_v34, %v7479_v22 }
 0xe47   :  { %v5960_v27 = vperm.slane %v5956_v61, %v7475_v17  ;;  %v5949_v47 = vperm.slane %v5945_v2, %v7475_v17  ;;  %v5937_v62 = vrot.slane %v5918_v11, 4  ;;  %v5933_v17 = vrot.slane %v5914_v33, 4 }
 0xe48   :  { %v5931_v0 = vrot.slane %v5926_v52, 4  ;;  %v5936_v12 = vsel %vm295_vm15, %v5935_v49, %v5918_v11 }
 0xe49   :  { %v5964_v25 = vsel %vm295_vm15, %v5949_v47, %v5963_v19  ;;  %v5976_v42 = vsel %vm295_vm15, %v5960_v27, %v5975_v36  ;;  %v5961_v24 = vrot.slane %v5949_v47, 4  ;;  %v5973_v43 = vrot.slane %v5960_v27, 4 }
 0xe4a   :  { %v5972_v21 = vperm.slane %v5964_v25, %v7479_v22  ;;  %v5984_v40 = vperm.slane %v5976_v42, %v7479_v22  ;;  %v5932_v60 = vsel %vm295_vm15, %v5931_v0, %v5914_v33  ;;  %v5938_v9 = vsel %vm295_vm15, %v5930_v5, %v5937_v62 }
 0xe4b   :  { %v5962_v20 = vsel %vm295_vm15, %v5961_v24, %v5943_v28  ;;  %v5974_v13 = vsel %vm295_vm15, %v5973_v43, %v5954_v44  ;;  %v5934_v8 = vsel %vm295_vm15, %v5926_v52, %v5933_v17 }
 0xe4c   :  { %v5989_v35 = vrot.slane %v5984_v40, 4  ;;  %v5991_v1 = vrot.slane %v5972_v21, 4  ;;  %v5968_v54 = vperm.slane %v5962_v20, %v7479_v22  ;;  %v5980_v58 = vperm.slane %v5974_v13, %v7479_v22 }
 0xe4e   :  { %v5990_v45 = vsel %vm295_vm15, %v5989_v35, %v5972_v21  ;;  %v5992_v30 = vsel %vm295_vm15, %v5984_v40, %v5991_v1  ;;  %v5987_v4 = vrot.slane %v5968_v54, 4  ;;  %v5985_v10 = vrot.slane %v5980_v58, 4 }
 0xe4f   :  { %v7037_v37 = vpack.i.bf16 %v5990_v45, %v5936_v12  ;;  %v7042_v51 = vpack.i.bf16 %v5992_v30, %v5938_v9  ;;  %v10575_v30 = vld [vmem:[#allocation9_spill] sm:$0xff] }
 0xe50   :  { %v5988_v15 = vsel %vm295_vm15, %v5980_v58, %v5987_v4  ;;  %v5986_v31 = vsel %vm295_vm15, %v5985_v10, %v5968_v54 }
 0xe51   :  { %7038 = vrot.lane.b32.xlu0 %v7037_v37, %s7287_s18  ;;  %7043 = vrot.lane.b32.xlu1 %v7042_v51, %s7286_s17  ;;  %v7032_v22 = vpack.i.bf16 %v5988_v15, %v5934_v8 }
 0xe53   :  { %7033 = vrot.lane.b32.xlu2 %v7032_v22, %s7288_s19 }
 0xe7b   :  { %v7019_v14 = vpop.permute.xlu2 %7018 }
 0xe7c   :  { %v7021_v38 = vunpack.i.h.bf16 %v7019_v14  ;;  %v7020_v29 = vunpack.i.l.bf16 %v7019_v14 }
 0xe8c   :  { %v6074_v48 = vpop.permute.xlu1 %6073 }
 0xe8d   :  { %6093 = vmatpush.bf16.msra.mxu2 %v6074_v48 }
 0xe94   :  { %v6072_v5 = vpop.permute.xlu1 %6071 }
 0xe95   :  { %v7024_v41 = vpop.permute.xlu0 %7023  ;;  %6094 = vmatpush.bf16.msra.mxu2 %v6072_v5 }
 0xe96   :  { %v7026_v50 = vunpack.i.h.bf16 %v7024_v41  ;;  %v7025_v55 = vunpack.i.l.bf16 %v7024_v41 }
 0xe98   :  { %v6042_v53 = vsel %vm1769_vm0, %v10223_v3, %v7026_v50  ;;  %v6041_v16 = vsel %vm1769_vm0, %v10208_v46, %v7025_v55  ;;  %v7058_v46 = vld [vmem:[%s10471_s4 + $0x1] ss:$0 sm:$0xff] }
 0xe99   :  { %v6045_v44 = vsel %vm2000_vm2, %v6041_v16, %v7020_v29  ;;  %v6046_v23 = vsel %vm2000_vm2, %v6042_v53, %v7021_v38  ;;  %6078 = vrot.lane.b32.xlu2 %v7058_v46, %s7285_s1 }
 0xe9d   :  { %v7029_v6 = vpop.permute.xlu0 %7028 }
 0xe9e   :  { %v7031_v57 = vunpack.i.h.bf16 %v7029_v6  ;;  %v7030_v59 = vunpack.i.l.bf16 %v7029_v6 }
 0xea0   :  { %v6049_v28 = vsel %vm2913_vm3, %v6045_v44, %v7030_v59  ;;  %v6050_v18 = vsel %vm2913_vm3, %v6046_v23, %v7031_v57 }
 0xea1   :  { %v6053_v39 = vpack.c.bf16 %v6050_v18, %v6049_v28 }
 0xea3   :  { %6651 = vmatmul.msk.bf16.vlgmr.msra.gmra.mxu2 %vm103_vm1, %v6053_v39 }
 0xead   :  { %v7034_v3 = vpop.permute.xlu2 %7033 }
 0xeae   :  { %v7036_v7 = vunpack.i.h.bf16 %v7034_v3  ;;  %v7035_v36 = vunpack.i.l.bf16 %v7034_v3 }
 0xeb0   :  { %v6043_v47 = vsel %vm1769_vm0, %v5932_v60, %v7035_v36  ;;  %v6044_v33 = vsel %vm1769_vm0, %v5986_v31, %v7036_v7  ;;  %v10574_v60 = vld [vmem:[#allocation16_spill] sm:$0xff] }
 0xec3   :  { %v7039_v11 = vpop.permute.xlu0 %7038  ;;  %v7044_v2 = vpop.permute.xlu1 %7043 }
 0xec4   :  { %v7041_v61 = vunpack.i.h.bf16 %v7039_v11  ;;  %v7040_v19 = vunpack.i.l.bf16 %v7039_v11  ;;  %v7046_v26 = vunpack.i.h.bf16 %v7044_v2  ;;  %v7045_v27 = vunpack.i.l.bf16 %v7044_v2 }
 0xec6   :  { %v6047_v34 = vsel %vm2000_vm2, %v6043_v47, %v7040_v19  ;;  %v6048_v49 = vsel %vm2000_vm2, %v6044_v33, %v7041_v61  ;;  %v7059_v47 = vld [vmem:[%s10472_s5 + $0x26] ss:$0 sm:$0xff] }
 0xec7   :  { %v6051_v52 = vsel %vm2913_vm3, %v6047_v34, %v7045_v27  ;;  %v6052_v25 = vsel %vm2913_vm3, %v6048_v49, %v7046_v26  ;;  %v6663_v49 = vld [vmem:[%s10469_s2 + $0x34] sm:$0xf] }
 0xec8   :  { %v6054_v42 = vpack.c.bf16 %v6052_v25, %v6051_v52  ;;  %v6740_v52 = vld [vmem:[%s10469_s2 + $0x38] sm:$0xf0] }
 0xeca   :  { %6652 = vmatmul.msk.bf16.gmra.mxu2 %vm103_vm1, %v6054_v42  ;;  %v6664_v42 = vor.u32 %v6740_v52, %v6663_v49 }
 0xecc   :  { %6242 = vmatpush.bf16.msrb.mxu3 %v6664_v42 }
 0xef3   :  { %v6079_v62 = vpop.permute.xlu2 %6078 }
 0xf26   :  { %v6096_v24 = vpop.f32.mrf.mxu2 }
 0xf27   :  { %v6097_v21 = vadd.f32 %v6096_v24, %v6079_v62  ;;  %v7060_v24 = vld [vmem:[%s10472_s5 + $0x27] ss:$0 sm:$0xff] }
 0xf29   :  { %v10328_v40 = vadd.f32 %v6097_v21, %v8947_v32 }
 0xf2b   :  { %v6112_v0 = vsel %vm103_vm1, %v10328_v40, 0.0 }
 0xf2c   :  { %6113 = vadd.xlane.f32.xlu0 %v6112_v0 }
 0xf2e   :  { %v6098_v43 = vpop.f32.mrf.mxu2 }
 0xf2f   :  { %v6099_v17 = vadd.f32 %v6098_v43, %v6079_v62 }
 0xf31   :  { %v10333_v20 = vadd.f32 %v6099_v17, %v8952_v56 }
 0xf33   :  { %v6115_v35 = vsel %vm103_vm1, %v10333_v20, 0.0 }
 0xf34   :  { %6116 = vadd.xlane.f32.xlu1 %v6115_v35  ;;  %v6659_v35 = vld [vmem:[%s10469_s2 + $0x24] sm:$0xf] }
 0xf4d   :  { %v6101_v1 = vpop.f32.mrf.mxu2 }
 0xf4e   :  { %v6102_v54 = vadd.f32 %v6101_v1, %v6079_v62  ;;  %v6739_v1 = vld [vmem:[%s10469_s2 + $0x28] sm:$0xf0]  ;;  %s7290_s2 = smov 128  }
 0xf50   :  { %v10338_v13 = vadd.f32 %v6102_v54, %v8957_v63 }
 0xf52   :  { %v6118_v32 = vsel %vm103_vm1, %v10338_v13, 0.0 }
 0xf53   :  { %6119 = vadd.xlane.f32.xlu2 %v6118_v32  ;;  %v6660_v32 = vor.u32 %v6739_v1, %v6659_v35 }
 0xf55   :  { %v6103_v12 = vpop.f32.mrf.mxu2  ;;  %6243 = vmatpush.bf16.msrb.mxu3 %v6660_v32 }
 0xf56   :  { %v6104_v58 = vadd.f32 %v6103_v12, %v6079_v62 }
 0xf58   :  { %v10343_v45 = vadd.f32 %v6104_v58, %v10574_v60 }
 0xf5a   :  { %v6121_v56 = vsel %vm103_vm1, %v10343_v45, 0.0 }
 0xf5b   :  { %6122 = vadd.xlane.f32.xlu0 %v6121_v56 }
 0xf9f   :  { %v6114_v9 = vpop.xlane.xlu0 %6113 }
 0xfa0   :  { %v6124_v4 = vmul.f32 %v6114_v9, %v10575_v30 }
 0xfa2   :  { %v6128_v37 = vsub.f32 %v10328_v40, %v6124_v4 }
 0xfa4   :  { %v6132_v63 = vmul.f32 %v6128_v37, %v6128_v37 }
 0xfa6   :  { %v6136_v51 = vsel %vm103_vm1, %v6132_v63, 0.0 }
 0xfa7   :  { %v6117_v10 = vpop.xlane.xlu1 %6116  ;;  %6137 = vadd.xlane.f32.xlu1 %v6136_v51 }
 0xfa8   :  { %v6125_v8 = vmul.f32 %v6117_v10, %v10575_v30 }
 0xfaa   :  { %v6129_v15 = vsub.f32 %v10333_v20, %v6125_v8 }
 0xfac   :  { %v6133_v22 = vmul.f32 %v6129_v15, %v6129_v15 }
 0xfae   :  { %v6139_v31 = vsel %vm103_vm1, %v6133_v22, 0.0 }
 0xfaf   :  { %6140 = vadd.xlane.f32.xlu2 %v6139_v31 }
 0xfc6   :  { %v6120_v48 = vpop.xlane.xlu2 %6119 }
 0xfc7   :  { %v6126_v41 = vmul.f32 %v6120_v48, %v10575_v30 }
 0xfc9   :  { %v10355_v50 = vsub.f32 %v10338_v13, %v6126_v41 }
 0xfcb   :  { %v6134_v55 = vmul.f32 %v10355_v50, %v10355_v50 }
 0xfcd   :  { %v6142_v14 = vsel %vm103_vm1, %v6134_v55, 0.0 }
 0xfce   :  { %v6123_v5 = vpop.xlane.xlu0 %6122  ;;  %6143 = vadd.xlane.f32.xlu0 %v6142_v14 }
 0xfcf   :  { %v6127_v53 = vmul.f32 %v6123_v5, %v10575_v30 }
 0xfd1   :  { %v10362_v16 = vsub.f32 %v10343_v45, %v6127_v53 }
 0xfd3   :  { %v6135_v38 = vmul.f32 %v10362_v16, %v10362_v16 }
 0xfd5   :  { %v6145_v29 = vsel %vm103_vm1, %v6135_v38, 0.0 }
 0xfd6   :  { %6146 = vadd.xlane.f32.xlu1 %v6145_v29 }
0x101a   :  { %v6138_v6 = vpop.xlane.xlu1 %6137 }
0x101b   :  { %v6148_v57 = vmul.f32 %v6138_v6, %v10575_v30 }
0x101d   :  { %v6152_v59 = vadd.f32 1e-05, %v6148_v57 }
0x101f   :  { %7227 = vrsqrt.f32 %v6152_v59  ;;  %vm6162_vm0 = vweird.f32 %v6152_v59 }
0x1022   :  { %v6141_v44 = vpop.xlane.xlu2 %6140 }
0x1023   :  { %v6149_v23 = vmul.f32 %v6141_v44, %v10575_v30 }
0x1025   :  { %v7228_v28 = vpop.eup %7227  ;;  %v6153_v18 = vadd.f32 1e-05, %v6149_v23 }
0x1026   :  { %v6157_v39 = vmul.f32 %v7228_v28, %v6152_v59  ;;  %vm6163_vm15 = vweird.f32 %v7228_v28 }
0x1027   :  { %7229 = vrsqrt.f32 %v6153_v18  ;;  %vm6164_vm2 = vmor %vm6162_vm0, %vm6163_vm15  ;;  %vm6172_vm6 = vweird.f32 %v6153_v18 }
0x1028   :  { %v6158_v46 = vmul.f32 %v7228_v28, %v6157_v39 }
0x102a   :  { %v6159_v3 = vmul.f32 0.5, %v6158_v46  ;;  %v6746_v46 = vld [vmem:[%s10470_s3 + $0x68] sm:$0xff] }
0x102c   :  { %v6160_v7 = vsub.f32 1.5, %v6159_v3 }
0x102d   :  { %v7230_v36 = vpop.eup %7229 }
0x102e   :  { %v6167_v11 = vmul.f32 %v7230_v36, %v6153_v18  ;;  %v6161_v2 = vmul.f32 %v7228_v28, %v6160_v7  ;;  %vm6173_vm3 = vweird.f32 %v7230_v36 }
0x102f   :  { %vm6174_vm7 = vmor %vm6172_vm6, %vm6173_vm3 }
0x1030   :  { %v6168_v61 = vmul.f32 %v7230_v36, %v6167_v11  ;;  %v6165_v26 = vsel %vm6164_vm2, %v7228_v28, %v6161_v2  ;;  %v6748_v28 = vld [vmem:[%s10470_s3 + $0x78] sm:$0xff] }
0x1031   :  { %v6196_v34 = vmul.f32 %v6165_v26, %v6128_v37  ;;  %6360 = vmatpush.bf16.msrb.mxu0 %v6748_v28  ;;  %v6744_v26 = vld [vmem:[%s10470_s3 + $0x58] sm:$0xff] }
0x1032   :  { %v6169_v19 = vmul.f32 0.5, %v6168_v61 }
0x1033   :  { %v6201_v21 = vmul.f32 %v7059_v47, %v6196_v34  ;;  %v6743_v34 = vld [vmem:[%s10470_s3 + $0x50] sm:$0xff] }
0x1034   :  { %v6170_v27 = vsub.f32 1.5, %v6169_v19 }
0x1035   :  { %v6206_v17 = vadd.f32 %v7060_v24, %v6201_v21 }
0x1036   :  { %v6171_v33 = vmul.f32 %v7230_v36, %v6170_v27 }
0x1038   :  { %v6175_v25 = vsel %vm6174_vm7, %v7230_v36, %v6171_v33  ;;  %v6745_v36 = vld [vmem:[%s10470_s3 + $0x60] sm:$0xff] }
0x1039   :  { %v6197_v62 = vmul.f32 %v6175_v25, %v6129_v15  ;;  %v6742_v25 = vld [vmem:[%s10470_s3 + $0x48] sm:$0xff] }
0x103b   :  { %v6202_v0 = vmul.f32 %v7059_v47, %v6197_v62 }
0x103d   :  { %v6207_v43 = vadd.f32 %v7060_v24, %v6202_v0 }
0x103f   :  { %v6210_v58 = vpack.c.bf16 %v6207_v43, %v6206_v17 }
0x1041   :  { %v6144_v54 = vpop.xlane.xlu0 %6143  ;;  %6665 = vmatmul.msk.bf16.vlgmr.msrb.gmra.mxu3 %vm103_vm1, %v6210_v58 }
0x1042   :  { %v6150_v12 = vmul.f32 %v6144_v54, %v10575_v30 }
0x1044   :  { %v6154_v60 = vadd.f32 1e-05, %v6150_v12 }
0x1046   :  { %7231 = vrsqrt.f32 %v6154_v60  ;;  %vm6182_vm9 = vweird.f32 %v6154_v60 }
0x1049   :  { %v6147_v56 = vpop.xlane.xlu1 %6146 }
0x104a   :  { %v6151_v9 = vmul.f32 %v6147_v56, %v10575_v30 }
0x104c   :  { %v7232_v4 = vpop.eup %7231  ;;  %v6155_v37 = vadd.f32 1e-05, %v6151_v9 }
0x104d   :  { %v6177_v63 = vmul.f32 %v7232_v4, %v6154_v60  ;;  %vm6183_vm8 = vweird.f32 %v7232_v4 }
0x104e   :  { %7233 = vrsqrt.f32 %v6155_v37  ;;  %vm6184_vm10 = vmor %vm6182_vm9, %vm6183_vm8  ;;  %vm6192_vm12 = vweird.f32 %v6155_v37 }
0x104f   :  { %v6178_v51 = vmul.f32 %v7232_v4, %v6177_v63 }
0x1051   :  { %v6179_v10 = vmul.f32 0.5, %v6178_v51 }
0x1053   :  { %v6180_v8 = vsub.f32 1.5, %v6179_v10 }
0x1054   :  { %v7234_v15 = vpop.eup %7233 }
0x1055   :  { %v6181_v22 = vmul.f32 %v7232_v4, %v6180_v8  ;;  %v6187_v31 = vmul.f32 %v7234_v15, %v6155_v37  ;;  %vm6193_vm11 = vweird.f32 %v7234_v15 }
0x1056   :  { %vm6194_vm13 = vmor %vm6192_vm12, %vm6193_vm11 }
0x1057   :  { %v6188_v48 = vmul.f32 %v7234_v15, %v6187_v31  ;;  %v6185_v41 = vsel %vm6184_vm10, %v7232_v4, %v6181_v22 }
0x1058   :  { %v6198_v5 = vmul.f32 %v6185_v41, %v10355_v50  ;;  %v7061_v50 = vld [vmem:[%s10471_s4 + $0x3] ss:$0 sm:$0xff] }
0x1059   :  { %v6189_v55 = vmul.f32 0.5, %v6188_v48 }
0x105a   :  { %v6203_v6 = vmul.f32 %v7059_v47, %v6198_v5 }
0x105b   :  { %v6190_v14 = vsub.f32 1.5, %v6189_v55 }
0x105c   :  { %v6208_v59 = vadd.f32 %v7060_v24, %v6203_v6 }
0x105d   :  { %v6191_v53 = vmul.f32 %v7234_v15, %v6190_v14 }
0x105f   :  { %v6195_v38 = vsel %vm6194_vm13, %v7234_v15, %v6191_v53 }
0x1060   :  { %v6199_v29 = vmul.f32 %v6195_v38, %v10362_v16  ;;  %v6747_v16 = vld [vmem:[%s10470_s3 + $0x70] sm:$0xff] }
0x1061   :  { %6361 = vmatpush.bf16.msrb.mxu0 %v6747_v16 }
0x1062   :  { %v6204_v57 = vmul.f32 %v7059_v47, %v6199_v29 }
0x1064   :  { %v6209_v44 = vadd.f32 %v7060_v24, %v6204_v57  ;;  %v6741_v24 = vld [vmem:[%s10470_s3 + $0x40] sm:$0xff] }
0x1065   :  { %6362 = vmatpush.bf16.msrb.mxu0 %v6746_v46  ;;  %v7062_v57 = vld [vmem:[%s10471_s4 + $0x5] ss:$0 sm:$0xff] }
0x1066   :  { %v6211_v23 = vpack.c.bf16 %v6209_v44, %v6208_v59 }
0x1068   :  { %6666 = vmatmul.msk.bf16.gmra.mxu3 %vm103_vm1, %v6211_v23 }
0x1069   :  { %6363 = vmatpush.bf16.msrb.mxu0 %v6745_v36 }
0x106d   :  { %6364 = vmatpush.bf16.msrb.mxu0 %v6744_v26 }
0x1071   :  { %6365 = vmatpush.bf16.msrb.mxu0 %v6743_v34 }
0x1075   :  { %6366 = vmatpush.bf16.msrb.mxu0 %v6742_v25 }
0x1079   :  { %6367 = vmatpush.bf16.msrb.mxu0 %v6741_v24 }
0x10c4   :  { %v6245_v18 = vpop.f32.mrf.mxu3 }
0x10c5   :  { %v6246_v39 = vadd.f32 %v7061_v50, %v6245_v18 }
0x10c7   :  { %v6255_v3 = vmul.f32 %v6246_v39, %v6246_v39 }
0x10c9   :  { %v6259_v7 = vmul.f32 %v6255_v3, %v6246_v39 }
0x10cb   :  { %v6263_v11 = vmul.f32 0.044715, %v6259_v7 }
0x10cc   :  { %v6247_v2 = vpop.f32.mrf.mxu3 }
0x10cd   :  { %v6267_v61 = vadd.f32 %v6263_v11, %v6246_v39  ;;  %v6248_v19 = vadd.f32 %v7061_v50, %v6247_v2 }
0x10cf   :  { %v6271_v27 = vmul.f32 0.7978846, %v6267_v61  ;;  %v6256_v47 = vmul.f32 %v6248_v19, %v6248_v19 }
0x10d1   :  { %v6260_v33 = vmul.f32 %v6256_v47, %v6248_v19  ;;  %7235 = vtanh.f32 %v6271_v27 }
0x10d3   :  { %v6264_v49 = vmul.f32 0.044715, %v6260_v33 }
0x10d5   :  { %v6268_v52 = vadd.f32 %v6264_v49, %v6248_v19 }
0x10d7   :  { %v6272_v42 = vmul.f32 0.7978846, %v6268_v52  ;;  %v7236_v62 = vpop.eup %7235 }
0x10d8   :  { %v6279_v21 = vadd.f32 1.0, %v7236_v62 }
0x10d9   :  { %7237 = vtanh.f32 %v6272_v42 }
0x10da   :  { %v6283_v43 = vmul.f32 0.5, %v6279_v21 }
0x10dc   :  { %v6287_v1 = vmul.f32 %v6283_v43, %v6246_v39 }
0x10df   :  { %v7238_v0 = vpop.eup %7237 }
0x10e0   :  { %v6280_v17 = vadd.f32 1.0, %v7238_v0 }
0x10e2   :  { %v6284_v35 = vmul.f32 0.5, %v6280_v17 }
0x10e4   :  { %v6288_v54 = vmul.f32 %v6284_v35, %v6248_v19 }
0x10e6   :  { %v6291_v12 = vpack.c.bf16 %v6288_v54, %v6287_v1 }
0x10e8   :  { %6368 = vmatmul.bf16.vlgmr.msrb.gmra.mxu0 %v6291_v12 }
0x10eb   :  { %v6250_v32 = vpop.f32.mrf.mxu3 }
0x10ec   :  { %v6251_v58 = vadd.f32 %v7061_v50, %v6250_v32 }
0x10ee   :  { %v6257_v60 = vmul.f32 %v6251_v58, %v6251_v58 }
0x10f0   :  { %v6261_v56 = vmul.f32 %v6257_v60, %v6251_v58 }
0x10f2   :  { %v6265_v9 = vmul.f32 0.044715, %v6261_v56 }
0x10f3   :  { %v6252_v4 = vpop.f32.mrf.mxu3 }
0x10f4   :  { %v6269_v37 = vadd.f32 %v6265_v9, %v6251_v58  ;;  %v6253_v63 = vadd.f32 %v7061_v50, %v6252_v4 }
0x10f6   :  { %v6258_v51 = vmul.f32 %v6253_v63, %v6253_v63  ;;  %v6273_v10 = vmul.f32 0.7978846, %v6269_v37 }
0x10f8   :  { %v6262_v8 = vmul.f32 %v6258_v51, %v6253_v63  ;;  %7239 = vtanh.f32 %v6273_v10 }
0x10fa   :  { %v6266_v15 = vmul.f32 0.044715, %v6262_v8 }
0x10fc   :  { %v6270_v22 = vadd.f32 %v6266_v15, %v6253_v63  ;;  %v7063_v15 = vld [vmem:[%s10472_s5 + $0x28] ss:$0 sm:$0xff] }
0x10fe   :  { %v6274_v31 = vmul.f32 0.7978846, %v6270_v22  ;;  %v7240_v48 = vpop.eup %7239 }
0x10ff   :  { %v6281_v41 = vadd.f32 1.0, %v7240_v48  ;;  %v7064_v48 = vld [vmem:[%s10472_s5 + $0x29] ss:$0 sm:$0xff] }
0x1100   :  { %7241 = vtanh.f32 %v6274_v31 }
0x1101   :  { %v6285_v5 = vmul.f32 0.5, %v6281_v41 }
0x1103   :  { %v6289_v38 = vmul.f32 %v6285_v5, %v6251_v58 }
0x1106   :  { %v7242_v55 = vpop.eup %7241 }
0x1107   :  { %v6282_v14 = vadd.f32 1.0, %v7242_v55 }
0x1109   :  { %v6286_v53 = vmul.f32 0.5, %v6282_v14 }
0x110b   :  { %v6290_v29 = vmul.f32 %v6286_v53, %v6253_v63 }
0x110d   :  { %v6292_v6 = vpack.c.bf16 %v6290_v29, %v6289_v38 }
0x110f   :  { %6373 = vmatmul.bf16.gmra.mxu0 %v6292_v6 }
0x1165   :  { %v6369_v59 = vpop.f32.mrf.mxu0 }
0x1166   :  { %v6370_v44 = vadd.f32 %v7062_v57, %v6369_v59 }
0x1168   :  { %v6379_v23 = vadd.f32 %v6370_v44, %v10328_v40 }
0x116a   :  { %v6385_v28 = vsel %vm103_vm1, %v6379_v23, 0.0 }
0x116b   :  { %6386 = vadd.xlane.f32.xlu2 %v6385_v28 }
0x116d   :  { %v6371_v50 = vpop.f32.mrf.mxu0 }
0x116e   :  { %v6372_v18 = vadd.f32 %v7062_v57, %v6371_v50 }
0x1170   :  { %v6380_v16 = vadd.f32 %v6372_v18, %v10333_v20 }
0x1172   :  { %v6388_v39 = vsel %vm103_vm1, %v6380_v16, 0.0 }
0x1173   :  { %6389 = vadd.xlane.f32.xlu0 %v6388_v39 }
0x118c   :  { %v6374_v46 = vpop.f32.mrf.mxu0 }
0x118d   :  { %v6375_v3 = vadd.f32 %v7062_v57, %v6374_v46 }
0x118f   :  { %v6381_v7 = vadd.f32 %v6375_v3, %v10338_v13 }
0x1191   :  { %v6391_v36 = vsel %vm103_vm1, %v6381_v7, 0.0 }
0x1192   :  { %6392 = vadd.xlane.f32.xlu1 %v6391_v36 }
0x1194   :  { %v6376_v11 = vpop.f32.mrf.mxu0 }
0x1195   :  { %v6377_v2 = vadd.f32 %v7062_v57, %v6376_v11 }
0x1197   :  { %v6382_v40 = vadd.f32 %v6377_v2, %v10343_v45 }
0x1199   :  { %v6394_v61 = vsel %vm103_vm1, %v6382_v40, 0.0 }
0x119a   :  { %6395 = vadd.xlane.f32.xlu2 %v6394_v61 }
0x11de   :  { %v6387_v19 = vpop.xlane.xlu2 %6386 }
0x11df   :  { %v6397_v20 = vmul.f32 %v6387_v19, %v10575_v30 }
0x11e1   :  { %v6401_v26 = vsub.f32 %v6379_v23, %v6397_v20 }
0x11e3   :  { %v6405_v27 = vmul.f32 %v6401_v26, %v6401_v26 }
0x11e5   :  { %v6409_v47 = vsel %vm103_vm1, %v6405_v27, 0.0 }
0x11e6   :  { %v6390_v33 = vpop.xlane.xlu0 %6389  ;;  %6410 = vadd.xlane.f32.xlu0 %v6409_v47 }
0x11e7   :  { %v6398_v13 = vmul.f32 %v6390_v33, %v10575_v30 }
0x11e9   :  { %v6402_v34 = vsub.f32 %v6380_v16, %v6398_v13 }
0x11eb   :  { %v6406_v49 = vmul.f32 %v6402_v34, %v6402_v34 }
0x11ed   :  { %v6412_v52 = vsel %vm103_vm1, %v6406_v49, 0.0 }
0x11ee   :  { %6413 = vadd.xlane.f32.xlu1 %v6412_v52 }
0x1205   :  { %v6393_v45 = vpop.xlane.xlu1 %6392 }
0x1206   :  { %v6399_v25 = vmul.f32 %v6393_v45, %v10575_v30 }
0x1208   :  { %v10436_v42 = vsub.f32 %v6381_v7, %v6399_v25 }
0x120a   :  { %v6407_v62 = vmul.f32 %v10436_v42, %v10436_v42 }
0x120c   :  { %v6415_v24 = vsel %vm103_vm1, %v6407_v62, 0.0 }
0x120d   :  { %6416 = vadd.xlane.f32.xlu2 %v6415_v24  ;;  %v6396_v21 = vpop.xlane.xlu2 %6395 }
0x120e   :  { %v6400_v0 = vmul.f32 %v6396_v21, %v10575_v30 }
0x1210   :  { %v10442_v43 = vsub.f32 %v6382_v40, %v6400_v0 }
0x1212   :  { %v6408_v17 = vmul.f32 %v10442_v43, %v10442_v43 }
0x1214   :  { %v6418_v35 = vsel %vm103_vm1, %v6408_v17, 0.0 }
0x1215   :  { %6419 = vadd.xlane.f32.xlu0 %v6418_v35 }
0x1259   :  { %v6411_v1 = vpop.xlane.xlu0 %6410 }
0x125a   :  { %v6421_v54 = vmul.f32 %v6411_v1, %v10575_v30 }
0x125c   :  { %v6425_v32 = vadd.f32 1e-05, %v6421_v54 }
0x125e   :  { %7243 = vrsqrt.f32 %v6425_v32  ;;  %vm6435_vm4 = vweird.f32 %v6425_v32 }
0x1261   :  { %v6414_v12 = vpop.xlane.xlu1 %6413 }
0x1262   :  { %v6422_v58 = vmul.f32 %v6414_v12, %v10575_v30 }
0x1264   :  { %v7244_v60 = vpop.eup %7243  ;;  %v6426_v56 = vadd.f32 1e-05, %v6422_v58 }
0x1265   :  { %v6430_v9 = vmul.f32 %v7244_v60, %v6425_v32  ;;  %vm6436_vm14 = vweird.f32 %v7244_v60 }
0x1266   :  { %7245 = vrsqrt.f32 %v6426_v56  ;;  %vm6437_vm5 = vmor %vm6435_vm4, %vm6436_vm14  ;;  %vm6445_vm0 = vweird.f32 %v6426_v56 }
0x1267   :  { %v6431_v4 = vmul.f32 %v7244_v60, %v6430_v9 }
0x1269   :  { %v6432_v37 = vmul.f32 0.5, %v6431_v4 }
0x126b   :  { %v6433_v63 = vsub.f32 1.5, %v6432_v37 }
0x126c   :  { %v7246_v51 = vpop.eup %7245 }
0x126d   :  { %v6434_v10 = vmul.f32 %v7244_v60, %v6433_v63  ;;  %v6440_v8 = vmul.f32 %v7246_v51, %v6426_v56  ;;  %vm6446_vm15 = vweird.f32 %v7246_v51 }
0x126e   :  { %vm6447_vm2 = vmor %vm6445_vm0, %vm6446_vm15 }
0x126f   :  { %v6438_v22 = vsel %vm6437_vm5, %v7244_v60, %v6434_v10  ;;  %v6441_v31 = vmul.f32 %v7246_v51, %v6440_v8 }
0x1270   :  { %v6469_v41 = vmul.f32 %v6438_v22, %v6401_v26 }
0x1271   :  { %v6442_v55 = vmul.f32 0.5, %v6441_v31 }
0x1272   :  { %v6474_v14 = vmul.f32 %v7063_v15, %v6469_v41 }
0x1273   :  { %v6443_v5 = vsub.f32 1.5, %v6442_v55 }
0x1274   :  { %v6479_v53 = vadd.f32 %v7064_v48, %v6474_v14 }
0x1275   :  { %v6444_v38 = vmul.f32 %v7246_v51, %v6443_v5 }
0x1276   :  { %6483 = vst.msk [vmem:[#allocation2] sm:$0xff] %vm103_vm1, %v6479_v53 }
0x1277   :  { %v6448_v29 = vsel %vm6447_vm2, %v7246_v51, %v6444_v38 }
0x1278   :  { %v6470_v6 = vmul.f32 %v6448_v29, %v6402_v34 }
0x127a   :  { %v6475_v57 = vmul.f32 %v7063_v15, %v6470_v6 }
0x127c   :  { %v6480_v44 = vadd.f32 %v7064_v48, %v6475_v57 }
0x127e   :  { %6484 = vst.msk [vmem:[#allocation2 + $0x8] sm:$0xff] %vm103_vm1, %v6480_v44 }
0x1280   :  { %v6417_v59 = vpop.xlane.xlu2 %6416 }
0x1281   :  { %v6423_v23 = vmul.f32 %v6417_v59, %v10575_v30 }
0x1283   :  { %v6427_v28 = vadd.f32 1e-05, %v6423_v23 }
0x1285   :  { %7247 = vrsqrt.f32 %v6427_v28  ;;  %vm6455_vm6 = vweird.f32 %v6427_v28 }
0x1288   :  { %v6420_v50 = vpop.xlane.xlu0 %6419 }
0x1289   :  { %v6424_v18 = vmul.f32 %v6420_v50, %v10575_v30 }
0x128b   :  { %v7248_v16 = vpop.eup %7247  ;;  %v6428_v39 = vadd.f32 1e-05, %v6424_v18 }
0x128c   :  { %v6450_v46 = vmul.f32 %v7248_v16, %v6427_v28  ;;  %vm6456_vm3 = vweird.f32 %v7248_v16 }
0x128d   :  { %7249 = vrsqrt.f32 %v6428_v39  ;;  %vm6457_vm7 = vmor %vm6455_vm6, %vm6456_vm3  ;;  %vm6465_vm9 = vweird.f32 %v6428_v39 }
0x128e   :  { %v6451_v3 = vmul.f32 %v7248_v16, %v6450_v46 }
0x1290   :  { %v6452_v7 = vmul.f32 0.5, %v6451_v3 }
0x1292   :  { %v6453_v36 = vsub.f32 1.5, %v6452_v7 }
0x1293   :  { %v7250_v11 = vpop.eup %7249 }
0x1294   :  { %v6454_v2 = vmul.f32 %v7248_v16, %v6453_v36  ;;  %v6460_v40 = vmul.f32 %v7250_v11, %v6428_v39  ;;  %vm6466_vm8 = vweird.f32 %v7250_v11 }
0x1295   :  { %vm6467_vm10 = vmor %vm6465_vm9, %vm6466_vm8 }
0x1296   :  { %v6458_v61 = vsel %vm6457_vm7, %v7248_v16, %v6454_v2  ;;  %v6461_v19 = vmul.f32 %v7250_v11, %v6460_v40 }
0x1297   :  { %v6471_v20 = vmul.f32 %v6458_v61, %v10436_v42 }
0x1298   :  { %v6462_v26 = vmul.f32 0.5, %v6461_v19 }
0x1299   :  { %v6476_v27 = vmul.f32 %v7063_v15, %v6471_v20 }
0x129a   :  { %v6463_v30 = vsub.f32 1.5, %v6462_v26 }
0x129b   :  { %v6481_v47 = vadd.f32 %v7064_v48, %v6476_v27 }
0x129c   :  { %v6464_v33 = vmul.f32 %v7250_v11, %v6463_v30 }
0x129d   :  { %6485 = vst.msk [vmem:[#allocation2 + $0x10] sm:$0xff] %vm103_vm1, %v6481_v47 }
0x129e   :  { %v6468_v13 = vsel %vm6467_vm10, %v7250_v11, %v6464_v33 }
0x129f   :  { %v6472_v34 = vmul.f32 %v6468_v13, %v10442_v43 }
0x12a1   :  { %v6477_v49 = vmul.f32 %v7063_v15, %v6472_v34 }
0x12a3   :  { %v6482_v52 = vadd.f32 %v7064_v48, %v6477_v49 }
0x12a5   :  { %6486 = vst.msk [vmem:[#allocation2 + $0x18] sm:$0xff] %vm103_vm1, %v6482_v52 }
0x12a6   :  { %6499 = dma.vmem_to_hbm [thread:$0]  %s6492_s11, 512, %s6494_s28, [#allocation3], %s7290_s2, %s7290_s2, %s7288_s19  }
0x12a7   :  { %7275 = dma.done.wait [#allocation3], 512  }
0x12a8   :  { %7276 = vsyncadd [#allocation3], 4294966784 }
0x12a9   :  { %6504 = vsyncpa [#allocation3], 1 }

</bundles_post_ra>
